<compile_context>
chip_gen: v7x
topology: tpu7x:2x2x1
jax: 0.10.0
libtpu: 0.0.40
codegen_flags: <defaults>
</compile_context>

<pallas_src>
import functools

import jax
import jax.numpy as jnp
from jax.experimental import pallas as pl
from jax.experimental.pallas import tpu as pltpu

LEAK = 0.2
EPS = 1e-5


# ---------------------------------------------------------------------------
# Kernel 1: conv1 as im2col matmul + bias + LeakyReLU (bf16 MXU, f32 accum)
# ---------------------------------------------------------------------------
def _conv1_kernel(a_ref, w_ref, b_ref, o_ref):
    y = jnp.dot(a_ref[...], w_ref[...], preferred_element_type=jnp.float32)
    y = y + b_ref[...]
    y = jnp.where(y > 0, y, LEAK * y)
    o_ref[...] = y.astype(o_ref.dtype)


def conv1_leaky(a, w, b):
    M, _ = a.shape
    N = w.shape[1]
    return pl.pallas_call(
        _conv1_kernel,
        out_shape=jax.ShapeDtypeStruct((M, N), jnp.bfloat16),
        in_specs=[pl.BlockSpec(memory_space=pltpu.MemorySpace.VMEM)] * 3,
        out_specs=pl.BlockSpec(memory_space=pltpu.MemorySpace.VMEM),
    )(a, w, b)


# ---------------------------------------------------------------------------
# Kernel 2: everything after conv2's im2col, in ONE kernel.
#   conv2 matmul -> BN2d (batch stats, biased var) -> LeakyReLU
#   -> fc1 (weight pre-permuted, so torch's NCHW flatten needs no transpose)
#   -> BN1d -> LeakyReLU -> fc2 as a lane reduction -> sigmoid
# Biases b2 / bf1 are omitted: train-mode BN cancels them exactly.
# ---------------------------------------------------------------------------
def _tail_kernel(a2_ref, w2_ref, wf1_ref, wf2_ref, bf2_ref, o_ref, y2_sc,
                 *, B, P, Nf):
    # conv2: (P*B, Cin*k*k) @ (Cin*k*k, 128); rows are ordered (p, b).
    z2 = jnp.dot(a2_ref[...], w2_ref[...], preferred_element_type=jnp.float32)

    # BatchNorm2d with per-batch statistics over all (B, OH, OW) rows.
    mean2 = jnp.mean(z2, axis=0, keepdims=True)
    d2 = z2 - mean2
    var2 = jnp.mean(d2 * d2, axis=0, keepdims=True)           # biased variance
    y2 = d2 * jax.lax.rsqrt(var2 + EPS)
    y2_sc[...] = jnp.where(y2 > 0, y2, LEAK * y2)

    # fc1 as a sum over spatial positions p of (B,128) @ (128, Nf).
    # wf1 was pre-permuted to (p, c, n), reproducing torch's NCHW flatten.
    z3 = jnp.zeros((B, Nf), jnp.float32)
    for p in range(P):
        yp = y2_sc[pl.ds(p * B, B), :].astype(jnp.bfloat16)
        z3 = z3 + jnp.dot(yp, wf1_ref[p], preferred_element_type=jnp.float32)

    # BatchNorm1d over the batch dimension.
    mean3 = jnp.mean(z3, axis=0, keepdims=True)
    d3 = z3 - mean3
    var3 = jnp.mean(d3 * d3, axis=0, keepdims=True)
    y3 = d3 * jax.lax.rsqrt(var3 + EPS)
    y3 = jnp.where(y3 > 0, y3, LEAK * y3)

    # fc2 (Linear(1024, 1)) + Sigmoid, fused as a row reduction.
    logit = jnp.sum(y3 * wf2_ref[...], axis=-1, keepdims=True) + bf2_ref[...]
    o_ref[...] = jax.nn.sigmoid(logit)


def fused_tail(a2, w2, wf1, wf2, bf2, *, B, P):
    N2 = w2.shape[1]
    Nf = wf1.shape[2]
    return pl.pallas_call(
        functools.partial(_tail_kernel, B=B, P=P, Nf=Nf),
        out_shape=jax.ShapeDtypeStruct((B, 1), jnp.float32),
        in_specs=[pl.BlockSpec(memory_space=pltpu.MemorySpace.VMEM)] * 5,
        out_specs=pl.BlockSpec(memory_space=pltpu.MemorySpace.VMEM),
        scratch_shapes=[pltpu.VMEM((P * B, N2), jnp.float32)],
        compiler_params=pltpu.CompilerParams(
            vmem_limit_bytes=32 * 1024 * 1024),
    )(a2, w2, wf1, wf2, bf2)


# ---------------------------------------------------------------------------
# XLA glue: im2col for Conv2d(k=4, s=2, p=1).  Columns ordered (Cin, kh, kw)
# to match torch's Conv2d weight flattening.  row_order:
#   "bhw": rows ordered (b, oh, ow)   (conv1)
#   "hwb": rows ordered (oh, ow, b)   (conv2 — lets the fused kernel index a
#                                       full spatial position with one slice)
# ---------------------------------------------------------------------------
def im2col_nhwc(x, k=4, s=2, p=1, row_order="bhw"):
    B, H, W, C = x.shape
    OH = (H + 2 * p - k) // s + 1
    OW = (W + 2 * p - k) // s + 1
    xp = jnp.pad(x, ((0, 0), (p, p), (p, p), (0, 0)))
    cols = []
    for kh in range(k):
        for kw in range(k):
            cols.append(xp[:, kh:kh + s * OH:s, kw:kw + s * OW:s, :])
    pat = jnp.stack(cols, axis=-1)                  # (B, OH, OW, C, k*k)
    if row_order == "hwb":
        pat = pat.transpose(1, 2, 0, 3, 4)          # (OH, OW, B, C, k*k)
        return pat.reshape(OH * OW * B, C * k * k), (OH, OW)
    return pat.reshape(B * OH * OW, C * k * k), (OH, OW)


# ---------------------------------------------------------------------------
# One-time parameter preparation (weight reshapes / permutation / bf16 cast).
# ---------------------------------------------------------------------------
def prepare_params(params, img_shape):
    _, S, _ = img_shape
    OH2 = S // 4
    P = OH2 * OH2
    n_fc = params["wf1"].shape[0]
    # fc1 weight: torch flat index = c * P + (oh * OW + ow).  Regroup to
    # (p, c, n) so the kernel can consume NHWC-ordered conv activations
    # without any runtime transpose.
    wf1 = params["wf1"].reshape(n_fc, 128, P).transpose(2, 1, 0)
    return {
        "emb": params["emb"],
        "w1": params["w1"].reshape(64, -1).T.astype(jnp.bfloat16),
        "b1": params["b1"].reshape(1, 64).astype(jnp.float32),
        "w2": params["w2"].reshape(128, -1).T.astype(jnp.bfloat16),
        # b2 / bf1 intentionally dropped: cancelled exactly by train-mode BN.
        "wf1": wf1.astype(jnp.bfloat16),
        "wf2": params["wf2"].reshape(1, n_fc).astype(jnp.float32),
        "bf2": params["bf2"].reshape(1, 1).astype(jnp.float32),
    }


# ---------------------------------------------------------------------------
# Forward pass
# ---------------------------------------------------------------------------
def discriminator_forward(pp, img, label):
    B, C, H, W = img.shape
    n_class = pp["emb"].shape[0]

    # label embedding -> spatial map -> channel concat (NHWC).
    emb = jnp.take(pp["emb"], label, axis=0)                     # (B, n_class)
    img_nhwc = jnp.transpose(img, (0, 2, 3, 1))
    emb_map = jnp.broadcast_to(emb[:, None, None, :], (B, H, W, n_class))
    x = jnp.concatenate([img_nhwc, emb_map], axis=-1).astype(jnp.bfloat16)

    # conv1 + LeakyReLU (Pallas kernel 1)
    a1, (OH1, OW1) = im2col_nhwc(x, row_order="bhw")
    y1 = conv1_leaky(a1, pp["w1"], pp["b1"])                     # (B*OH1*OW1, 64) bf16
    y1 = y1.reshape(B, OH1, OW1, 64)

    # conv2 + BN + LeakyReLU + fc1 + BN + LeakyReLU + fc2 + sigmoid
    # (all inside Pallas kernel 2)
    a2, (OH2, OW2) = im2col_nhwc(y1, row_order="hwb")            # (P*B, 1024) bf16
    return fused_tail(a2, pp["w2"], pp["wf1"], pp["wf2"], pp["bf2"],
                      B=B, P=OH2 * OW2)                          # (B, 1)


def init_params(key, n_class, img_shape):
    C, img_size, _ = img_shape
    ks = jax.random.split(key, 6)
    flat_dim = 128 * (img_size // 4) * (img_size // 4)
    return {
        # nn.Embedding default init: N(0, 1)
        "emb": jax.random.normal(ks[0], (n_class, n_class), jnp.float32),
        # Conv/Linear weights: N(0, 0.02), biases zero (initialize_weights)
        "w1": 0.02 * jax.random.normal(ks[1], (64, C + n_class, 4, 4), jnp.float32),
        "b1": jnp.zeros((64,), jnp.float32),
        "w2": 0.02 * jax.random.normal(ks[2], (128, 64, 4, 4), jnp.float32),
        "b2": jnp.zeros((128,), jnp.float32),     # unused: cancelled by BN
        "wf1": 0.02 * jax.random.normal(ks[3], (1024, flat_dim), jnp.float32),
        "bf1": jnp.zeros((1024,), jnp.float32),   # unused: cancelled by BN
        "wf2": 0.02 * jax.random.normal(ks[4], (1, 1024), jnp.float32),
        "bf2": jnp.zeros((1,), jnp.float32),
    }


if __name__ == "__main__":
    n_class = 10
    img_shape = (1, 16, 16)   # (C, H, W)
    B = 2

    key = jax.random.PRNGKey(0)
    k_param, k_img, k_lab = jax.random.split(key, 3)

    params = init_params(k_param, n_class, img_shape)
    prepped = prepare_params(params, img_shape)   # one-time weight prep

    img = jax.random.normal(k_img, (B,) + img_shape, jnp.float32)
    label = jax.random.randint(k_lab, (B,), 0, n_class, jnp.int32)

    fwd = jax.jit(discriminator_forward)
    out = jax.block_until_ready(fwd(prepped, img, label))

    assert out.shape == (B, 1)
    assert bool(jnp.all((out >= 0.0) & (out <= 1.0)))
    print("KERNEL_OK")
</pallas_src>

<mosaic_0001>
module attributes {stable_mosaic.version = 11 : i64} {
  func.func @_conv1_kernel(%arg0: memref<128x176xbf16, #tpu.memory_space<vmem>>, %arg1: memref<176x64xbf16, #tpu.memory_space<vmem>>, %arg2: memref<1x64xf32, #tpu.memory_space<vmem>>, %arg3: memref<128x64xbf16, #tpu.memory_space<vmem>>) attributes {dimension_semantics = [], scalar_prefetch = 0 : i64, scratch_operands = 0 : i64, tpu.core_type = #tpu.core_type<tc>} {
    %c0 = arith.constant 0 : index
    %c0_0 = arith.constant 0 : index
    %0 = vector.load %arg0[%c0, %c0_0] : memref<128x176xbf16, #tpu.memory_space<vmem>>, vector<128x176xbf16>
    %c0_1 = arith.constant 0 : index
    %c0_2 = arith.constant 0 : index
    %1 = vector.load %arg1[%c0_1, %c0_2] : memref<176x64xbf16, #tpu.memory_space<vmem>>, vector<176x64xbf16>
    %cst = arith.constant dense<0.000000e+00> : vector<128x64xf32>
    %2 = tpu.matmul %0, %1, %cst {dimension_numbers = #tpu.dot_dimension_numbers<[1], [0], [0], [1], [0, 0, 1, 1], [], []>} : vector<128x176xbf16>, vector<176x64xbf16>, vector<128x64xf32> -> vector<128x64xf32>
    %c0_3 = arith.constant 0 : index
    %c0_4 = arith.constant 0 : index
    %3 = vector.load %arg2[%c0_3, %c0_4] : memref<1x64xf32, #tpu.memory_space<vmem>>, vector<1x64xf32>
    %4 = vector.broadcast %3 : vector<1x64xf32> to vector<128x64xf32>
    %5 = arith.addf %2, %4 : vector<128x64xf32>
    %cst_5 = arith.constant 0.000000e+00 : f32
    %6 = vector.broadcast %cst_5 : f32 to vector<128x64xf32>
    %7 = arith.cmpf ogt, %5, %6 : vector<128x64xf32>
    %cst_6 = arith.constant 2.000000e-01 : f32
    %8 = vector.broadcast %cst_6 : f32 to vector<128x64xf32>
    %9 = arith.mulf %8, %5 : vector<128x64xf32>
    %10 = arith.select %7, %5, %9 : vector<128x64xi1>, vector<128x64xf32>
    %11 = arith.truncf %10 : vector<128x64xf32> to vector<128x64xbf16>
    %c0_7 = arith.constant 0 : index
    %c0_8 = arith.constant 0 : index
    %12 = vector.load %arg3[%c0_7, %c0_8] : memref<128x64xbf16, #tpu.memory_space<vmem>>, vector<128x64xbf16>
    tpu.vector_store %arg3[%c0_7, %c0_8], %11 {strides = array<i32>} : memref<128x64xbf16, #tpu.memory_space<vmem>>, vector<128x64xbf16>,
    return
  }
}

module attributes {stable_mosaic.version = 11 : i64} {
  func.func @_tail_kernel(%arg0: memref<32x1024xbf16, #tpu.memory_space<vmem>>, %arg1: memref<1024x128xbf16, #tpu.memory_space<vmem>>, %arg2: memref<16x128x1024xbf16, #tpu.memory_space<vmem>>, %arg3: memref<1x1024xf32, #tpu.memory_space<vmem>>, %arg4: memref<1x1xf32, #tpu.memory_space<vmem>>, %arg5: memref<2x1xf32, #tpu.memory_space<vmem>>, %arg6: memref<32x128xf32, #tpu.memory_space<vmem>>) attributes {dimension_semantics = [], scalar_prefetch = 0 : i64, scratch_operands = 1 : i64, tpu.core_type = #tpu.core_type<tc>} {
    %c0 = arith.constant 0 : index
    %c0_0 = arith.constant 0 : index
    %0 = vector.load %arg0[%c0, %c0_0] : memref<32x1024xbf16, #tpu.memory_space<vmem>>, vector<32x1024xbf16>
    %c0_1 = arith.constant 0 : index
    %c0_2 = arith.constant 0 : index
    %1 = vector.load %arg1[%c0_1, %c0_2] : memref<1024x128xbf16, #tpu.memory_space<vmem>>, vector<1024x128xbf16>
    %cst = arith.constant dense<0.000000e+00> : vector<32x128xf32>
    %2 = tpu.matmul %0, %1, %cst {dimension_numbers = #tpu.dot_dimension_numbers<[1], [0], [0], [1], [0, 0, 1, 1], [], []>} : vector<32x1024xbf16>, vector<1024x128xbf16>, vector<32x128xf32> -> vector<32x128xf32>
    %cst_3 = arith.constant dense<0.000000e+00> : vector<128xf32>
    %3 = vector.multi_reduction <add>, %2, %cst_3 [0] : vector<32x128xf32> to vector<128xf32>
    %4 = vector.shape_cast %3 : vector<128xf32> to vector<1x128xf32>
    %cst_4 = arith.constant 3.200000e+01 : f32
    %5 = vector.broadcast %cst_4 : f32 to vector<1x128xf32>
    %6 = arith.divf %4, %5 : vector<1x128xf32>
    %7 = vector.broadcast %6 : vector<1x128xf32> to vector<32x128xf32>
    %8 = arith.subf %2, %7 : vector<32x128xf32>
    %9 = arith.mulf %8, %8 : vector<32x128xf32>
    %cst_5 = arith.constant dense<0.000000e+00> : vector<128xf32>
    %10 = vector.multi_reduction <add>, %9, %cst_5 [0] : vector<32x128xf32> to vector<128xf32>
    %11 = vector.shape_cast %10 : vector<128xf32> to vector<1x128xf32>
    %cst_6 = arith.constant 3.200000e+01 : f32
    %12 = vector.broadcast %cst_6 : f32 to vector<1x128xf32>
    %13 = arith.divf %11, %12 : vector<1x128xf32>
    %cst_7 = arith.constant 9.99999974E-6 : f32
    %14 = vector.broadcast %cst_7 : f32 to vector<1x128xf32>
    %15 = arith.addf %13, %14 : vector<1x128xf32>
    %16 = math.rsqrt %15 : vector<1x128xf32>
    %17 = vector.broadcast %16 : vector<1x128xf32> to vector<32x128xf32>
    %18 = arith.mulf %8, %17 : vector<32x128xf32>
    %cst_8 = arith.constant 0.000000e+00 : f32
    %19 = vector.broadcast %cst_8 : f32 to vector<32x128xf32>
    %20 = arith.cmpf ogt, %18, %19 : vector<32x128xf32>
    %cst_9 = arith.constant 2.000000e-01 : f32
    %21 = vector.broadcast %cst_9 : f32 to vector<32x128xf32>
    %22 = arith.mulf %21, %18 : vector<32x128xf32>
    %23 = arith.select %20, %18, %22 : vector<32x128xi1>, vector<32x128xf32>
    %c0_10 = arith.constant 0 : index
    %c0_11 = arith.constant 0 : index
    %24 = vector.load %arg6[%c0_10, %c0_11] : memref<32x128xf32, #tpu.memory_space<vmem>>, vector<32x128xf32>
    tpu.vector_store %arg6[%c0_10, %c0_11], %23 {strides = array<i32>} : memref<32x128xf32, #tpu.memory_space<vmem>>, vector<32x128xf32>,
    %cst_12 = arith.constant 0.000000e+00 : f32
    %25 = vector.broadcast %cst_12 : f32 to vector<2x1024xf32>
    %c0_13 = arith.constant 0 : index
    %c0_14 = arith.constant 0 : index
    %26 = vector.load %arg6[%c0_13, %c0_14] : memref<32x128xf32, #tpu.memory_space<vmem>>, vector<2x128xf32>
    %27 = arith.truncf %26 : vector<2x128xf32> to vector<2x128xbf16>
    %c0_15 = arith.constant 0 : index
    %c0_16 = arith.constant 0 : index
    %c0_17 = arith.constant 0 : index
    %28 = vector.load %arg2[%c0_15, %c0_16, %c0_17] : memref<16x128x1024xbf16, #tpu.memory_space<vmem>>, vector<1x128x1024xbf16>
    %29 = vector.shape_cast %28 : vector<1x128x1024xbf16> to vector<128x1024xbf16>
    %cst_18 = arith.constant dense<0.000000e+00> : vector<2x1024xf32>
    %30 = tpu.matmul %27, %29, %cst_18 {dimension_numbers = #tpu.dot_dimension_numbers<[1], [0], [0], [1], [0, 0, 1, 1], [], []>} : vector<2x128xbf16>, vector<128x1024xbf16>, vector<2x1024xf32> -> vector<2x1024xf32>
    %31 = arith.addf %25, %30 : vector<2x1024xf32>
    %c2 = arith.constant 2 : index
    %c0_19 = arith.constant 0 : index
    %32 = vector.load %arg6[%c2, %c0_19] : memref<32x128xf32, #tpu.memory_space<vmem>>, vector<2x128xf32>
    %33 = arith.truncf %32 : vector<2x128xf32> to vector<2x128xbf16>
    %c1 = arith.constant 1 : index
    %c0_20 = arith.constant 0 : index
    %c0_21 = arith.constant 0 : index
    %34 = vector.load %arg2[%c1, %c0_20, %c0_21] : memref<16x128x1024xbf16, #tpu.memory_space<vmem>>, vector<1x128x1024xbf16>
    %35 = vector.shape_cast %34 : vector<1x128x1024xbf16> to vector<128x1024xbf16>
    %cst_22 = arith.constant dense<0.000000e+00> : vector<2x1024xf32>
    %36 = tpu.matmul %33, %35, %cst_22 {dimension_numbers = #tpu.dot_dimension_numbers<[1], [0], [0], [1], [0, 0, 1, 1], [], []>} : vector<2x128xbf16>, vector<128x1024xbf16>, vector<2x1024xf32> -> vector<2x1024xf32>
    %37 = arith.addf %31, %36 : vector<2x1024xf32>
    %c4 = arith.constant 4 : index
    %c0_23 = arith.constant 0 : index
    %38 = vector.load %arg6[%c4, %c0_23] : memref<32x128xf32, #tpu.memory_space<vmem>>, vector<2x128xf32>
    %39 = arith.truncf %38 : vector<2x128xf32> to vector<2x128xbf16>
    %c2_24 = arith.constant 2 : index
    %c0_25 = arith.constant 0 : index
    %c0_26 = arith.constant 0 : index
    %40 = vector.load %arg2[%c2_24, %c0_25, %c0_26] : memref<16x128x1024xbf16, #tpu.memory_space<vmem>>, vector<1x128x1024xbf16>
    %41 = vector.shape_cast %40 : vector<1x128x1024xbf16> to vector<128x1024xbf16>
    %cst_27 = arith.constant dense<0.000000e+00> : vector<2x1024xf32>
    %42 = tpu.matmul %39, %41, %cst_27 {dimension_numbers = #tpu.dot_dimension_numbers<[1], [0], [0], [1], [0, 0, 1, 1], [], []>} : vector<2x128xbf16>, vector<128x1024xbf16>, vector<2x1024xf32> -> vector<2x1024xf32>
    %43 = arith.addf %37, %42 : vector<2x1024xf32>
    %c6 = arith.constant 6 : index
    %c0_28 = arith.constant 0 : index
    %44 = vector.load %arg6[%c6, %c0_28] : memref<32x128xf32, #tpu.memory_space<vmem>>, vector<2x128xf32>
    %45 = arith.truncf %44 : vector<2x128xf32> to vector<2x128xbf16>
    %c3 = arith.constant 3 : index
    %c0_29 = arith.constant 0 : index
    %c0_30 = arith.constant 0 : index
    %46 = vector.load %arg2[%c3, %c0_29, %c0_30] : memref<16x128x1024xbf16, #tpu.memory_space<vmem>>, vector<1x128x1024xbf16>
    %47 = vector.shape_cast %46 : vector<1x128x1024xbf16> to vector<128x1024xbf16>
    %cst_31 = arith.constant dense<0.000000e+00> : vector<2x1024xf32>
    %48 = tpu.matmul %45, %47, %cst_31 {dimension_numbers = #tpu.dot_dimension_numbers<[1], [0], [0], [1], [0, 0, 1, 1], [], []>} : vector<2x128xbf16>, vector<128x1024xbf16>, vector<2x1024xf32> -> vector<2x1024xf32>
    %49 = arith.addf %43, %48 : vector<2x1024xf32>
    %c8 = arith.constant 8 : index
    %c0_32 = arith.constant 0 : index
    %50 = vector.load %arg6[%c8, %c0_32] : memref<32x128xf32, #tpu.memory_space<vmem>>, vector<2x128xf32>
    %51 = arith.truncf %50 : vector<2x128xf32> to vector<2x128xbf16>
    %c4_33 = arith.constant 4 : index
    %c0_34 = arith.constant 0 : index
    %c0_35 = arith.constant 0 : index
    %52 = vector.load %arg2[%c4_33, %c0_34, %c0_35] : memref<16x128x1024xbf16, #tpu.memory_space<vmem>>, vector<1x128x1024xbf16>
    %53 = vector.shape_cast %52 : vector<1x128x1024xbf16> to vector<128x1024xbf16>
    %cst_36 = arith.constant dense<0.000000e+00> : vector<2x1024xf32>
    %54 = tpu.matmul %51, %53, %cst_36 {dimension_numbers = #tpu.dot_dimension_numbers<[1], [0], [0], [1], [0, 0, 1, 1], [], []>} : vector<2x128xbf16>, vector<128x1024xbf16>, vector<2x1024xf32> -> vector<2x1024xf32>
    %55 = arith.addf %49, %54 : vector<2x1024xf32>
    %c10 = arith.constant 10 : index
    %c0_37 = arith.constant 0 : index
    %56 = vector.load %arg6[%c10, %c0_37] : memref<32x128xf32, #tpu.memory_space<vmem>>, vector<2x128xf32>
    %57 = arith.truncf %56 : vector<2x128xf32> to vector<2x128xbf16>
    %c5 = arith.constant 5 : index
    %c0_38 = arith.constant 0 : index
    %c0_39 = arith.constant 0 : index
    %58 = vector.load %arg2[%c5, %c0_38, %c0_39] : memref<16x128x1024xbf16, #tpu.memory_space<vmem>>, vector<1x128x1024xbf16>
    %59 = vector.shape_cast %58 : vector<1x128x1024xbf16> to vector<128x1024xbf16>
    %cst_40 = arith.constant dense<0.000000e+00> : vector<2x1024xf32>
    %60 = tpu.matmul %57, %59, %cst_40 {dimension_numbers = #tpu.dot_dimension_numbers<[1], [0], [0], [1], [0, 0, 1, 1], [], []>} : vector<2x128xbf16>, vector<128x1024xbf16>, vector<2x1024xf32> -> vector<2x1024xf32>
    %61 = arith.addf %55, %60 : vector<2x1024xf32>
    %c12 = arith.constant 12 : index
    %c0_41 = arith.constant 0 : index
    %62 = vector.load %arg6[%c12, %c0_41] : memref<32x128xf32, #tpu.memory_space<vmem>>, vector<2x128xf32>
    %63 = arith.truncf %62 : vector<2x128xf32> to vector<2x128xbf16>
    %c6_42 = arith.constant 6 : index
    %c0_43 = arith.constant 0 : index
    %c0_44 = arith.constant 0 : index
    %64 = vector.load %arg2[%c6_42, %c0_43, %c0_44] : memref<16x128x1024xbf16, #tpu.memory_space<vmem>>, vector<1x128x1024xbf16>
    %65 = vector.shape_cast %64 : vector<1x128x1024xbf16> to vector<128x1024xbf16>
    %cst_45 = arith.constant dense<0.000000e+00> : vector<2x1024xf32>
    %66 = tpu.matmul %63, %65, %cst_45 {dimension_numbers = #tpu.dot_dimension_numbers<[1], [0], [0], [1], [0, 0, 1, 1], [], []>} : vector<2x128xbf16>, vector<128x1024xbf16>, vector<2x1024xf32> -> vector<2x1024xf32>
    %67 = arith.addf %61, %66 : vector<2x1024xf32>
    %c14 = arith.constant 14 : index
    %c0_46 = arith.constant 0 : index
    %68 = vector.load %arg6[%c14, %c0_46] : memref<32x128xf32, #tpu.memory_space<vmem>>, vector<2x128xf32>
    %69 = arith.truncf %68 : vector<2x128xf32> to vector<2x128xbf16>
    %c7 = arith.constant 7 : index
    %c0_47 = arith.constant 0 : index
    %c0_48 = arith.constant 0 : index
    %70 = vector.load %arg2[%c7, %c0_47, %c0_48] : memref<16x128x1024xbf16, #tpu.memory_space<vmem>>, vector<1x128x1024xbf16>
    %71 = vector.shape_cast %70 : vector<1x128x1024xbf16> to vector<128x1024xbf16>
    %cst_49 = arith.constant dense<0.000000e+00> : vector<2x1024xf32>
    %72 = tpu.matmul %69, %71, %cst_49 {dimension_numbers = #tpu.dot_dimension_numbers<[1], [0], [0], [1], [0, 0, 1, 1], [], []>} : vector<2x128xbf16>, vector<128x1024xbf16>, vector<2x1024xf32> -> vector<2x1024xf32>
    %73 = arith.addf %67, %72 : vector<2x1024xf32>
    %c16 = arith.constant 16 : index
    %c0_50 = arith.constant 0 : index
    %74 = vector.load %arg6[%c16, %c0_50] : memref<32x128xf32, #tpu.memory_space<vmem>>, vector<2x128xf32>
    %75 = arith.truncf %74 : vector<2x128xf32> to vector<2x128xbf16>
    %c8_51 = arith.constant 8 : index
    %c0_52 = arith.constant 0 : index
    %c0_53 = arith.constant 0 : index
    %76 = vector.load %arg2[%c8_51, %c0_52, %c0_53] : memref<16x128x1024xbf16, #tpu.memory_space<vmem>>, vector<1x128x1024xbf16>
    %77 = vector.shape_cast %76 : vector<1x128x1024xbf16> to vector<128x1024xbf16>
    %cst_54 = arith.constant dense<0.000000e+00> : vector<2x1024xf32>
    %78 = tpu.matmul %75, %77, %cst_54 {dimension_numbers = #tpu.dot_dimension_numbers<[1], [0], [0], [1], [0, 0, 1, 1], [], []>} : vector<2x128xbf16>, vector<128x1024xbf16>, vector<2x1024xf32> -> vector<2x1024xf32>
    %79 = arith.addf %73, %78 : vector<2x1024xf32>
    %c18 = arith.constant 18 : index
    %c0_55 = arith.constant 0 : index
    %80 = vector.load %arg6[%c18, %c0_55] : memref<32x128xf32, #tpu.memory_space<vmem>>, vector<2x128xf32>
    %81 = arith.truncf %80 : vector<2x128xf32> to vector<2x128xbf16>
    %c9 = arith.constant 9 : index
    %c0_56 = arith.constant 0 : index
    %c0_57 = arith.constant 0 : index
    %82 = vector.load %arg2[%c9, %c0_56, %c0_57] : memref<16x128x1024xbf16, #tpu.memory_space<vmem>>, vector<1x128x1024xbf16>
    %83 = vector.shape_cast %82 : vector<1x128x1024xbf16> to vector<128x1024xbf16>
    %cst_58 = arith.constant dense<0.000000e+00> : vector<2x1024xf32>
    %84 = tpu.matmul %81, %83, %cst_58 {dimension_numbers = #tpu.dot_dimension_numbers<[1], [0], [0], [1], [0, 0, 1, 1], [], []>} : vector<2x128xbf16>, vector<128x1024xbf16>, vector<2x1024xf32> -> vector<2x1024xf32>
    %85 = arith.addf %79, %84 : vector<2x1024xf32>
    %c20 = arith.constant 20 : index
    %c0_59 = arith.constant 0 : index
    %86 = vector.load %arg6[%c20, %c0_59] : memref<32x128xf32, #tpu.memory_space<vmem>>, vector<2x128xf32>
    %87 = arith.truncf %86 : vector<2x128xf32> to vector<2x128xbf16>
    %c10_60 = arith.constant 10 : index
    %c0_61 = arith.constant 0 : index
    %c0_62 = arith.constant 0 : index
    %88 = vector.load %arg2[%c10_60, %c0_61, %c0_62] : memref<16x128x1024xbf16, #tpu.memory_space<vmem>>, vector<1x128x1024xbf16>
    %89 = vector.shape_cast %88 : vector<1x128x1024xbf16> to vector<128x1024xbf16>
    %cst_63 = arith.constant dense<0.000000e+00> : vector<2x1024xf32>
    %90 = tpu.matmul %87, %89, %cst_63 {dimension_numbers = #tpu.dot_dimension_numbers<[1], [0], [0], [1], [0, 0, 1, 1], [], []>} : vector<2x128xbf16>, vector<128x1024xbf16>, vector<2x1024xf32> -> vector<2x1024xf32>
    %91 = arith.addf %85, %90 : vector<2x1024xf32>
    %c22 = arith.constant 22 : index
    %c0_64 = arith.constant 0 : index
    %92 = vector.load %arg6[%c22, %c0_64] : memref<32x128xf32, #tpu.memory_space<vmem>>, vector<2x128xf32>
    %93 = arith.truncf %92 : vector<2x128xf32> to vector<2x128xbf16>
    %c11 = arith.constant 11 : index
    %c0_65 = arith.constant 0 : index
    %c0_66 = arith.constant 0 : index
    %94 = vector.load %arg2[%c11, %c0_65, %c0_66] : memref<16x128x1024xbf16, #tpu.memory_space<vmem>>, vector<1x128x1024xbf16>
    %95 = vector.shape_cast %94 : vector<1x128x1024xbf16> to vector<128x1024xbf16>
    %cst_67 = arith.constant dense<0.000000e+00> : vector<2x1024xf32>
    %96 = tpu.matmul %93, %95, %cst_67 {dimension_numbers = #tpu.dot_dimension_numbers<[1], [0], [0], [1], [0, 0, 1, 1], [], []>} : vector<2x128xbf16>, vector<128x1024xbf16>, vector<2x1024xf32> -> vector<2x1024xf32>
    %97 = arith.addf %91, %96 : vector<2x1024xf32>
    %c24 = arith.constant 24 : index
    %c0_68 = arith.constant 0 : index
    %98 = vector.load %arg6[%c24, %c0_68] : memref<32x128xf32, #tpu.memory_space<vmem>>, vector<2x128xf32>
    %99 = arith.truncf %98 : vector<2x128xf32> to vector<2x128xbf16>
    %c12_69 = arith.constant 12 : index
    %c0_70 = arith.constant 0 : index
    %c0_71 = arith.constant 0 : index
    %100 = vector.load %arg2[%c12_69, %c0_70, %c0_71] : memref<16x128x1024xbf16, #tpu.memory_space<vmem>>, vector<1x128x1024xbf16>
    %101 = vector.shape_cast %100 : vector<1x128x1024xbf16> to vector<128x1024xbf16>
    %cst_72 = arith.constant dense<0.000000e+00> : vector<2x1024xf32>
    %102 = tpu.matmul %99, %101, %cst_72 {dimension_numbers = #tpu.dot_dimension_numbers<[1], [0], [0], [1], [0, 0, 1, 1], [], []>} : vector<2x128xbf16>, vector<128x1024xbf16>, vector<2x1024xf32> -> vector<2x1024xf32>
    %103 = arith.addf %97, %102 : vector<2x1024xf32>
    %c26 = arith.constant 26 : index
    %c0_73 = arith.constant 0 : index
    %104 = vector.load %arg6[%c26, %c0_73] : memref<32x128xf32, #tpu.memory_space<vmem>>, vector<2x128xf32>
    %105 = arith.truncf %104 : vector<2x128xf32> to vector<2x128xbf16>
    %c13 = arith.constant 13 : index
    %c0_74 = arith.constant 0 : index
    %c0_75 = arith.constant 0 : index
    %106 = vector.load %arg2[%c13, %c0_74, %c0_75] : memref<16x128x1024xbf16, #tpu.memory_space<vmem>>, vector<1x128x1024xbf16>
    %107 = vector.shape_cast %106 : vector<1x128x1024xbf16> to vector<128x1024xbf16>
    %cst_76 = arith.constant dense<0.000000e+00> : vector<2x1024xf32>
    %108 = tpu.matmul %105, %107, %cst_76 {dimension_numbers = #tpu.dot_dimension_numbers<[1], [0], [0], [1], [0, 0, 1, 1], [], []>} : vector<2x128xbf16>, vector<128x1024xbf16>, vector<2x1024xf32> -> vector<2x1024xf32>
    %109 = arith.addf %103, %108 : vector<2x1024xf32>
    %c28 = arith.constant 28 : index
    %c0_77 = arith.constant 0 : index
    %110 = vector.load %arg6[%c28, %c0_77] : memref<32x128xf32, #tpu.memory_space<vmem>>, vector<2x128xf32>
    %111 = arith.truncf %110 : vector<2x128xf32> to vector<2x128xbf16>
    %c14_78 = arith.constant 14 : index
    %c0_79 = arith.constant 0 : index
    %c0_80 = arith.constant 0 : index
    %112 = vector.load %arg2[%c14_78, %c0_79, %c0_80] : memref<16x128x1024xbf16, #tpu.memory_space<vmem>>, vector<1x128x1024xbf16>
    %113 = vector.shape_cast %112 : vector<1x128x1024xbf16> to vector<128x1024xbf16>
    %cst_81 = arith.constant dense<0.000000e+00> : vector<2x1024xf32>
    %114 = tpu.matmul %111, %113, %cst_81 {dimension_numbers = #tpu.dot_dimension_numbers<[1], [0], [0], [1], [0, 0, 1, 1], [], []>} : vector<2x128xbf16>, vector<128x1024xbf16>, vector<2x1024xf32> -> vector<2x1024xf32>
    %115 = arith.addf %109, %114 : vector<2x1024xf32>
    %c30 = arith.constant 30 : index
    %c0_82 = arith.constant 0 : index
    %116 = vector.load %arg6[%c30, %c0_82] : memref<32x128xf32, #tpu.memory_space<vmem>>, vector<2x128xf32>
    %117 = arith.truncf %116 : vector<2x128xf32> to vector<2x128xbf16>
    %c15 = arith.constant 15 : index
    %c0_83 = arith.constant 0 : index
    %c0_84 = arith.constant 0 : index
    %118 = vector.load %arg2[%c15, %c0_83, %c0_84] : memref<16x128x1024xbf16, #tpu.memory_space<vmem>>, vector<1x128x1024xbf16>
    %119 = vector.shape_cast %118 : vector<1x128x1024xbf16> to vector<128x1024xbf16>
    %cst_85 = arith.constant dense<0.000000e+00> : vector<2x1024xf32>
    %120 = tpu.matmul %117, %119, %cst_85 {dimension_numbers = #tpu.dot_dimension_numbers<[1], [0], [0], [1], [0, 0, 1, 1], [], []>} : vector<2x128xbf16>, vector<128x1024xbf16>, vector<2x1024xf32> -> vector<2x1024xf32>
    %121 = arith.addf %115, %120 : vector<2x1024xf32>
    %cst_86 = arith.constant dense<0.000000e+00> : vector<1024xf32>
    %122 = vector.multi_reduction <add>, %121, %cst_86 [0] : vector<2x1024xf32> to vector<1024xf32>
    %123 = vector.shape_cast %122 : vector<1024xf32> to vector<1x1024xf32>
    %cst_87 = arith.constant 2.000000e+00 : f32
    %124 = vector.broadcast %cst_87 : f32 to vector<1x1024xf32>
    %125 = arith.divf %123, %124 : vector<1x1024xf32>
    %126 = vector.broadcast %125 : vector<1x1024xf32> to vector<2x1024xf32>
    %127 = arith.subf %121, %126 : vector<2x1024xf32>
    %128 = arith.mulf %127, %127 : vector<2x1024xf32>
    %cst_88 = arith.constant dense<0.000000e+00> : vector<1024xf32>
    %129 = vector.multi_reduction <add>, %128, %cst_88 [0] : vector<2x1024xf32> to vector<1024xf32>
    %130 = vector.shape_cast %129 : vector<1024xf32> to vector<1x1024xf32>
    %cst_89 = arith.constant 2.000000e+00 : f32
    %131 = vector.broadcast %cst_89 : f32 to vector<1x1024xf32>
    %132 = arith.divf %130, %131 : vector<1x1024xf32>
    %cst_90 = arith.constant 9.99999974E-6 : f32
    %133 = vector.broadcast %cst_90 : f32 to vector<1x1024xf32>
    %134 = arith.addf %132, %133 : vector<1x1024xf32>
    %135 = math.rsqrt %134 : vector<1x1024xf32>
    %136 = vector.broadcast %135 : vector<1x1024xf32> to vector<2x1024xf32>
    %137 = arith.mulf %127, %136 : vector<2x1024xf32>
    %cst_91 = arith.constant 0.000000e+00 : f32
    %138 = vector.broadcast %cst_91 : f32 to vector<2x1024xf32>
    %139 = arith.cmpf ogt, %137, %138 : vector<2x1024xf32>
    %cst_92 = arith.constant 2.000000e-01 : f32
    %140 = vector.broadcast %cst_92 : f32 to vector<2x1024xf32>
    %141 = arith.mulf %140, %137 : vector<2x1024xf32>
    %142 = arith.select %139, %137, %141 : vector<2x1024xi1>, vector<2x1024xf32>
    %c0_93 = arith.constant 0 : index
    %c0_94 = arith.constant 0 : index
    %143 = vector.load %arg3[%c0_93, %c0_94] : memref<1x1024xf32, #tpu.memory_space<vmem>>, vector<1x1024xf32>
    %144 = vector.broadcast %143 : vector<1x1024xf32> to vector<2x1024xf32>
    %145 = arith.mulf %142, %144 : vector<2x1024xf32>
    %cst_95 = arith.constant dense<0.000000e+00> : vector<2xf32>
    %146 = vector.multi_reduction <add>, %145, %cst_95 [1] : vector<2x1024xf32> to vector<2xf32>
    %147 = vector.shape_cast %146 : vector<2xf32> to vector<2x1xf32>
    %c0_96 = arith.constant 0 : index
    %c0_97 = arith.constant 0 : index
    %148 = vector.load %arg4[%c0_96, %c0_97] : memref<1x1xf32, #tpu.memory_space<vmem>>, vector<1x1xf32>
    %149 = vector.broadcast %148 : vector<1x1xf32> to vector<2x1xf32>
    %150 = arith.addf %147, %149 : vector<2x1xf32>
    %151 = arith.negf %150 : vector<2x1xf32>
    %152 = math.exp %151 : vector<2x1xf32>
    %cst_98 = arith.constant 1.000000e+00 : f32
    %153 = vector.broadcast %cst_98 : f32 to vector<2x1xf32>
    %154 = arith.addf %153, %152 : vector<2x1xf32>
    %155 = arith.divf %153, %154 : vector<2x1xf32>
    %c0_99 = arith.constant 0 : index
    %c0_100 = arith.constant 0 : index
    %156 = vector.load %arg5[%c0_99, %c0_100] : memref<2x1xf32, #tpu.memory_space<vmem>>, vector<2x1xf32>
    tpu.vector_store %arg5[%c0_99, %c0_100], %155 {strides = array<i32>} : memref<2x1xf32, #tpu.memory_space<vmem>>, vector<2x1xf32>,
    return
  }
}

</mosaic_0001>

<bundles_post_ra>
// kernel: discriminator_forward.2
= control target key start
LH: loop header
LB: loop body
LE: loop exit
PB: predicated region body
PF: predicated region fallthrough
CT: control target
= control target key end

     0   :  { %v579_v0 = vmov 0   ;;  %vm198_vm0 = vcmask 392192   ;;  %vm432_vm3 = vcmask 519168   ;;  %s774_s1 = inlined_call_operand.vmem [shape: bf16[176,64], index: 1, kind: input, shape index: {}]   ;;  %s775_s0 = inlined_call_operand.vmem [shape: bf16[128,176], index: 0, kind: input, shape index: {}]   ;;  %s776_s2 = inlined_call_operand.vmem [shape: f32[1,64], index: 2, kind: input, shape index: {}]   ;;  %s777_s3 = inlined_call_operand.vmem [shape: bf16[128,64], index: 3, kind: output, shape index: {}]  }
   0x1   :  { %223 = vmatprep.subr.bf16.mxu0 %v579_v0  ;;  %521 = vmatprep.subr.bf16.mxu1 %v579_v0  ;;  %v544_v1 = vld [vmem:[%s774_s1] sm:$0xff]   ;;  %v545_v2 = vld [vmem:[%s774_s1 + $0x8] sm:$0xff]   ;;  %v546_v3 = vld [vmem:[%s774_s1 + $0x10] sm:$0xff]  }
   0x2   :  { %224 = vmatpush1.bf16.msra.mxu0 %v544_v1  ;;  %532 = vmatpush1.bf16.msra.mxu1 %v544_v1  ;;  %v547_v4 = vld [vmem:[%s774_s1 + $0x18] sm:$0xff]   ;;  %v557_v5 = vld [vmem:[%s775_s0 + $0x4] ss:$8 sps:$4 sm:$0xff]   ;;  %v550_v9 = vld [vmem:[%s774_s1 + $0x30] sm:$0xff]  }
   0x3   :  { %225 = vmatprep.subr.bf16.mxu0 %v579_v0  ;;  %522 = vmatprep.subr.bf16.mxu1 %v579_v0  ;;  %v560_v6 = vld [vmem:[%s775_s0 + $0x44] ss:$8 sps:$4 sm:$0xff]   ;;  %v551_v10 = vld [vmem:[%s774_s1 + $0x38] sm:$0xff]   ;;  %v554_v13 = vld [vmem:[%s774_s1 + $0x50] sm:$0xff]  }
   0x4   :  { %v548_v7 = vld [vmem:[%s774_s1 + $0x20] sm:$0xff]   ;;  %481 = vmatprep.mubr.msk.bf16.mxu0 %vm198_vm0, %v557_v5  ;;  %485 = vmatprep.mubr.msk.bf16.mxu1 %vm198_vm0, %v560_v6  ;;  %v549_v8 = vld [vmem:[%s774_s1 + $0x28] sm:$0xff]   ;;  %v561_v16 = vld [vmem:[%s775_s0 + $0x14] ss:$8 sps:$4 sm:$0xff]  }
   0x5   :  { %v552_v11 = vld [vmem:[%s774_s1 + $0x40] sm:$0xff]   ;;  %v553_v12 = vld [vmem:[%s774_s1 + $0x48] sm:$0xff]   ;;  %v563_v17 = vld [vmem:[%s775_s0 + $0x54] ss:$8 sps:$4 sm:$0xff]  }
   0x6   :  { %226 = vmatpush1.bf16.msra.mxu0 %v545_v2  ;;  %533 = vmatpush1.bf16.msra.mxu1 %v545_v2  ;;  %v555_v14 = vld [vmem:[%s775_s0] ss:$8 sps:$4 sm:$0xff]   ;;  %v565_v18 = vld [vmem:[%s775_s0 + $0x10] ss:$8 sps:$4 sm:$0xff]   ;;  %v567_v20 = vld [vmem:[%s775_s0 + $0x24] ss:$8 sps:$4 sm:$0xff]  }
   0x7   :  { %227 = vmatprep.subr.bf16.mxu0 %v579_v0  ;;  %523 = vmatprep.subr.bf16.mxu1 %v579_v0  ;;  %v558_v15 = vld [vmem:[%s775_s0 + $0x40] ss:$8 sps:$4 sm:$0xff]   ;;  %v566_v19 = vld [vmem:[%s775_s0 + $0x50] ss:$8 sps:$4 sm:$0xff]   ;;  %v569_v21 = vld [vmem:[%s775_s0 + $0x64] ss:$8 sps:$4 sm:$0xff]  }
   0x8   :  { %v571_v22 = vld [vmem:[%s775_s0 + $0x20] ss:$8 sps:$4 sm:$0xff]   ;;  %v573_v24 = vld [vmem:[%s775_s0 + $0x34] ss:$8 sps:$4 sm:$0xff]   ;;  %v577_v26 = vld [vmem:[%s775_s0 + $0x30] ss:$8 sps:$4 sm:$0xff]  }
   0x9   :  { %v572_v23 = vld [vmem:[%s775_s0 + $0x60] ss:$8 sps:$4 sm:$0xff]   ;;  %v575_v25 = vld [vmem:[%s775_s0 + $0x74] ss:$8 sps:$4 sm:$0xff]   ;;  %v578_v27 = vld [vmem:[%s775_s0 + $0x70] ss:$8 sps:$4 sm:$0xff]  }
   0xa   :  { %228 = vmatpush1.bf16.msra.mxu0 %v546_v3  ;;  %534 = vmatpush1.bf16.msra.mxu1 %v546_v3  ;;  %v692_v28 = vld [vmem:[%s776_s2] ss:$0 sm:$0xff] }
   0xb   :  { %229 = vmatprep.subr.bf16.mxu0 %v579_v0  ;;  %524 = vmatprep.subr.bf16.mxu1 %v579_v0 }
   0xe   :  { %230 = vmatpush1.bf16.msra.mxu0 %v547_v4  ;;  %535 = vmatpush1.bf16.msra.mxu1 %v547_v4 }
   0xf   :  { %231 = vmatprep.subr.bf16.mxu0 %v579_v0  ;;  %525 = vmatprep.subr.bf16.mxu1 %v579_v0 }
  0x12   :  { %232 = vmatpush1.bf16.msra.mxu0 %v548_v7  ;;  %536 = vmatpush1.bf16.msra.mxu1 %v548_v7 }
  0x13   :  { %233 = vmatprep.subr.bf16.mxu0 %v579_v0  ;;  %526 = vmatprep.subr.bf16.mxu1 %v579_v0 }
  0x16   :  { %234 = vmatpush1.bf16.msra.mxu0 %v549_v8  ;;  %537 = vmatpush1.bf16.msra.mxu1 %v549_v8 }
  0x17   :  { %235 = vmatprep.subr.bf16.mxu0 %v579_v0  ;;  %527 = vmatprep.subr.bf16.mxu1 %v579_v0 }
  0x1a   :  { %236 = vmatpush1.bf16.msra.mxu0 %v550_v9  ;;  %538 = vmatpush1.bf16.msra.mxu1 %v550_v9 }
  0x1b   :  { %237 = vmatprep.subr.bf16.mxu0 %v579_v0  ;;  %528 = vmatprep.subr.bf16.mxu1 %v579_v0 }
  0x1e   :  { %238 = vmatpush1.bf16.msra.mxu0 %v551_v10  ;;  %539 = vmatpush1.bf16.msra.mxu1 %v551_v10 }
  0x1f   :  { %239 = vmatprep.subr.bf16.mxu0 %v579_v0  ;;  %529 = vmatprep.subr.bf16.mxu1 %v579_v0 }
  0x22   :  { %240 = vmatpush1.bf16.msra.mxu0 %v552_v11  ;;  %540 = vmatpush1.bf16.msra.mxu1 %v552_v11 }
  0x23   :  { %241 = vmatprep.subr.bf16.mxu0 %v579_v0  ;;  %530 = vmatprep.subr.bf16.mxu1 %v579_v0 }
  0x26   :  { %242 = vmatpush1.bf16.msra.mxu0 %v553_v12  ;;  %541 = vmatpush1.bf16.msra.mxu1 %v553_v12 }
  0x27   :  { %243 = vmatprep.subr.bf16.mxu0 %v579_v0  ;;  %531 = vmatprep.subr.bf16.mxu1 %v579_v0 }
  0x2a   :  { %244 = vmatpush1.bf16.msra.mxu0 %v554_v13  ;;  %542 = vmatpush1.bf16.msra.mxu1 %v554_v13 }
  0x2d   :  { %256 = vmatmul.mubr.bf16.vlgmr.msra.gmra.mrb[0].mxu0 %v555_v14  ;;  %288 = vmatmul.mubr.bf16.vlgmr.msra.gmra.mrb[0].mxu1 %v558_v15 }
  0x2e   :  { %482 = vmatprep.mubr.msk.bf16.mxu0 %vm198_vm0, %v561_v16  ;;  %486 = vmatprep.mubr.msk.bf16.mxu1 %vm198_vm0, %v563_v17 }
  0x35   :  { %264 = vmatmul.mubr.bf16.gmra.mrb[4].mxu0 %v565_v18  ;;  %296 = vmatmul.mubr.bf16.gmra.mrb[4].mxu1 %v566_v19 }
  0x36   :  { %483 = vmatprep.mubr.msk.bf16.mxu0 %vm198_vm0, %v567_v20  ;;  %487 = vmatprep.mubr.msk.bf16.mxu1 %vm198_vm0, %v569_v21 }
  0x3d   :  { %272 = vmatmul.mubr.bf16.gmra.mrb[8].mxu0 %v571_v22  ;;  %304 = vmatmul.mubr.bf16.gmra.mrb[8].mxu1 %v572_v23 }
  0x3e   :  { %484 = vmatprep.mubr.msk.bf16.mxu0 %vm198_vm0, %v573_v24  ;;  %488 = vmatprep.mubr.msk.bf16.mxu1 %vm198_vm0, %v575_v25 }
  0x45   :  { %280 = vmatmul.mubr.bf16.gmra.mrb[12].mxu0 %v577_v26  ;;  %312 = vmatmul.mubr.bf16.gmra.mrb[12].mxu1 %v578_v27 }
 0x100   :  { %v257_v29 = vpop.f32.mrb[0].mxu0  ;;  %v289_v30 = vpop.f32.mrb[0].mxu1 }
 0x101   :  { %v258_v31 = vadd.f32 %v692_v28, %v257_v29  ;;  %v290_v32 = vadd.f32 %v692_v28, %v289_v30  ;;  %v259_v33 = vpop.f32.mrb[1].mxu0  ;;  %v291_v34 = vpop.f32.mrb[1].mxu1 }
 0x102   :  { %v260_v35 = vpop.f32.mrb[2].mxu0  ;;  %v292_v36 = vpop.f32.mrb[2].mxu1 }
 0x103   :  { %vm320_vm1 = vcmp.gt.f32.partialorder %v258_v31, 0.0  ;;  %v336_v37 = vmul.f32 0.2, %v258_v31  ;;  %vm328_vm2 = vcmp.gt.f32.partialorder %v290_v32, 0.0  ;;  %v344_v38 = vmul.f32 0.2, %v290_v32 }
 0x104   :  { %v261_v39 = vadd.f32 %v692_v28, %v260_v35  ;;  %v293_v40 = vadd.f32 %v692_v28, %v292_v36  ;;  %v262_v41 = vpop.f32.mrb[3].mxu0  ;;  %v294_v42 = vpop.f32.mrb[3].mxu1 }
 0x105   :  { %v352_v43 = vsel %vm320_vm1, %v258_v31, %v336_v37  ;;  %v360_v44 = vsel %vm328_vm2, %v290_v32, %v344_v38 }
 0x106   :  { %v505_v45 = vpack.c.bf16 %v352_v43, %v352_v43  ;;  %v513_v46 = vpack.c.bf16 %v360_v44, %v360_v44  ;;  %vm321_vm4 = vcmp.gt.f32.partialorder %v261_v39, 0.0  ;;  %v337_v47 = vmul.f32 0.2, %v261_v39 }
 0x107   :  { %vm329_vm5 = vcmp.gt.f32.partialorder %v293_v40, 0.0  ;;  %v345_v48 = vmul.f32 0.2, %v293_v40 }
 0x108   :  { %433 = vst.msk [vmem:[%s777_s3] sm:$0xf] %vm432_vm3, %v505_v45  ;;  %441 = vst.msk [vmem:[%s777_s3 + $0x20] sm:$0xf] %vm432_vm3, %v513_v46  ;;  %v353_v49 = vsel %vm321_vm4, %v261_v39, %v337_v47  ;;  %v265_v50 = vpop.f32.mrb[4].mxu0  ;;  %v297_v51 = vpop.f32.mrb[4].mxu1 }
 0x109   :  { %v506_v52 = vpack.c.bf16 %v353_v49, %v353_v49  ;;  %v361_v53 = vsel %vm329_vm5, %v293_v40, %v345_v48  ;;  %v266_v54 = vadd.f32 %v692_v28, %v265_v50  ;;  %v298_v55 = vadd.f32 %v692_v28, %v297_v51  ;;  %v267_v56 = vpop.f32.mrb[5].mxu0  ;;  %v299_v57 = vpop.f32.mrb[5].mxu1 }
 0x10a   :  { %v514_v58 = vpack.c.bf16 %v361_v53, %v361_v53  ;;  %v268_v59 = vpop.f32.mrb[6].mxu0  ;;  %v300_v60 = vpop.f32.mrb[6].mxu1 }
 0x10b   :  { %434 = vst.msk [vmem:[%s777_s3 + $0x4] sm:$0xf] %vm432_vm3, %v506_v52  ;;  %vm322_vm6 = vcmp.gt.f32.partialorder %v266_v54, 0.0  ;;  %v338_v61 = vmul.f32 0.2, %v266_v54  ;;  %vm330_vm7 = vcmp.gt.f32.partialorder %v298_v55, 0.0  ;;  %v269_v63 = vadd.f32 %v692_v28, %v268_v59 }
 0x10c   :  { %v346_v62 = vmul.f32 0.2, %v298_v55  ;;  %442 = vst.msk [vmem:[%s777_s3 + $0x24] sm:$0xf] %vm432_vm3, %v514_v58  ;;  %v301_v0 = vadd.f32 %v692_v28, %v300_v60  ;;  %v270_v1 = vpop.f32.mrb[7].mxu0  ;;  %v302_v2 = vpop.f32.mrb[7].mxu1 }
 0x10d   :  { %v354_v3 = vsel %vm322_vm6, %v266_v54, %v338_v61  ;;  %vm323_vm8 = vcmp.gt.f32.partialorder %v269_v63, 0.0  ;;  %v339_v7 = vmul.f32 0.2, %v269_v63 }
 0x10e   :  { %v362_v4 = vsel %vm330_vm7, %v298_v55, %v346_v62  ;;  %v507_v5 = vpack.c.bf16 %v354_v3, %v354_v3  ;;  %vm331_vm9 = vcmp.gt.f32.partialorder %v301_v0, 0.0  ;;  %v347_v8 = vmul.f32 0.2, %v301_v0 }
 0x10f   :  { %v515_v6 = vpack.c.bf16 %v362_v4, %v362_v4  ;;  %v355_v9 = vsel %vm323_vm8, %v269_v63, %v339_v7 }
 0x110   :  { %435 = vst.msk [vmem:[%s777_s3 + $0x8] sm:$0xf] %vm432_vm3, %v507_v5  ;;  %v273_v10 = vpop.f32.mrb[8].mxu0  ;;  %v305_v11 = vpop.f32.mrb[8].mxu1  ;;  %v508_v12 = vpack.c.bf16 %v355_v9, %v355_v9  ;;  %v363_v13 = vsel %vm331_vm9, %v301_v0, %v347_v8 }
 0x111   :  { %443 = vst.msk [vmem:[%s777_s3 + $0x28] sm:$0xf] %vm432_vm3, %v515_v6  ;;  %v274_v14 = vadd.f32 %v692_v28, %v273_v10  ;;  %v306_v15 = vadd.f32 %v692_v28, %v305_v11  ;;  %v275_v16 = vpop.f32.mrb[9].mxu0  ;;  %v307_v17 = vpop.f32.mrb[9].mxu1  ;;  %v516_v18 = vpack.c.bf16 %v363_v13, %v363_v13 }
 0x112   :  { %v276_v19 = vpop.f32.mrb[10].mxu0  ;;  %v308_v20 = vpop.f32.mrb[10].mxu1  ;;  %436 = vst.msk [vmem:[%s777_s3 + $0xc] sm:$0xf] %vm432_vm3, %v508_v12 }
 0x113   :  { %vm324_vm10 = vcmp.gt.f32.partialorder %v274_v14, 0.0  ;;  %v340_v21 = vmul.f32 0.2, %v274_v14  ;;  %vm332_vm11 = vcmp.gt.f32.partialorder %v306_v15, 0.0  ;;  %v348_v22 = vmul.f32 0.2, %v306_v15 }
 0x114   :  { %444 = vst.msk [vmem:[%s777_s3 + $0x2c] sm:$0xf] %vm432_vm3, %v516_v18  ;;  %v277_v23 = vadd.f32 %v692_v28, %v276_v19  ;;  %v309_v24 = vadd.f32 %v692_v28, %v308_v20  ;;  %v278_v25 = vpop.f32.mrb[11].mxu0  ;;  %v310_v26 = vpop.f32.mrb[11].mxu1 }
 0x115   :  { %v356_v27 = vsel %vm324_vm10, %v274_v14, %v340_v21  ;;  %v364_v29 = vsel %vm332_vm11, %v306_v15, %v348_v22 }
 0x116   :  { %v509_v30 = vpack.c.bf16 %v356_v27, %v356_v27  ;;  %v517_v31 = vpack.c.bf16 %v364_v29, %v364_v29  ;;  %vm325_vm12 = vcmp.gt.f32.partialorder %v277_v23, 0.0  ;;  %v341_v32 = vmul.f32 0.2, %v277_v23 }
 0x117   :  { %vm333_vm13 = vcmp.gt.f32.partialorder %v309_v24, 0.0  ;;  %v349_v33 = vmul.f32 0.2, %v309_v24 }
 0x118   :  { %437 = vst.msk [vmem:[%s777_s3 + $0x10] sm:$0xf] %vm432_vm3, %v509_v30  ;;  %445 = vst.msk [vmem:[%s777_s3 + $0x30] sm:$0xf] %vm432_vm3, %v517_v31  ;;  %v357_v34 = vsel %vm325_vm12, %v277_v23, %v341_v32  ;;  %v281_v35 = vpop.f32.mrb[12].mxu0  ;;  %v313_v36 = vpop.f32.mrb[12].mxu1 }
 0x119   :  { %v510_v37 = vpack.c.bf16 %v357_v34, %v357_v34  ;;  %v365_v38 = vsel %vm333_vm13, %v309_v24, %v349_v33  ;;  %v282_v39 = vadd.f32 %v692_v28, %v281_v35  ;;  %v314_v40 = vadd.f32 %v692_v28, %v313_v36  ;;  %v283_v41 = vpop.f32.mrb[13].mxu0  ;;  %v315_v42 = vpop.f32.mrb[13].mxu1 }
 0x11a   :  { %v518_v43 = vpack.c.bf16 %v365_v38, %v365_v38  ;;  %v284_v44 = vpop.f32.mrb[14].mxu0  ;;  %v316_v45 = vpop.f32.mrb[14].mxu1 }
 0x11b   :  { %438 = vst.msk [vmem:[%s777_s3 + $0x14] sm:$0xf] %vm432_vm3, %v510_v37  ;;  %vm326_vm14 = vcmp.gt.f32.partialorder %v282_v39, 0.0  ;;  %v342_v46 = vmul.f32 0.2, %v282_v39  ;;  %vm334_vm15 = vcmp.gt.f32.partialorder %v314_v40, 0.0  ;;  %v285_v48 = vadd.f32 %v692_v28, %v284_v44 }
 0x11c   :  { %v350_v47 = vmul.f32 0.2, %v314_v40  ;;  %446 = vst.msk [vmem:[%s777_s3 + $0x34] sm:$0xf] %vm432_vm3, %v518_v43  ;;  %v317_v49 = vadd.f32 %v692_v28, %v316_v45  ;;  %v286_v50 = vpop.f32.mrb[15].mxu0  ;;  %v318_v51 = vpop.f32.mrb[15].mxu1 }
 0x11d   :  { %v358_v52 = vsel %vm326_vm14, %v282_v39, %v342_v46  ;;  %vm327_vm0 = vcmp.gt.f32.partialorder %v285_v48, 0.0  ;;  %v343_v56 = vmul.f32 0.2, %v285_v48 }
 0x11e   :  { %v366_v53 = vsel %vm334_vm15, %v314_v40, %v350_v47  ;;  %v511_v54 = vpack.c.bf16 %v358_v52, %v358_v52  ;;  %vm335_vm1 = vcmp.gt.f32.partialorder %v317_v49, 0.0  ;;  %v351_v57 = vmul.f32 0.2, %v317_v49 }
 0x11f   :  { %v519_v55 = vpack.c.bf16 %v366_v53, %v366_v53  ;;  %v359_v28 = vsel %vm327_vm0, %v285_v48, %v343_v56 }
 0x120   :  { %439 = vst.msk [vmem:[%s777_s3 + $0x18] sm:$0xf] %vm432_vm3, %v511_v54  ;;  %v512_v58 = vpack.c.bf16 %v359_v28, %v359_v28  ;;  %v367_v59 = vsel %vm335_vm1, %v317_v49, %v351_v57 }
 0x121   :  { %447 = vst.msk [vmem:[%s777_s3 + $0x38] sm:$0xf] %vm432_vm3, %v519_v55  ;;  %v520_v60 = vpack.c.bf16 %v367_v59, %v367_v59 }
 0x122   :  { %440 = vst.msk [vmem:[%s777_s3 + $0x1c] sm:$0xf] %vm432_vm3, %v512_v58 }
 0x123   :  { %448 = vst.msk [vmem:[%s777_s3 + $0x3c] sm:$0xf] %vm432_vm3, %v520_v60 }

// kernel: discriminator_forward.3
= control target key start
LH: loop header
LB: loop body
LE: loop exit
PB: predicated region body
PF: predicated region fallthrough
CT: control target
= control target key end

     0   :  { %vm9805_vm4 = vcmask 1041408   ;;  %vm10080_vm13 = vcmask 1024   ;;  %s16225_s1 = inlined_call_operand.vmem [shape: bf16[1024,128], index: 1, kind: input, shape index: {}]   ;;  %s16226_s0 = inlined_call_operand.vmem [shape: bf16[32,1024], index: 0, kind: input, shape index: {}]   ;;  %s16227_s2 = inlined_call_operand.vmem [shape: bf16[16,128,1024], index: 2, kind: input, shape index: {}]   ;;  %s16228_s4 = inlined_call_operand.<no memory space> [shape: f32[1,1], index: 4, kind: input, shape index: {}]   ;;  %s16229_s3 = inlined_call_operand.vmem [shape: f32[1,1024], index: 3, kind: input, shape index: {}]   ;;  %s16230_s5 = inlined_call_operand.vmem [shape: f32[2,1], index: 5, kind: output, shape index: {}]  }
   0x1   :  { %v12505_v0 = vld [vmem:[%s16225_s1 + $0x40] sm:$0xff]   ;;  %v12509_v4 = vld [vmem:[%s16225_s1 + $0x48] sm:$0xff]   ;;  %v12513_v8 = vld [vmem:[%s16225_s1 + $0x50] sm:$0xff]  }
   0x2   :  { %v12506_v1 = vld [vmem:[%s16225_s1 + $0xc0] sm:$0xff]   ;;  %12152 = vmatprep.subr.bf16.mxu0 %v12505_v0  ;;  %v12510_v5 = vld [vmem:[%s16225_s1 + $0xc8] sm:$0xff]   ;;  %v12514_v9 = vld [vmem:[%s16225_s1 + $0xd0] sm:$0xff]  }
   0x3   :  { %v12507_v2 = vld [vmem:[%s16225_s1] sm:$0xff]   ;;  %12180 = vmatprep.subr.bf16.mxu1 %v12506_v1  ;;  %v12511_v6 = vld [vmem:[%s16225_s1 + $0x8] sm:$0xff]   ;;  %v12515_v10 = vld [vmem:[%s16225_s1 + $0x10] sm:$0xff]  }
   0x4   :  { %v12508_v3 = vld [vmem:[%s16225_s1 + $0x80] sm:$0xff]   ;;  %12153 = vmatpush3.bf16.msra.mxu0 %v12507_v2  ;;  %v12512_v7 = vld [vmem:[%s16225_s1 + $0x88] sm:$0xff]   ;;  %v12516_v11 = vld [vmem:[%s16225_s1 + $0x90] sm:$0xff]  }
   0x5   :  { %12181 = vmatpush3.bf16.msra.mxu1 %v12508_v3  ;;  %12154 = vmatprep.subr.bf16.mxu0 %v12509_v4  ;;  %v12517_v12 = vld [vmem:[%s16225_s1 + $0x58] sm:$0xff]   ;;  %v12521_v16 = vld [vmem:[%s16225_s1 + $0x60] sm:$0xff]   ;;  %v12525_v20 = vld [vmem:[%s16225_s1 + $0x68] sm:$0xff]  }
   0x6   :  { %12182 = vmatprep.subr.bf16.mxu1 %v12510_v5  ;;  %v12518_v13 = vld [vmem:[%s16225_s1 + $0xd8] sm:$0xff]   ;;  %v12522_v17 = vld [vmem:[%s16225_s1 + $0xe0] sm:$0xff]   ;;  %v12526_v21 = vld [vmem:[%s16225_s1 + $0xe8] sm:$0xff]  }
   0x7   :  { %v12519_v14 = vld [vmem:[%s16225_s1 + $0x18] sm:$0xff]   ;;  %v12523_v18 = vld [vmem:[%s16225_s1 + $0x20] sm:$0xff]   ;;  %v12527_v22 = vld [vmem:[%s16225_s1 + $0x28] sm:$0xff]  }
   0x8   :  { %12155 = vmatpush3.bf16.msra.mxu0 %v12511_v6  ;;  %v12520_v15 = vld [vmem:[%s16225_s1 + $0x98] sm:$0xff]   ;;  %v12524_v19 = vld [vmem:[%s16225_s1 + $0xa0] sm:$0xff]   ;;  %v12528_v23 = vld [vmem:[%s16225_s1 + $0xa8] sm:$0xff]  }
   0x9   :  { %12183 = vmatpush3.bf16.msra.mxu1 %v12512_v7  ;;  %12156 = vmatprep.subr.bf16.mxu0 %v12513_v8  ;;  %v12529_v24 = vld [vmem:[%s16225_s1 + $0x70] sm:$0xff]   ;;  %v12533_v28 = vld [vmem:[%s16225_s1 + $0x78] sm:$0xff]   ;;  %v23_v32 = vld [vmem:[%s16226_s0] sm:$0xff] }
   0xa   :  { %12184 = vmatprep.subr.bf16.mxu1 %v12514_v9  ;;  %v12530_v25 = vld [vmem:[%s16225_s1 + $0xf0] sm:$0xff]   ;;  %v12534_v29 = vld [vmem:[%s16225_s1 + $0xf8] sm:$0xff]   ;;  %v27_v33 = vld [vmem:[%s16226_s0 + $0x20] sm:$0xff] }
   0xb   :  { %v12531_v26 = vld [vmem:[%s16225_s1 + $0x30] sm:$0xff]   ;;  %v12535_v30 = vld [vmem:[%s16225_s1 + $0x38] sm:$0xff]   ;;  %v24_v34 = vld [vmem:[%s16226_s0 + $0x8] sm:$0xff]  ;;  %v10086_v35 = vcombine.low %v23_v32, %v27_v33  ;;  %v10087_v36 = vcombine.high %v23_v32, %v27_v33 }
   0xc   :  { %12157 = vmatpush3.bf16.msra.mxu0 %v12515_v10  ;;  %v12532_v27 = vld [vmem:[%s16225_s1 + $0xb0] sm:$0xff]   ;;  %v12536_v31 = vld [vmem:[%s16225_s1 + $0xb8] sm:$0xff]   ;;  %v28_v37 = vld [vmem:[%s16226_s0 + $0x28] sm:$0xff] }
   0xd   :  { %12185 = vmatpush3.bf16.msra.mxu1 %v12516_v11  ;;  %12158 = vmatprep.subr.bf16.mxu0 %v12517_v12  ;;  %v10088_v38 = vcombine.low %v24_v34, %v28_v37  ;;  %v10089_v39 = vcombine.high %v24_v34, %v28_v37  ;;  %v12537_v40 = vld [vmem:[%s16225_s1 + $0x140] sm:$0xff]   ;;  %v12541_v44 = vld [vmem:[%s16225_s1 + $0x148] sm:$0xff]   ;;  %v12545_v48 = vld [vmem:[%s16225_s1 + $0x150] sm:$0xff]  }
   0xe   :  { %12186 = vmatprep.subr.bf16.mxu1 %v12518_v13  ;;  %663 = vmatprep.mubr.bf16.mxu0 %v10087_v36  ;;  %v12538_v41 = vld [vmem:[%s16225_s1 + $0x1c0] sm:$0xff]   ;;  %v12542_v45 = vld [vmem:[%s16225_s1 + $0x1c8] sm:$0xff]   ;;  %v12546_v49 = vld [vmem:[%s16225_s1 + $0x1d0] sm:$0xff]  }
   0xf   :  { %712 = vmatprep.mubr.bf16.mxu1 %v10089_v39  ;;  %v12539_v42 = vld [vmem:[%s16225_s1 + $0x100] sm:$0xff]   ;;  %v12543_v46 = vld [vmem:[%s16225_s1 + $0x108] sm:$0xff]   ;;  %v12547_v50 = vld [vmem:[%s16225_s1 + $0x110] sm:$0xff]  }
  0x10   :  { %12159 = vmatpush3.bf16.msra.mxu0 %v12519_v14  ;;  %v12540_v43 = vld [vmem:[%s16225_s1 + $0x180] sm:$0xff]   ;;  %v12544_v47 = vld [vmem:[%s16225_s1 + $0x188] sm:$0xff]   ;;  %v12548_v51 = vld [vmem:[%s16225_s1 + $0x190] sm:$0xff]  }
  0x11   :  { %12187 = vmatpush3.bf16.msra.mxu1 %v12520_v15  ;;  %12160 = vmatprep.subr.bf16.mxu0 %v12521_v16  ;;  %v12549_v52 = vld [vmem:[%s16225_s1 + $0x158] sm:$0xff]   ;;  %v12553_v56 = vld [vmem:[%s16225_s1 + $0x160] sm:$0xff]   ;;  %v32_v63 = vld [vmem:[%s16226_s0 + $0x48] sm:$0xff] }
  0x12   :  { %12188 = vmatprep.subr.bf16.mxu1 %v12522_v17  ;;  %v12550_v53 = vld [vmem:[%s16225_s1 + $0x1d8] sm:$0xff]   ;;  %v12554_v57 = vld [vmem:[%s16225_s1 + $0x1e0] sm:$0xff]   ;;  %v36_v0 = vld [vmem:[%s16226_s0 + $0x68] sm:$0xff] }
  0x13   :  { %v12551_v54 = vld [vmem:[%s16225_s1 + $0x118] sm:$0xff]   ;;  %v12555_v58 = vld [vmem:[%s16225_s1 + $0x120] sm:$0xff]   ;;  %v10097_v2 = vcombine.high %v32_v63, %v36_v0  ;;  %v12557_v3 = vld [vmem:[%s16225_s1 + $0x168] sm:$0xff]   ;;  %v10096_v4 = vcombine.low %v32_v63, %v36_v0 }
  0x14   :  { %12161 = vmatpush3.bf16.msra.mxu0 %v12523_v18  ;;  %v12552_v55 = vld [vmem:[%s16225_s1 + $0x198] sm:$0xff]   ;;  %v12556_v59 = vld [vmem:[%s16225_s1 + $0x1a0] sm:$0xff]   ;;  %v12558_v5 = vld [vmem:[%s16225_s1 + $0x1e8] sm:$0xff]  }
  0x15   :  { %12189 = vmatpush3.bf16.msra.mxu1 %v12524_v19  ;;  %12162 = vmatprep.subr.bf16.mxu0 %v12525_v20  ;;  %v31_v60 = vld [vmem:[%s16226_s0 + $0x40] sm:$0xff]  ;;  %v12559_v6 = vld [vmem:[%s16225_s1 + $0x128] sm:$0xff]   ;;  %v12561_v8 = vld [vmem:[%s16225_s1 + $0x170] sm:$0xff]  }
  0x16   :  { %12190 = vmatprep.subr.bf16.mxu1 %v12526_v21  ;;  %v35_v61 = vld [vmem:[%s16226_s0 + $0x60] sm:$0xff]  ;;  %v12560_v7 = vld [vmem:[%s16225_s1 + $0x1a8] sm:$0xff]   ;;  %v12562_v9 = vld [vmem:[%s16225_s1 + $0x1f0] sm:$0xff]  }
  0x17   :  { %v10095_v62 = vcombine.high %v31_v60, %v35_v61  ;;  %v10094_v1 = vcombine.low %v31_v60, %v35_v61  ;;  %v12563_v10 = vld [vmem:[%s16225_s1 + $0x130] sm:$0xff]   ;;  %v12565_v12 = vld [vmem:[%s16225_s1 + $0x178] sm:$0xff]   ;;  %v10166_v32 = vld [vmem:[%s16227_s2 + $0x200] sm:$0xff] }
  0x18   :  { %12163 = vmatpush3.bf16.msra.mxu0 %v12527_v22  ;;  %v12564_v11 = vld [vmem:[%s16225_s1 + $0x1b0] sm:$0xff]   ;;  %v12566_v13 = vld [vmem:[%s16225_s1 + $0x1f8] sm:$0xff]   ;;  %v10170_v33 = vld [vmem:[%s16227_s2 + $0x220] sm:$0xff] }
  0x19   :  { %12191 = vmatpush3.bf16.msra.mxu1 %v12528_v23  ;;  %12164 = vmatprep.subr.bf16.mxu0 %v12529_v24  ;;  %v12567_v14 = vld [vmem:[%s16225_s1 + $0x138] sm:$0xff]   ;;  %v25_v16 = vld [vmem:[%s16226_s0 + $0x10] sm:$0xff]  ;;  %v10167_v34 = vld [vmem:[%s16227_s2 + $0x208] sm:$0xff]  ;;  %v10230_v37 = vcombine.low %v10166_v32, %v10170_v33 }
  0x1a   :  { %12192 = vmatprep.subr.bf16.mxu1 %v12530_v25  ;;  %v12568_v15 = vld [vmem:[%s16225_s1 + $0x1b8] sm:$0xff]   ;;  %v29_v17 = vld [vmem:[%s16226_s0 + $0x30] sm:$0xff]  ;;  %v10171_v36 = vld [vmem:[%s16227_s2 + $0x228] sm:$0xff] }
  0x1b   :  { %v26_v18 = vld [vmem:[%s16226_s0 + $0x18] sm:$0xff]  ;;  %v10090_v20 = vcombine.low %v25_v16, %v29_v17  ;;  %v10091_v21 = vcombine.high %v25_v16, %v29_v17  ;;  %v33_v24 = vld [vmem:[%s16226_s0 + $0x50] sm:$0xff]  ;;  %v10233_v39 = vcombine.high %v10167_v34, %v10171_v36  ;;  %v10195_v60 = vld [vmem:[%s16227_s2 + $0x2e8] sm:$0xff] }
  0x1c   :  { %12165 = vmatpush3.bf16.msra.mxu0 %v12531_v26  ;;  %v30_v19 = vld [vmem:[%s16226_s0 + $0x38] sm:$0xff]  ;;  %v37_v25 = vld [vmem:[%s16226_s0 + $0x70] sm:$0xff]  ;;  %v10198_v0 = vld [vmem:[%s16227_s2 + $0x300] sm:$0xff] }
  0x1d   :  { %12193 = vmatpush3.bf16.msra.mxu1 %v12532_v27  ;;  %12166 = vmatprep.subr.bf16.mxu0 %v12533_v28  ;;  %v10092_v22 = vcombine.low %v26_v18, %v30_v19  ;;  %v10093_v23 = vcombine.high %v26_v18, %v30_v19  ;;  %v34_v26 = vld [vmem:[%s16226_s0 + $0x58] sm:$0xff]  ;;  %v10099_v27 = vcombine.high %v33_v24, %v37_v25  ;;  %v10214_v16 = vld [vmem:[%s16227_s2 + $0x380] sm:$0xff]  ;;  %v10215_v18 = vld [vmem:[%s16227_s2 + $0x388] sm:$0xff] }
  0x1e   :  { %12194 = vmatprep.subr.bf16.mxu1 %v12534_v29  ;;  %v38_v28 = vld [vmem:[%s16226_s0 + $0x78] sm:$0xff]  ;;  %v10218_v17 = vld [vmem:[%s16227_s2 + $0x3a0] sm:$0xff] }
  0x1f   :  { %v10101_v29 = vcombine.high %v34_v26, %v38_v28  ;;  %v10279_v19 = vcombine.high %v10214_v16, %v10218_v17 }
  0x20   :  { %12167 = vmatpush3.bf16.msra.mxu0 %v12535_v30  ;;  %v10098_v30 = vcombine.low %v33_v24, %v37_v25  ;;  %v10222_v24 = vld [vmem:[%s16227_s2 + $0x3c0] sm:$0xff] }
  0x21   :  { %12195 = vmatpush3.bf16.msra.mxu1 %v12536_v31  ;;  %12208 = vmatprep.subr.bf16.mxu0 %v12537_v40  ;;  %v10100_v31 = vcombine.low %v34_v26, %v38_v28  ;;  %v10174_v40 = vld [vmem:[%s16227_s2 + $0x240] sm:$0xff]  ;;  %v10223_v26 = vld [vmem:[%s16227_s2 + $0x3c8] sm:$0xff] }
  0x22   :  { %12236 = vmatprep.subr.bf16.mxu1 %v12538_v41  ;;  %v10178_v41 = vld [vmem:[%s16227_s2 + $0x260] sm:$0xff]  ;;  %v10227_v28 = vld [vmem:[%s16227_s2 + $0x3e8] sm:$0xff] }
  0x23   :  { %664 = vmatmul.mubr.bf16.vlgmr.msra.gmra.mrb[0].mxu0 %v10086_v35  ;;  %v10231_v35 = vcombine.high %v10166_v32, %v10170_v33  ;;  %v10226_v25 = vld [vmem:[%s16227_s2 + $0x3e0] sm:$0xff]  ;;  %v10289_v33 = vcombine.high %v10223_v26, %v10227_v28 }
  0x24   :  { %713 = vmatmul.mubr.bf16.vlgmr.msra.gmra.mrb[0].mxu1 %v10088_v38  ;;  %12209 = vmatpush3.bf16.msra.mxu0 %v12539_v42  ;;  %v10232_v38 = vcombine.low %v10167_v34, %v10171_v36  ;;  %v10175_v42 = vld [vmem:[%s16227_s2 + $0x248] sm:$0xff]  ;;  %v10286_v32 = vcombine.low %v10222_v24, %v10226_v25  ;;  %v12979_v36 = vld [vmem:[%s16227_s2 + $0x238] sm:$0xff] }
  0x25   :  { %12237 = vmatpush3.bf16.msra.mxu1 %v12540_v43  ;;  %12210 = vmatprep.subr.bf16.mxu0 %v12541_v44  ;;  %v10239_v43 = vcombine.high %v10174_v40, %v10178_v41  ;;  %v10179_v44 = vld [vmem:[%s16227_s2 + $0x268] sm:$0xff] }
  0x26   :  { %12238 = vmatprep.subr.bf16.mxu1 %v12542_v45  ;;  %671 = vmatprep.mubr.bf16.mxu0 %v10095_v62  ;;  %v10238_v45 = vcombine.low %v10174_v40, %v10178_v41 }
  0x27   :  { %720 = vmatprep.mubr.bf16.mxu1 %v10097_v2  ;;  %v10199_v2 = vld [vmem:[%s16227_s2 + $0x308] sm:$0xff] }
  0x28   :  { %12211 = vmatpush3.bf16.msra.mxu0 %v12543_v46  ;;  %v10240_v46 = vcombine.low %v10175_v42, %v10179_v44 }
  0x29   :  { %12239 = vmatpush3.bf16.msra.mxu1 %v12544_v47  ;;  %12212 = vmatprep.subr.bf16.mxu0 %v12545_v48  ;;  %v10241_v47 = vcombine.high %v10175_v42, %v10179_v44  ;;  %v10182_v48 = vld [vmem:[%s16227_s2 + $0x280] sm:$0xff] }
  0x2a   :  { %12240 = vmatprep.subr.bf16.mxu1 %v12546_v49  ;;  %v10186_v49 = vld [vmem:[%s16227_s2 + $0x2a0] sm:$0xff] }
  0x2b   :  { %672 = vmatmul.mubr.bf16.gmra.mrb[4].mxu0 %v10094_v1  ;;  %v10202_v1 = vld [vmem:[%s16227_s2 + $0x320] sm:$0xff] }
  0x2c   :  { %12213 = vmatpush3.bf16.msra.mxu0 %v12547_v50  ;;  %721 = vmatmul.mubr.bf16.gmra.mrb[4].mxu1 %v10096_v4  ;;  %v10183_v50 = vld [vmem:[%s16227_s2 + $0x288] sm:$0xff] }
  0x2d   :  { %12241 = vmatpush3.bf16.msra.mxu1 %v12548_v51  ;;  %12214 = vmatprep.subr.bf16.mxu0 %v12549_v52  ;;  %v10247_v51 = vcombine.high %v10182_v48, %v10186_v49  ;;  %v10187_v52 = vld [vmem:[%s16227_s2 + $0x2a8] sm:$0xff] }
  0x2e   :  { %12242 = vmatprep.subr.bf16.mxu1 %v12550_v53  ;;  %761 = vmatprep.mubr.bf16.mxu0 %v10091_v21  ;;  %v10246_v53 = vcombine.low %v10182_v48, %v10186_v49  ;;  %v10203_v4 = vld [vmem:[%s16227_s2 + $0x328] sm:$0xff]  ;;  %v10278_v21 = vcombine.low %v10214_v16, %v10218_v17 }
  0x2f   :  { %810 = vmatprep.mubr.bf16.mxu1 %v10093_v23 }
  0x30   :  { %12215 = vmatpush3.bf16.msra.mxu0 %v12551_v54  ;;  %v10248_v54 = vcombine.low %v10183_v50, %v10187_v52 }
  0x31   :  { %12243 = vmatpush3.bf16.msra.mxu1 %v12552_v55  ;;  %12216 = vmatprep.subr.bf16.mxu0 %v12553_v56  ;;  %v10249_v55 = vcombine.high %v10183_v50, %v10187_v52  ;;  %v10190_v56 = vld [vmem:[%s16227_s2 + $0x2c0] sm:$0xff] }
  0x32   :  { %12244 = vmatprep.subr.bf16.mxu1 %v12554_v57  ;;  %v10194_v57 = vld [vmem:[%s16227_s2 + $0x2e0] sm:$0xff] }
  0x33   :  { %v10254_v61 = vcombine.low %v10190_v56, %v10194_v57 }
  0x34   :  { %12217 = vmatpush3.bf16.msra.mxu0 %v12555_v58  ;;  %v10191_v58 = vld [vmem:[%s16227_s2 + $0x2c8] sm:$0xff] }
  0x35   :  { %12245 = vmatpush3.bf16.msra.mxu1 %v12556_v59  ;;  %12218 = vmatprep.subr.bf16.mxu0 %v12557_v3  ;;  %v10255_v59 = vcombine.high %v10190_v56, %v10194_v57  ;;  %v10256_v62 = vcombine.low %v10191_v58, %v10195_v60  ;;  %v10257_v63 = vcombine.high %v10191_v58, %v10195_v60 }
  0x36   :  { %12246 = vmatprep.subr.bf16.mxu1 %v12558_v5  ;;  %v10263_v3 = vcombine.high %v10198_v0, %v10202_v1  ;;  %v10262_v5 = vcombine.low %v10198_v0, %v10202_v1 }
  0x38   :  { %12219 = vmatpush3.bf16.msra.mxu0 %v12559_v6  ;;  %v10264_v6 = vcombine.low %v10199_v2, %v10203_v4 }
  0x39   :  { %12247 = vmatpush3.bf16.msra.mxu1 %v12560_v7  ;;  %12220 = vmatprep.subr.bf16.mxu0 %v12561_v8  ;;  %v10265_v7 = vcombine.high %v10199_v2, %v10203_v4  ;;  %v10206_v8 = vld [vmem:[%s16227_s2 + $0x340] sm:$0xff] }
  0x3a   :  { %12248 = vmatprep.subr.bf16.mxu1 %v12562_v9  ;;  %v10210_v9 = vld [vmem:[%s16227_s2 + $0x360] sm:$0xff] }
  0x3c   :  { %12221 = vmatpush3.bf16.msra.mxu0 %v12563_v10  ;;  %v10207_v10 = vld [vmem:[%s16227_s2 + $0x348] sm:$0xff] }
  0x3d   :  { %12249 = vmatpush3.bf16.msra.mxu1 %v12564_v11  ;;  %12222 = vmatprep.subr.bf16.mxu0 %v12565_v12  ;;  %v10271_v11 = vcombine.high %v10206_v8, %v10210_v9  ;;  %v10211_v12 = vld [vmem:[%s16227_s2 + $0x368] sm:$0xff] }
  0x3e   :  { %12250 = vmatprep.subr.bf16.mxu1 %v12566_v13  ;;  %v10270_v13 = vcombine.low %v10206_v8, %v10210_v9 }
  0x40   :  { %12223 = vmatpush3.bf16.msra.mxu0 %v12567_v14  ;;  %v10272_v14 = vcombine.low %v10207_v10, %v10211_v12 }
  0x41   :  { %12251 = vmatpush3.bf16.msra.mxu1 %v12568_v15  ;;  %1331 = vmatprep.subr.bf16.mxu0 %v10231_v35  ;;  %v10273_v15 = vcombine.high %v10207_v10, %v10211_v12  ;;  %v12974_v35 = vld [vmem:[%s16227_s2 + $0x218] sm:$0xff] }
  0x42   :  { %1372 = vmatprep.subr.bf16.mxu1 %v10233_v39  ;;  %v10236_v39 = vcombine.low %v12974_v35, %v12979_v36  ;;  %v10237_v40 = vcombine.high %v12974_v35, %v12979_v36 }
  0x43   :  { %762 = vmatmul.mubr.bf16.vlgmr.msra.gmra.mrb[8].mxu0 %v10090_v20  ;;  %v10219_v20 = vld [vmem:[%s16227_s2 + $0x3a8] sm:$0xff] }
  0x44   :  { %811 = vmatmul.mubr.bf16.vlgmr.msra.gmra.mrb[8].mxu1 %v10092_v22  ;;  %769 = vmatprep.mubr.bf16.mxu0 %v10099_v27  ;;  %v10280_v22 = vcombine.low %v10215_v18, %v10219_v20  ;;  %v10281_v23 = vcombine.high %v10215_v18, %v10219_v20  ;;  %v10287_v27 = vcombine.high %v10222_v24, %v10226_v25 }
  0x45   :  { %818 = vmatprep.mubr.bf16.mxu1 %v10101_v29  ;;  %1332 = vmatpush1.bf16.msra.mxu0 %v10230_v37  ;;  %v12591_v29 = vmov 0   ;;  %v10288_v37 = vcombine.low %v10223_v26, %v10227_v28 }
  0x46   :  { %1373 = vmatpush1.bf16.msra.mxu1 %v10232_v38  ;;  %1333 = vmatprep.subr.bf16.mxu0 %v10239_v43 }
  0x47   :  { %1374 = vmatprep.subr.bf16.mxu1 %v10241_v47 }
  0x49   :  { %1334 = vmatpush1.bf16.msra.mxu0 %v10238_v45 }
  0x4a   :  { %1375 = vmatpush1.bf16.msra.mxu1 %v10240_v46  ;;  %1335 = vmatprep.subr.bf16.mxu0 %v10247_v51 }
  0x4b   :  { %770 = vmatmul.mubr.bf16.gmra.mrb[12].mxu0 %v10098_v30  ;;  %1376 = vmatprep.subr.bf16.mxu1 %v10249_v55  ;;  %v12962_v30 = vld [vmem:[%s16227_s2 + $0x210] sm:$0xff] }
  0x4c   :  { %819 = vmatmul.mubr.bf16.gmra.mrb[12].mxu1 %v10100_v31  ;;  %1363 = vmatprep.mubr.bf16.mxu0 %v12591_v29  ;;  %v12967_v31 = vld [vmem:[%s16227_s2 + $0x230] sm:$0xff] }
  0x4d   :  { %1336 = vmatpush1.bf16.msra.mxu0 %v10246_v53  ;;  %v10234_v34 = vcombine.low %v12962_v30, %v12967_v31  ;;  %v10235_v38 = vcombine.high %v12962_v30, %v12967_v31  ;;  %1404 = vmatprep.mubr.bf16.mxu1 %v12591_v29  ;;  %v10193_v30 = vld [vmem:[%s16227_s2 + $0x2d8] sm:$0xff] }
  0x4e   :  { %1377 = vmatpush1.bf16.msra.mxu1 %v10248_v54  ;;  %1337 = vmatprep.subr.bf16.mxu0 %v10255_v59  ;;  %v10197_v31 = vld [vmem:[%s16227_s2 + $0x2f8] sm:$0xff] }
  0x4f   :  { %1378 = vmatprep.subr.bf16.mxu1 %v10257_v63 }
  0x51   :  { %1338 = vmatpush1.bf16.msra.mxu0 %v10254_v61 }
  0x52   :  { %1379 = vmatpush1.bf16.msra.mxu1 %v10256_v62  ;;  %1339 = vmatprep.subr.bf16.mxu0 %v10263_v3 }
  0x53   :  { %1380 = vmatprep.subr.bf16.mxu1 %v10265_v7 }
  0x55   :  { %1340 = vmatpush1.bf16.msra.mxu0 %v10262_v5 }
  0x56   :  { %1381 = vmatpush1.bf16.msra.mxu1 %v10264_v6  ;;  %1341 = vmatprep.subr.bf16.mxu0 %v10271_v11 }
  0x57   :  { %1382 = vmatprep.subr.bf16.mxu1 %v10273_v15 }
  0x59   :  { %1342 = vmatpush1.bf16.msra.mxu0 %v10270_v13 }
  0x5a   :  { %1383 = vmatpush1.bf16.msra.mxu1 %v10272_v14  ;;  %1343 = vmatprep.subr.bf16.mxu0 %v10279_v19 }
  0x5b   :  { %1384 = vmatprep.subr.bf16.mxu1 %v10281_v23 }
  0x5d   :  { %1344 = vmatpush1.bf16.msra.mxu0 %v10278_v21 }
  0x5e   :  { %1385 = vmatpush1.bf16.msra.mxu1 %v10280_v22  ;;  %1345 = vmatprep.subr.bf16.mxu0 %v10287_v27 }
  0x5f   :  { %1386 = vmatprep.subr.bf16.mxu1 %v10289_v33 }
  0x61   :  { %1346 = vmatpush1.bf16.msra.mxu0 %v10286_v32 }
  0x62   :  { %1387 = vmatpush1.bf16.msra.mxu1 %v10288_v37  ;;  %1413 = vmatprep.subr.bf16.mxu0 %v10235_v38 }
  0x63   :  { %1454 = vmatprep.subr.bf16.mxu1 %v10237_v40 }
  0xf6   :  { %v12168_v41 = vpop.f32.mrb[0].mxu0 }
  0xf7   :  { %v12196_v42 = vpop.f32.mrb[0].mxu1  ;;  %v12169_v43 = vpop.f32.mrb[1].mxu0 }
  0xf8   :  { %v12170_v44 = vadd.f32 %v12169_v43, %v12168_v41  ;;  %v12197_v45 = vpop.f32.mrb[1].mxu1  ;;  %v12171_v46 = vpop.f32.mrb[2].mxu0 }
  0xf9   :  { %v12198_v47 = vadd.f32 %v12197_v45, %v12196_v42  ;;  %v12199_v48 = vpop.f32.mrb[2].mxu1  ;;  %v12172_v49 = vpop.f32.mrb[3].mxu0 }
  0xfa   :  { %v12173_v50 = vadd.f32 %v12172_v49, %v12171_v46  ;;  %v12200_v51 = vpop.f32.mrb[3].mxu1 }
  0xfb   :  { %v715_v52 = vadd.f32 %v12198_v47, %v12170_v44  ;;  %v12201_v53 = vadd.f32 %v12200_v51, %v12199_v48 }
  0xfd   :  { %v718_v54 = vadd.f32 %v12201_v53, %v12173_v50 }
  0xfe   :  { %v12174_v55 = vpop.f32.mrb[4].mxu0 }
  0xff   :  { %v12202_v56 = vpop.f32.mrb[4].mxu1  ;;  %v12175_v57 = vpop.f32.mrb[5].mxu0 }
 0x100   :  { %v12176_v58 = vadd.f32 %v12175_v57, %v12174_v55  ;;  %v12203_v59 = vpop.f32.mrb[5].mxu1  ;;  %v12177_v60 = vpop.f32.mrb[6].mxu0 }
 0x101   :  { %v12204_v61 = vadd.f32 %v12203_v59, %v12202_v56  ;;  %v12205_v62 = vpop.f32.mrb[6].mxu1  ;;  %v12178_v63 = vpop.f32.mrb[7].mxu0 }
 0x102   :  { %v12179_v0 = vadd.f32 %v12178_v63, %v12177_v60  ;;  %v12206_v1 = vpop.f32.mrb[7].mxu1 }
 0x103   :  { %v723_v2 = vadd.f32 %v12204_v61, %v12176_v58  ;;  %v12207_v3 = vadd.f32 %v12206_v1, %v12205_v62 }
 0x105   :  { %v726_v4 = vadd.f32 %v12207_v3, %v12179_v0 }
 0x116   :  { %v12224_v5 = vpop.f32.mrb[8].mxu0 }
 0x117   :  { %v12252_v6 = vpop.f32.mrb[8].mxu1  ;;  %v12225_v7 = vpop.f32.mrb[9].mxu0 }
 0x118   :  { %v12253_v8 = vpop.f32.mrb[9].mxu1  ;;  %v12226_v9 = vadd.f32 %v12225_v7, %v12224_v5  ;;  %v12227_v11 = vpop.f32.mrb[10].mxu0 }
 0x119   :  { %v12254_v10 = vadd.f32 %v12253_v8, %v12252_v6  ;;  %v12255_v12 = vpop.f32.mrb[10].mxu1  ;;  %v12228_v13 = vpop.f32.mrb[11].mxu0 }
 0x11a   :  { %v12256_v14 = vpop.f32.mrb[11].mxu1  ;;  %v764_v15 = vadd.f32 %v12226_v9, %v715_v52  ;;  %v12229_v16 = vadd.f32 %v12228_v13, %v12227_v11 }
 0x11b   :  { %v12257_v17 = vadd.f32 %v12256_v14, %v12255_v12 }
 0x11c   :  { %v813_v18 = vadd.f32 %v12254_v10, %v764_v15  ;;  %v767_v19 = vadd.f32 %v12229_v16, %v718_v54 }
 0x11e   :  { %v816_v20 = vadd.f32 %v12257_v17, %v767_v19  ;;  %v12230_v21 = vpop.f32.mrb[12].mxu0 }
 0x11f   :  { %v12258_v22 = vpop.f32.mrb[12].mxu1  ;;  %v12231_v23 = vpop.f32.mrb[13].mxu0 }
 0x120   :  { %v12259_v24 = vpop.f32.mrb[13].mxu1  ;;  %v827_v25 = vadd.f32 %v816_v20, %v813_v18  ;;  %v12232_v26 = vadd.f32 %v12231_v23, %v12230_v21  ;;  %v12233_v28 = vpop.f32.mrb[14].mxu0  ;;  %v10180_v23 = vld [vmem:[%s16227_s2 + $0x270] sm:$0xff] }
 0x121   :  { %v12260_v27 = vadd.f32 %v12259_v24, %v12258_v22  ;;  %v12261_v32 = vpop.f32.mrb[14].mxu1  ;;  %v12234_v33 = vpop.f32.mrb[15].mxu0  ;;  %v10176_v22 = vld [vmem:[%s16227_s2 + $0x250] sm:$0xff]  ;;  %v10177_v24 = vld [vmem:[%s16227_s2 + $0x258] sm:$0xff] }
 0x122   :  { %v12262_v37 = vpop.f32.mrb[15].mxu1  ;;  %v772_v38 = vadd.f32 %v12232_v26, %v723_v2  ;;  %v12235_v40 = vadd.f32 %v12234_v33, %v12233_v28  ;;  %v10243_v28 = vcombine.high %v10176_v22, %v10180_v23  ;;  %v10184_v33 = vld [vmem:[%s16227_s2 + $0x290] sm:$0xff] }
 0x123   :  { %v12263_v41 = vadd.f32 %v12262_v37, %v12261_v32  ;;  %v10188_v37 = vld [vmem:[%s16227_s2 + $0x2b0] sm:$0xff] }
 0x124   :  { %v821_v42 = vadd.f32 %v12260_v27, %v772_v38  ;;  %v775_v43 = vadd.f32 %v12235_v40, %v726_v4  ;;  %v10185_v38 = vld [vmem:[%s16227_s2 + $0x298] sm:$0xff] }
 0x125   :  { %v10189_v40 = vld [vmem:[%s16227_s2 + $0x2b8] sm:$0xff] }
 0x126   :  { %v828_v44 = vadd.f32 %v827_v25, %v821_v42  ;;  %v824_v45 = vadd.f32 %v12263_v41, %v775_v43  ;;  %v10181_v25 = vld [vmem:[%s16227_s2 + $0x278] sm:$0xff]  ;;  %v10242_v41 = vcombine.low %v10176_v22, %v10180_v23  ;;  %v10251_v43 = vcombine.high %v10184_v33, %v10188_v37  ;;  %v888_v23 = vld [vmem:[%s16227_s2 + $0x40] sm:$0xff] }
 0x127   :  { %v10245_v32 = vcombine.high %v10177_v24, %v10181_v25  ;;  %v10252_v35 = vcombine.low %v10185_v38, %v10189_v40 }
 0x128   :  { %v829_v46 = vadd.f32 %v828_v44, %v824_v45  ;;  %v10253_v44 = vcombine.high %v10185_v38, %v10189_v40  ;;  %v896_v38 = vld [vmem:[%s16227_s2 + $0x80] sm:$0xff] }
 0x129   :  { %v900_v40 = vld [vmem:[%s16227_s2 + $0xa0] sm:$0xff] }
 0x12a   :  { %v830_v47 = vrot.slane %v829_v46, 4 }
 0x12c   :  { %v831_v48 = vadd.f32 %v830_v47, %v829_v46  ;;  %v10196_v46 = vld [vmem:[%s16227_s2 + $0x2f0] sm:$0xff] }
 0x12d   :  { %v10200_v47 = vld [vmem:[%s16227_s2 + $0x310] sm:$0xff] }
 0x12e   :  { %v832_v49 = vrot.slane %v831_v48, 2 }
 0x130   :  { %v833_v50 = vadd.f32 %v832_v49, %v831_v48  ;;  %v10204_v48 = vld [vmem:[%s16227_s2 + $0x330] sm:$0xff]  ;;  %v10201_v49 = vld [vmem:[%s16227_s2 + $0x318] sm:$0xff] }
 0x132   :  { %v834_v51 = vrot.slane %v833_v50, 1 }
 0x134   :  { %v835_v52 = vadd.f32 %v834_v51, %v833_v50  ;;  %v10205_v50 = vld [vmem:[%s16227_s2 + $0x338] sm:$0xff] }
 0x136   :  { %v837_v53 = vmul.f32 0.03125, %v835_v52  ;;  %v10260_v52 = vcombine.low %v10193_v30, %v10197_v31 }
 0x138   :  { %v838_v54 = vsub.f32 %v813_v18, %v837_v53  ;;  %v839_v55 = vsub.f32 %v816_v20, %v837_v53  ;;  %v840_v56 = vsub.f32 %v821_v42, %v837_v53  ;;  %v841_v57 = vsub.f32 %v824_v45, %v837_v53  ;;  %v10192_v45 = vld [vmem:[%s16227_s2 + $0x2d0] sm:$0xff] }
 0x139   :  { %v10244_v42 = vcombine.low %v10177_v24, %v10181_v25  ;;  %v10259_v36 = vcombine.high %v10192_v45, %v10196_v46  ;;  %v10258_v51 = vcombine.low %v10192_v45, %v10196_v46  ;;  %v10267_v53 = vcombine.high %v10200_v47, %v10204_v48  ;;  %v892_v24 = vld [vmem:[%s16227_s2 + $0x60] sm:$0xff]  ;;  %v889_v25 = vld [vmem:[%s16227_s2 + $0x48] sm:$0xff] }
 0x13a   :  { %v842_v58 = vmul.f32 %v838_v54, %v838_v54  ;;  %v843_v59 = vmul.f32 %v839_v55, %v839_v55  ;;  %v844_v60 = vmul.f32 %v840_v56, %v840_v56  ;;  %v845_v62 = vmul.f32 %v841_v57, %v841_v57 }
 0x13b   :  { %v10311_v45 = vcombine.high %v896_v38, %v900_v40 }
 0x13c   :  { %v846_v61 = vadd.f32 %v843_v59, %v842_v58  ;;  %v10213_v58 = vld [vmem:[%s16227_s2 + $0x378] sm:$0xff]  ;;  %v10266_v59 = vcombine.low %v10200_v47, %v10204_v48  ;;  %v912_v48 = vld [vmem:[%s16227_s2 + $0x100] sm:$0xff] }
 0x13e   :  { %v847_v63 = vadd.f32 %v846_v61, %v844_v60  ;;  %v10268_v60 = vcombine.low %v10201_v49, %v10205_v50 }
 0x140   :  { %v848_v0 = vadd.f32 %v847_v63, %v845_v62  ;;  %v10216_v63 = vld [vmem:[%s16227_s2 + $0x390] sm:$0xff] }
 0x142   :  { %v849_v1 = vrot.slane %v848_v0, 4 }
 0x144   :  { %v850_v2 = vadd.f32 %v849_v1, %v848_v0  ;;  %v10220_v0 = vld [vmem:[%s16227_s2 + $0x3b0] sm:$0xff]  ;;  %v10217_v1 = vld [vmem:[%s16227_s2 + $0x398] sm:$0xff] }
 0x146   :  { %v851_v3 = vrot.slane %v850_v2, 2 }
 0x148   :  { %v852_v4 = vadd.f32 %v851_v3, %v850_v2  ;;  %v10221_v2 = vld [vmem:[%s16227_s2 + $0x3b8] sm:$0xff] }
 0x14a   :  { %v853_v5 = vrot.slane %v852_v4, 1 }
 0x14c   :  { %v854_v6 = vadd.f32 %v853_v5, %v852_v4  ;;  %v10283_v5 = vcombine.high %v10216_v63, %v10220_v0 }
 0x14e   :  { %v855_v7 = vmul.f32 0.03125, %v854_v6  ;;  %v10285_v6 = vcombine.high %v10217_v1, %v10221_v2 }
 0x150   :  { %v856_v8 = vadd.f32 1e-05, %v855_v7  ;;  %v10224_v7 = vld [vmem:[%s16227_s2 + $0x3d0] sm:$0xff] }
 0x152   :  { %12569 = vrsqrt.f32 %v856_v8  ;;  %v10228_v8 = vld [vmem:[%s16227_s2 + $0x3f0] sm:$0xff] }
 0x15c   :  { %v12570_v9 = vpop.eup %12569 }
 0x15d   :  { %v858_v10 = vmul.f32 %v12570_v9, %v838_v54  ;;  %v859_v11 = vmul.f32 %v12570_v9, %v839_v55  ;;  %v860_v12 = vmul.f32 %v12570_v9, %v840_v56  ;;  %v861_v13 = vmul.f32 %v12570_v9, %v841_v57  ;;  %v10208_v55 = vld [vmem:[%s16227_s2 + $0x350] sm:$0xff]  ;;  %v10209_v57 = vld [vmem:[%s16227_s2 + $0x358] sm:$0xff] }
 0x15e   :  { %v10269_v54 = vcombine.high %v10201_v49, %v10205_v50  ;;  %v10212_v56 = vld [vmem:[%s16227_s2 + $0x370] sm:$0xff]  ;;  %v10277_v62 = vcombine.high %v10209_v57, %v10213_v58  ;;  %v10276_v4 = vcombine.low %v10209_v57, %v10213_v58  ;;  %v10225_v9 = vld [vmem:[%s16227_s2 + $0x3d8] sm:$0xff]  ;;  %v916_v49 = vld [vmem:[%s16227_s2 + $0x120] sm:$0xff] }
 0x15f   :  { %vm862_vm0 = vcmp.gt.f32.partialorder %v858_v10, 0.0  ;;  %vm863_vm1 = vcmp.gt.f32.partialorder %v859_v11, 0.0  ;;  %vm864_vm2 = vcmp.gt.f32.partialorder %v860_v12, 0.0  ;;  %vm865_vm3 = vcmp.gt.f32.partialorder %v861_v13, 0.0  ;;  %v913_v50 = vld [vmem:[%s16227_s2 + $0x108] sm:$0xff]  ;;  %v924_v57 = vld [vmem:[%s16227_s2 + $0x160] sm:$0xff] }
 0x160   :  { %v866_v14 = vmul.f32 0.2, %v858_v10  ;;  %v867_v15 = vmul.f32 0.2, %v859_v11  ;;  %v868_v16 = vmul.f32 0.2, %v860_v12  ;;  %v10275_v61 = vcombine.high %v10208_v55, %v10212_v56 }
 0x161   :  { %v869_v17 = vmul.f32 0.2, %v861_v13  ;;  %v10274_v3 = vcombine.low %v10208_v55, %v10212_v56  ;;  %v920_v56 = vld [vmem:[%s16227_s2 + $0x140] sm:$0xff]  ;;  %v921_v58 = vld [vmem:[%s16227_s2 + $0x148] sm:$0xff] }
 0x162   :  { %v870_v18 = vsel %vm862_vm0, %v858_v10, %v866_v14  ;;  %v871_v19 = vsel %vm863_vm1, %v859_v11, %v867_v15  ;;  %v872_v20 = vsel %vm864_vm2, %v860_v12, %v868_v16  ;;  %v10229_v10 = vld [vmem:[%s16227_s2 + $0x3f8] sm:$0xff]  ;;  %v10282_v11 = vcombine.low %v10216_v63, %v10220_v0  ;;  %v880_v15 = vld [vmem:[%s16227_s2] sm:$0xff] }
 0x163   :  { %v873_v21 = vsel %vm865_vm3, %v861_v13, %v869_v17  ;;  %874 = vst [vmem:[#allocation2] sm:$0xff] %v870_v18  ;;  %875 = vst [vmem:[#allocation2 + $0x8] sm:$0xff] %v871_v19  ;;  %v10284_v12 = vcombine.low %v10217_v1, %v10221_v2  ;;  %v10291_v13 = vcombine.high %v10224_v7, %v10228_v8  ;;  %v884_v16 = vld [vmem:[%s16227_s2 + $0x20] sm:$0xff]  ;;  %v881_v17 = vld [vmem:[%s16227_s2 + $0x8] sm:$0xff] }
 0x164   :  { %876 = vst [vmem:[#allocation2 + $0x10] sm:$0xff] %v872_v20  ;;  %877 = vst [vmem:[#allocation2 + $0x18] sm:$0xff] %v873_v21  ;;  %v10293_v14 = vcombine.high %v10225_v9, %v10229_v10  ;;  %v885_v18 = vld [vmem:[%s16227_s2 + $0x28] sm:$0xff]  ;;  %v10290_v19 = vcombine.low %v10224_v7, %v10228_v8  ;;  %v10292_v20 = vcombine.low %v10225_v9, %v10229_v10  ;;  %v928_v0 = vld [vmem:[%s16227_s2 + $0x180] sm:$0xff] }
 0x165   :  { %v10295_v21 = vcombine.high %v880_v15, %v884_v16  ;;  %v10297_v22 = vcombine.high %v881_v17, %v885_v18  ;;  %v932_v1 = vld [vmem:[%s16227_s2 + $0x1a0] sm:$0xff]  ;;  %v929_v2 = vld [vmem:[%s16227_s2 + $0x188] sm:$0xff] }
 0x166   :  { %v936_v8 = vld [vmem:[%s16227_s2 + $0x1c0] sm:$0xff]  ;;  %v937_v10 = vld [vmem:[%s16227_s2 + $0x1c8] sm:$0xff] }
 0x167   :  { %v940_v9 = vld [vmem:[%s16227_s2 + $0x1e0] sm:$0xff] }
 0x16a   :  { %v944_v26 = vld [vmem:[#allocation2 + $0x2] sm:$0x3] }
 0x16b   :  { %v13000_v27 = vpack.c.bf16 %v944_v26, %v944_v26  ;;  %v893_v26 = vld [vmem:[%s16227_s2 + $0x68] sm:$0xff] }
 0x16d   :  { %1364 = vmatmul.mubr.bf16.vlgmr.msra.gmra.mrb[16].mxu0 %v13000_v27  ;;  %1405 = vmatmul.mubr.bf16.vlgmr.msra.gmra.mrb[16].mxu1 %v13000_v27 }
 0x16e   :  { %1414 = vmatpush1.bf16.msra.mxu0 %v10234_v34  ;;  %1455 = vmatpush1.bf16.msra.mxu1 %v10236_v39  ;;  %v10250_v34 = vcombine.low %v10184_v33, %v10188_v37  ;;  %v10261_v39 = vcombine.high %v10193_v30, %v10197_v31  ;;  %v10303_v33 = vcombine.high %v888_v23, %v892_v24  ;;  %v904_v30 = vld [vmem:[%s16227_s2 + $0xc0] sm:$0xff] }
 0x16f   :  { %1415 = vmatprep.subr.bf16.mxu0 %v10243_v28  ;;  %1456 = vmatprep.subr.bf16.mxu1 %v10245_v32  ;;  %v10294_v28 = vcombine.low %v880_v15, %v884_v16  ;;  %v10296_v32 = vcombine.low %v881_v17, %v885_v18  ;;  %v10305_v37 = vcombine.high %v889_v25, %v893_v26  ;;  %v908_v31 = vld [vmem:[%s16227_s2 + $0xe0] sm:$0xff]  ;;  %v882_v16 = vld [vmem:[%s16227_s2 + $0x10] sm:$0xff]  ;;  %v883_v18 = vld [vmem:[%s16227_s2 + $0x18] sm:$0xff] }
 0x170   :  { %1445 = vmatprep.mubr.bf16.mxu0 %v12591_v29  ;;  %1486 = vmatprep.mubr.bf16.mxu1 %v12591_v29  ;;  %v886_v17 = vld [vmem:[%s16227_s2 + $0x30] sm:$0xff] }
 0x172   :  { %1416 = vmatpush1.bf16.msra.mxu0 %v10242_v41  ;;  %1457 = vmatpush1.bf16.msra.mxu1 %v10244_v42  ;;  %v897_v41 = vld [vmem:[%s16227_s2 + $0x88] sm:$0xff] }
 0x173   :  { %1417 = vmatprep.subr.bf16.mxu0 %v10251_v43  ;;  %1458 = vmatprep.subr.bf16.mxu1 %v10253_v44  ;;  %v901_v42 = vld [vmem:[%s16227_s2 + $0xa8] sm:$0xff]  ;;  %v10302_v43 = vcombine.low %v888_v23, %v892_v24  ;;  %v10304_v44 = vcombine.low %v889_v25, %v893_v26  ;;  %v890_v24 = vld [vmem:[%s16227_s2 + $0x50] sm:$0xff]  ;;  %v878_v26 = vld [vmem:[#allocation2] sm:$0x3] }
 0x174   :  { %v10313_v46 = vcombine.high %v897_v41, %v901_v42  ;;  %v894_v25 = vld [vmem:[%s16227_s2 + $0x70] sm:$0xff] }
 0x176   :  { %1418 = vmatpush1.bf16.msra.mxu0 %v10250_v34  ;;  %1459 = vmatpush1.bf16.msra.mxu1 %v10252_v35  ;;  %v909_v34 = vld [vmem:[%s16227_s2 + $0xe8] sm:$0xff]  ;;  %v10310_v35 = vcombine.low %v896_v38, %v900_v40  ;;  %v13208_v38 = vpack.c.bf16 %v878_v26, %v878_v26  ;;  %v10307_v40 = vcombine.high %v890_v24, %v894_v25 }
 0x177   :  { %1419 = vmatprep.subr.bf16.mxu0 %v10259_v36  ;;  %1460 = vmatprep.subr.bf16.mxu1 %v10261_v39  ;;  %v10312_v36 = vcombine.low %v897_v41, %v901_v42  ;;  %v10319_v39 = vcombine.high %v904_v30, %v908_v31  ;;  %v898_v42 = vld [vmem:[%s16227_s2 + $0x90] sm:$0xff] }
 0x17a   :  { %1420 = vmatpush1.bf16.msra.mxu0 %v10258_v51  ;;  %1461 = vmatpush1.bf16.msra.mxu1 %v10260_v52  ;;  %v917_v51 = vld [vmem:[%s16227_s2 + $0x128] sm:$0xff]  ;;  %v10318_v52 = vcombine.low %v904_v30, %v908_v31 }
 0x17b   :  { %1421 = vmatprep.subr.bf16.mxu0 %v10267_v53  ;;  %1462 = vmatprep.subr.bf16.mxu1 %v10269_v54  ;;  %v10327_v54 = vcombine.high %v912_v48, %v916_v49  ;;  %v10329_v55 = vcombine.high %v913_v50, %v917_v51 }
 0x17e   :  { %1422 = vmatpush1.bf16.msra.mxu0 %v10266_v59  ;;  %1463 = vmatpush1.bf16.msra.mxu1 %v10268_v60  ;;  %v925_v59 = vld [vmem:[%s16227_s2 + $0x168] sm:$0xff]  ;;  %v10326_v60 = vcombine.low %v912_v48, %v916_v49 }
 0x17f   :  { %1423 = vmatprep.subr.bf16.mxu0 %v10275_v61  ;;  %1464 = vmatprep.subr.bf16.mxu1 %v10277_v62  ;;  %v10328_v61 = vcombine.low %v913_v50, %v917_v51  ;;  %v10335_v62 = vcombine.high %v920_v56, %v924_v57  ;;  %v10337_v63 = vcombine.high %v921_v58, %v925_v59  ;;  %v914_v51 = vld [vmem:[%s16227_s2 + $0x110] sm:$0xff] }
 0x182   :  { %1424 = vmatpush1.bf16.msra.mxu0 %v10274_v3  ;;  %1465 = vmatpush1.bf16.msra.mxu1 %v10276_v4  ;;  %v933_v3 = vld [vmem:[%s16227_s2 + $0x1a8] sm:$0xff]  ;;  %v10334_v4 = vcombine.low %v920_v56, %v924_v57 }
 0x183   :  { %1425 = vmatprep.subr.bf16.mxu0 %v10283_v5  ;;  %1466 = vmatprep.subr.bf16.mxu1 %v10285_v6  ;;  %v10336_v5 = vcombine.low %v921_v58, %v925_v59  ;;  %v10343_v6 = vcombine.high %v928_v0, %v932_v1  ;;  %v10345_v7 = vcombine.high %v929_v2, %v933_v3  ;;  %v922_v59 = vld [vmem:[%s16227_s2 + $0x150] sm:$0xff] }
 0x186   :  { %1426 = vmatpush1.bf16.msra.mxu0 %v10282_v11  ;;  %1467 = vmatpush1.bf16.msra.mxu1 %v10284_v12  ;;  %v941_v11 = vld [vmem:[%s16227_s2 + $0x1e8] sm:$0xff]  ;;  %v10342_v12 = vcombine.low %v928_v0, %v932_v1 }
 0x187   :  { %1427 = vmatprep.subr.bf16.mxu0 %v10291_v13  ;;  %1468 = vmatprep.subr.bf16.mxu1 %v10293_v14  ;;  %v10344_v13 = vcombine.low %v929_v2, %v933_v3  ;;  %v10351_v14 = vcombine.high %v936_v8, %v940_v9  ;;  %v10353_v15 = vcombine.high %v937_v10, %v941_v11  ;;  %v930_v3 = vld [vmem:[%s16227_s2 + $0x190] sm:$0xff] }
 0x18a   :  { %1428 = vmatpush1.bf16.msra.mxu0 %v10290_v19  ;;  %1469 = vmatpush1.bf16.msra.mxu1 %v10292_v20  ;;  %v887_v19 = vld [vmem:[%s16227_s2 + $0x38] sm:$0xff]  ;;  %v10350_v20 = vcombine.low %v936_v8, %v940_v9 }
 0x18b   :  { %1815 = vmatprep.subr.bf16.mxu0 %v10295_v21  ;;  %1856 = vmatprep.subr.bf16.mxu1 %v10297_v22  ;;  %v10352_v21 = vcombine.low %v937_v10, %v941_v11  ;;  %v10299_v22 = vcombine.high %v882_v16, %v886_v17  ;;  %v10301_v23 = vcombine.high %v883_v18, %v887_v19  ;;  %v938_v11 = vld [vmem:[%s16227_s2 + $0x1d0] sm:$0xff] }
 0x18d   :  { %1446 = vmatmul.mubr.bf16.vlgmr.msra.gmra.mrb[20].mxu0 %v13000_v27  ;;  %1487 = vmatmul.mubr.bf16.vlgmr.msra.gmra.mrb[20].mxu1 %v13000_v27  ;;  %v905_v27 = vld [vmem:[%s16227_s2 + $0xc8] sm:$0xff] }
 0x18e   :  { %1816 = vmatpush1.bf16.msra.mxu0 %v10294_v28  ;;  %1857 = vmatpush1.bf16.msra.mxu1 %v10296_v32  ;;  %v10321_v47 = vcombine.high %v905_v27, %v909_v34  ;;  %v10320_v53 = vcombine.low %v905_v27, %v909_v34  ;;  %v891_v28 = vld [vmem:[%s16227_s2 + $0x58] sm:$0xff]  ;;  %v906_v34 = vld [vmem:[%s16227_s2 + $0xd0] sm:$0xff] }
 0x18f   :  { %1817 = vmatprep.subr.bf16.mxu0 %v10303_v33  ;;  %1858 = vmatprep.subr.bf16.mxu1 %v10305_v37  ;;  %v895_v32 = vld [vmem:[%s16227_s2 + $0x78] sm:$0xff]  ;;  %v10298_v33 = vcombine.low %v882_v16, %v886_v17  ;;  %v10300_v37 = vcombine.low %v883_v18, %v887_v19  ;;  %v10358_v19 = vld [vmem:[%s16227_s2 + $0x400] sm:$0xff] }
 0x190   :  { %1847 = vmatprep.mubr.bf16.mxu0 %v12591_v29  ;;  %1888 = vmatprep.mubr.bf16.mxu1 %v12591_v29  ;;  %v10309_v41 = vcombine.high %v891_v28, %v895_v32  ;;  %v10308_v30 = vcombine.low %v891_v28, %v895_v32  ;;  %v10366_v28 = vld [vmem:[%s16227_s2 + $0x440] sm:$0xff] }
 0x191   :  { %v10370_v32 = vld [vmem:[%s16227_s2 + $0x460] sm:$0xff] }
 0x192   :  { %1818 = vmatpush1.bf16.msra.mxu0 %v10302_v43  ;;  %1859 = vmatpush1.bf16.msra.mxu1 %v10304_v44  ;;  %v902_v43 = vld [vmem:[%s16227_s2 + $0xb0] sm:$0xff]  ;;  %v899_v44 = vld [vmem:[%s16227_s2 + $0x98] sm:$0xff] }
 0x193   :  { %1819 = vmatprep.subr.bf16.mxu0 %v10311_v45  ;;  %1860 = vmatprep.subr.bf16.mxu1 %v10313_v46  ;;  %v903_v45 = vld [vmem:[%s16227_s2 + $0xb8] sm:$0xff]  ;;  %v10306_v46 = vcombine.low %v890_v24, %v894_v25  ;;  %v10315_v31 = vcombine.high %v898_v42, %v902_v43 }
 0x194   :  { %v10317_v27 = vcombine.high %v899_v44, %v903_v45  ;;  %v10316_v48 = vcombine.low %v899_v44, %v903_v45  ;;  %v10374_v44 = vld [vmem:[%s16227_s2 + $0x480] sm:$0xff] }
 0x195   :  { %v10378_v45 = vld [vmem:[%s16227_s2 + $0x4a0] sm:$0xff] }
 0x196   :  { %1820 = vmatpush1.bf16.msra.mxu0 %v10310_v35  ;;  %1861 = vmatpush1.bf16.msra.mxu1 %v10312_v36  ;;  %v910_v35 = vld [vmem:[%s16227_s2 + $0xf0] sm:$0xff]  ;;  %v907_v36 = vld [vmem:[%s16227_s2 + $0xd8] sm:$0xff] }
 0x197   :  { %1821 = vmatprep.subr.bf16.mxu0 %v10319_v39  ;;  %1862 = vmatprep.subr.bf16.mxu1 %v10321_v47  ;;  %v911_v39 = vld [vmem:[%s16227_s2 + $0xf8] sm:$0xff]  ;;  %v10314_v47 = vcombine.low %v898_v42, %v902_v43  ;;  %v10323_v49 = vcombine.high %v906_v34, %v910_v35  ;;  %v10431_v42 = vcombine.high %v10366_v28, %v10370_v32 }
 0x198   :  { %v10325_v50 = vcombine.high %v907_v36, %v911_v39  ;;  %v10324_v56 = vcombine.low %v907_v36, %v911_v39  ;;  %v10382_v36 = vld [vmem:[%s16227_s2 + $0x4c0] sm:$0xff] }
 0x199   :  { %v10386_v39 = vld [vmem:[%s16227_s2 + $0x4e0] sm:$0xff] }
 0x19a   :  { %1822 = vmatpush1.bf16.msra.mxu0 %v10318_v52  ;;  %1863 = vmatpush1.bf16.msra.mxu1 %v10320_v53  ;;  %v918_v52 = vld [vmem:[%s16227_s2 + $0x130] sm:$0xff]  ;;  %v915_v53 = vld [vmem:[%s16227_s2 + $0x118] sm:$0xff] }
 0x19b   :  { %1823 = vmatprep.subr.bf16.mxu0 %v10327_v54  ;;  %1864 = vmatprep.subr.bf16.mxu1 %v10329_v55  ;;  %v919_v54 = vld [vmem:[%s16227_s2 + $0x138] sm:$0xff]  ;;  %v10322_v55 = vcombine.low %v906_v34, %v910_v35  ;;  %v10331_v57 = vcombine.high %v914_v51, %v918_v52  ;;  %v10439_v34 = vcombine.high %v10374_v44, %v10378_v45 }
 0x19c   :  { %v10333_v58 = vcombine.high %v915_v53, %v919_v54  ;;  %v10332_v0 = vcombine.low %v915_v53, %v919_v54  ;;  %v10394_v53 = vld [vmem:[%s16227_s2 + $0x520] sm:$0xff]  ;;  %v10391_v54 = vld [vmem:[%s16227_s2 + $0x508] sm:$0xff] }
 0x19e   :  { %1824 = vmatpush1.bf16.msra.mxu0 %v10326_v60  ;;  %1865 = vmatpush1.bf16.msra.mxu1 %v10328_v61  ;;  %v926_v60 = vld [vmem:[%s16227_s2 + $0x170] sm:$0xff]  ;;  %v923_v61 = vld [vmem:[%s16227_s2 + $0x158] sm:$0xff] }
 0x19f   :  { %1825 = vmatprep.subr.bf16.mxu0 %v10335_v62  ;;  %1866 = vmatprep.subr.bf16.mxu1 %v10337_v63  ;;  %v927_v62 = vld [vmem:[%s16227_s2 + $0x178] sm:$0xff]  ;;  %v10330_v63 = vcombine.low %v914_v51, %v918_v52  ;;  %v10339_v1 = vcombine.high %v922_v59, %v926_v60  ;;  %v10390_v52 = vld [vmem:[%s16227_s2 + $0x500] sm:$0xff] }
 0x1a0   :  { %v10341_v2 = vcombine.high %v923_v61, %v927_v62  ;;  %v10340_v8 = vcombine.low %v923_v61, %v927_v62  ;;  %v10402_v61 = vld [vmem:[%s16227_s2 + $0x560] sm:$0xff]  ;;  %v10399_v62 = vld [vmem:[%s16227_s2 + $0x548] sm:$0xff] }
 0x1a2   :  { %1826 = vmatpush1.bf16.msra.mxu0 %v10334_v4  ;;  %1867 = vmatpush1.bf16.msra.mxu1 %v10336_v5  ;;  %v934_v4 = vld [vmem:[%s16227_s2 + $0x1b0] sm:$0xff]  ;;  %v931_v5 = vld [vmem:[%s16227_s2 + $0x198] sm:$0xff] }
 0x1a3   :  { %1827 = vmatprep.subr.bf16.mxu0 %v10343_v6  ;;  %1868 = vmatprep.subr.bf16.mxu1 %v10345_v7  ;;  %v935_v6 = vld [vmem:[%s16227_s2 + $0x1b8] sm:$0xff]  ;;  %v10338_v7 = vcombine.low %v922_v59, %v926_v60  ;;  %v10347_v9 = vcombine.high %v930_v3, %v934_v4  ;;  %v10398_v60 = vld [vmem:[%s16227_s2 + $0x540] sm:$0xff] }
 0x1a4   :  { %v10349_v10 = vcombine.high %v931_v5, %v935_v6  ;;  %v10348_v16 = vcombine.low %v931_v5, %v935_v6  ;;  %v10410_v5 = vld [vmem:[%s16227_s2 + $0x5a0] sm:$0xff]  ;;  %v10407_v6 = vld [vmem:[%s16227_s2 + $0x588] sm:$0xff] }
 0x1a6   :  { %1828 = vmatpush1.bf16.msra.mxu0 %v10342_v12  ;;  %1869 = vmatpush1.bf16.msra.mxu1 %v10344_v13  ;;  %v942_v12 = vld [vmem:[%s16227_s2 + $0x1f0] sm:$0xff]  ;;  %v939_v13 = vld [vmem:[%s16227_s2 + $0x1d8] sm:$0xff] }
 0x1a7   :  { %1829 = vmatprep.subr.bf16.mxu0 %v10351_v14  ;;  %1870 = vmatprep.subr.bf16.mxu1 %v10353_v15  ;;  %v943_v14 = vld [vmem:[%s16227_s2 + $0x1f8] sm:$0xff]  ;;  %v10346_v15 = vcombine.low %v930_v3, %v934_v4  ;;  %v10355_v17 = vcombine.high %v938_v11, %v942_v12  ;;  %v10406_v4 = vld [vmem:[%s16227_s2 + $0x580] sm:$0xff] }
 0x1a8   :  { %v10357_v18 = vcombine.high %v939_v13, %v943_v14  ;;  %v10356_v24 = vcombine.low %v939_v13, %v943_v14  ;;  %v10418_v13 = vld [vmem:[%s16227_s2 + $0x5e0] sm:$0xff]  ;;  %v10415_v14 = vld [vmem:[%s16227_s2 + $0x5c8] sm:$0xff] }
 0x1aa   :  { %1830 = vmatpush1.bf16.msra.mxu0 %v10350_v20  ;;  %1871 = vmatpush1.bf16.msra.mxu1 %v10352_v21  ;;  %v10362_v20 = vld [vmem:[%s16227_s2 + $0x420] sm:$0xff]  ;;  %v10359_v21 = vld [vmem:[%s16227_s2 + $0x408] sm:$0xff] }
 0x1ab   :  { %1897 = vmatprep.subr.bf16.mxu0 %v10299_v22  ;;  %1938 = vmatprep.subr.bf16.mxu1 %v10301_v23  ;;  %v10363_v22 = vld [vmem:[%s16227_s2 + $0x428] sm:$0xff]  ;;  %v10354_v23 = vcombine.low %v938_v11, %v942_v12  ;;  %v10423_v25 = vcombine.high %v10358_v19, %v10362_v20  ;;  %v10414_v12 = vld [vmem:[%s16227_s2 + $0x5c0] sm:$0xff] }
 0x1ac   :  { %v10425_v26 = vcombine.high %v10359_v21, %v10363_v22 }
 0x1ad   :  { %1848 = vmatmul.mubr.bf16.vlgmr.msra.gmra.mrb[16].mxu0 %v13208_v38  ;;  %1889 = vmatmul.mubr.bf16.vlgmr.msra.gmra.mrb[16].mxu1 %v13208_v38 }
 0x1ae   :  { %1898 = vmatpush1.bf16.msra.mxu0 %v10298_v33  ;;  %1939 = vmatpush1.bf16.msra.mxu1 %v10300_v37  ;;  %v10367_v33 = vld [vmem:[%s16227_s2 + $0x448] sm:$0xff] }
 0x1af   :  { %1899 = vmatprep.subr.bf16.mxu0 %v10307_v40  ;;  %1940 = vmatprep.subr.bf16.mxu1 %v10309_v41  ;;  %v10371_v37 = vld [vmem:[%s16227_s2 + $0x468] sm:$0xff]  ;;  %v10422_v40 = vcombine.low %v10358_v19, %v10362_v20  ;;  %v10424_v41 = vcombine.low %v10359_v21, %v10363_v22  ;;  %v10360_v20 = vld [vmem:[%s16227_s2 + $0x410] sm:$0xff]  ;;  %v10361_v22 = vld [vmem:[%s16227_s2 + $0x418] sm:$0xff] }
 0x1b0   :  { %1929 = vmatprep.mubr.bf16.mxu0 %v12591_v29  ;;  %1970 = vmatprep.mubr.bf16.mxu1 %v12591_v29  ;;  %v10433_v43 = vcombine.high %v10367_v33, %v10371_v37  ;;  %v10364_v21 = vld [vmem:[%s16227_s2 + $0x430] sm:$0xff] }
 0x1b2   :  { %1900 = vmatpush1.bf16.msra.mxu0 %v10306_v46  ;;  %1941 = vmatpush1.bf16.msra.mxu1 %v10308_v30  ;;  %v10375_v46 = vld [vmem:[%s16227_s2 + $0x488] sm:$0xff] }
 0x1b3   :  { %1901 = vmatprep.subr.bf16.mxu0 %v10315_v31  ;;  %1942 = vmatprep.subr.bf16.mxu1 %v10317_v27  ;;  %v10379_v30 = vld [vmem:[%s16227_s2 + $0x4a8] sm:$0xff]  ;;  %v10430_v31 = vcombine.low %v10366_v28, %v10370_v32  ;;  %v10432_v27 = vcombine.low %v10367_v33, %v10371_v37  ;;  %v10427_v28 = vcombine.high %v10360_v20, %v10364_v21  ;;  %v10368_v33 = vld [vmem:[%s16227_s2 + $0x450] sm:$0xff] }
 0x1b4   :  { %v10441_v35 = vcombine.high %v10375_v46, %v10379_v30  ;;  %v10372_v37 = vld [vmem:[%s16227_s2 + $0x470] sm:$0xff] }
 0x1b6   :  { %1902 = vmatpush1.bf16.msra.mxu0 %v10314_v47  ;;  %1943 = vmatpush1.bf16.msra.mxu1 %v10316_v48  ;;  %v10387_v47 = vld [vmem:[%s16227_s2 + $0x4e8] sm:$0xff]  ;;  %v10438_v48 = vcombine.low %v10374_v44, %v10378_v45  ;;  %v10435_v45 = vcombine.high %v10368_v33, %v10372_v37 }
 0x1b7   :  { %1903 = vmatprep.subr.bf16.mxu0 %v10323_v49  ;;  %1944 = vmatprep.subr.bf16.mxu1 %v10325_v50  ;;  %v10440_v49 = vcombine.low %v10375_v46, %v10379_v30  ;;  %v10447_v50 = vcombine.high %v10382_v36, %v10386_v39  ;;  %v10376_v30 = vld [vmem:[%s16227_s2 + $0x490] sm:$0xff] }
 0x1ba   :  { %1904 = vmatpush1.bf16.msra.mxu0 %v10322_v55  ;;  %1945 = vmatpush1.bf16.msra.mxu1 %v10324_v56  ;;  %v10395_v55 = vld [vmem:[%s16227_s2 + $0x528] sm:$0xff]  ;;  %v10446_v56 = vcombine.low %v10382_v36, %v10386_v39 }
 0x1bb   :  { %1905 = vmatprep.subr.bf16.mxu0 %v10331_v57  ;;  %1946 = vmatprep.subr.bf16.mxu1 %v10333_v58  ;;  %v10455_v58 = vcombine.high %v10390_v52, %v10394_v53  ;;  %v10457_v59 = vcombine.high %v10391_v54, %v10395_v55 }
 0x1be   :  { %1906 = vmatpush1.bf16.msra.mxu0 %v10330_v63  ;;  %1947 = vmatpush1.bf16.msra.mxu1 %v10332_v0  ;;  %v10403_v63 = vld [vmem:[%s16227_s2 + $0x568] sm:$0xff]  ;;  %v10454_v0 = vcombine.low %v10390_v52, %v10394_v53 }
 0x1bf   :  { %1907 = vmatprep.subr.bf16.mxu0 %v10339_v1  ;;  %1948 = vmatprep.subr.bf16.mxu1 %v10341_v2  ;;  %v10456_v1 = vcombine.low %v10391_v54, %v10395_v55  ;;  %v10463_v2 = vcombine.high %v10398_v60, %v10402_v61  ;;  %v10465_v3 = vcombine.high %v10399_v62, %v10403_v63  ;;  %v10392_v55 = vld [vmem:[%s16227_s2 + $0x510] sm:$0xff] }
 0x1c2   :  { %1908 = vmatpush1.bf16.msra.mxu0 %v10338_v7  ;;  %1949 = vmatpush1.bf16.msra.mxu1 %v10340_v8  ;;  %v10411_v7 = vld [vmem:[%s16227_s2 + $0x5a8] sm:$0xff]  ;;  %v10462_v8 = vcombine.low %v10398_v60, %v10402_v61 }
 0x1c3   :  { %1909 = vmatprep.subr.bf16.mxu0 %v10347_v9  ;;  %1950 = vmatprep.subr.bf16.mxu1 %v10349_v10  ;;  %v10464_v9 = vcombine.low %v10399_v62, %v10403_v63  ;;  %v10471_v10 = vcombine.high %v10406_v4, %v10410_v5  ;;  %v10473_v11 = vcombine.high %v10407_v6, %v10411_v7  ;;  %v10400_v63 = vld [vmem:[%s16227_s2 + $0x550] sm:$0xff] }
 0x1c6   :  { %1910 = vmatpush1.bf16.msra.mxu0 %v10346_v15  ;;  %1951 = vmatpush1.bf16.msra.mxu1 %v10348_v16  ;;  %v10419_v15 = vld [vmem:[%s16227_s2 + $0x5e8] sm:$0xff]  ;;  %v10470_v16 = vcombine.low %v10406_v4, %v10410_v5 }
 0x1c7   :  { %1911 = vmatprep.subr.bf16.mxu0 %v10355_v17  ;;  %1952 = vmatprep.subr.bf16.mxu1 %v10357_v18  ;;  %v10472_v17 = vcombine.low %v10407_v6, %v10411_v7  ;;  %v10479_v18 = vcombine.high %v10414_v12, %v10418_v13  ;;  %v10481_v19 = vcombine.high %v10415_v14, %v10419_v15  ;;  %v10408_v7 = vld [vmem:[%s16227_s2 + $0x590] sm:$0xff] }
 0x1ca   :  { %1912 = vmatpush1.bf16.msra.mxu0 %v10354_v23  ;;  %1953 = vmatpush1.bf16.msra.mxu1 %v10356_v24  ;;  %v10365_v23 = vld [vmem:[%s16227_s2 + $0x438] sm:$0xff]  ;;  %v10478_v24 = vcombine.low %v10414_v12, %v10418_v13 }
 0x1cb   :  { %2366 = vmatprep.subr.bf16.mxu0 %v10423_v25  ;;  %2407 = vmatprep.subr.bf16.mxu1 %v10425_v26  ;;  %v10480_v25 = vcombine.low %v10415_v14, %v10419_v15  ;;  %v1979_v26 = vld [vmem:[#allocation2 + $0x4] sm:$0x3]  ;;  %v10429_v32 = vcombine.high %v10361_v22, %v10365_v23  ;;  %v10416_v15 = vld [vmem:[%s16227_s2 + $0x5d0] sm:$0xff] }
 0x1cc   :  { %v13410_v44 = vpack.c.bf16 %v1979_v26, %v1979_v26  ;;  %v10491_v26 = vld [vmem:[%s16227_s2 + $0x628] sm:$0xff] }
 0x1cd   :  { %1930 = vmatmul.mubr.bf16.vlgmr.msra.gmra.mrb[20].mxu0 %v13208_v38  ;;  %1971 = vmatmul.mubr.bf16.vlgmr.msra.gmra.mrb[20].mxu1 %v13208_v38  ;;  %v10383_v38 = vld [vmem:[%s16227_s2 + $0x4c8] sm:$0xff] }
 0x1ce   :  { %2367 = vmatpush1.bf16.msra.mxu0 %v10422_v40  ;;  %2408 = vmatpush1.bf16.msra.mxu1 %v10424_v41  ;;  %v10449_v51 = vcombine.high %v10383_v38, %v10387_v47  ;;  %v10448_v57 = vcombine.low %v10383_v38, %v10387_v47  ;;  %v10369_v40 = vld [vmem:[%s16227_s2 + $0x458] sm:$0xff]  ;;  %v10384_v47 = vld [vmem:[%s16227_s2 + $0x4d0] sm:$0xff] }
 0x1cf   :  { %2368 = vmatprep.subr.bf16.mxu0 %v10431_v42  ;;  %2409 = vmatprep.subr.bf16.mxu1 %v10433_v43  ;;  %v10373_v41 = vld [vmem:[%s16227_s2 + $0x478] sm:$0xff]  ;;  %v10426_v42 = vcombine.low %v10360_v20, %v10364_v21  ;;  %v10428_v43 = vcombine.low %v10361_v22, %v10365_v23  ;;  %v10486_v23 = vld [vmem:[%s16227_s2 + $0x600] sm:$0xff] }
 0x1d0   :  { %2398 = vmatprep.mubr.bf16.mxu0 %v12591_v29  ;;  %2439 = vmatprep.mubr.bf16.mxu1 %v12591_v29  ;;  %v10437_v46 = vcombine.high %v10369_v40, %v10373_v41  ;;  %v10436_v36 = vcombine.low %v10369_v40, %v10373_v41  ;;  %v10494_v40 = vld [vmem:[%s16227_s2 + $0x640] sm:$0xff] }
 0x1d1   :  { %v10498_v41 = vld [vmem:[%s16227_s2 + $0x660] sm:$0xff] }
 0x1d2   :  { %2369 = vmatpush1.bf16.msra.mxu0 %v10430_v31  ;;  %2410 = vmatpush1.bf16.msra.mxu1 %v10432_v27  ;;  %v10380_v31 = vld [vmem:[%s16227_s2 + $0x4b0] sm:$0xff]  ;;  %v10377_v27 = vld [vmem:[%s16227_s2 + $0x498] sm:$0xff] }
 0x1d3   :  { %2370 = vmatprep.subr.bf16.mxu0 %v10439_v34  ;;  %2411 = vmatprep.subr.bf16.mxu1 %v10441_v35  ;;  %v10381_v34 = vld [vmem:[%s16227_s2 + $0x4b8] sm:$0xff]  ;;  %v10434_v35 = vcombine.low %v10368_v33, %v10372_v37  ;;  %v10443_v39 = vcombine.high %v10376_v30, %v10380_v31 }
 0x1d4   :  { %v10445_v38 = vcombine.high %v10377_v27, %v10381_v34  ;;  %v10444_v52 = vcombine.low %v10377_v27, %v10381_v34  ;;  %v10502_v27 = vld [vmem:[%s16227_s2 + $0x680] sm:$0xff] }
 0x1d5   :  { %v10506_v34 = vld [vmem:[%s16227_s2 + $0x6a0] sm:$0xff] }
 0x1d6   :  { %2371 = vmatpush1.bf16.msra.mxu0 %v10438_v48  ;;  %2412 = vmatpush1.bf16.msra.mxu1 %v10440_v49  ;;  %v10388_v48 = vld [vmem:[%s16227_s2 + $0x4f0] sm:$0xff]  ;;  %v10385_v49 = vld [vmem:[%s16227_s2 + $0x4d8] sm:$0xff] }
 0x1d7   :  { %2372 = vmatprep.subr.bf16.mxu0 %v10447_v50  ;;  %2413 = vmatprep.subr.bf16.mxu1 %v10449_v51  ;;  %v10389_v50 = vld [vmem:[%s16227_s2 + $0x4f8] sm:$0xff]  ;;  %v10442_v51 = vcombine.low %v10376_v30, %v10380_v31  ;;  %v10451_v53 = vcombine.high %v10384_v47, %v10388_v48  ;;  %v10559_v30 = vcombine.high %v10494_v40, %v10498_v41 }
 0x1d8   :  { %v10453_v54 = vcombine.high %v10385_v49, %v10389_v50  ;;  %v10452_v60 = vcombine.low %v10385_v49, %v10389_v50  ;;  %v10510_v49 = vld [vmem:[%s16227_s2 + $0x6c0] sm:$0xff] }
 0x1d9   :  { %v10514_v50 = vld [vmem:[%s16227_s2 + $0x6e0] sm:$0xff] }
 0x1da   :  { %2373 = vmatpush1.bf16.msra.mxu0 %v10446_v56  ;;  %2414 = vmatpush1.bf16.msra.mxu1 %v10448_v57  ;;  %v10396_v56 = vld [vmem:[%s16227_s2 + $0x530] sm:$0xff]  ;;  %v10393_v57 = vld [vmem:[%s16227_s2 + $0x518] sm:$0xff] }
 0x1db   :  { %2374 = vmatprep.subr.bf16.mxu0 %v10455_v58  ;;  %2415 = vmatprep.subr.bf16.mxu1 %v10457_v59  ;;  %v10397_v58 = vld [vmem:[%s16227_s2 + $0x538] sm:$0xff]  ;;  %v10450_v59 = vcombine.low %v10384_v47, %v10388_v48  ;;  %v10459_v61 = vcombine.high %v10392_v55, %v10396_v56  ;;  %v10567_v47 = vcombine.high %v10502_v27, %v10506_v34 }
 0x1dc   :  { %v10461_v62 = vcombine.high %v10393_v57, %v10397_v58  ;;  %v10460_v4 = vcombine.low %v10393_v57, %v10397_v58  ;;  %v10522_v57 = vld [vmem:[%s16227_s2 + $0x720] sm:$0xff]  ;;  %v10519_v58 = vld [vmem:[%s16227_s2 + $0x708] sm:$0xff] }
 0x1de   :  { %2375 = vmatpush1.bf16.msra.mxu0 %v10454_v0  ;;  %2416 = vmatpush1.bf16.msra.mxu1 %v10456_v1  ;;  %v10404_v0 = vld [vmem:[%s16227_s2 + $0x570] sm:$0xff]  ;;  %v10401_v1 = vld [vmem:[%s16227_s2 + $0x558] sm:$0xff] }
 0x1df   :  { %2376 = vmatprep.subr.bf16.mxu0 %v10463_v2  ;;  %2417 = vmatprep.subr.bf16.mxu1 %v10465_v3  ;;  %v10405_v2 = vld [vmem:[%s16227_s2 + $0x578] sm:$0xff]  ;;  %v10458_v3 = vcombine.low %v10392_v55, %v10396_v56  ;;  %v10467_v5 = vcombine.high %v10400_v63, %v10404_v0  ;;  %v10518_v56 = vld [vmem:[%s16227_s2 + $0x700] sm:$0xff] }
 0x1e0   :  { %v10469_v6 = vcombine.high %v10401_v1, %v10405_v2  ;;  %v10468_v12 = vcombine.low %v10401_v1, %v10405_v2  ;;  %v10530_v1 = vld [vmem:[%s16227_s2 + $0x760] sm:$0xff]  ;;  %v10527_v2 = vld [vmem:[%s16227_s2 + $0x748] sm:$0xff] }
 0x1e2   :  { %2377 = vmatpush1.bf16.msra.mxu0 %v10462_v8  ;;  %2418 = vmatpush1.bf16.msra.mxu1 %v10464_v9  ;;  %v10412_v8 = vld [vmem:[%s16227_s2 + $0x5b0] sm:$0xff]  ;;  %v10409_v9 = vld [vmem:[%s16227_s2 + $0x598] sm:$0xff] }
 0x1e3   :  { %2378 = vmatprep.subr.bf16.mxu0 %v10471_v10  ;;  %2419 = vmatprep.subr.bf16.mxu1 %v10473_v11  ;;  %v10413_v10 = vld [vmem:[%s16227_s2 + $0x5b8] sm:$0xff]  ;;  %v10466_v11 = vcombine.low %v10400_v63, %v10404_v0  ;;  %v10475_v13 = vcombine.high %v10408_v7, %v10412_v8  ;;  %v10526_v0 = vld [vmem:[%s16227_s2 + $0x740] sm:$0xff] }
 0x1e4   :  { %v10477_v14 = vcombine.high %v10409_v9, %v10413_v10  ;;  %v10476_v20 = vcombine.low %v10409_v9, %v10413_v10  ;;  %v10538_v9 = vld [vmem:[%s16227_s2 + $0x7a0] sm:$0xff]  ;;  %v10535_v10 = vld [vmem:[%s16227_s2 + $0x788] sm:$0xff] }
 0x1e6   :  { %2379 = vmatpush1.bf16.msra.mxu0 %v10470_v16  ;;  %2420 = vmatpush1.bf16.msra.mxu1 %v10472_v17  ;;  %v10420_v16 = vld [vmem:[%s16227_s2 + $0x5f0] sm:$0xff]  ;;  %v10417_v17 = vld [vmem:[%s16227_s2 + $0x5d8] sm:$0xff] }
 0x1e7   :  { %2380 = vmatprep.subr.bf16.mxu0 %v10479_v18  ;;  %2421 = vmatprep.subr.bf16.mxu1 %v10481_v19  ;;  %v10421_v18 = vld [vmem:[%s16227_s2 + $0x5f8] sm:$0xff]  ;;  %v10474_v19 = vcombine.low %v10408_v7, %v10412_v8  ;;  %v10483_v21 = vcombine.high %v10416_v15, %v10420_v16  ;;  %v10534_v8 = vld [vmem:[%s16227_s2 + $0x780] sm:$0xff] }
 0x1e8   :  { %v10485_v22 = vcombine.high %v10417_v17, %v10421_v18 }
 0x1ea   :  { %2381 = vmatpush1.bf16.msra.mxu0 %v10478_v24  ;;  %2422 = vmatpush1.bf16.msra.mxu1 %v10480_v25  ;;  %v10490_v24 = vld [vmem:[%s16227_s2 + $0x620] sm:$0xff]  ;;  %v10487_v25 = vld [vmem:[%s16227_s2 + $0x608] sm:$0xff] }
 0x1eb   :  { %2448 = vmatprep.subr.bf16.mxu0 %v10427_v28  ;;  %2489 = vmatprep.subr.bf16.mxu1 %v10429_v32  ;;  %v10482_v28 = vcombine.low %v10416_v15, %v10420_v16  ;;  %v10484_v32 = vcombine.low %v10417_v17, %v10421_v18  ;;  %v10551_v33 = vcombine.high %v10486_v23, %v10490_v24  ;;  %v10542_v16 = vld [vmem:[%s16227_s2 + $0x7c0] sm:$0xff]  ;;  %v10543_v18 = vld [vmem:[%s16227_s2 + $0x7c8] sm:$0xff] }
 0x1ec   :  { %v10553_v37 = vcombine.high %v10487_v25, %v10491_v26  ;;  %v10546_v17 = vld [vmem:[%s16227_s2 + $0x7e0] sm:$0xff] }
 0x1ed   :  { %2399 = vmatmul.mubr.bf16.vlgmr.msra.gmra.mrb[16].mxu0 %v13410_v44  ;;  %2440 = vmatmul.mubr.bf16.vlgmr.msra.gmra.mrb[16].mxu1 %v13410_v44 }
 0x1ee   :  { %2449 = vmatpush1.bf16.msra.mxu0 %v10426_v42  ;;  %2490 = vmatpush1.bf16.msra.mxu1 %v10428_v43  ;;  %v10495_v42 = vld [vmem:[%s16227_s2 + $0x648] sm:$0xff] }
 0x1ef   :  { %2450 = vmatprep.subr.bf16.mxu0 %v10435_v45  ;;  %2491 = vmatprep.subr.bf16.mxu1 %v10437_v46  ;;  %v10499_v43 = vld [vmem:[%s16227_s2 + $0x668] sm:$0xff]  ;;  %v10550_v45 = vcombine.low %v10486_v23, %v10490_v24  ;;  %v10552_v46 = vcombine.low %v10487_v25, %v10491_v26  ;;  %v10488_v24 = vld [vmem:[%s16227_s2 + $0x610] sm:$0xff]  ;;  %v10489_v26 = vld [vmem:[%s16227_s2 + $0x618] sm:$0xff] }
 0x1f0   :  { %2480 = vmatprep.mubr.bf16.mxu0 %v12591_v29  ;;  %2521 = vmatprep.mubr.bf16.mxu1 %v12591_v29  ;;  %v10561_v31 = vcombine.high %v10495_v42, %v10499_v43  ;;  %v10492_v25 = vld [vmem:[%s16227_s2 + $0x630] sm:$0xff] }
 0x1f2   :  { %2451 = vmatpush1.bf16.msra.mxu0 %v10434_v35  ;;  %2492 = vmatpush1.bf16.msra.mxu1 %v10436_v36  ;;  %v10503_v35 = vld [vmem:[%s16227_s2 + $0x688] sm:$0xff] }
 0x1f3   :  { %2452 = vmatprep.subr.bf16.mxu0 %v10443_v39  ;;  %2493 = vmatprep.subr.bf16.mxu1 %v10445_v38  ;;  %v10507_v36 = vld [vmem:[%s16227_s2 + $0x6a8] sm:$0xff]  ;;  %v10558_v39 = vcombine.low %v10494_v40, %v10498_v41  ;;  %v10560_v38 = vcombine.low %v10495_v42, %v10499_v43  ;;  %v10555_v40 = vcombine.high %v10488_v24, %v10492_v25  ;;  %v10496_v42 = vld [vmem:[%s16227_s2 + $0x650] sm:$0xff] }
 0x1f4   :  { %v10569_v48 = vcombine.high %v10503_v35, %v10507_v36  ;;  %v10500_v43 = vld [vmem:[%s16227_s2 + $0x670] sm:$0xff] }
 0x1f6   :  { %2453 = vmatpush1.bf16.msra.mxu0 %v10442_v51  ;;  %2494 = vmatpush1.bf16.msra.mxu1 %v10444_v52  ;;  %v10515_v51 = vld [vmem:[%s16227_s2 + $0x6e8] sm:$0xff]  ;;  %v10566_v52 = vcombine.low %v10502_v27, %v10506_v34  ;;  %v10563_v34 = vcombine.high %v10496_v42, %v10500_v43 }
 0x1f7   :  { %2454 = vmatprep.subr.bf16.mxu0 %v10451_v53  ;;  %2495 = vmatprep.subr.bf16.mxu1 %v10453_v54  ;;  %v10568_v53 = vcombine.low %v10503_v35, %v10507_v36  ;;  %v10575_v54 = vcombine.high %v10510_v49, %v10514_v50  ;;  %v10504_v36 = vld [vmem:[%s16227_s2 + $0x690] sm:$0xff] }
 0x1fa   :  { %2455 = vmatpush1.bf16.msra.mxu0 %v10450_v59  ;;  %2496 = vmatpush1.bf16.msra.mxu1 %v10452_v60  ;;  %v10523_v59 = vld [vmem:[%s16227_s2 + $0x728] sm:$0xff]  ;;  %v10574_v60 = vcombine.low %v10510_v49, %v10514_v50 }
 0x1fb   :  { %2456 = vmatprep.subr.bf16.mxu0 %v10459_v61  ;;  %2497 = vmatprep.subr.bf16.mxu1 %v10461_v62  ;;  %v10583_v62 = vcombine.high %v10518_v56, %v10522_v57  ;;  %v10585_v63 = vcombine.high %v10519_v58, %v10523_v59 }
 0x1fe   :  { %2457 = vmatpush1.bf16.msra.mxu0 %v10458_v3  ;;  %2498 = vmatpush1.bf16.msra.mxu1 %v10460_v4  ;;  %v10531_v3 = vld [vmem:[%s16227_s2 + $0x768] sm:$0xff]  ;;  %v10582_v4 = vcombine.low %v10518_v56, %v10522_v57 }
 0x1ff   :  { %2458 = vmatprep.subr.bf16.mxu0 %v10467_v5  ;;  %2499 = vmatprep.subr.bf16.mxu1 %v10469_v6  ;;  %v10584_v5 = vcombine.low %v10519_v58, %v10523_v59  ;;  %v10591_v6 = vcombine.high %v10526_v0, %v10530_v1  ;;  %v10593_v7 = vcombine.high %v10527_v2, %v10531_v3  ;;  %v10520_v59 = vld [vmem:[%s16227_s2 + $0x710] sm:$0xff] }
 0x202   :  { %2459 = vmatpush1.bf16.msra.mxu0 %v10466_v11  ;;  %2500 = vmatpush1.bf16.msra.mxu1 %v10468_v12  ;;  %v10539_v11 = vld [vmem:[%s16227_s2 + $0x7a8] sm:$0xff]  ;;  %v10590_v12 = vcombine.low %v10526_v0, %v10530_v1 }
 0x203   :  { %2460 = vmatprep.subr.bf16.mxu0 %v10475_v13  ;;  %2501 = vmatprep.subr.bf16.mxu1 %v10477_v14  ;;  %v10592_v13 = vcombine.low %v10527_v2, %v10531_v3  ;;  %v10599_v14 = vcombine.high %v10534_v8, %v10538_v9  ;;  %v10601_v15 = vcombine.high %v10535_v10, %v10539_v11  ;;  %v10528_v3 = vld [vmem:[%s16227_s2 + $0x750] sm:$0xff] }
 0x206   :  { %2461 = vmatpush1.bf16.msra.mxu0 %v10474_v19  ;;  %2502 = vmatpush1.bf16.msra.mxu1 %v10476_v20  ;;  %v10547_v19 = vld [vmem:[%s16227_s2 + $0x7e8] sm:$0xff]  ;;  %v10598_v20 = vcombine.low %v10534_v8, %v10538_v9 }
 0x207   :  { %2462 = vmatprep.subr.bf16.mxu0 %v10483_v21  ;;  %2503 = vmatprep.subr.bf16.mxu1 %v10485_v22  ;;  %v10600_v21 = vcombine.low %v10535_v10, %v10539_v11  ;;  %v10607_v22 = vcombine.high %v10542_v16, %v10546_v17  ;;  %v10609_v23 = vcombine.high %v10543_v18, %v10547_v19  ;;  %v10536_v11 = vld [vmem:[%s16227_s2 + $0x790] sm:$0xff] }
 0x20a   :  { %2463 = vmatpush1.bf16.msra.mxu0 %v10482_v28  ;;  %2504 = vmatpush1.bf16.msra.mxu1 %v10484_v32  ;;  %v10493_v28 = vld [vmem:[%s16227_s2 + $0x638] sm:$0xff]  ;;  %v10606_v32 = vcombine.low %v10542_v16, %v10546_v17 }
 0x20b   :  { %2925 = vmatprep.subr.bf16.mxu0 %v10551_v33  ;;  %2966 = vmatprep.subr.bf16.mxu1 %v10553_v37  ;;  %v10608_v33 = vcombine.low %v10543_v18, %v10547_v19  ;;  %v2538_v37 = vld [vmem:[#allocation2 + $0x6] sm:$0x3]  ;;  %v10557_v41 = vcombine.high %v10489_v26, %v10493_v28  ;;  %v10544_v19 = vld [vmem:[%s16227_s2 + $0x7d0] sm:$0xff] }
 0x20c   :  { %v13612_v27 = vpack.c.bf16 %v2538_v37, %v2538_v37  ;;  %v10619_v37 = vld [vmem:[%s16227_s2 + $0x828] sm:$0xff] }
 0x20d   :  { %2481 = vmatmul.mubr.bf16.vlgmr.msra.gmra.mrb[20].mxu0 %v13410_v44  ;;  %2522 = vmatmul.mubr.bf16.vlgmr.msra.gmra.mrb[20].mxu1 %v13410_v44  ;;  %v10511_v44 = vld [vmem:[%s16227_s2 + $0x6c8] sm:$0xff] }
 0x20e   :  { %2926 = vmatpush1.bf16.msra.mxu0 %v10550_v45  ;;  %2967 = vmatpush1.bf16.msra.mxu1 %v10552_v46  ;;  %v10577_v55 = vcombine.high %v10511_v44, %v10515_v51  ;;  %v10576_v61 = vcombine.low %v10511_v44, %v10515_v51  ;;  %v10497_v45 = vld [vmem:[%s16227_s2 + $0x658] sm:$0xff]  ;;  %v10512_v51 = vld [vmem:[%s16227_s2 + $0x6d0] sm:$0xff] }
 0x20f   :  { %2927 = vmatprep.subr.bf16.mxu0 %v10559_v30  ;;  %2968 = vmatprep.subr.bf16.mxu1 %v10561_v31  ;;  %v10501_v46 = vld [vmem:[%s16227_s2 + $0x678] sm:$0xff]  ;;  %v10554_v30 = vcombine.low %v10488_v24, %v10492_v25  ;;  %v10556_v31 = vcombine.low %v10489_v26, %v10493_v28  ;;  %v10614_v28 = vld [vmem:[%s16227_s2 + $0x800] sm:$0xff] }
 0x210   :  { %2957 = vmatprep.mubr.bf16.mxu0 %v12591_v29  ;;  %2998 = vmatprep.mubr.bf16.mxu1 %v12591_v29  ;;  %v10565_v35 = vcombine.high %v10497_v45, %v10501_v46  ;;  %v10564_v49 = vcombine.low %v10497_v45, %v10501_v46  ;;  %v10622_v45 = vld [vmem:[%s16227_s2 + $0x840] sm:$0xff] }
 0x211   :  { %v10626_v46 = vld [vmem:[%s16227_s2 + $0x860] sm:$0xff] }
 0x212   :  { %2928 = vmatpush1.bf16.msra.mxu0 %v10558_v39  ;;  %2969 = vmatpush1.bf16.msra.mxu1 %v10560_v38  ;;  %v10508_v39 = vld [vmem:[%s16227_s2 + $0x6b0] sm:$0xff]  ;;  %v10505_v38 = vld [vmem:[%s16227_s2 + $0x698] sm:$0xff] }
 0x213   :  { %2929 = vmatprep.subr.bf16.mxu0 %v10567_v47  ;;  %2970 = vmatprep.subr.bf16.mxu1 %v10569_v48  ;;  %v10509_v47 = vld [vmem:[%s16227_s2 + $0x6b8] sm:$0xff]  ;;  %v10562_v48 = vcombine.low %v10496_v42, %v10500_v43  ;;  %v10571_v50 = vcombine.high %v10504_v36, %v10508_v39 }
 0x214   :  { %v10573_v44 = vcombine.high %v10505_v38, %v10509_v47  ;;  %v10572_v56 = vcombine.low %v10505_v38, %v10509_v47  ;;  %v10630_v38 = vld [vmem:[%s16227_s2 + $0x880] sm:$0xff] }
 0x215   :  { %v10634_v47 = vld [vmem:[%s16227_s2 + $0x8a0] sm:$0xff] }
 0x216   :  { %2930 = vmatpush1.bf16.msra.mxu0 %v10566_v52  ;;  %2971 = vmatpush1.bf16.msra.mxu1 %v10568_v53  ;;  %v10516_v52 = vld [vmem:[%s16227_s2 + $0x6f0] sm:$0xff]  ;;  %v10513_v53 = vld [vmem:[%s16227_s2 + $0x6d8] sm:$0xff] }
 0x217   :  { %2931 = vmatprep.subr.bf16.mxu0 %v10575_v54  ;;  %2972 = vmatprep.subr.bf16.mxu1 %v10577_v55  ;;  %v10517_v54 = vld [vmem:[%s16227_s2 + $0x6f8] sm:$0xff]  ;;  %v10570_v55 = vcombine.low %v10504_v36, %v10508_v39  ;;  %v10579_v57 = vcombine.high %v10512_v51, %v10516_v52  ;;  %v10687_v36 = vcombine.high %v10622_v45, %v10626_v46 }
 0x218   :  { %v10581_v58 = vcombine.high %v10513_v53, %v10517_v54  ;;  %v10580_v0 = vcombine.low %v10513_v53, %v10517_v54  ;;  %v10638_v53 = vld [vmem:[%s16227_s2 + $0x8c0] sm:$0xff] }
 0x219   :  { %v10642_v54 = vld [vmem:[%s16227_s2 + $0x8e0] sm:$0xff] }
 0x21a   :  { %2932 = vmatpush1.bf16.msra.mxu0 %v10574_v60  ;;  %2973 = vmatpush1.bf16.msra.mxu1 %v10576_v61  ;;  %v10524_v60 = vld [vmem:[%s16227_s2 + $0x730] sm:$0xff]  ;;  %v10521_v61 = vld [vmem:[%s16227_s2 + $0x718] sm:$0xff] }
 0x21b   :  { %2933 = vmatprep.subr.bf16.mxu0 %v10583_v62  ;;  %2974 = vmatprep.subr.bf16.mxu1 %v10585_v63  ;;  %v10525_v62 = vld [vmem:[%s16227_s2 + $0x738] sm:$0xff]  ;;  %v10578_v63 = vcombine.low %v10512_v51, %v10516_v52  ;;  %v10587_v1 = vcombine.high %v10520_v59, %v10524_v60  ;;  %v10695_v51 = vcombine.high %v10630_v38, %v10634_v47 }
 0x21c   :  { %v10589_v2 = vcombine.high %v10521_v61, %v10525_v62  ;;  %v10588_v8 = vcombine.low %v10521_v61, %v10525_v62  ;;  %v10650_v61 = vld [vmem:[%s16227_s2 + $0x920] sm:$0xff]  ;;  %v10647_v62 = vld [vmem:[%s16227_s2 + $0x908] sm:$0xff] }
 0x21e   :  { %2934 = vmatpush1.bf16.msra.mxu0 %v10582_v4  ;;  %2975 = vmatpush1.bf16.msra.mxu1 %v10584_v5  ;;  %v10532_v4 = vld [vmem:[%s16227_s2 + $0x770] sm:$0xff]  ;;  %v10529_v5 = vld [vmem:[%s16227_s2 + $0x758] sm:$0xff] }
 0x21f   :  { %2935 = vmatprep.subr.bf16.mxu0 %v10591_v6  ;;  %2976 = vmatprep.subr.bf16.mxu1 %v10593_v7  ;;  %v10533_v6 = vld [vmem:[%s16227_s2 + $0x778] sm:$0xff]  ;;  %v10586_v7 = vcombine.low %v10520_v59, %v10524_v60  ;;  %v10595_v9 = vcombine.high %v10528_v3, %v10532_v4  ;;  %v10646_v60 = vld [vmem:[%s16227_s2 + $0x900] sm:$0xff] }
 0x220   :  { %v10597_v10 = vcombine.high %v10529_v5, %v10533_v6  ;;  %v10596_v16 = vcombine.low %v10529_v5, %v10533_v6  ;;  %v10658_v5 = vld [vmem:[%s16227_s2 + $0x960] sm:$0xff]  ;;  %v10655_v6 = vld [vmem:[%s16227_s2 + $0x948] sm:$0xff] }
 0x222   :  { %2936 = vmatpush1.bf16.msra.mxu0 %v10590_v12  ;;  %2977 = vmatpush1.bf16.msra.mxu1 %v10592_v13  ;;  %v10540_v12 = vld [vmem:[%s16227_s2 + $0x7b0] sm:$0xff]  ;;  %v10537_v13 = vld [vmem:[%s16227_s2 + $0x798] sm:$0xff] }
 0x223   :  { %2937 = vmatprep.subr.bf16.mxu0 %v10599_v14  ;;  %2978 = vmatprep.subr.bf16.mxu1 %v10601_v15  ;;  %v10541_v14 = vld [vmem:[%s16227_s2 + $0x7b8] sm:$0xff]  ;;  %v10594_v15 = vcombine.low %v10528_v3, %v10532_v4  ;;  %v10603_v17 = vcombine.high %v10536_v11, %v10540_v12  ;;  %v10654_v4 = vld [vmem:[%s16227_s2 + $0x940] sm:$0xff] }
 0x224   :  { %v10605_v18 = vcombine.high %v10537_v13, %v10541_v14  ;;  %v10604_v24 = vcombine.low %v10537_v13, %v10541_v14  ;;  %v10666_v13 = vld [vmem:[%s16227_s2 + $0x9a0] sm:$0xff]  ;;  %v10663_v14 = vld [vmem:[%s16227_s2 + $0x988] sm:$0xff] }
 0x226   :  { %2938 = vmatpush1.bf16.msra.mxu0 %v10598_v20  ;;  %2979 = vmatpush1.bf16.msra.mxu1 %v10600_v21  ;;  %v10548_v20 = vld [vmem:[%s16227_s2 + $0x7f0] sm:$0xff]  ;;  %v10545_v21 = vld [vmem:[%s16227_s2 + $0x7d8] sm:$0xff] }
 0x227   :  { %2939 = vmatprep.subr.bf16.mxu0 %v10607_v22  ;;  %2980 = vmatprep.subr.bf16.mxu1 %v10609_v23  ;;  %v10549_v22 = vld [vmem:[%s16227_s2 + $0x7f8] sm:$0xff]  ;;  %v10602_v23 = vcombine.low %v10536_v11, %v10540_v12  ;;  %v10611_v25 = vcombine.high %v10544_v19, %v10548_v20  ;;  %v10662_v12 = vld [vmem:[%s16227_s2 + $0x980] sm:$0xff] }
 0x228   :  { %v10613_v26 = vcombine.high %v10545_v21, %v10549_v22 }
 0x22a   :  { %2940 = vmatpush1.bf16.msra.mxu0 %v10606_v32  ;;  %2981 = vmatpush1.bf16.msra.mxu1 %v10608_v33  ;;  %v10618_v32 = vld [vmem:[%s16227_s2 + $0x820] sm:$0xff]  ;;  %v10615_v33 = vld [vmem:[%s16227_s2 + $0x808] sm:$0xff] }
 0x22b   :  { %3007 = vmatprep.subr.bf16.mxu0 %v10555_v40  ;;  %3048 = vmatprep.subr.bf16.mxu1 %v10557_v41  ;;  %v10610_v40 = vcombine.low %v10544_v19, %v10548_v20  ;;  %v10612_v41 = vcombine.low %v10545_v21, %v10549_v22  ;;  %v10679_v42 = vcombine.high %v10614_v28, %v10618_v32  ;;  %v10670_v20 = vld [vmem:[%s16227_s2 + $0x9c0] sm:$0xff]  ;;  %v10671_v22 = vld [vmem:[%s16227_s2 + $0x9c8] sm:$0xff] }
 0x22c   :  { %v10681_v43 = vcombine.high %v10615_v33, %v10619_v37  ;;  %v10674_v21 = vld [vmem:[%s16227_s2 + $0x9e0] sm:$0xff] }
 0x22d   :  { %2958 = vmatmul.mubr.bf16.vlgmr.msra.gmra.mrb[16].mxu0 %v13612_v27  ;;  %2999 = vmatmul.mubr.bf16.vlgmr.msra.gmra.mrb[16].mxu1 %v13612_v27 }
 0x22e   :  { %3008 = vmatpush1.bf16.msra.mxu0 %v10554_v30  ;;  %3049 = vmatpush1.bf16.msra.mxu1 %v10556_v31  ;;  %v10623_v30 = vld [vmem:[%s16227_s2 + $0x848] sm:$0xff] }
 0x22f   :  { %3009 = vmatprep.subr.bf16.mxu0 %v10563_v34  ;;  %3050 = vmatprep.subr.bf16.mxu1 %v10565_v35  ;;  %v10627_v31 = vld [vmem:[%s16227_s2 + $0x868] sm:$0xff]  ;;  %v10678_v34 = vcombine.low %v10614_v28, %v10618_v32  ;;  %v10680_v35 = vcombine.low %v10615_v33, %v10619_v37  ;;  %v10616_v32 = vld [vmem:[%s16227_s2 + $0x810] sm:$0xff]  ;;  %v10617_v37 = vld [vmem:[%s16227_s2 + $0x818] sm:$0xff] }
 0x230   :  { %3039 = vmatprep.mubr.bf16.mxu0 %v12591_v29  ;;  %3080 = vmatprep.mubr.bf16.mxu1 %v12591_v29  ;;  %v10689_v39 = vcombine.high %v10623_v30, %v10627_v31  ;;  %v10620_v33 = vld [vmem:[%s16227_s2 + $0x830] sm:$0xff] }
 0x232   :  { %3010 = vmatpush1.bf16.msra.mxu0 %v10562_v48  ;;  %3051 = vmatpush1.bf16.msra.mxu1 %v10564_v49  ;;  %v10631_v48 = vld [vmem:[%s16227_s2 + $0x888] sm:$0xff] }
 0x233   :  { %3011 = vmatprep.subr.bf16.mxu0 %v10571_v50  ;;  %3052 = vmatprep.subr.bf16.mxu1 %v10573_v44  ;;  %v10635_v49 = vld [vmem:[%s16227_s2 + $0x8a8] sm:$0xff]  ;;  %v10686_v50 = vcombine.low %v10622_v45, %v10626_v46  ;;  %v10688_v44 = vcombine.low %v10623_v30, %v10627_v31  ;;  %v10683_v45 = vcombine.high %v10616_v32, %v10620_v33  ;;  %v10624_v30 = vld [vmem:[%s16227_s2 + $0x850] sm:$0xff] }
 0x234   :  { %v10697_v52 = vcombine.high %v10631_v48, %v10635_v49  ;;  %v10628_v31 = vld [vmem:[%s16227_s2 + $0x870] sm:$0xff] }
 0x236   :  { %3012 = vmatpush1.bf16.msra.mxu0 %v10570_v55  ;;  %3053 = vmatpush1.bf16.msra.mxu1 %v10572_v56  ;;  %v10643_v55 = vld [vmem:[%s16227_s2 + $0x8e8] sm:$0xff]  ;;  %v10694_v56 = vcombine.low %v10630_v38, %v10634_v47  ;;  %v10691_v47 = vcombine.high %v10624_v30, %v10628_v31 }
 0x237   :  { %3013 = vmatprep.subr.bf16.mxu0 %v10579_v57  ;;  %3054 = vmatprep.subr.bf16.mxu1 %v10581_v58  ;;  %v10696_v57 = vcombine.low %v10631_v48, %v10635_v49  ;;  %v10703_v58 = vcombine.high %v10638_v53, %v10642_v54  ;;  %v10632_v49 = vld [vmem:[%s16227_s2 + $0x890] sm:$0xff] }
 0x23a   :  { %3014 = vmatpush1.bf16.msra.mxu0 %v10578_v63  ;;  %3055 = vmatpush1.bf16.msra.mxu1 %v10580_v0  ;;  %v10651_v63 = vld [vmem:[%s16227_s2 + $0x928] sm:$0xff]  ;;  %v10702_v0 = vcombine.low %v10638_v53, %v10642_v54 }
 0x23b   :  { %3015 = vmatprep.subr.bf16.mxu0 %v10587_v1  ;;  %3056 = vmatprep.subr.bf16.mxu1 %v10589_v2  ;;  %v10711_v2 = vcombine.high %v10646_v60, %v10650_v61  ;;  %v10713_v3 = vcombine.high %v10647_v62, %v10651_v63 }
 0x23e   :  { %3016 = vmatpush1.bf16.msra.mxu0 %v10586_v7  ;;  %3057 = vmatpush1.bf16.msra.mxu1 %v10588_v8  ;;  %v10659_v7 = vld [vmem:[%s16227_s2 + $0x968] sm:$0xff]  ;;  %v10710_v8 = vcombine.low %v10646_v60, %v10650_v61 }
 0x23f   :  { %3017 = vmatprep.subr.bf16.mxu0 %v10595_v9  ;;  %3058 = vmatprep.subr.bf16.mxu1 %v10597_v10  ;;  %v10712_v9 = vcombine.low %v10647_v62, %v10651_v63  ;;  %v10719_v10 = vcombine.high %v10654_v4, %v10658_v5  ;;  %v10721_v11 = vcombine.high %v10655_v6, %v10659_v7  ;;  %v10648_v63 = vld [vmem:[%s16227_s2 + $0x910] sm:$0xff] }
 0x242   :  { %3018 = vmatpush1.bf16.msra.mxu0 %v10594_v15  ;;  %3059 = vmatpush1.bf16.msra.mxu1 %v10596_v16  ;;  %v10667_v15 = vld [vmem:[%s16227_s2 + $0x9a8] sm:$0xff]  ;;  %v10718_v16 = vcombine.low %v10654_v4, %v10658_v5 }
 0x243   :  { %3019 = vmatprep.subr.bf16.mxu0 %v10603_v17  ;;  %3060 = vmatprep.subr.bf16.mxu1 %v10605_v18  ;;  %v10720_v17 = vcombine.low %v10655_v6, %v10659_v7  ;;  %v10727_v18 = vcombine.high %v10662_v12, %v10666_v13  ;;  %v10729_v19 = vcombine.high %v10663_v14, %v10667_v15  ;;  %v10656_v7 = vld [vmem:[%s16227_s2 + $0x950] sm:$0xff] }
 0x246   :  { %3020 = vmatpush1.bf16.msra.mxu0 %v10602_v23  ;;  %3061 = vmatpush1.bf16.msra.mxu1 %v10604_v24  ;;  %v10675_v23 = vld [vmem:[%s16227_s2 + $0x9e8] sm:$0xff]  ;;  %v10726_v24 = vcombine.low %v10662_v12, %v10666_v13 }
 0x247   :  { %3021 = vmatprep.subr.bf16.mxu0 %v10611_v25  ;;  %3062 = vmatprep.subr.bf16.mxu1 %v10613_v26  ;;  %v10728_v25 = vcombine.low %v10663_v14, %v10667_v15  ;;  %v10735_v26 = vcombine.high %v10670_v20, %v10674_v21  ;;  %v10737_v28 = vcombine.high %v10671_v22, %v10675_v23  ;;  %v10664_v15 = vld [vmem:[%s16227_s2 + $0x990] sm:$0xff] }
 0x24a   :  { %3022 = vmatpush1.bf16.msra.mxu0 %v10610_v40  ;;  %3063 = vmatpush1.bf16.msra.mxu1 %v10612_v41  ;;  %v10621_v40 = vld [vmem:[%s16227_s2 + $0x838] sm:$0xff]  ;;  %v10734_v41 = vcombine.low %v10670_v20, %v10674_v21 }
 0x24b   :  { %3484 = vmatprep.subr.bf16.mxu0 %v10679_v42  ;;  %3525 = vmatprep.subr.bf16.mxu1 %v10681_v43  ;;  %v10736_v42 = vcombine.low %v10671_v22, %v10675_v23  ;;  %v3097_v43 = vld [vmem:[#allocation2 + $0x8] sm:$0x3]  ;;  %v10685_v46 = vcombine.high %v10617_v37, %v10621_v40  ;;  %v10672_v23 = vld [vmem:[%s16227_s2 + $0x9d0] sm:$0xff] }
 0x24c   :  { %v13814_v38 = vpack.c.bf16 %v3097_v43, %v3097_v43  ;;  %v10747_v43 = vld [vmem:[%s16227_s2 + $0xa28] sm:$0xff] }
 0x24d   :  { %3040 = vmatmul.mubr.bf16.vlgmr.msra.gmra.mrb[20].mxu0 %v13612_v27  ;;  %3081 = vmatmul.mubr.bf16.vlgmr.msra.gmra.mrb[20].mxu1 %v13612_v27  ;;  %v10639_v27 = vld [vmem:[%s16227_s2 + $0x8c8] sm:$0xff] }
 0x24e   :  { %3485 = vmatpush1.bf16.msra.mxu0 %v10678_v34  ;;  %3526 = vmatpush1.bf16.msra.mxu1 %v10680_v35  ;;  %v10705_v59 = vcombine.high %v10639_v27, %v10643_v55  ;;  %v10704_v1 = vcombine.low %v10639_v27, %v10643_v55  ;;  %v10625_v34 = vld [vmem:[%s16227_s2 + $0x858] sm:$0xff]  ;;  %v10640_v55 = vld [vmem:[%s16227_s2 + $0x8d0] sm:$0xff] }
 0x24f   :  { %3486 = vmatprep.subr.bf16.mxu0 %v10687_v36  ;;  %3527 = vmatprep.subr.bf16.mxu1 %v10689_v39  ;;  %v10629_v35 = vld [vmem:[%s16227_s2 + $0x878] sm:$0xff]  ;;  %v10682_v36 = vcombine.low %v10616_v32, %v10620_v33  ;;  %v10684_v39 = vcombine.low %v10617_v37, %v10621_v40  ;;  %v10742_v40 = vld [vmem:[%s16227_s2 + $0xa00] sm:$0xff] }
 0x250   :  { %3516 = vmatprep.mubr.bf16.mxu0 %v12591_v29  ;;  %3557 = vmatprep.mubr.bf16.mxu1 %v12591_v29  ;;  %v10693_v48 = vcombine.high %v10625_v34, %v10629_v35  ;;  %v10692_v53 = vcombine.low %v10625_v34, %v10629_v35  ;;  %v10750_v34 = vld [vmem:[%s16227_s2 + $0xa40] sm:$0xff] }
 0x251   :  { %v10754_v35 = vld [vmem:[%s16227_s2 + $0xa60] sm:$0xff] }
 0x252   :  { %3487 = vmatpush1.bf16.msra.mxu0 %v10686_v50  ;;  %3528 = vmatpush1.bf16.msra.mxu1 %v10688_v44  ;;  %v10636_v50 = vld [vmem:[%s16227_s2 + $0x8b0] sm:$0xff]  ;;  %v10633_v44 = vld [vmem:[%s16227_s2 + $0x898] sm:$0xff] }
 0x253   :  { %3488 = vmatprep.subr.bf16.mxu0 %v10695_v51  ;;  %3529 = vmatprep.subr.bf16.mxu1 %v10697_v52  ;;  %v10637_v51 = vld [vmem:[%s16227_s2 + $0x8b8] sm:$0xff]  ;;  %v10690_v52 = vcombine.low %v10624_v30, %v10628_v31  ;;  %v10699_v54 = vcombine.high %v10632_v49, %v10636_v50 }
 0x254   :  { %v10701_v27 = vcombine.high %v10633_v44, %v10637_v51  ;;  %v10700_v60 = vcombine.low %v10633_v44, %v10637_v51  ;;  %v10758_v44 = vld [vmem:[%s16227_s2 + $0xa80] sm:$0xff] }
 0x255   :  { %v10762_v51 = vld [vmem:[%s16227_s2 + $0xaa0] sm:$0xff] }
 0x256   :  { %3489 = vmatpush1.bf16.msra.mxu0 %v10694_v56  ;;  %3530 = vmatpush1.bf16.msra.mxu1 %v10696_v57  ;;  %v10644_v56 = vld [vmem:[%s16227_s2 + $0x8f0] sm:$0xff]  ;;  %v10641_v57 = vld [vmem:[%s16227_s2 + $0x8d8] sm:$0xff] }
 0x257   :  { %3490 = vmatprep.subr.bf16.mxu0 %v10703_v58  ;;  %3531 = vmatprep.subr.bf16.mxu1 %v10705_v59  ;;  %v10645_v58 = vld [vmem:[%s16227_s2 + $0x8f8] sm:$0xff]  ;;  %v10698_v59 = vcombine.low %v10632_v49, %v10636_v50  ;;  %v10707_v61 = vcombine.high %v10640_v55, %v10644_v56  ;;  %v10815_v49 = vcombine.high %v10750_v34, %v10754_v35 }
 0x258   :  { %v10709_v62 = vcombine.high %v10641_v57, %v10645_v58  ;;  %v10708_v4 = vcombine.low %v10641_v57, %v10645_v58  ;;  %v10766_v57 = vld [vmem:[%s16227_s2 + $0xac0] sm:$0xff] }
 0x259   :  { %v10770_v58 = vld [vmem:[%s16227_s2 + $0xae0] sm:$0xff] }
 0x25a   :  { %3491 = vmatpush1.bf16.msra.mxu0 %v10702_v0  ;;  %3532 = vmatpush1.bf16.msra.mxu1 %v10704_v1  ;;  %v10652_v0 = vld [vmem:[%s16227_s2 + $0x930] sm:$0xff]  ;;  %v10649_v1 = vld [vmem:[%s16227_s2 + $0x918] sm:$0xff] }
 0x25b   :  { %3492 = vmatprep.subr.bf16.mxu0 %v10711_v2  ;;  %3533 = vmatprep.subr.bf16.mxu1 %v10713_v3  ;;  %v10653_v2 = vld [vmem:[%s16227_s2 + $0x938] sm:$0xff]  ;;  %v10706_v3 = vcombine.low %v10640_v55, %v10644_v56  ;;  %v10715_v5 = vcombine.high %v10648_v63, %v10652_v0  ;;  %v10823_v55 = vcombine.high %v10758_v44, %v10762_v51 }
 0x25c   :  { %v10717_v6 = vcombine.high %v10649_v1, %v10653_v2  ;;  %v10716_v12 = vcombine.low %v10649_v1, %v10653_v2  ;;  %v10778_v1 = vld [vmem:[%s16227_s2 + $0xb20] sm:$0xff]  ;;  %v10775_v2 = vld [vmem:[%s16227_s2 + $0xb08] sm:$0xff] }
 0x25e   :  { %3493 = vmatpush1.bf16.msra.mxu0 %v10710_v8  ;;  %3534 = vmatpush1.bf16.msra.mxu1 %v10712_v9  ;;  %v10660_v8 = vld [vmem:[%s16227_s2 + $0x970] sm:$0xff]  ;;  %v10657_v9 = vld [vmem:[%s16227_s2 + $0x958] sm:$0xff] }
 0x25f   :  { %3494 = vmatprep.subr.bf16.mxu0 %v10719_v10  ;;  %3535 = vmatprep.subr.bf16.mxu1 %v10721_v11  ;;  %v10661_v10 = vld [vmem:[%s16227_s2 + $0x978] sm:$0xff]  ;;  %v10714_v11 = vcombine.low %v10648_v63, %v10652_v0  ;;  %v10723_v13 = vcombine.high %v10656_v7, %v10660_v8  ;;  %v10774_v0 = vld [vmem:[%s16227_s2 + $0xb00] sm:$0xff] }
 0x260   :  { %v10725_v14 = vcombine.high %v10657_v9, %v10661_v10  ;;  %v10724_v20 = vcombine.low %v10657_v9, %v10661_v10  ;;  %v10786_v9 = vld [vmem:[%s16227_s2 + $0xb60] sm:$0xff]  ;;  %v10783_v10 = vld [vmem:[%s16227_s2 + $0xb48] sm:$0xff] }
 0x262   :  { %3495 = vmatpush1.bf16.msra.mxu0 %v10718_v16  ;;  %3536 = vmatpush1.bf16.msra.mxu1 %v10720_v17  ;;  %v10668_v16 = vld [vmem:[%s16227_s2 + $0x9b0] sm:$0xff]  ;;  %v10665_v17 = vld [vmem:[%s16227_s2 + $0x998] sm:$0xff] }
 0x263   :  { %3496 = vmatprep.subr.bf16.mxu0 %v10727_v18  ;;  %3537 = vmatprep.subr.bf16.mxu1 %v10729_v19  ;;  %v10669_v18 = vld [vmem:[%s16227_s2 + $0x9b8] sm:$0xff]  ;;  %v10722_v19 = vcombine.low %v10656_v7, %v10660_v8  ;;  %v10731_v21 = vcombine.high %v10664_v15, %v10668_v16  ;;  %v10782_v8 = vld [vmem:[%s16227_s2 + $0xb40] sm:$0xff] }
 0x264   :  { %v10733_v22 = vcombine.high %v10665_v17, %v10669_v18  ;;  %v10732_v32 = vcombine.low %v10665_v17, %v10669_v18  ;;  %v10794_v17 = vld [vmem:[%s16227_s2 + $0xba0] sm:$0xff]  ;;  %v10791_v18 = vld [vmem:[%s16227_s2 + $0xb88] sm:$0xff] }
 0x266   :  { %3497 = vmatpush1.bf16.msra.mxu0 %v10726_v24  ;;  %3538 = vmatpush1.bf16.msra.mxu1 %v10728_v25  ;;  %v10676_v24 = vld [vmem:[%s16227_s2 + $0x9f0] sm:$0xff]  ;;  %v10673_v25 = vld [vmem:[%s16227_s2 + $0x9d8] sm:$0xff] }
 0x267   :  { %3498 = vmatprep.subr.bf16.mxu0 %v10735_v26  ;;  %3539 = vmatprep.subr.bf16.mxu1 %v10737_v28  ;;  %v10677_v26 = vld [vmem:[%s16227_s2 + $0x9f8] sm:$0xff]  ;;  %v10730_v28 = vcombine.low %v10664_v15, %v10668_v16  ;;  %v10739_v33 = vcombine.high %v10672_v23, %v10676_v24  ;;  %v10790_v16 = vld [vmem:[%s16227_s2 + $0xb80] sm:$0xff] }
 0x268   :  { %v10741_v37 = vcombine.high %v10673_v25, %v10677_v26 }
 0x26a   :  { %3499 = vmatpush1.bf16.msra.mxu0 %v10734_v41  ;;  %3540 = vmatpush1.bf16.msra.mxu1 %v10736_v42  ;;  %v10746_v41 = vld [vmem:[%s16227_s2 + $0xa20] sm:$0xff]  ;;  %v10743_v42 = vld [vmem:[%s16227_s2 + $0xa08] sm:$0xff] }
 0x26b   :  { %3566 = vmatprep.subr.bf16.mxu0 %v10683_v45  ;;  %3607 = vmatprep.subr.bf16.mxu1 %v10685_v46  ;;  %v10738_v45 = vcombine.low %v10672_v23, %v10676_v24  ;;  %v10740_v46 = vcombine.low %v10673_v25, %v10677_v26  ;;  %v10807_v30 = vcombine.high %v10742_v40, %v10746_v41  ;;  %v10798_v24 = vld [vmem:[%s16227_s2 + $0xbc0] sm:$0xff]  ;;  %v10799_v26 = vld [vmem:[%s16227_s2 + $0xbc8] sm:$0xff] }
 0x26c   :  { %v10809_v31 = vcombine.high %v10743_v42, %v10747_v43  ;;  %v10802_v25 = vld [vmem:[%s16227_s2 + $0xbe0] sm:$0xff] }
 0x26d   :  { %3517 = vmatmul.mubr.bf16.vlgmr.msra.gmra.mrb[16].mxu0 %v13814_v38  ;;  %3558 = vmatmul.mubr.bf16.vlgmr.msra.gmra.mrb[16].mxu1 %v13814_v38 }
 0x26e   :  { %3567 = vmatpush1.bf16.msra.mxu0 %v10682_v36  ;;  %3608 = vmatpush1.bf16.msra.mxu1 %v10684_v39  ;;  %v10751_v36 = vld [vmem:[%s16227_s2 + $0xa48] sm:$0xff] }
 0x26f   :  { %3568 = vmatprep.subr.bf16.mxu0 %v10691_v47  ;;  %3609 = vmatprep.subr.bf16.mxu1 %v10693_v48  ;;  %v10755_v39 = vld [vmem:[%s16227_s2 + $0xa68] sm:$0xff]  ;;  %v10806_v47 = vcombine.low %v10742_v40, %v10746_v41  ;;  %v10808_v48 = vcombine.low %v10743_v42, %v10747_v43  ;;  %v10744_v41 = vld [vmem:[%s16227_s2 + $0xa10] sm:$0xff]  ;;  %v10745_v43 = vld [vmem:[%s16227_s2 + $0xa18] sm:$0xff] }
 0x270   :  { %3598 = vmatprep.mubr.bf16.mxu0 %v12591_v29  ;;  %3639 = vmatprep.mubr.bf16.mxu1 %v12591_v29  ;;  %v10817_v50 = vcombine.high %v10751_v36, %v10755_v39  ;;  %v10748_v42 = vld [vmem:[%s16227_s2 + $0xa30] sm:$0xff] }
 0x272   :  { %3569 = vmatpush1.bf16.msra.mxu0 %v10690_v52  ;;  %3610 = vmatpush1.bf16.msra.mxu1 %v10692_v53  ;;  %v10759_v52 = vld [vmem:[%s16227_s2 + $0xa88] sm:$0xff] }
 0x273   :  { %3570 = vmatprep.subr.bf16.mxu0 %v10699_v54  ;;  %3611 = vmatprep.subr.bf16.mxu1 %v10701_v27  ;;  %v10763_v53 = vld [vmem:[%s16227_s2 + $0xaa8] sm:$0xff]  ;;  %v10814_v54 = vcombine.low %v10750_v34, %v10754_v35  ;;  %v10816_v27 = vcombine.low %v10751_v36, %v10755_v39  ;;  %v10811_v34 = vcombine.high %v10744_v41, %v10748_v42  ;;  %v10752_v36 = vld [vmem:[%s16227_s2 + $0xa50] sm:$0xff] }
 0x274   :  { %v10825_v56 = vcombine.high %v10759_v52, %v10763_v53  ;;  %v10756_v39 = vld [vmem:[%s16227_s2 + $0xa70] sm:$0xff] }
 0x276   :  { %3571 = vmatpush1.bf16.msra.mxu0 %v10698_v59  ;;  %3612 = vmatpush1.bf16.msra.mxu1 %v10700_v60  ;;  %v10771_v59 = vld [vmem:[%s16227_s2 + $0xae8] sm:$0xff]  ;;  %v10822_v60 = vcombine.low %v10758_v44, %v10762_v51  ;;  %v10819_v51 = vcombine.high %v10752_v36, %v10756_v39 }
 0x277   :  { %3572 = vmatprep.subr.bf16.mxu0 %v10707_v61  ;;  %3613 = vmatprep.subr.bf16.mxu1 %v10709_v62  ;;  %v10824_v61 = vcombine.low %v10759_v52, %v10763_v53  ;;  %v10831_v62 = vcombine.high %v10766_v57, %v10770_v58  ;;  %v10760_v53 = vld [vmem:[%s16227_s2 + $0xa90] sm:$0xff] }
 0x27a   :  { %3573 = vmatpush1.bf16.msra.mxu0 %v10706_v3  ;;  %3614 = vmatpush1.bf16.msra.mxu1 %v10708_v4  ;;  %v10779_v3 = vld [vmem:[%s16227_s2 + $0xb28] sm:$0xff]  ;;  %v10830_v4 = vcombine.low %v10766_v57, %v10770_v58 }
 0x27b   :  { %3574 = vmatprep.subr.bf16.mxu0 %v10715_v5  ;;  %3615 = vmatprep.subr.bf16.mxu1 %v10717_v6  ;;  %v10839_v6 = vcombine.high %v10774_v0, %v10778_v1  ;;  %v10841_v7 = vcombine.high %v10775_v2, %v10779_v3 }
 0x27e   :  { %3575 = vmatpush1.bf16.msra.mxu0 %v10714_v11  ;;  %3616 = vmatpush1.bf16.msra.mxu1 %v10716_v12  ;;  %v10787_v11 = vld [vmem:[%s16227_s2 + $0xb68] sm:$0xff]  ;;  %v10838_v12 = vcombine.low %v10774_v0, %v10778_v1 }
 0x27f   :  { %3576 = vmatprep.subr.bf16.mxu0 %v10723_v13  ;;  %3617 = vmatprep.subr.bf16.mxu1 %v10725_v14  ;;  %v10840_v13 = vcombine.low %v10775_v2, %v10779_v3  ;;  %v10847_v14 = vcombine.high %v10782_v8, %v10786_v9  ;;  %v10849_v15 = vcombine.high %v10783_v10, %v10787_v11  ;;  %v10776_v3 = vld [vmem:[%s16227_s2 + $0xb10] sm:$0xff] }
 0x282   :  { %3577 = vmatpush1.bf16.msra.mxu0 %v10722_v19  ;;  %3618 = vmatpush1.bf16.msra.mxu1 %v10724_v20  ;;  %v10795_v19 = vld [vmem:[%s16227_s2 + $0xba8] sm:$0xff]  ;;  %v10846_v20 = vcombine.low %v10782_v8, %v10786_v9 }
 0x283   :  { %3578 = vmatprep.subr.bf16.mxu0 %v10731_v21  ;;  %3619 = vmatprep.subr.bf16.mxu1 %v10733_v22  ;;  %v10848_v21 = vcombine.low %v10783_v10, %v10787_v11  ;;  %v10855_v22 = vcombine.high %v10790_v16, %v10794_v17  ;;  %v10857_v23 = vcombine.high %v10791_v18, %v10795_v19  ;;  %v10784_v11 = vld [vmem:[%s16227_s2 + $0xb50] sm:$0xff] }
 0x286   :  { %3579 = vmatpush1.bf16.msra.mxu0 %v10730_v28  ;;  %3620 = vmatpush1.bf16.msra.mxu1 %v10732_v32  ;;  %v10803_v28 = vld [vmem:[%s16227_s2 + $0xbe8] sm:$0xff]  ;;  %v10854_v32 = vcombine.low %v10790_v16, %v10794_v17 }
 0x287   :  { %3580 = vmatprep.subr.bf16.mxu0 %v10739_v33  ;;  %3621 = vmatprep.subr.bf16.mxu1 %v10741_v37  ;;  %v10856_v33 = vcombine.low %v10791_v18, %v10795_v19  ;;  %v10863_v37 = vcombine.high %v10798_v24, %v10802_v25  ;;  %v10865_v40 = vcombine.high %v10799_v26, %v10803_v28  ;;  %v10792_v19 = vld [vmem:[%s16227_s2 + $0xb90] sm:$0xff] }
 0x28a   :  { %3581 = vmatpush1.bf16.msra.mxu0 %v10738_v45  ;;  %3622 = vmatpush1.bf16.msra.mxu1 %v10740_v46  ;;  %v10749_v45 = vld [vmem:[%s16227_s2 + $0xa38] sm:$0xff]  ;;  %v10862_v46 = vcombine.low %v10798_v24, %v10802_v25 }
 0x28b   :  { %4043 = vmatprep.subr.bf16.mxu0 %v10807_v30  ;;  %4084 = vmatprep.subr.bf16.mxu1 %v10809_v31  ;;  %v10864_v30 = vcombine.low %v10799_v26, %v10803_v28  ;;  %v3656_v31 = vld [vmem:[#allocation2 + $0xa] sm:$0x3]  ;;  %v10813_v35 = vcombine.high %v10745_v43, %v10749_v45  ;;  %v10800_v28 = vld [vmem:[%s16227_s2 + $0xbd0] sm:$0xff] }
 0x28c   :  { %v14016_v44 = vpack.c.bf16 %v3656_v31, %v3656_v31  ;;  %v10875_v31 = vld [vmem:[%s16227_s2 + $0xc28] sm:$0xff] }
 0x28d   :  { %3599 = vmatmul.mubr.bf16.vlgmr.msra.gmra.mrb[20].mxu0 %v13814_v38  ;;  %3640 = vmatmul.mubr.bf16.vlgmr.msra.gmra.mrb[20].mxu1 %v13814_v38  ;;  %v10767_v38 = vld [vmem:[%s16227_s2 + $0xac8] sm:$0xff] }
 0x28e   :  { %4044 = vmatpush1.bf16.msra.mxu0 %v10806_v47  ;;  %4085 = vmatpush1.bf16.msra.mxu1 %v10808_v48  ;;  %v10833_v63 = vcombine.high %v10767_v38, %v10771_v59  ;;  %v10832_v5 = vcombine.low %v10767_v38, %v10771_v59  ;;  %v10753_v47 = vld [vmem:[%s16227_s2 + $0xa58] sm:$0xff]  ;;  %v10768_v59 = vld [vmem:[%s16227_s2 + $0xad0] sm:$0xff] }
 0x28f   :  { %4045 = vmatprep.subr.bf16.mxu0 %v10815_v49  ;;  %4086 = vmatprep.subr.bf16.mxu1 %v10817_v50  ;;  %v10757_v48 = vld [vmem:[%s16227_s2 + $0xa78] sm:$0xff]  ;;  %v10810_v49 = vcombine.low %v10744_v41, %v10748_v42  ;;  %v10812_v50 = vcombine.low %v10745_v43, %v10749_v45  ;;  %v10870_v45 = vld [vmem:[%s16227_s2 + $0xc00] sm:$0xff] }
 0x290   :  { %4075 = vmatprep.mubr.bf16.mxu0 %v12591_v29  ;;  %4116 = vmatprep.mubr.bf16.mxu1 %v12591_v29  ;;  %v10821_v52 = vcombine.high %v10753_v47, %v10757_v48  ;;  %v10820_v57 = vcombine.low %v10753_v47, %v10757_v48  ;;  %v10878_v47 = vld [vmem:[%s16227_s2 + $0xc40] sm:$0xff] }
 0x291   :  { %v10882_v48 = vld [vmem:[%s16227_s2 + $0xc60] sm:$0xff] }
 0x292   :  { %4046 = vmatpush1.bf16.msra.mxu0 %v10814_v54  ;;  %4087 = vmatpush1.bf16.msra.mxu1 %v10816_v27  ;;  %v10764_v54 = vld [vmem:[%s16227_s2 + $0xab0] sm:$0xff]  ;;  %v10761_v27 = vld [vmem:[%s16227_s2 + $0xa98] sm:$0xff] }
 0x293   :  { %4047 = vmatprep.subr.bf16.mxu0 %v10823_v55  ;;  %4088 = vmatprep.subr.bf16.mxu1 %v10825_v56  ;;  %v10765_v55 = vld [vmem:[%s16227_s2 + $0xab8] sm:$0xff]  ;;  %v10818_v56 = vcombine.low %v10752_v36, %v10756_v39  ;;  %v10827_v58 = vcombine.high %v10760_v53, %v10764_v54 }
 0x294   :  { %v10829_v38 = vcombine.high %v10761_v27, %v10765_v55  ;;  %v10828_v0 = vcombine.low %v10761_v27, %v10765_v55  ;;  %v10886_v27 = vld [vmem:[%s16227_s2 + $0xc80] sm:$0xff] }
 0x295   :  { %v10890_v55 = vld [vmem:[%s16227_s2 + $0xca0] sm:$0xff] }
 0x296   :  { %4048 = vmatpush1.bf16.msra.mxu0 %v10822_v60  ;;  %4089 = vmatpush1.bf16.msra.mxu1 %v10824_v61  ;;  %v10772_v60 = vld [vmem:[%s16227_s2 + $0xaf0] sm:$0xff]  ;;  %v10769_v61 = vld [vmem:[%s16227_s2 + $0xad8] sm:$0xff] }
 0x297   :  { %4049 = vmatprep.subr.bf16.mxu0 %v10831_v62  ;;  %4090 = vmatprep.subr.bf16.mxu1 %v10833_v63  ;;  %v10773_v62 = vld [vmem:[%s16227_s2 + $0xaf8] sm:$0xff]  ;;  %v10826_v63 = vcombine.low %v10760_v53, %v10764_v54  ;;  %v10835_v1 = vcombine.high %v10768_v59, %v10772_v60  ;;  %v10943_v53 = vcombine.high %v10878_v47, %v10882_v48 }
 0x298   :  { %v10837_v2 = vcombine.high %v10769_v61, %v10773_v62  ;;  %v10836_v8 = vcombine.low %v10769_v61, %v10773_v62  ;;  %v10894_v61 = vld [vmem:[%s16227_s2 + $0xcc0] sm:$0xff] }
 0x299   :  { %v10898_v62 = vld [vmem:[%s16227_s2 + $0xce0] sm:$0xff] }
 0x29a   :  { %4050 = vmatpush1.bf16.msra.mxu0 %v10830_v4  ;;  %4091 = vmatpush1.bf16.msra.mxu1 %v10832_v5  ;;  %v10780_v4 = vld [vmem:[%s16227_s2 + $0xb30] sm:$0xff]  ;;  %v10777_v5 = vld [vmem:[%s16227_s2 + $0xb18] sm:$0xff] }
 0x29b   :  { %4051 = vmatprep.subr.bf16.mxu0 %v10839_v6  ;;  %4092 = vmatprep.subr.bf16.mxu1 %v10841_v7  ;;  %v10781_v6 = vld [vmem:[%s16227_s2 + $0xb38] sm:$0xff]  ;;  %v10834_v7 = vcombine.low %v10768_v59, %v10772_v60  ;;  %v10843_v9 = vcombine.high %v10776_v3, %v10780_v4  ;;  %v10951_v59 = vcombine.high %v10886_v27, %v10890_v55 }
 0x29c   :  { %v10845_v10 = vcombine.high %v10777_v5, %v10781_v6  ;;  %v10844_v16 = vcombine.low %v10777_v5, %v10781_v6  ;;  %v10906_v5 = vld [vmem:[%s16227_s2 + $0xd20] sm:$0xff]  ;;  %v10903_v6 = vld [vmem:[%s16227_s2 + $0xd08] sm:$0xff] }
 0x29e   :  { %4052 = vmatpush1.bf16.msra.mxu0 %v10838_v12  ;;  %4093 = vmatpush1.bf16.msra.mxu1 %v10840_v13  ;;  %v10788_v12 = vld [vmem:[%s16227_s2 + $0xb70] sm:$0xff]  ;;  %v10785_v13 = vld [vmem:[%s16227_s2 + $0xb58] sm:$0xff] }
 0x29f   :  { %4053 = vmatprep.subr.bf16.mxu0 %v10847_v14  ;;  %4094 = vmatprep.subr.bf16.mxu1 %v10849_v15  ;;  %v10789_v14 = vld [vmem:[%s16227_s2 + $0xb78] sm:$0xff]  ;;  %v10842_v15 = vcombine.low %v10776_v3, %v10780_v4  ;;  %v10851_v17 = vcombine.high %v10784_v11, %v10788_v12  ;;  %v10902_v4 = vld [vmem:[%s16227_s2 + $0xd00] sm:$0xff] }
 0x2a0   :  { %v10853_v18 = vcombine.high %v10785_v13, %v10789_v14  ;;  %v10852_v24 = vcombine.low %v10785_v13, %v10789_v14  ;;  %v10914_v13 = vld [vmem:[%s16227_s2 + $0xd60] sm:$0xff]  ;;  %v10911_v14 = vld [vmem:[%s16227_s2 + $0xd48] sm:$0xff] }
 0x2a2   :  { %4054 = vmatpush1.bf16.msra.mxu0 %v10846_v20  ;;  %4095 = vmatpush1.bf16.msra.mxu1 %v10848_v21  ;;  %v10796_v20 = vld [vmem:[%s16227_s2 + $0xbb0] sm:$0xff]  ;;  %v10793_v21 = vld [vmem:[%s16227_s2 + $0xb98] sm:$0xff] }
 0x2a3   :  { %4055 = vmatprep.subr.bf16.mxu0 %v10855_v22  ;;  %4096 = vmatprep.subr.bf16.mxu1 %v10857_v23  ;;  %v10797_v22 = vld [vmem:[%s16227_s2 + $0xbb8] sm:$0xff]  ;;  %v10850_v23 = vcombine.low %v10784_v11, %v10788_v12  ;;  %v10859_v25 = vcombine.high %v10792_v19, %v10796_v20  ;;  %v10910_v12 = vld [vmem:[%s16227_s2 + $0xd40] sm:$0xff] }
 0x2a4   :  { %v10861_v26 = vcombine.high %v10793_v21, %v10797_v22  ;;  %v10860_v41 = vcombine.low %v10793_v21, %v10797_v22  ;;  %v10922_v21 = vld [vmem:[%s16227_s2 + $0xda0] sm:$0xff]  ;;  %v10919_v22 = vld [vmem:[%s16227_s2 + $0xd88] sm:$0xff] }
 0x2a6   :  { %4056 = vmatpush1.bf16.msra.mxu0 %v10854_v32  ;;  %4097 = vmatpush1.bf16.msra.mxu1 %v10856_v33  ;;  %v10804_v32 = vld [vmem:[%s16227_s2 + $0xbf0] sm:$0xff]  ;;  %v10801_v33 = vld [vmem:[%s16227_s2 + $0xbd8] sm:$0xff] }
 0x2a7   :  { %4057 = vmatprep.subr.bf16.mxu0 %v10863_v37  ;;  %4098 = vmatprep.subr.bf16.mxu1 %v10865_v40  ;;  %v10805_v37 = vld [vmem:[%s16227_s2 + $0xbf8] sm:$0xff]  ;;  %v10858_v40 = vcombine.low %v10792_v19, %v10796_v20  ;;  %v10867_v42 = vcombine.high %v10800_v28, %v10804_v32  ;;  %v10918_v20 = vld [vmem:[%s16227_s2 + $0xd80] sm:$0xff] }
 0x2a8   :  { %v10869_v43 = vcombine.high %v10801_v33, %v10805_v37 }
 0x2aa   :  { %4058 = vmatpush1.bf16.msra.mxu0 %v10862_v46  ;;  %4099 = vmatpush1.bf16.msra.mxu1 %v10864_v30  ;;  %v10874_v46 = vld [vmem:[%s16227_s2 + $0xc20] sm:$0xff]  ;;  %v10871_v30 = vld [vmem:[%s16227_s2 + $0xc08] sm:$0xff] }
 0x2ab   :  { %4125 = vmatprep.subr.bf16.mxu0 %v10811_v34  ;;  %4166 = vmatprep.subr.bf16.mxu1 %v10813_v35  ;;  %v10866_v34 = vcombine.low %v10800_v28, %v10804_v32  ;;  %v10868_v35 = vcombine.low %v10801_v33, %v10805_v37  ;;  %v10935_v36 = vcombine.high %v10870_v45, %v10874_v46  ;;  %v10926_v32 = vld [vmem:[%s16227_s2 + $0xdc0] sm:$0xff]  ;;  %v10927_v37 = vld [vmem:[%s16227_s2 + $0xdc8] sm:$0xff] }
 0x2ac   :  { %v10937_v39 = vcombine.high %v10871_v30, %v10875_v31  ;;  %v10930_v33 = vld [vmem:[%s16227_s2 + $0xde0] sm:$0xff] }
 0x2ad   :  { %4076 = vmatmul.mubr.bf16.vlgmr.msra.gmra.mrb[16].mxu0 %v14016_v44  ;;  %4117 = vmatmul.mubr.bf16.vlgmr.msra.gmra.mrb[16].mxu1 %v14016_v44 }
 0x2ae   :  { %4126 = vmatpush1.bf16.msra.mxu0 %v10810_v49  ;;  %4167 = vmatpush1.bf16.msra.mxu1 %v10812_v50  ;;  %v10879_v49 = vld [vmem:[%s16227_s2 + $0xc48] sm:$0xff] }
 0x2af   :  { %4127 = vmatprep.subr.bf16.mxu0 %v10819_v51  ;;  %4168 = vmatprep.subr.bf16.mxu1 %v10821_v52  ;;  %v10883_v50 = vld [vmem:[%s16227_s2 + $0xc68] sm:$0xff]  ;;  %v10934_v51 = vcombine.low %v10870_v45, %v10874_v46  ;;  %v10936_v52 = vcombine.low %v10871_v30, %v10875_v31  ;;  %v10872_v46 = vld [vmem:[%s16227_s2 + $0xc10] sm:$0xff]  ;;  %v10873_v31 = vld [vmem:[%s16227_s2 + $0xc18] sm:$0xff] }
 0x2b0   :  { %4157 = vmatprep.mubr.bf16.mxu0 %v12591_v29  ;;  %4198 = vmatprep.mubr.bf16.mxu1 %v12591_v29  ;;  %v10945_v54 = vcombine.high %v10879_v49, %v10883_v50  ;;  %v10876_v30 = vld [vmem:[%s16227_s2 + $0xc30] sm:$0xff] }
 0x2b2   :  { %4128 = vmatpush1.bf16.msra.mxu0 %v10818_v56  ;;  %4169 = vmatpush1.bf16.msra.mxu1 %v10820_v57  ;;  %v10887_v56 = vld [vmem:[%s16227_s2 + $0xc88] sm:$0xff] }
 0x2b3   :  { %4129 = vmatprep.subr.bf16.mxu0 %v10827_v58  ;;  %4170 = vmatprep.subr.bf16.mxu1 %v10829_v38  ;;  %v10891_v57 = vld [vmem:[%s16227_s2 + $0xca8] sm:$0xff]  ;;  %v10942_v58 = vcombine.low %v10878_v47, %v10882_v48  ;;  %v10944_v38 = vcombine.low %v10879_v49, %v10883_v50  ;;  %v10939_v47 = vcombine.high %v10872_v46, %v10876_v30  ;;  %v10880_v49 = vld [vmem:[%s16227_s2 + $0xc50] sm:$0xff] }
 0x2b4   :  { %v10953_v60 = vcombine.high %v10887_v56, %v10891_v57  ;;  %v10884_v50 = vld [vmem:[%s16227_s2 + $0xc70] sm:$0xff] }
 0x2b6   :  { %4130 = vmatpush1.bf16.msra.mxu0 %v10826_v63  ;;  %4171 = vmatpush1.bf16.msra.mxu1 %v10828_v0  ;;  %v10899_v63 = vld [vmem:[%s16227_s2 + $0xce8] sm:$0xff]  ;;  %v10950_v0 = vcombine.low %v10886_v27, %v10890_v55  ;;  %v10947_v55 = vcombine.high %v10880_v49, %v10884_v50 }
 0x2b7   :  { %4131 = vmatprep.subr.bf16.mxu0 %v10835_v1  ;;  %4172 = vmatprep.subr.bf16.mxu1 %v10837_v2  ;;  %v10952_v1 = vcombine.low %v10887_v56, %v10891_v57  ;;  %v10959_v2 = vcombine.high %v10894_v61, %v10898_v62  ;;  %v10888_v57 = vld [vmem:[%s16227_s2 + $0xc90] sm:$0xff] }
 0x2ba   :  { %4132 = vmatpush1.bf16.msra.mxu0 %v10834_v7  ;;  %4173 = vmatpush1.bf16.msra.mxu1 %v10836_v8  ;;  %v10907_v7 = vld [vmem:[%s16227_s2 + $0xd28] sm:$0xff]  ;;  %v10958_v8 = vcombine.low %v10894_v61, %v10898_v62 }
 0x2bb   :  { %4133 = vmatprep.subr.bf16.mxu0 %v10843_v9  ;;  %4174 = vmatprep.subr.bf16.mxu1 %v10845_v10  ;;  %v10967_v10 = vcombine.high %v10902_v4, %v10906_v5  ;;  %v10969_v11 = vcombine.high %v10903_v6, %v10907_v7 }
 0x2be   :  { %4134 = vmatpush1.bf16.msra.mxu0 %v10842_v15  ;;  %4175 = vmatpush1.bf16.msra.mxu1 %v10844_v16  ;;  %v10915_v15 = vld [vmem:[%s16227_s2 + $0xd68] sm:$0xff]  ;;  %v10966_v16 = vcombine.low %v10902_v4, %v10906_v5 }
 0x2bf   :  { %4135 = vmatprep.subr.bf16.mxu0 %v10851_v17  ;;  %4176 = vmatprep.subr.bf16.mxu1 %v10853_v18  ;;  %v10968_v17 = vcombine.low %v10903_v6, %v10907_v7  ;;  %v10975_v18 = vcombine.high %v10910_v12, %v10914_v13  ;;  %v10977_v19 = vcombine.high %v10911_v14, %v10915_v15  ;;  %v10904_v7 = vld [vmem:[%s16227_s2 + $0xd10] sm:$0xff] }
 0x2c2   :  { %4136 = vmatpush1.bf16.msra.mxu0 %v10850_v23  ;;  %4177 = vmatpush1.bf16.msra.mxu1 %v10852_v24  ;;  %v10923_v23 = vld [vmem:[%s16227_s2 + $0xda8] sm:$0xff]  ;;  %v10974_v24 = vcombine.low %v10910_v12, %v10914_v13 }
 0x2c3   :  { %4137 = vmatprep.subr.bf16.mxu0 %v10859_v25  ;;  %4178 = vmatprep.subr.bf16.mxu1 %v10861_v26  ;;  %v10976_v25 = vcombine.low %v10911_v14, %v10915_v15  ;;  %v10983_v26 = vcombine.high %v10918_v20, %v10922_v21  ;;  %v10985_v28 = vcombine.high %v10919_v22, %v10923_v23  ;;  %v10912_v15 = vld [vmem:[%s16227_s2 + $0xd50] sm:$0xff] }
 0x2c6   :  { %4138 = vmatpush1.bf16.msra.mxu0 %v10858_v40  ;;  %4179 = vmatpush1.bf16.msra.mxu1 %v10860_v41  ;;  %v10931_v40 = vld [vmem:[%s16227_s2 + $0xde8] sm:$0xff]  ;;  %v10982_v41 = vcombine.low %v10918_v20, %v10922_v21 }
 0x2c7   :  { %4139 = vmatprep.subr.bf16.mxu0 %v10867_v42  ;;  %4180 = vmatprep.subr.bf16.mxu1 %v10869_v43  ;;  %v10984_v42 = vcombine.low %v10919_v22, %v10923_v23  ;;  %v10991_v43 = vcombine.high %v10926_v32, %v10930_v33  ;;  %v10993_v45 = vcombine.high %v10927_v37, %v10931_v40  ;;  %v10920_v23 = vld [vmem:[%s16227_s2 + $0xd90] sm:$0xff] }
 0x2ca   :  { %4140 = vmatpush1.bf16.msra.mxu0 %v10866_v34  ;;  %4181 = vmatpush1.bf16.msra.mxu1 %v10868_v35  ;;  %v10877_v34 = vld [vmem:[%s16227_s2 + $0xc38] sm:$0xff]  ;;  %v10990_v35 = vcombine.low %v10926_v32, %v10930_v33 }
 0x2cb   :  { %4602 = vmatprep.subr.bf16.mxu0 %v10935_v36  ;;  %4643 = vmatprep.subr.bf16.mxu1 %v10937_v39  ;;  %v10992_v36 = vcombine.low %v10927_v37, %v10931_v40  ;;  %v4215_v39 = vld [vmem:[#allocation2 + $0xc] sm:$0x3]  ;;  %v10941_v48 = vcombine.high %v10873_v31, %v10877_v34  ;;  %v10928_v40 = vld [vmem:[%s16227_s2 + $0xdd0] sm:$0xff] }
 0x2cc   :  { %v14218_v27 = vpack.c.bf16 %v4215_v39, %v4215_v39  ;;  %v11003_v39 = vld [vmem:[%s16227_s2 + $0xe28] sm:$0xff] }
 0x2cd   :  { %4158 = vmatmul.mubr.bf16.vlgmr.msra.gmra.mrb[20].mxu0 %v14016_v44  ;;  %4199 = vmatmul.mubr.bf16.vlgmr.msra.gmra.mrb[20].mxu1 %v14016_v44  ;;  %v10895_v44 = vld [vmem:[%s16227_s2 + $0xcc8] sm:$0xff] }
 0x2ce   :  { %4603 = vmatpush1.bf16.msra.mxu0 %v10934_v51  ;;  %4644 = vmatpush1.bf16.msra.mxu1 %v10936_v52  ;;  %v10961_v3 = vcombine.high %v10895_v44, %v10899_v63  ;;  %v10960_v9 = vcombine.low %v10895_v44, %v10899_v63  ;;  %v10881_v51 = vld [vmem:[%s16227_s2 + $0xc58] sm:$0xff]  ;;  %v10896_v63 = vld [vmem:[%s16227_s2 + $0xcd0] sm:$0xff] }
 0x2cf   :  { %4604 = vmatprep.subr.bf16.mxu0 %v10943_v53  ;;  %4645 = vmatprep.subr.bf16.mxu1 %v10945_v54  ;;  %v10885_v52 = vld [vmem:[%s16227_s2 + $0xc78] sm:$0xff]  ;;  %v10938_v53 = vcombine.low %v10872_v46, %v10876_v30  ;;  %v10940_v54 = vcombine.low %v10873_v31, %v10877_v34  ;;  %v10998_v34 = vld [vmem:[%s16227_s2 + $0xe00] sm:$0xff] }
 0x2d0   :  { %4634 = vmatprep.mubr.bf16.mxu0 %v12591_v29  ;;  %4675 = vmatprep.mubr.bf16.mxu1 %v12591_v29  ;;  %v10949_v56 = vcombine.high %v10881_v51, %v10885_v52  ;;  %v10948_v61 = vcombine.low %v10881_v51, %v10885_v52  ;;  %v11006_v51 = vld [vmem:[%s16227_s2 + $0xe40] sm:$0xff] }
 0x2d1   :  { %v11010_v52 = vld [vmem:[%s16227_s2 + $0xe60] sm:$0xff] }
 0x2d2   :  { %4605 = vmatpush1.bf16.msra.mxu0 %v10942_v58  ;;  %4646 = vmatpush1.bf16.msra.mxu1 %v10944_v38  ;;  %v10892_v58 = vld [vmem:[%s16227_s2 + $0xcb0] sm:$0xff]  ;;  %v10889_v38 = vld [vmem:[%s16227_s2 + $0xc98] sm:$0xff] }
 0x2d3   :  { %4606 = vmatprep.subr.bf16.mxu0 %v10951_v59  ;;  %4647 = vmatprep.subr.bf16.mxu1 %v10953_v60  ;;  %v10893_v59 = vld [vmem:[%s16227_s2 + $0xcb8] sm:$0xff]  ;;  %v10946_v60 = vcombine.low %v10880_v49, %v10884_v50  ;;  %v10955_v62 = vcombine.high %v10888_v57, %v10892_v58 }
 0x2d4   :  { %v10957_v44 = vcombine.high %v10889_v38, %v10893_v59  ;;  %v10956_v4 = vcombine.low %v10889_v38, %v10893_v59  ;;  %v11014_v38 = vld [vmem:[%s16227_s2 + $0xe80] sm:$0xff] }
 0x2d5   :  { %v11018_v59 = vld [vmem:[%s16227_s2 + $0xea0] sm:$0xff] }
 0x2d6   :  { %4607 = vmatpush1.bf16.msra.mxu0 %v10950_v0  ;;  %4648 = vmatpush1.bf16.msra.mxu1 %v10952_v1  ;;  %v10900_v0 = vld [vmem:[%s16227_s2 + $0xcf0] sm:$0xff]  ;;  %v10897_v1 = vld [vmem:[%s16227_s2 + $0xcd8] sm:$0xff] }
 0x2d7   :  { %4608 = vmatprep.subr.bf16.mxu0 %v10959_v2  ;;  %4649 = vmatprep.subr.bf16.mxu1 %v10961_v3  ;;  %v10901_v2 = vld [vmem:[%s16227_s2 + $0xcf8] sm:$0xff]  ;;  %v10954_v3 = vcombine.low %v10888_v57, %v10892_v58  ;;  %v10963_v5 = vcombine.high %v10896_v63, %v10900_v0  ;;  %v11071_v57 = vcombine.high %v11006_v51, %v11010_v52 }
 0x2d8   :  { %v10965_v6 = vcombine.high %v10897_v1, %v10901_v2  ;;  %v10964_v12 = vcombine.low %v10897_v1, %v10901_v2  ;;  %v11022_v1 = vld [vmem:[%s16227_s2 + $0xec0] sm:$0xff] }
 0x2d9   :  { %v11026_v2 = vld [vmem:[%s16227_s2 + $0xee0] sm:$0xff] }
 0x2da   :  { %4609 = vmatpush1.bf16.msra.mxu0 %v10958_v8  ;;  %4650 = vmatpush1.bf16.msra.mxu1 %v10960_v9  ;;  %v10908_v8 = vld [vmem:[%s16227_s2 + $0xd30] sm:$0xff]  ;;  %v10905_v9 = vld [vmem:[%s16227_s2 + $0xd18] sm:$0xff] }
 0x2db   :  { %4610 = vmatprep.subr.bf16.mxu0 %v10967_v10  ;;  %4651 = vmatprep.subr.bf16.mxu1 %v10969_v11  ;;  %v10909_v10 = vld [vmem:[%s16227_s2 + $0xd38] sm:$0xff]  ;;  %v10962_v11 = vcombine.low %v10896_v63, %v10900_v0  ;;  %v10971_v13 = vcombine.high %v10904_v7, %v10908_v8  ;;  %v11079_v63 = vcombine.high %v11014_v38, %v11018_v59 }
 0x2dc   :  { %v10973_v14 = vcombine.high %v10905_v9, %v10909_v10  ;;  %v10972_v20 = vcombine.low %v10905_v9, %v10909_v10  ;;  %v11034_v9 = vld [vmem:[%s16227_s2 + $0xf20] sm:$0xff]  ;;  %v11031_v10 = vld [vmem:[%s16227_s2 + $0xf08] sm:$0xff] }
 0x2de   :  { %4611 = vmatpush1.bf16.msra.mxu0 %v10966_v16  ;;  %4652 = vmatpush1.bf16.msra.mxu1 %v10968_v17  ;;  %v10916_v16 = vld [vmem:[%s16227_s2 + $0xd70] sm:$0xff]  ;;  %v10913_v17 = vld [vmem:[%s16227_s2 + $0xd58] sm:$0xff] }
 0x2df   :  { %4612 = vmatprep.subr.bf16.mxu0 %v10975_v18  ;;  %4653 = vmatprep.subr.bf16.mxu1 %v10977_v19  ;;  %v10917_v18 = vld [vmem:[%s16227_s2 + $0xd78] sm:$0xff]  ;;  %v10970_v19 = vcombine.low %v10904_v7, %v10908_v8  ;;  %v10979_v21 = vcombine.high %v10912_v15, %v10916_v16  ;;  %v11030_v8 = vld [vmem:[%s16227_s2 + $0xf00] sm:$0xff] }
 0x2e0   :  { %v10981_v22 = vcombine.high %v10913_v17, %v10917_v18  ;;  %v10980_v32 = vcombine.low %v10913_v17, %v10917_v18  ;;  %v11042_v17 = vld [vmem:[%s16227_s2 + $0xf60] sm:$0xff]  ;;  %v11039_v18 = vld [vmem:[%s16227_s2 + $0xf48] sm:$0xff] }
 0x2e2   :  { %4613 = vmatpush1.bf16.msra.mxu0 %v10974_v24  ;;  %4654 = vmatpush1.bf16.msra.mxu1 %v10976_v25  ;;  %v10924_v24 = vld [vmem:[%s16227_s2 + $0xdb0] sm:$0xff]  ;;  %v10921_v25 = vld [vmem:[%s16227_s2 + $0xd98] sm:$0xff] }
 0x2e3   :  { %4614 = vmatprep.subr.bf16.mxu0 %v10983_v26  ;;  %4655 = vmatprep.subr.bf16.mxu1 %v10985_v28  ;;  %v10925_v26 = vld [vmem:[%s16227_s2 + $0xdb8] sm:$0xff]  ;;  %v10978_v28 = vcombine.low %v10912_v15, %v10916_v16  ;;  %v10987_v33 = vcombine.high %v10920_v23, %v10924_v24  ;;  %v11038_v16 = vld [vmem:[%s16227_s2 + $0xf40] sm:$0xff] }
 0x2e4   :  { %v10989_v37 = vcombine.high %v10921_v25, %v10925_v26  ;;  %v10988_v46 = vcombine.low %v10921_v25, %v10925_v26  ;;  %v11050_v25 = vld [vmem:[%s16227_s2 + $0xfa0] sm:$0xff]  ;;  %v11047_v26 = vld [vmem:[%s16227_s2 + $0xf88] sm:$0xff] }
 0x2e6   :  { %4615 = vmatpush1.bf16.msra.mxu0 %v10982_v41  ;;  %4656 = vmatpush1.bf16.msra.mxu1 %v10984_v42  ;;  %v10932_v41 = vld [vmem:[%s16227_s2 + $0xdf0] sm:$0xff]  ;;  %v10929_v42 = vld [vmem:[%s16227_s2 + $0xdd8] sm:$0xff] }
 0x2e7   :  { %4616 = vmatprep.subr.bf16.mxu0 %v10991_v43  ;;  %4657 = vmatprep.subr.bf16.mxu1 %v10993_v45  ;;  %v10933_v43 = vld [vmem:[%s16227_s2 + $0xdf8] sm:$0xff]  ;;  %v10986_v45 = vcombine.low %v10920_v23, %v10924_v24  ;;  %v10995_v30 = vcombine.high %v10928_v40, %v10932_v41  ;;  %v11046_v24 = vld [vmem:[%s16227_s2 + $0xf80] sm:$0xff] }
 0x2e8   :  { %v10997_v31 = vcombine.high %v10929_v42, %v10933_v43 }
 0x2ea   :  { %4617 = vmatpush1.bf16.msra.mxu0 %v10990_v35  ;;  %4658 = vmatpush1.bf16.msra.mxu1 %v10992_v36  ;;  %v11002_v35 = vld [vmem:[%s16227_s2 + $0xe20] sm:$0xff]  ;;  %v10999_v36 = vld [vmem:[%s16227_s2 + $0xe08] sm:$0xff] }
 0x2eb   :  { %4684 = vmatprep.subr.bf16.mxu0 %v10939_v47  ;;  %4725 = vmatprep.subr.bf16.mxu1 %v10941_v48  ;;  %v10994_v47 = vcombine.low %v10928_v40, %v10932_v41  ;;  %v10996_v48 = vcombine.low %v10929_v42, %v10933_v43  ;;  %v11063_v49 = vcombine.high %v10998_v34, %v11002_v35  ;;  %v11054_v41 = vld [vmem:[%s16227_s2 + $0xfc0] sm:$0xff]  ;;  %v11055_v43 = vld [vmem:[%s16227_s2 + $0xfc8] sm:$0xff] }
 0x2ec   :  { %v11065_v50 = vcombine.high %v10999_v36, %v11003_v39  ;;  %v11058_v42 = vld [vmem:[%s16227_s2 + $0xfe0] sm:$0xff] }
 0x2ed   :  { %4635 = vmatmul.mubr.bf16.vlgmr.msra.gmra.mrb[16].mxu0 %v14218_v27  ;;  %4676 = vmatmul.mubr.bf16.vlgmr.msra.gmra.mrb[16].mxu1 %v14218_v27 }
 0x2ee   :  { %4685 = vmatpush1.bf16.msra.mxu0 %v10938_v53  ;;  %4726 = vmatpush1.bf16.msra.mxu1 %v10940_v54  ;;  %v11007_v53 = vld [vmem:[%s16227_s2 + $0xe48] sm:$0xff] }
 0x2ef   :  { %4686 = vmatprep.subr.bf16.mxu0 %v10947_v55  ;;  %4727 = vmatprep.subr.bf16.mxu1 %v10949_v56  ;;  %v11011_v54 = vld [vmem:[%s16227_s2 + $0xe68] sm:$0xff]  ;;  %v11062_v55 = vcombine.low %v10998_v34, %v11002_v35  ;;  %v11064_v56 = vcombine.low %v10999_v36, %v11003_v39  ;;  %v11000_v35 = vld [vmem:[%s16227_s2 + $0xe10] sm:$0xff]  ;;  %v11001_v39 = vld [vmem:[%s16227_s2 + $0xe18] sm:$0xff] }
 0x2f0   :  { %4716 = vmatprep.mubr.bf16.mxu0 %v12591_v29  ;;  %4757 = vmatprep.mubr.bf16.mxu1 %v12591_v29  ;;  %v11073_v58 = vcombine.high %v11007_v53, %v11011_v54  ;;  %v11004_v36 = vld [vmem:[%s16227_s2 + $0xe30] sm:$0xff] }
 0x2f2   :  { %4687 = vmatpush1.bf16.msra.mxu0 %v10946_v60  ;;  %4728 = vmatpush1.bf16.msra.mxu1 %v10948_v61  ;;  %v11015_v60 = vld [vmem:[%s16227_s2 + $0xe88] sm:$0xff] }
 0x2f3   :  { %4688 = vmatprep.subr.bf16.mxu0 %v10955_v62  ;;  %4729 = vmatprep.subr.bf16.mxu1 %v10957_v44  ;;  %v11019_v61 = vld [vmem:[%s16227_s2 + $0xea8] sm:$0xff]  ;;  %v11070_v62 = vcombine.low %v11006_v51, %v11010_v52  ;;  %v11072_v44 = vcombine.low %v11007_v53, %v11011_v54  ;;  %v11067_v51 = vcombine.high %v11000_v35, %v11004_v36  ;;  %v11008_v53 = vld [vmem:[%s16227_s2 + $0xe50] sm:$0xff] }
 0x2f4   :  { %v11081_v0 = vcombine.high %v11015_v60, %v11019_v61  ;;  %v11012_v54 = vld [vmem:[%s16227_s2 + $0xe70] sm:$0xff] }
 0x2f6   :  { %4689 = vmatpush1.bf16.msra.mxu0 %v10954_v3  ;;  %4730 = vmatpush1.bf16.msra.mxu1 %v10956_v4  ;;  %v11027_v3 = vld [vmem:[%s16227_s2 + $0xee8] sm:$0xff]  ;;  %v11078_v4 = vcombine.low %v11014_v38, %v11018_v59  ;;  %v11075_v59 = vcombine.high %v11008_v53, %v11012_v54 }
 0x2f7   :  { %4690 = vmatprep.subr.bf16.mxu0 %v10963_v5  ;;  %4731 = vmatprep.subr.bf16.mxu1 %v10965_v6  ;;  %v11080_v5 = vcombine.low %v11015_v60, %v11019_v61  ;;  %v11087_v6 = vcombine.high %v11022_v1, %v11026_v2  ;;  %v11016_v61 = vld [vmem:[%s16227_s2 + $0xe90] sm:$0xff] }
 0x2fa   :  { %4691 = vmatpush1.bf16.msra.mxu0 %v10962_v11  ;;  %4732 = vmatpush1.bf16.msra.mxu1 %v10964_v12  ;;  %v11035_v11 = vld [vmem:[%s16227_s2 + $0xf28] sm:$0xff]  ;;  %v11086_v12 = vcombine.low %v11022_v1, %v11026_v2 }
 0x2fb   :  { %4692 = vmatprep.subr.bf16.mxu0 %v10971_v13  ;;  %4733 = vmatprep.subr.bf16.mxu1 %v10973_v14  ;;  %v11095_v14 = vcombine.high %v11030_v8, %v11034_v9  ;;  %v11097_v15 = vcombine.high %v11031_v10, %v11035_v11 }
 0x2fe   :  { %4693 = vmatpush1.bf16.msra.mxu0 %v10970_v19  ;;  %4734 = vmatpush1.bf16.msra.mxu1 %v10972_v20  ;;  %v11043_v19 = vld [vmem:[%s16227_s2 + $0xf68] sm:$0xff]  ;;  %v11094_v20 = vcombine.low %v11030_v8, %v11034_v9 }
 0x2ff   :  { %4694 = vmatprep.subr.bf16.mxu0 %v10979_v21  ;;  %4735 = vmatprep.subr.bf16.mxu1 %v10981_v22  ;;  %v11096_v21 = vcombine.low %v11031_v10, %v11035_v11  ;;  %v11103_v22 = vcombine.high %v11038_v16, %v11042_v17  ;;  %v11105_v23 = vcombine.high %v11039_v18, %v11043_v19  ;;  %v11032_v11 = vld [vmem:[%s16227_s2 + $0xf10] sm:$0xff] }
 0x302   :  { %4695 = vmatpush1.bf16.msra.mxu0 %v10978_v28  ;;  %4736 = vmatpush1.bf16.msra.mxu1 %v10980_v32  ;;  %v11051_v28 = vld [vmem:[%s16227_s2 + $0xfa8] sm:$0xff]  ;;  %v11102_v32 = vcombine.low %v11038_v16, %v11042_v17 }
 0x303   :  { %4696 = vmatprep.subr.bf16.mxu0 %v10987_v33  ;;  %4737 = vmatprep.subr.bf16.mxu1 %v10989_v37  ;;  %v11104_v33 = vcombine.low %v11039_v18, %v11043_v19  ;;  %v11111_v37 = vcombine.high %v11046_v24, %v11050_v25  ;;  %v11113_v40 = vcombine.high %v11047_v26, %v11051_v28  ;;  %v11040_v19 = vld [vmem:[%s16227_s2 + $0xf50] sm:$0xff] }
 0x306   :  { %4697 = vmatpush1.bf16.msra.mxu0 %v10986_v45  ;;  %4738 = vmatpush1.bf16.msra.mxu1 %v10988_v46  ;;  %v11059_v45 = vld [vmem:[%s16227_s2 + $0xfe8] sm:$0xff]  ;;  %v11110_v46 = vcombine.low %v11046_v24, %v11050_v25 }
 0x307   :  { %4698 = vmatprep.subr.bf16.mxu0 %v10995_v30  ;;  %4739 = vmatprep.subr.bf16.mxu1 %v10997_v31  ;;  %v11112_v30 = vcombine.low %v11047_v26, %v11051_v28  ;;  %v11119_v31 = vcombine.high %v11054_v41, %v11058_v42  ;;  %v11121_v34 = vcombine.high %v11055_v43, %v11059_v45  ;;  %v11048_v28 = vld [vmem:[%s16227_s2 + $0xf90] sm:$0xff] }
 0x30a   :  { %4699 = vmatpush1.bf16.msra.mxu0 %v10994_v47  ;;  %4740 = vmatpush1.bf16.msra.mxu1 %v10996_v48  ;;  %v11005_v47 = vld [vmem:[%s16227_s2 + $0xe38] sm:$0xff]  ;;  %v11118_v48 = vcombine.low %v11054_v41, %v11058_v42 }
 0x30b   :  { %5161 = vmatprep.subr.bf16.mxu0 %v11063_v49  ;;  %5202 = vmatprep.subr.bf16.mxu1 %v11065_v50  ;;  %v11120_v49 = vcombine.low %v11055_v43, %v11059_v45  ;;  %v4774_v50 = vld [vmem:[#allocation2 + $0xe] sm:$0x3]  ;;  %v11069_v52 = vcombine.high %v11001_v39, %v11005_v47  ;;  %v11056_v45 = vld [vmem:[%s16227_s2 + $0xfd0] sm:$0xff] }
 0x30c   :  { %v14420_v38 = vpack.c.bf16 %v4774_v50, %v4774_v50  ;;  %v11131_v50 = vld [vmem:[%s16227_s2 + $0x1028] sm:$0xff] }
 0x30d   :  { %4717 = vmatmul.mubr.bf16.vlgmr.msra.gmra.mrb[20].mxu0 %v14218_v27  ;;  %4758 = vmatmul.mubr.bf16.vlgmr.msra.gmra.mrb[20].mxu1 %v14218_v27  ;;  %v11023_v27 = vld [vmem:[%s16227_s2 + $0xec8] sm:$0xff] }
 0x30e   :  { %5162 = vmatpush1.bf16.msra.mxu0 %v11062_v55  ;;  %5203 = vmatpush1.bf16.msra.mxu1 %v11064_v56  ;;  %v11089_v7 = vcombine.high %v11023_v27, %v11027_v3  ;;  %v11088_v13 = vcombine.low %v11023_v27, %v11027_v3  ;;  %v11009_v55 = vld [vmem:[%s16227_s2 + $0xe58] sm:$0xff]  ;;  %v11024_v3 = vld [vmem:[%s16227_s2 + $0xed0] sm:$0xff] }
 0x30f   :  { %5163 = vmatprep.subr.bf16.mxu0 %v11071_v57  ;;  %5204 = vmatprep.subr.bf16.mxu1 %v11073_v58  ;;  %v11013_v56 = vld [vmem:[%s16227_s2 + $0xe78] sm:$0xff]  ;;  %v11066_v57 = vcombine.low %v11000_v35, %v11004_v36  ;;  %v11068_v58 = vcombine.low %v11001_v39, %v11005_v47  ;;  %v11126_v47 = vld [vmem:[%s16227_s2 + $0x1000] sm:$0xff] }
 0x310   :  { %5193 = vmatprep.mubr.bf16.mxu0 %v12591_v29  ;;  %5234 = vmatprep.mubr.bf16.mxu1 %v12591_v29  ;;  %v11077_v60 = vcombine.high %v11009_v55, %v11013_v56  ;;  %v11076_v1 = vcombine.low %v11009_v55, %v11013_v56  ;;  %v11134_v55 = vld [vmem:[%s16227_s2 + $0x1040] sm:$0xff] }
 0x311   :  { %v11138_v56 = vld [vmem:[%s16227_s2 + $0x1060] sm:$0xff] }
 0x312   :  { %5164 = vmatpush1.bf16.msra.mxu0 %v11070_v62  ;;  %5205 = vmatpush1.bf16.msra.mxu1 %v11072_v44  ;;  %v11020_v62 = vld [vmem:[%s16227_s2 + $0xeb0] sm:$0xff]  ;;  %v11017_v44 = vld [vmem:[%s16227_s2 + $0xe98] sm:$0xff] }
 0x313   :  { %5165 = vmatprep.subr.bf16.mxu0 %v11079_v63  ;;  %5206 = vmatprep.subr.bf16.mxu1 %v11081_v0  ;;  %v11021_v63 = vld [vmem:[%s16227_s2 + $0xeb8] sm:$0xff]  ;;  %v11074_v0 = vcombine.low %v11008_v53, %v11012_v54  ;;  %v11083_v2 = vcombine.high %v11016_v61, %v11020_v62 }
 0x314   :  { %v11085_v27 = vcombine.high %v11017_v44, %v11021_v63  ;;  %v11084_v8 = vcombine.low %v11017_v44, %v11021_v63  ;;  %v11142_v44 = vld [vmem:[%s16227_s2 + $0x1080] sm:$0xff] }
 0x315   :  { %v11146_v63 = vld [vmem:[%s16227_s2 + $0x10a0] sm:$0xff] }
 0x316   :  { %5166 = vmatpush1.bf16.msra.mxu0 %v11078_v4  ;;  %5207 = vmatpush1.bf16.msra.mxu1 %v11080_v5  ;;  %v11028_v4 = vld [vmem:[%s16227_s2 + $0xef0] sm:$0xff]  ;;  %v11025_v5 = vld [vmem:[%s16227_s2 + $0xed8] sm:$0xff] }
 0x317   :  { %5167 = vmatprep.subr.bf16.mxu0 %v11087_v6  ;;  %5208 = vmatprep.subr.bf16.mxu1 %v11089_v7  ;;  %v11029_v6 = vld [vmem:[%s16227_s2 + $0xef8] sm:$0xff]  ;;  %v11082_v7 = vcombine.low %v11016_v61, %v11020_v62  ;;  %v11091_v9 = vcombine.high %v11024_v3, %v11028_v4  ;;  %v11199_v61 = vcombine.high %v11134_v55, %v11138_v56 }
 0x318   :  { %v11093_v10 = vcombine.high %v11025_v5, %v11029_v6  ;;  %v11092_v16 = vcombine.low %v11025_v5, %v11029_v6  ;;  %v11150_v5 = vld [vmem:[%s16227_s2 + $0x10c0] sm:$0xff] }
 0x319   :  { %v11154_v6 = vld [vmem:[%s16227_s2 + $0x10e0] sm:$0xff] }
 0x31a   :  { %5168 = vmatpush1.bf16.msra.mxu0 %v11086_v12  ;;  %5209 = vmatpush1.bf16.msra.mxu1 %v11088_v13  ;;  %v11036_v12 = vld [vmem:[%s16227_s2 + $0xf30] sm:$0xff]  ;;  %v11033_v13 = vld [vmem:[%s16227_s2 + $0xf18] sm:$0xff] }
 0x31b   :  { %5169 = vmatprep.subr.bf16.mxu0 %v11095_v14  ;;  %5210 = vmatprep.subr.bf16.mxu1 %v11097_v15  ;;  %v11037_v14 = vld [vmem:[%s16227_s2 + $0xf38] sm:$0xff]  ;;  %v11090_v15 = vcombine.low %v11024_v3, %v11028_v4  ;;  %v11099_v17 = vcombine.high %v11032_v11, %v11036_v12  ;;  %v11207_v3 = vcombine.high %v11142_v44, %v11146_v63 }
 0x31c   :  { %v11101_v18 = vcombine.high %v11033_v13, %v11037_v14  ;;  %v11100_v24 = vcombine.low %v11033_v13, %v11037_v14  ;;  %v11162_v13 = vld [vmem:[%s16227_s2 + $0x1120] sm:$0xff]  ;;  %v11159_v14 = vld [vmem:[%s16227_s2 + $0x1108] sm:$0xff] }
 0x31e   :  { %5170 = vmatpush1.bf16.msra.mxu0 %v11094_v20  ;;  %5211 = vmatpush1.bf16.msra.mxu1 %v11096_v21  ;;  %v11044_v20 = vld [vmem:[%s16227_s2 + $0xf70] sm:$0xff]  ;;  %v11041_v21 = vld [vmem:[%s16227_s2 + $0xf58] sm:$0xff] }
 0x31f   :  { %5171 = vmatprep.subr.bf16.mxu0 %v11103_v22  ;;  %5212 = vmatprep.subr.bf16.mxu1 %v11105_v23  ;;  %v11045_v22 = vld [vmem:[%s16227_s2 + $0xf78] sm:$0xff]  ;;  %v11098_v23 = vcombine.low %v11032_v11, %v11036_v12  ;;  %v11107_v25 = vcombine.high %v11040_v19, %v11044_v20  ;;  %v11158_v12 = vld [vmem:[%s16227_s2 + $0x1100] sm:$0xff] }
 0x320   :  { %v11109_v26 = vcombine.high %v11041_v21, %v11045_v22  ;;  %v11108_v41 = vcombine.low %v11041_v21, %v11045_v22  ;;  %v11170_v21 = vld [vmem:[%s16227_s2 + $0x1160] sm:$0xff]  ;;  %v11167_v22 = vld [vmem:[%s16227_s2 + $0x1148] sm:$0xff] }
 0x322   :  { %5172 = vmatpush1.bf16.msra.mxu0 %v11102_v32  ;;  %5213 = vmatpush1.bf16.msra.mxu1 %v11104_v33  ;;  %v11052_v32 = vld [vmem:[%s16227_s2 + $0xfb0] sm:$0xff]  ;;  %v11049_v33 = vld [vmem:[%s16227_s2 + $0xf98] sm:$0xff] }
 0x323   :  { %5173 = vmatprep.subr.bf16.mxu0 %v11111_v37  ;;  %5214 = vmatprep.subr.bf16.mxu1 %v11113_v40  ;;  %v11053_v37 = vld [vmem:[%s16227_s2 + $0xfb8] sm:$0xff]  ;;  %v11106_v40 = vcombine.low %v11040_v19, %v11044_v20  ;;  %v11115_v42 = vcombine.high %v11048_v28, %v11052_v32  ;;  %v11166_v20 = vld [vmem:[%s16227_s2 + $0x1140] sm:$0xff] }
 0x324   :  { %v11117_v43 = vcombine.high %v11049_v33, %v11053_v37  ;;  %v11116_v35 = vcombine.low %v11049_v33, %v11053_v37  ;;  %v11178_v33 = vld [vmem:[%s16227_s2 + $0x11a0] sm:$0xff]  ;;  %v11175_v37 = vld [vmem:[%s16227_s2 + $0x1188] sm:$0xff] }
 0x326   :  { %5174 = vmatpush1.bf16.msra.mxu0 %v11110_v46  ;;  %5215 = vmatpush1.bf16.msra.mxu1 %v11112_v30  ;;  %v11060_v46 = vld [vmem:[%s16227_s2 + $0xff0] sm:$0xff]  ;;  %v11057_v30 = vld [vmem:[%s16227_s2 + $0xfd8] sm:$0xff] }
 0x327   :  { %5175 = vmatprep.subr.bf16.mxu0 %v11119_v31  ;;  %5216 = vmatprep.subr.bf16.mxu1 %v11121_v34  ;;  %v11061_v31 = vld [vmem:[%s16227_s2 + $0xff8] sm:$0xff]  ;;  %v11114_v34 = vcombine.low %v11048_v28, %v11052_v32  ;;  %v11123_v36 = vcombine.high %v11056_v45, %v11060_v46  ;;  %v11174_v32 = vld [vmem:[%s16227_s2 + $0x1180] sm:$0xff] }
 0x328   :  { %v11125_v39 = vcombine.high %v11057_v30, %v11061_v31 }
 0x32a   :  { %5176 = vmatpush1.bf16.msra.mxu0 %v11118_v48  ;;  %5217 = vmatpush1.bf16.msra.mxu1 %v11120_v49  ;;  %v11130_v48 = vld [vmem:[%s16227_s2 + $0x1020] sm:$0xff]  ;;  %v11127_v49 = vld [vmem:[%s16227_s2 + $0x1008] sm:$0xff] }
 0x32b   :  { %5243 = vmatprep.subr.bf16.mxu0 %v11067_v51  ;;  %5284 = vmatprep.subr.bf16.mxu1 %v11069_v52  ;;  %v11122_v51 = vcombine.low %v11056_v45, %v11060_v46  ;;  %v11124_v52 = vcombine.low %v11057_v30, %v11061_v31  ;;  %v11191_v53 = vcombine.high %v11126_v47, %v11130_v48  ;;  %v11182_v46 = vld [vmem:[%s16227_s2 + $0x11c0] sm:$0xff]  ;;  %v11183_v31 = vld [vmem:[%s16227_s2 + $0x11c8] sm:$0xff] }
 0x32c   :  { %v11193_v54 = vcombine.high %v11127_v49, %v11131_v50  ;;  %v11186_v30 = vld [vmem:[%s16227_s2 + $0x11e0] sm:$0xff] }
 0x32d   :  { %5194 = vmatmul.mubr.bf16.vlgmr.msra.gmra.mrb[16].mxu0 %v14420_v38  ;;  %5235 = vmatmul.mubr.bf16.vlgmr.msra.gmra.mrb[16].mxu1 %v14420_v38 }
 0x32e   :  { %5244 = vmatpush1.bf16.msra.mxu0 %v11066_v57  ;;  %5285 = vmatpush1.bf16.msra.mxu1 %v11068_v58  ;;  %v11135_v57 = vld [vmem:[%s16227_s2 + $0x1048] sm:$0xff] }
 0x32f   :  { %5245 = vmatprep.subr.bf16.mxu0 %v11075_v59  ;;  %5286 = vmatprep.subr.bf16.mxu1 %v11077_v60  ;;  %v11139_v58 = vld [vmem:[%s16227_s2 + $0x1068] sm:$0xff]  ;;  %v11190_v59 = vcombine.low %v11126_v47, %v11130_v48  ;;  %v11192_v60 = vcombine.low %v11127_v49, %v11131_v50  ;;  %v11128_v48 = vld [vmem:[%s16227_s2 + $0x1010] sm:$0xff]  ;;  %v11129_v50 = vld [vmem:[%s16227_s2 + $0x1018] sm:$0xff] }
 0x330   :  { %5275 = vmatprep.mubr.bf16.mxu0 %v12591_v29  ;;  %5316 = vmatprep.mubr.bf16.mxu1 %v12591_v29  ;;  %v11201_v62 = vcombine.high %v11135_v57, %v11139_v58  ;;  %v11132_v49 = vld [vmem:[%s16227_s2 + $0x1030] sm:$0xff] }
 0x332   :  { %5246 = vmatpush1.bf16.msra.mxu0 %v11074_v0  ;;  %5287 = vmatpush1.bf16.msra.mxu1 %v11076_v1  ;;  %v11143_v0 = vld [vmem:[%s16227_s2 + $0x1088] sm:$0xff] }
 0x333   :  { %5247 = vmatprep.subr.bf16.mxu0 %v11083_v2  ;;  %5288 = vmatprep.subr.bf16.mxu1 %v11085_v27  ;;  %v11147_v1 = vld [vmem:[%s16227_s2 + $0x10a8] sm:$0xff]  ;;  %v11198_v2 = vcombine.low %v11134_v55, %v11138_v56  ;;  %v11200_v27 = vcombine.low %v11135_v57, %v11139_v58  ;;  %v11195_v55 = vcombine.high %v11128_v48, %v11132_v49  ;;  %v11136_v57 = vld [vmem:[%s16227_s2 + $0x1050] sm:$0xff] }
 0x334   :  { %v11209_v4 = vcombine.high %v11143_v0, %v11147_v1  ;;  %v11140_v58 = vld [vmem:[%s16227_s2 + $0x1070] sm:$0xff] }
 0x336   :  { %5248 = vmatpush1.bf16.msra.mxu0 %v11082_v7  ;;  %5289 = vmatpush1.bf16.msra.mxu1 %v11084_v8  ;;  %v11155_v7 = vld [vmem:[%s16227_s2 + $0x10e8] sm:$0xff]  ;;  %v11206_v8 = vcombine.low %v11142_v44, %v11146_v63  ;;  %v11203_v63 = vcombine.high %v11136_v57, %v11140_v58 }
 0x337   :  { %5249 = vmatprep.subr.bf16.mxu0 %v11091_v9  ;;  %5290 = vmatprep.subr.bf16.mxu1 %v11093_v10  ;;  %v11208_v9 = vcombine.low %v11143_v0, %v11147_v1  ;;  %v11215_v10 = vcombine.high %v11150_v5, %v11154_v6  ;;  %v11144_v1 = vld [vmem:[%s16227_s2 + $0x1090] sm:$0xff] }
 0x33a   :  { %5250 = vmatpush1.bf16.msra.mxu0 %v11090_v15  ;;  %5291 = vmatpush1.bf16.msra.mxu1 %v11092_v16  ;;  %v11163_v15 = vld [vmem:[%s16227_s2 + $0x1128] sm:$0xff]  ;;  %v11214_v16 = vcombine.low %v11150_v5, %v11154_v6 }
 0x33b   :  { %5251 = vmatprep.subr.bf16.mxu0 %v11099_v17  ;;  %5292 = vmatprep.subr.bf16.mxu1 %v11101_v18  ;;  %v11223_v18 = vcombine.high %v11158_v12, %v11162_v13  ;;  %v11225_v19 = vcombine.high %v11159_v14, %v11163_v15 }
 0x33e   :  { %5252 = vmatpush1.bf16.msra.mxu0 %v11098_v23  ;;  %5293 = vmatpush1.bf16.msra.mxu1 %v11100_v24  ;;  %v11171_v23 = vld [vmem:[%s16227_s2 + $0x1168] sm:$0xff]  ;;  %v11222_v24 = vcombine.low %v11158_v12, %v11162_v13 }
 0x33f   :  { %5253 = vmatprep.subr.bf16.mxu0 %v11107_v25  ;;  %5294 = vmatprep.subr.bf16.mxu1 %v11109_v26  ;;  %v11224_v25 = vcombine.low %v11159_v14, %v11163_v15  ;;  %v11231_v26 = vcombine.high %v11166_v20, %v11170_v21  ;;  %v11233_v28 = vcombine.high %v11167_v22, %v11171_v23  ;;  %v11160_v15 = vld [vmem:[%s16227_s2 + $0x1110] sm:$0xff] }
 0x342   :  { %5254 = vmatpush1.bf16.msra.mxu0 %v11106_v40  ;;  %5295 = vmatpush1.bf16.msra.mxu1 %v11108_v41  ;;  %v11179_v40 = vld [vmem:[%s16227_s2 + $0x11a8] sm:$0xff]  ;;  %v11230_v41 = vcombine.low %v11166_v20, %v11170_v21 }
 0x343   :  { %5255 = vmatprep.subr.bf16.mxu0 %v11115_v42  ;;  %5296 = vmatprep.subr.bf16.mxu1 %v11117_v43  ;;  %v11232_v42 = vcombine.low %v11167_v22, %v11171_v23  ;;  %v11239_v43 = vcombine.high %v11174_v32, %v11178_v33  ;;  %v11241_v45 = vcombine.high %v11175_v37, %v11179_v40  ;;  %v11168_v23 = vld [vmem:[%s16227_s2 + $0x1150] sm:$0xff] }
 0x346   :  { %5256 = vmatpush1.bf16.msra.mxu0 %v11114_v34  ;;  %5297 = vmatpush1.bf16.msra.mxu1 %v11116_v35  ;;  %v11187_v34 = vld [vmem:[%s16227_s2 + $0x11e8] sm:$0xff]  ;;  %v11238_v35 = vcombine.low %v11174_v32, %v11178_v33 }
 0x347   :  { %5257 = vmatprep.subr.bf16.mxu0 %v11123_v36  ;;  %5298 = vmatprep.subr.bf16.mxu1 %v11125_v39  ;;  %v11240_v36 = vcombine.low %v11175_v37, %v11179_v40  ;;  %v11247_v39 = vcombine.high %v11182_v46, %v11186_v30  ;;  %v11249_v47 = vcombine.high %v11183_v31, %v11187_v34  ;;  %v11176_v40 = vld [vmem:[%s16227_s2 + $0x1190] sm:$0xff] }
 0x34a   :  { %5258 = vmatpush1.bf16.msra.mxu0 %v11122_v51  ;;  %5299 = vmatpush1.bf16.msra.mxu1 %v11124_v52  ;;  %v11133_v51 = vld [vmem:[%s16227_s2 + $0x1038] sm:$0xff]  ;;  %v11246_v52 = vcombine.low %v11182_v46, %v11186_v30 }
 0x34b   :  { %5720 = vmatprep.subr.bf16.mxu0 %v11191_v53  ;;  %5761 = vmatprep.subr.bf16.mxu1 %v11193_v54  ;;  %v11248_v53 = vcombine.low %v11183_v31, %v11187_v34  ;;  %v5333_v54 = vld [vmem:[#allocation2 + $0x10] sm:$0x3]  ;;  %v11197_v56 = vcombine.high %v11129_v50, %v11133_v51 }
 0x34c   :  { %v14622_v44 = vpack.c.bf16 %v5333_v54, %v5333_v54  ;;  %v11184_v34 = vld [vmem:[%s16227_s2 + $0x11d0] sm:$0xff]  ;;  %v11259_v54 = vld [vmem:[%s16227_s2 + $0x1228] sm:$0xff] }
 0x34d   :  { %5276 = vmatmul.mubr.bf16.vlgmr.msra.gmra.mrb[20].mxu0 %v14420_v38  ;;  %5317 = vmatmul.mubr.bf16.vlgmr.msra.gmra.mrb[20].mxu1 %v14420_v38  ;;  %v11151_v38 = vld [vmem:[%s16227_s2 + $0x10c8] sm:$0xff] }
 0x34e   :  { %5721 = vmatpush1.bf16.msra.mxu0 %v11190_v59  ;;  %5762 = vmatpush1.bf16.msra.mxu1 %v11192_v60  ;;  %v11217_v11 = vcombine.high %v11151_v38, %v11155_v7  ;;  %v11216_v17 = vcombine.low %v11151_v38, %v11155_v7  ;;  %v11137_v59 = vld [vmem:[%s16227_s2 + $0x1058] sm:$0xff]  ;;  %v11152_v7 = vld [vmem:[%s16227_s2 + $0x10d0] sm:$0xff] }
 0x34f   :  { %5722 = vmatprep.subr.bf16.mxu0 %v11199_v61  ;;  %5763 = vmatprep.subr.bf16.mxu1 %v11201_v62  ;;  %v11141_v60 = vld [vmem:[%s16227_s2 + $0x1078] sm:$0xff]  ;;  %v11194_v61 = vcombine.low %v11128_v48, %v11132_v49  ;;  %v11196_v62 = vcombine.low %v11129_v50, %v11133_v51  ;;  %v11254_v51 = vld [vmem:[%s16227_s2 + $0x1200] sm:$0xff] }
 0x350   :  { %5752 = vmatprep.mubr.bf16.mxu0 %v12591_v29  ;;  %5793 = vmatprep.mubr.bf16.mxu1 %v12591_v29  ;;  %v11205_v0 = vcombine.high %v11137_v59, %v11141_v60  ;;  %v11204_v5 = vcombine.low %v11137_v59, %v11141_v60  ;;  %v11262_v59 = vld [vmem:[%s16227_s2 + $0x1240] sm:$0xff] }
 0x351   :  { %v11266_v60 = vld [vmem:[%s16227_s2 + $0x1260] sm:$0xff] }
 0x352   :  { %5723 = vmatpush1.bf16.msra.mxu0 %v11198_v2  ;;  %5764 = vmatpush1.bf16.msra.mxu1 %v11200_v27  ;;  %v11148_v2 = vld [vmem:[%s16227_s2 + $0x10b0] sm:$0xff]  ;;  %v11145_v27 = vld [vmem:[%s16227_s2 + $0x1098] sm:$0xff] }
 0x353   :  { %5724 = vmatprep.subr.bf16.mxu0 %v11207_v3  ;;  %5765 = vmatprep.subr.bf16.mxu1 %v11209_v4  ;;  %v11149_v3 = vld [vmem:[%s16227_s2 + $0x10b8] sm:$0xff]  ;;  %v11202_v4 = vcombine.low %v11136_v57, %v11140_v58  ;;  %v11211_v6 = vcombine.high %v11144_v1, %v11148_v2 }
 0x354   :  { %v11213_v38 = vcombine.high %v11145_v27, %v11149_v3  ;;  %v11212_v12 = vcombine.low %v11145_v27, %v11149_v3  ;;  %v11270_v27 = vld [vmem:[%s16227_s2 + $0x1280] sm:$0xff] }
 0x355   :  { %v11274_v3 = vld [vmem:[%s16227_s2 + $0x12a0] sm:$0xff] }
 0x356   :  { %5725 = vmatpush1.bf16.msra.mxu0 %v11206_v8  ;;  %5766 = vmatpush1.bf16.msra.mxu1 %v11208_v9  ;;  %v11156_v8 = vld [vmem:[%s16227_s2 + $0x10f0] sm:$0xff]  ;;  %v11153_v9 = vld [vmem:[%s16227_s2 + $0x10d8] sm:$0xff] }
 0x357   :  { %5726 = vmatprep.subr.bf16.mxu0 %v11215_v10  ;;  %5767 = vmatprep.subr.bf16.mxu1 %v11217_v11  ;;  %v11157_v10 = vld [vmem:[%s16227_s2 + $0x10f8] sm:$0xff]  ;;  %v11210_v11 = vcombine.low %v11144_v1, %v11148_v2  ;;  %v11219_v13 = vcombine.high %v11152_v7, %v11156_v8  ;;  %v11327_v1 = vcombine.high %v11262_v59, %v11266_v60 }
 0x358   :  { %v11221_v14 = vcombine.high %v11153_v9, %v11157_v10  ;;  %v11220_v20 = vcombine.low %v11153_v9, %v11157_v10  ;;  %v11278_v9 = vld [vmem:[%s16227_s2 + $0x12c0] sm:$0xff] }
 0x359   :  { %v11282_v10 = vld [vmem:[%s16227_s2 + $0x12e0] sm:$0xff] }
 0x35a   :  { %5727 = vmatpush1.bf16.msra.mxu0 %v11214_v16  ;;  %5768 = vmatpush1.bf16.msra.mxu1 %v11216_v17  ;;  %v11164_v16 = vld [vmem:[%s16227_s2 + $0x1130] sm:$0xff]  ;;  %v11161_v17 = vld [vmem:[%s16227_s2 + $0x1118] sm:$0xff] }
 0x35b   :  { %5728 = vmatprep.subr.bf16.mxu0 %v11223_v18  ;;  %5769 = vmatprep.subr.bf16.mxu1 %v11225_v19  ;;  %v11165_v18 = vld [vmem:[%s16227_s2 + $0x1138] sm:$0xff]  ;;  %v11218_v19 = vcombine.low %v11152_v7, %v11156_v8  ;;  %v11227_v21 = vcombine.high %v11160_v15, %v11164_v16  ;;  %v11335_v7 = vcombine.high %v11270_v27, %v11274_v3 }
 0x35c   :  { %v11229_v22 = vcombine.high %v11161_v17, %v11165_v18  ;;  %v11228_v32 = vcombine.low %v11161_v17, %v11165_v18  ;;  %v11290_v17 = vld [vmem:[%s16227_s2 + $0x1320] sm:$0xff]  ;;  %v11287_v18 = vld [vmem:[%s16227_s2 + $0x1308] sm:$0xff] }
 0x35e   :  { %5729 = vmatpush1.bf16.msra.mxu0 %v11222_v24  ;;  %5770 = vmatpush1.bf16.msra.mxu1 %v11224_v25  ;;  %v11172_v24 = vld [vmem:[%s16227_s2 + $0x1170] sm:$0xff]  ;;  %v11169_v25 = vld [vmem:[%s16227_s2 + $0x1158] sm:$0xff] }
 0x35f   :  { %5730 = vmatprep.subr.bf16.mxu0 %v11231_v26  ;;  %5771 = vmatprep.subr.bf16.mxu1 %v11233_v28  ;;  %v11173_v26 = vld [vmem:[%s16227_s2 + $0x1178] sm:$0xff]  ;;  %v11226_v28 = vcombine.low %v11160_v15, %v11164_v16  ;;  %v11235_v33 = vcombine.high %v11168_v23, %v11172_v24  ;;  %v11286_v16 = vld [vmem:[%s16227_s2 + $0x1300] sm:$0xff] }
 0x360   :  { %v11237_v37 = vcombine.high %v11169_v25, %v11173_v26  ;;  %v11236_v46 = vcombine.low %v11169_v25, %v11173_v26  ;;  %v11298_v25 = vld [vmem:[%s16227_s2 + $0x1360] sm:$0xff]  ;;  %v11295_v26 = vld [vmem:[%s16227_s2 + $0x1348] sm:$0xff] }
 0x362   :  { %5731 = vmatpush1.bf16.msra.mxu0 %v11230_v41  ;;  %5772 = vmatpush1.bf16.msra.mxu1 %v11232_v42  ;;  %v11180_v41 = vld [vmem:[%s16227_s2 + $0x11b0] sm:$0xff]  ;;  %v11177_v42 = vld [vmem:[%s16227_s2 + $0x1198] sm:$0xff] }
 0x363   :  { %5732 = vmatprep.subr.bf16.mxu0 %v11239_v43  ;;  %5773 = vmatprep.subr.bf16.mxu1 %v11241_v45  ;;  %v11181_v43 = vld [vmem:[%s16227_s2 + $0x11b8] sm:$0xff]  ;;  %v11234_v45 = vcombine.low %v11168_v23, %v11172_v24  ;;  %v11243_v30 = vcombine.high %v11176_v40, %v11180_v41  ;;  %v11294_v24 = vld [vmem:[%s16227_s2 + $0x1340] sm:$0xff] }
 0x364   :  { %v11245_v31 = vcombine.high %v11177_v42, %v11181_v43  ;;  %v11244_v48 = vcombine.low %v11177_v42, %v11181_v43  ;;  %v11306_v42 = vld [vmem:[%s16227_s2 + $0x13a0] sm:$0xff]  ;;  %v11303_v43 = vld [vmem:[%s16227_s2 + $0x1388] sm:$0xff] }
 0x366   :  { %5733 = vmatpush1.bf16.msra.mxu0 %v11238_v35  ;;  %5774 = vmatpush1.bf16.msra.mxu1 %v11240_v36  ;;  %v11188_v35 = vld [vmem:[%s16227_s2 + $0x11f0] sm:$0xff]  ;;  %v11185_v36 = vld [vmem:[%s16227_s2 + $0x11d8] sm:$0xff] }
 0x367   :  { %5734 = vmatprep.subr.bf16.mxu0 %v11247_v39  ;;  %5775 = vmatprep.subr.bf16.mxu1 %v11249_v47  ;;  %v11189_v39 = vld [vmem:[%s16227_s2 + $0x11f8] sm:$0xff]  ;;  %v11242_v47 = vcombine.low %v11176_v40, %v11180_v41  ;;  %v11251_v49 = vcombine.high %v11184_v34, %v11188_v35  ;;  %v11302_v41 = vld [vmem:[%s16227_s2 + $0x1380] sm:$0xff] }
 0x368   :  { %v11253_v50 = vcombine.high %v11185_v36, %v11189_v39 }
 0x36a   :  { %5735 = vmatpush1.bf16.msra.mxu0 %v11246_v52  ;;  %5776 = vmatpush1.bf16.msra.mxu1 %v11248_v53  ;;  %v11258_v52 = vld [vmem:[%s16227_s2 + $0x1220] sm:$0xff]  ;;  %v11255_v53 = vld [vmem:[%s16227_s2 + $0x1208] sm:$0xff] }
 0x36b   :  { %5802 = vmatprep.subr.bf16.mxu0 %v11195_v55  ;;  %5843 = vmatprep.subr.bf16.mxu1 %v11197_v56  ;;  %v11250_v55 = vcombine.low %v11184_v34, %v11188_v35  ;;  %v11252_v56 = vcombine.low %v11185_v36, %v11189_v39  ;;  %v11319_v57 = vcombine.high %v11254_v51, %v11258_v52  ;;  %v11310_v35 = vld [vmem:[%s16227_s2 + $0x13c0] sm:$0xff]  ;;  %v11311_v39 = vld [vmem:[%s16227_s2 + $0x13c8] sm:$0xff] }
 0x36c   :  { %v11321_v58 = vcombine.high %v11255_v53, %v11259_v54  ;;  %v11314_v36 = vld [vmem:[%s16227_s2 + $0x13e0] sm:$0xff] }
 0x36d   :  { %5753 = vmatmul.mubr.bf16.vlgmr.msra.gmra.mrb[16].mxu0 %v14622_v44  ;;  %5794 = vmatmul.mubr.bf16.vlgmr.msra.gmra.mrb[16].mxu1 %v14622_v44 }
 0x36e   :  { %5803 = vmatpush1.bf16.msra.mxu0 %v11194_v61  ;;  %5844 = vmatpush1.bf16.msra.mxu1 %v11196_v62  ;;  %v11263_v61 = vld [vmem:[%s16227_s2 + $0x1248] sm:$0xff] }
 0x36f   :  { %5804 = vmatprep.subr.bf16.mxu0 %v11203_v63  ;;  %5845 = vmatprep.subr.bf16.mxu1 %v11205_v0  ;;  %v11267_v62 = vld [vmem:[%s16227_s2 + $0x1268] sm:$0xff]  ;;  %v11318_v63 = vcombine.low %v11254_v51, %v11258_v52  ;;  %v11320_v0 = vcombine.low %v11255_v53, %v11259_v54  ;;  %v11256_v52 = vld [vmem:[%s16227_s2 + $0x1210] sm:$0xff]  ;;  %v11257_v54 = vld [vmem:[%s16227_s2 + $0x1218] sm:$0xff] }
 0x370   :  { %5834 = vmatprep.mubr.bf16.mxu0 %v12591_v29  ;;  %5875 = vmatprep.mubr.bf16.mxu1 %v12591_v29  ;;  %v11329_v2 = vcombine.high %v11263_v61, %v11267_v62  ;;  %v11260_v53 = vld [vmem:[%s16227_s2 + $0x1230] sm:$0xff] }
 0x372   :  { %5805 = vmatpush1.bf16.msra.mxu0 %v11202_v4  ;;  %5846 = vmatpush1.bf16.msra.mxu1 %v11204_v5  ;;  %v11271_v4 = vld [vmem:[%s16227_s2 + $0x1288] sm:$0xff] }
 0x373   :  { %5806 = vmatprep.subr.bf16.mxu0 %v11211_v6  ;;  %5847 = vmatprep.subr.bf16.mxu1 %v11213_v38  ;;  %v11275_v5 = vld [vmem:[%s16227_s2 + $0x12a8] sm:$0xff]  ;;  %v11326_v6 = vcombine.low %v11262_v59, %v11266_v60  ;;  %v11328_v38 = vcombine.low %v11263_v61, %v11267_v62  ;;  %v11323_v59 = vcombine.high %v11256_v52, %v11260_v53  ;;  %v11264_v61 = vld [vmem:[%s16227_s2 + $0x1250] sm:$0xff] }
 0x374   :  { %v11337_v8 = vcombine.high %v11271_v4, %v11275_v5  ;;  %v11268_v62 = vld [vmem:[%s16227_s2 + $0x1270] sm:$0xff] }
 0x376   :  { %5807 = vmatpush1.bf16.msra.mxu0 %v11210_v11  ;;  %5848 = vmatpush1.bf16.msra.mxu1 %v11212_v12  ;;  %v11283_v11 = vld [vmem:[%s16227_s2 + $0x12e8] sm:$0xff]  ;;  %v11334_v12 = vcombine.low %v11270_v27, %v11274_v3  ;;  %v11331_v3 = vcombine.high %v11264_v61, %v11268_v62 }
 0x377   :  { %5808 = vmatprep.subr.bf16.mxu0 %v11219_v13  ;;  %5849 = vmatprep.subr.bf16.mxu1 %v11221_v14  ;;  %v11336_v13 = vcombine.low %v11271_v4, %v11275_v5  ;;  %v11343_v14 = vcombine.high %v11278_v9, %v11282_v10  ;;  %v11272_v5 = vld [vmem:[%s16227_s2 + $0x1290] sm:$0xff] }
 0x37a   :  { %5809 = vmatpush1.bf16.msra.mxu0 %v11218_v19  ;;  %5850 = vmatpush1.bf16.msra.mxu1 %v11220_v20  ;;  %v11291_v19 = vld [vmem:[%s16227_s2 + $0x1328] sm:$0xff]  ;;  %v11342_v20 = vcombine.low %v11278_v9, %v11282_v10 }
 0x37b   :  { %5810 = vmatprep.subr.bf16.mxu0 %v11227_v21  ;;  %5851 = vmatprep.subr.bf16.mxu1 %v11229_v22  ;;  %v11351_v22 = vcombine.high %v11286_v16, %v11290_v17  ;;  %v11353_v23 = vcombine.high %v11287_v18, %v11291_v19 }
 0x37e   :  { %5811 = vmatpush1.bf16.msra.mxu0 %v11226_v28  ;;  %5852 = vmatpush1.bf16.msra.mxu1 %v11228_v32  ;;  %v11299_v28 = vld [vmem:[%s16227_s2 + $0x1368] sm:$0xff]  ;;  %v11350_v32 = vcombine.low %v11286_v16, %v11290_v17 }
 0x37f   :  { %5812 = vmatprep.subr.bf16.mxu0 %v11235_v33  ;;  %5853 = vmatprep.subr.bf16.mxu1 %v11237_v37  ;;  %v11352_v33 = vcombine.low %v11287_v18, %v11291_v19  ;;  %v11359_v37 = vcombine.high %v11294_v24, %v11298_v25  ;;  %v11361_v40 = vcombine.high %v11295_v26, %v11299_v28  ;;  %v11288_v19 = vld [vmem:[%s16227_s2 + $0x1310] sm:$0xff] }
 0x382   :  { %5813 = vmatpush1.bf16.msra.mxu0 %v11234_v45  ;;  %5854 = vmatpush1.bf16.msra.mxu1 %v11236_v46  ;;  %v11307_v45 = vld [vmem:[%s16227_s2 + $0x13a8] sm:$0xff]  ;;  %v11358_v46 = vcombine.low %v11294_v24, %v11298_v25 }
 0x383   :  { %5814 = vmatprep.subr.bf16.mxu0 %v11243_v30  ;;  %5855 = vmatprep.subr.bf16.mxu1 %v11245_v31  ;;  %v11360_v30 = vcombine.low %v11295_v26, %v11299_v28  ;;  %v11367_v31 = vcombine.high %v11302_v41, %v11306_v42  ;;  %v11369_v34 = vcombine.high %v11303_v43, %v11307_v45  ;;  %v11296_v28 = vld [vmem:[%s16227_s2 + $0x1350] sm:$0xff] }
 0x386   :  { %5815 = vmatpush1.bf16.msra.mxu0 %v11242_v47  ;;  %5856 = vmatpush1.bf16.msra.mxu1 %v11244_v48  ;;  %v11315_v47 = vld [vmem:[%s16227_s2 + $0x13e8] sm:$0xff]  ;;  %v11366_v48 = vcombine.low %v11302_v41, %v11306_v42 }
 0x387   :  { %5816 = vmatprep.subr.bf16.mxu0 %v11251_v49  ;;  %5857 = vmatprep.subr.bf16.mxu1 %v11253_v50  ;;  %v11368_v49 = vcombine.low %v11303_v43, %v11307_v45  ;;  %v11375_v50 = vcombine.high %v11310_v35, %v11314_v36  ;;  %v11377_v51 = vcombine.high %v11311_v39, %v11315_v47  ;;  %v11304_v45 = vld [vmem:[%s16227_s2 + $0x1390] sm:$0xff] }
 0x38a   :  { %5817 = vmatpush1.bf16.msra.mxu0 %v11250_v55  ;;  %5858 = vmatpush1.bf16.msra.mxu1 %v11252_v56  ;;  %v11261_v55 = vld [vmem:[%s16227_s2 + $0x1238] sm:$0xff]  ;;  %v11374_v56 = vcombine.low %v11310_v35, %v11314_v36 }
 0x38b   :  { %6279 = vmatprep.subr.bf16.mxu0 %v11319_v57  ;;  %6320 = vmatprep.subr.bf16.mxu1 %v11321_v58  ;;  %v11376_v57 = vcombine.low %v11311_v39, %v11315_v47  ;;  %v5892_v58 = vld [vmem:[#allocation2 + $0x12] sm:$0x3]  ;;  %v11325_v60 = vcombine.high %v11257_v54, %v11261_v55 }
 0x38c   :  { %v14824_v27 = vpack.c.bf16 %v5892_v58, %v5892_v58  ;;  %v11312_v47 = vld [vmem:[%s16227_s2 + $0x13d0] sm:$0xff]  ;;  %v11387_v58 = vld [vmem:[%s16227_s2 + $0x1428] sm:$0xff] }
 0x38d   :  { %5835 = vmatmul.mubr.bf16.vlgmr.msra.gmra.mrb[20].mxu0 %v14622_v44  ;;  %5876 = vmatmul.mubr.bf16.vlgmr.msra.gmra.mrb[20].mxu1 %v14622_v44  ;;  %v11279_v44 = vld [vmem:[%s16227_s2 + $0x12c8] sm:$0xff] }
 0x38e   :  { %6280 = vmatpush1.bf16.msra.mxu0 %v11318_v63  ;;  %6321 = vmatpush1.bf16.msra.mxu1 %v11320_v0  ;;  %v11345_v15 = vcombine.high %v11279_v44, %v11283_v11  ;;  %v11344_v21 = vcombine.low %v11279_v44, %v11283_v11  ;;  %v11265_v63 = vld [vmem:[%s16227_s2 + $0x1258] sm:$0xff]  ;;  %v11280_v11 = vld [vmem:[%s16227_s2 + $0x12d0] sm:$0xff] }
 0x38f   :  { %6281 = vmatprep.subr.bf16.mxu0 %v11327_v1  ;;  %6322 = vmatprep.subr.bf16.mxu1 %v11329_v2  ;;  %v11269_v0 = vld [vmem:[%s16227_s2 + $0x1278] sm:$0xff]  ;;  %v11322_v1 = vcombine.low %v11256_v52, %v11260_v53  ;;  %v11324_v2 = vcombine.low %v11257_v54, %v11261_v55  ;;  %v11382_v55 = vld [vmem:[%s16227_s2 + $0x1400] sm:$0xff] }
 0x390   :  { %6311 = vmatprep.mubr.bf16.mxu0 %v12591_v29  ;;  %6352 = vmatprep.mubr.bf16.mxu1 %v12591_v29  ;;  %v11333_v4 = vcombine.high %v11265_v63, %v11269_v0  ;;  %v11332_v9 = vcombine.low %v11265_v63, %v11269_v0  ;;  %v11390_v63 = vld [vmem:[%s16227_s2 + $0x1440] sm:$0xff] }
 0x391   :  { %v11394_v0 = vld [vmem:[%s16227_s2 + $0x1460] sm:$0xff] }
 0x392   :  { %6282 = vmatpush1.bf16.msra.mxu0 %v11326_v6  ;;  %6323 = vmatpush1.bf16.msra.mxu1 %v11328_v38  ;;  %v11276_v6 = vld [vmem:[%s16227_s2 + $0x12b0] sm:$0xff]  ;;  %v11273_v38 = vld [vmem:[%s16227_s2 + $0x1298] sm:$0xff] }
 0x393   :  { %6283 = vmatprep.subr.bf16.mxu0 %v11335_v7  ;;  %6324 = vmatprep.subr.bf16.mxu1 %v11337_v8  ;;  %v11277_v7 = vld [vmem:[%s16227_s2 + $0x12b8] sm:$0xff]  ;;  %v11330_v8 = vcombine.low %v11264_v61, %v11268_v62  ;;  %v11339_v10 = vcombine.high %v11272_v5, %v11276_v6 }
 0x394   :  { %v11341_v44 = vcombine.high %v11273_v38, %v11277_v7  ;;  %v11340_v16 = vcombine.low %v11273_v38, %v11277_v7  ;;  %v11398_v38 = vld [vmem:[%s16227_s2 + $0x1480] sm:$0xff] }
 0x395   :  { %v11402_v7 = vld [vmem:[%s16227_s2 + $0x14a0] sm:$0xff] }
 0x396   :  { %6284 = vmatpush1.bf16.msra.mxu0 %v11334_v12  ;;  %6325 = vmatpush1.bf16.msra.mxu1 %v11336_v13  ;;  %v11284_v12 = vld [vmem:[%s16227_s2 + $0x12f0] sm:$0xff]  ;;  %v11281_v13 = vld [vmem:[%s16227_s2 + $0x12d8] sm:$0xff] }
 0x397   :  { %6285 = vmatprep.subr.bf16.mxu0 %v11343_v14  ;;  %6326 = vmatprep.subr.bf16.mxu1 %v11345_v15  ;;  %v11285_v14 = vld [vmem:[%s16227_s2 + $0x12f8] sm:$0xff]  ;;  %v11338_v15 = vcombine.low %v11272_v5, %v11276_v6  ;;  %v11347_v17 = vcombine.high %v11280_v11, %v11284_v12  ;;  %v11455_v5 = vcombine.high %v11390_v63, %v11394_v0 }
 0x398   :  { %v11349_v18 = vcombine.high %v11281_v13, %v11285_v14  ;;  %v11348_v24 = vcombine.low %v11281_v13, %v11285_v14  ;;  %v11406_v13 = vld [vmem:[%s16227_s2 + $0x14c0] sm:$0xff] }
 0x399   :  { %v11410_v14 = vld [vmem:[%s16227_s2 + $0x14e0] sm:$0xff] }
 0x39a   :  { %6286 = vmatpush1.bf16.msra.mxu0 %v11342_v20  ;;  %6327 = vmatpush1.bf16.msra.mxu1 %v11344_v21  ;;  %v11292_v20 = vld [vmem:[%s16227_s2 + $0x1330] sm:$0xff]  ;;  %v11289_v21 = vld [vmem:[%s16227_s2 + $0x1318] sm:$0xff] }
 0x39b   :  { %6287 = vmatprep.subr.bf16.mxu0 %v11351_v22  ;;  %6328 = vmatprep.subr.bf16.mxu1 %v11353_v23  ;;  %v11293_v22 = vld [vmem:[%s16227_s2 + $0x1338] sm:$0xff]  ;;  %v11346_v23 = vcombine.low %v11280_v11, %v11284_v12  ;;  %v11355_v25 = vcombine.high %v11288_v19, %v11292_v20  ;;  %v11463_v11 = vcombine.high %v11398_v38, %v11402_v7 }
 0x39c   :  { %v11357_v26 = vcombine.high %v11289_v21, %v11293_v22  ;;  %v11356_v41 = vcombine.low %v11289_v21, %v11293_v22  ;;  %v11418_v21 = vld [vmem:[%s16227_s2 + $0x1520] sm:$0xff]  ;;  %v11415_v22 = vld [vmem:[%s16227_s2 + $0x1508] sm:$0xff] }
 0x39e   :  { %6288 = vmatpush1.bf16.msra.mxu0 %v11350_v32  ;;  %6329 = vmatpush1.bf16.msra.mxu1 %v11352_v33  ;;  %v11300_v32 = vld [vmem:[%s16227_s2 + $0x1370] sm:$0xff]  ;;  %v11297_v33 = vld [vmem:[%s16227_s2 + $0x1358] sm:$0xff] }
 0x39f   :  { %6289 = vmatprep.subr.bf16.mxu0 %v11359_v37  ;;  %6330 = vmatprep.subr.bf16.mxu1 %v11361_v40  ;;  %v11301_v37 = vld [vmem:[%s16227_s2 + $0x1378] sm:$0xff]  ;;  %v11354_v40 = vcombine.low %v11288_v19, %v11292_v20  ;;  %v11363_v42 = vcombine.high %v11296_v28, %v11300_v32  ;;  %v11414_v20 = vld [vmem:[%s16227_s2 + $0x1500] sm:$0xff] }
 0x3a0   :  { %v11365_v43 = vcombine.high %v11297_v33, %v11301_v37  ;;  %v11364_v35 = vcombine.low %v11297_v33, %v11301_v37  ;;  %v11426_v33 = vld [vmem:[%s16227_s2 + $0x1560] sm:$0xff]  ;;  %v11423_v37 = vld [vmem:[%s16227_s2 + $0x1548] sm:$0xff] }
 0x3a2   :  { %6290 = vmatpush1.bf16.msra.mxu0 %v11358_v46  ;;  %6331 = vmatpush1.bf16.msra.mxu1 %v11360_v30  ;;  %v11308_v46 = vld [vmem:[%s16227_s2 + $0x13b0] sm:$0xff]  ;;  %v11305_v30 = vld [vmem:[%s16227_s2 + $0x1398] sm:$0xff] }
 0x3a3   :  { %6291 = vmatprep.subr.bf16.mxu0 %v11367_v31  ;;  %6332 = vmatprep.subr.bf16.mxu1 %v11369_v34  ;;  %v11309_v31 = vld [vmem:[%s16227_s2 + $0x13b8] sm:$0xff]  ;;  %v11362_v34 = vcombine.low %v11296_v28, %v11300_v32  ;;  %v11371_v36 = vcombine.high %v11304_v45, %v11308_v46  ;;  %v11422_v32 = vld [vmem:[%s16227_s2 + $0x1540] sm:$0xff] }
 0x3a4   :  { %v11373_v39 = vcombine.high %v11305_v30, %v11309_v31  ;;  %v11372_v52 = vcombine.low %v11305_v30, %v11309_v31  ;;  %v11434_v30 = vld [vmem:[%s16227_s2 + $0x15a0] sm:$0xff]  ;;  %v11431_v31 = vld [vmem:[%s16227_s2 + $0x1588] sm:$0xff] }
 0x3a6   :  { %6292 = vmatpush1.bf16.msra.mxu0 %v11366_v48  ;;  %6333 = vmatpush1.bf16.msra.mxu1 %v11368_v49  ;;  %v11316_v48 = vld [vmem:[%s16227_s2 + $0x13f0] sm:$0xff]  ;;  %v11313_v49 = vld [vmem:[%s16227_s2 + $0x13d8] sm:$0xff] }
 0x3a7   :  { %6293 = vmatprep.subr.bf16.mxu0 %v11375_v50  ;;  %6334 = vmatprep.subr.bf16.mxu1 %v11377_v51  ;;  %v11317_v50 = vld [vmem:[%s16227_s2 + $0x13f8] sm:$0xff]  ;;  %v11370_v51 = vcombine.low %v11304_v45, %v11308_v46  ;;  %v11379_v53 = vcombine.high %v11312_v47, %v11316_v48  ;;  %v11430_v46 = vld [vmem:[%s16227_s2 + $0x1580] sm:$0xff] }
 0x3a8   :  { %v11381_v54 = vcombine.high %v11313_v49, %v11317_v50 }
 0x3aa   :  { %6294 = vmatpush1.bf16.msra.mxu0 %v11374_v56  ;;  %6335 = vmatpush1.bf16.msra.mxu1 %v11376_v57  ;;  %v11386_v56 = vld [vmem:[%s16227_s2 + $0x1420] sm:$0xff]  ;;  %v11383_v57 = vld [vmem:[%s16227_s2 + $0x1408] sm:$0xff] }
 0x3ab   :  { %6361 = vmatprep.subr.bf16.mxu0 %v11323_v59  ;;  %6402 = vmatprep.subr.bf16.mxu1 %v11325_v60  ;;  %v11378_v59 = vcombine.low %v11312_v47, %v11316_v48  ;;  %v11380_v60 = vcombine.low %v11313_v49, %v11317_v50  ;;  %v11447_v61 = vcombine.high %v11382_v55, %v11386_v56  ;;  %v11438_v48 = vld [vmem:[%s16227_s2 + $0x15c0] sm:$0xff]  ;;  %v11439_v50 = vld [vmem:[%s16227_s2 + $0x15c8] sm:$0xff] }
 0x3ac   :  { %v11449_v62 = vcombine.high %v11383_v57, %v11387_v58  ;;  %v11442_v49 = vld [vmem:[%s16227_s2 + $0x15e0] sm:$0xff] }
 0x3ad   :  { %6312 = vmatmul.mubr.bf16.vlgmr.msra.gmra.mrb[16].mxu0 %v14824_v27  ;;  %6353 = vmatmul.mubr.bf16.vlgmr.msra.gmra.mrb[16].mxu1 %v14824_v27 }
 0x3ae   :  { %6362 = vmatpush1.bf16.msra.mxu0 %v11322_v1  ;;  %6403 = vmatpush1.bf16.msra.mxu1 %v11324_v2  ;;  %v11391_v1 = vld [vmem:[%s16227_s2 + $0x1448] sm:$0xff] }
 0x3af   :  { %6363 = vmatprep.subr.bf16.mxu0 %v11331_v3  ;;  %6404 = vmatprep.subr.bf16.mxu1 %v11333_v4  ;;  %v11395_v2 = vld [vmem:[%s16227_s2 + $0x1468] sm:$0xff]  ;;  %v11446_v3 = vcombine.low %v11382_v55, %v11386_v56  ;;  %v11448_v4 = vcombine.low %v11383_v57, %v11387_v58  ;;  %v11384_v56 = vld [vmem:[%s16227_s2 + $0x1410] sm:$0xff]  ;;  %v11385_v58 = vld [vmem:[%s16227_s2 + $0x1418] sm:$0xff] }
 0x3b0   :  { %6393 = vmatprep.mubr.bf16.mxu0 %v12591_v29  ;;  %6434 = vmatprep.mubr.bf16.mxu1 %v12591_v29  ;;  %v11457_v6 = vcombine.high %v11391_v1, %v11395_v2  ;;  %v11388_v57 = vld [vmem:[%s16227_s2 + $0x1430] sm:$0xff] }
 0x3b2   :  { %6364 = vmatpush1.bf16.msra.mxu0 %v11330_v8  ;;  %6405 = vmatpush1.bf16.msra.mxu1 %v11332_v9  ;;  %v11399_v8 = vld [vmem:[%s16227_s2 + $0x1488] sm:$0xff] }
 0x3b3   :  { %6365 = vmatprep.subr.bf16.mxu0 %v11339_v10  ;;  %6406 = vmatprep.subr.bf16.mxu1 %v11341_v44  ;;  %v11403_v9 = vld [vmem:[%s16227_s2 + $0x14a8] sm:$0xff]  ;;  %v11454_v10 = vcombine.low %v11390_v63, %v11394_v0  ;;  %v11456_v44 = vcombine.low %v11391_v1, %v11395_v2  ;;  %v11451_v63 = vcombine.high %v11384_v56, %v11388_v57  ;;  %v11392_v1 = vld [vmem:[%s16227_s2 + $0x1450] sm:$0xff] }
 0x3b4   :  { %v11465_v12 = vcombine.high %v11399_v8, %v11403_v9  ;;  %v11396_v2 = vld [vmem:[%s16227_s2 + $0x1470] sm:$0xff] }
 0x3b6   :  { %6366 = vmatpush1.bf16.msra.mxu0 %v11338_v15  ;;  %6407 = vmatpush1.bf16.msra.mxu1 %v11340_v16  ;;  %v11411_v15 = vld [vmem:[%s16227_s2 + $0x14e8] sm:$0xff]  ;;  %v11462_v16 = vcombine.low %v11398_v38, %v11402_v7  ;;  %v11459_v7 = vcombine.high %v11392_v1, %v11396_v2 }
 0x3b7   :  { %6367 = vmatprep.subr.bf16.mxu0 %v11347_v17  ;;  %6408 = vmatprep.subr.bf16.mxu1 %v11349_v18  ;;  %v11464_v17 = vcombine.low %v11399_v8, %v11403_v9  ;;  %v11471_v18 = vcombine.high %v11406_v13, %v11410_v14  ;;  %v11400_v9 = vld [vmem:[%s16227_s2 + $0x1490] sm:$0xff] }
 0x3ba   :  { %6368 = vmatpush1.bf16.msra.mxu0 %v11346_v23  ;;  %6409 = vmatpush1.bf16.msra.mxu1 %v11348_v24  ;;  %v11419_v23 = vld [vmem:[%s16227_s2 + $0x1528] sm:$0xff]  ;;  %v11470_v24 = vcombine.low %v11406_v13, %v11410_v14 }
 0x3bb   :  { %6369 = vmatprep.subr.bf16.mxu0 %v11355_v25  ;;  %6410 = vmatprep.subr.bf16.mxu1 %v11357_v26  ;;  %v11479_v26 = vcombine.high %v11414_v20, %v11418_v21  ;;  %v11481_v28 = vcombine.high %v11415_v22, %v11419_v23 }
 0x3be   :  { %6370 = vmatpush1.bf16.msra.mxu0 %v11354_v40  ;;  %6411 = vmatpush1.bf16.msra.mxu1 %v11356_v41  ;;  %v11427_v40 = vld [vmem:[%s16227_s2 + $0x1568] sm:$0xff]  ;;  %v11478_v41 = vcombine.low %v11414_v20, %v11418_v21 }
 0x3bf   :  { %6371 = vmatprep.subr.bf16.mxu0 %v11363_v42  ;;  %6412 = vmatprep.subr.bf16.mxu1 %v11365_v43  ;;  %v11480_v42 = vcombine.low %v11415_v22, %v11419_v23  ;;  %v11487_v43 = vcombine.high %v11422_v32, %v11426_v33  ;;  %v11489_v45 = vcombine.high %v11423_v37, %v11427_v40  ;;  %v11416_v23 = vld [vmem:[%s16227_s2 + $0x1510] sm:$0xff] }
 0x3c2   :  { %6372 = vmatpush1.bf16.msra.mxu0 %v11362_v34  ;;  %6413 = vmatpush1.bf16.msra.mxu1 %v11364_v35  ;;  %v11435_v34 = vld [vmem:[%s16227_s2 + $0x15a8] sm:$0xff]  ;;  %v11486_v35 = vcombine.low %v11422_v32, %v11426_v33 }
 0x3c3   :  { %6373 = vmatprep.subr.bf16.mxu0 %v11371_v36  ;;  %6414 = vmatprep.subr.bf16.mxu1 %v11373_v39  ;;  %v11488_v36 = vcombine.low %v11423_v37, %v11427_v40  ;;  %v11495_v39 = vcombine.high %v11430_v46, %v11434_v30  ;;  %v11497_v47 = vcombine.high %v11431_v31, %v11435_v34  ;;  %v11424_v40 = vld [vmem:[%s16227_s2 + $0x1550] sm:$0xff] }
 0x3c6   :  { %6374 = vmatpush1.bf16.msra.mxu0 %v11370_v51  ;;  %6415 = vmatpush1.bf16.msra.mxu1 %v11372_v52  ;;  %v11443_v51 = vld [vmem:[%s16227_s2 + $0x15e8] sm:$0xff]  ;;  %v11494_v52 = vcombine.low %v11430_v46, %v11434_v30 }
 0x3c7   :  { %6375 = vmatprep.subr.bf16.mxu0 %v11379_v53  ;;  %6416 = vmatprep.subr.bf16.mxu1 %v11381_v54  ;;  %v11496_v53 = vcombine.low %v11431_v31, %v11435_v34  ;;  %v11503_v54 = vcombine.high %v11438_v48, %v11442_v49  ;;  %v11505_v55 = vcombine.high %v11439_v50, %v11443_v51  ;;  %v11432_v34 = vld [vmem:[%s16227_s2 + $0x1590] sm:$0xff] }
 0x3ca   :  { %6376 = vmatpush1.bf16.msra.mxu0 %v11378_v59  ;;  %6417 = vmatpush1.bf16.msra.mxu1 %v11380_v60  ;;  %v11389_v59 = vld [vmem:[%s16227_s2 + $0x1438] sm:$0xff]  ;;  %v11502_v60 = vcombine.low %v11438_v48, %v11442_v49 }
 0x3cb   :  { %6838 = vmatprep.subr.bf16.mxu0 %v11447_v61  ;;  %6879 = vmatprep.subr.bf16.mxu1 %v11449_v62  ;;  %v11504_v61 = vcombine.low %v11439_v50, %v11443_v51  ;;  %v6451_v62 = vld [vmem:[#allocation2 + $0x14] sm:$0x3]  ;;  %v11453_v0 = vcombine.high %v11385_v58, %v11389_v59 }
 0x3cc   :  { %v15026_v38 = vpack.c.bf16 %v6451_v62, %v6451_v62  ;;  %v11440_v51 = vld [vmem:[%s16227_s2 + $0x15d0] sm:$0xff]  ;;  %v11515_v62 = vld [vmem:[%s16227_s2 + $0x1628] sm:$0xff] }
 0x3cd   :  { %6394 = vmatmul.mubr.bf16.vlgmr.msra.gmra.mrb[20].mxu0 %v14824_v27  ;;  %6435 = vmatmul.mubr.bf16.vlgmr.msra.gmra.mrb[20].mxu1 %v14824_v27  ;;  %v11407_v27 = vld [vmem:[%s16227_s2 + $0x14c8] sm:$0xff] }
 0x3ce   :  { %6839 = vmatpush1.bf16.msra.mxu0 %v11446_v3  ;;  %6880 = vmatpush1.bf16.msra.mxu1 %v11448_v4  ;;  %v11473_v19 = vcombine.high %v11407_v27, %v11411_v15  ;;  %v11472_v25 = vcombine.low %v11407_v27, %v11411_v15  ;;  %v11393_v3 = vld [vmem:[%s16227_s2 + $0x1458] sm:$0xff]  ;;  %v11408_v15 = vld [vmem:[%s16227_s2 + $0x14d0] sm:$0xff] }
 0x3cf   :  { %6840 = vmatprep.subr.bf16.mxu0 %v11455_v5  ;;  %6881 = vmatprep.subr.bf16.mxu1 %v11457_v6  ;;  %v11397_v4 = vld [vmem:[%s16227_s2 + $0x1478] sm:$0xff]  ;;  %v11450_v5 = vcombine.low %v11384_v56, %v11388_v57  ;;  %v11452_v6 = vcombine.low %v11385_v58, %v11389_v59  ;;  %v11510_v59 = vld [vmem:[%s16227_s2 + $0x1600] sm:$0xff] }
 0x3d0   :  { %6870 = vmatprep.mubr.bf16.mxu0 %v12591_v29  ;;  %6911 = vmatprep.mubr.bf16.mxu1 %v12591_v29  ;;  %v11461_v8 = vcombine.high %v11393_v3, %v11397_v4  ;;  %v11460_v13 = vcombine.low %v11393_v3, %v11397_v4  ;;  %v11518_v3 = vld [vmem:[%s16227_s2 + $0x1640] sm:$0xff] }
 0x3d1   :  { %v11522_v4 = vld [vmem:[%s16227_s2 + $0x1660] sm:$0xff] }
 0x3d2   :  { %6841 = vmatpush1.bf16.msra.mxu0 %v11454_v10  ;;  %6882 = vmatpush1.bf16.msra.mxu1 %v11456_v44  ;;  %v11404_v10 = vld [vmem:[%s16227_s2 + $0x14b0] sm:$0xff]  ;;  %v11401_v44 = vld [vmem:[%s16227_s2 + $0x1498] sm:$0xff] }
 0x3d3   :  { %6842 = vmatprep.subr.bf16.mxu0 %v11463_v11  ;;  %6883 = vmatprep.subr.bf16.mxu1 %v11465_v12  ;;  %v11405_v11 = vld [vmem:[%s16227_s2 + $0x14b8] sm:$0xff]  ;;  %v11458_v12 = vcombine.low %v11392_v1, %v11396_v2  ;;  %v11467_v14 = vcombine.high %v11400_v9, %v11404_v10 }
 0x3d4   :  { %v11469_v27 = vcombine.high %v11401_v44, %v11405_v11  ;;  %v11468_v20 = vcombine.low %v11401_v44, %v11405_v11  ;;  %v11526_v44 = vld [vmem:[%s16227_s2 + $0x1680] sm:$0xff] }
 0x3d5   :  { %v11530_v11 = vld [vmem:[%s16227_s2 + $0x16a0] sm:$0xff] }
 0x3d6   :  { %6843 = vmatpush1.bf16.msra.mxu0 %v11462_v16  ;;  %6884 = vmatpush1.bf16.msra.mxu1 %v11464_v17  ;;  %v11412_v16 = vld [vmem:[%s16227_s2 + $0x14f0] sm:$0xff]  ;;  %v11409_v17 = vld [vmem:[%s16227_s2 + $0x14d8] sm:$0xff] }
 0x3d7   :  { %6844 = vmatprep.subr.bf16.mxu0 %v11471_v18  ;;  %6885 = vmatprep.subr.bf16.mxu1 %v11473_v19  ;;  %v11413_v18 = vld [vmem:[%s16227_s2 + $0x14f8] sm:$0xff]  ;;  %v11466_v19 = vcombine.low %v11400_v9, %v11404_v10  ;;  %v11475_v21 = vcombine.high %v11408_v15, %v11412_v16  ;;  %v11583_v9 = vcombine.high %v11518_v3, %v11522_v4 }
 0x3d8   :  { %v11477_v22 = vcombine.high %v11409_v17, %v11413_v18  ;;  %v11476_v32 = vcombine.low %v11409_v17, %v11413_v18  ;;  %v11534_v17 = vld [vmem:[%s16227_s2 + $0x16c0] sm:$0xff] }
 0x3d9   :  { %v11538_v18 = vld [vmem:[%s16227_s2 + $0x16e0] sm:$0xff] }
 0x3da   :  { %6845 = vmatpush1.bf16.msra.mxu0 %v11470_v24  ;;  %6886 = vmatpush1.bf16.msra.mxu1 %v11472_v25  ;;  %v11420_v24 = vld [vmem:[%s16227_s2 + $0x1530] sm:$0xff]  ;;  %v11417_v25 = vld [vmem:[%s16227_s2 + $0x1518] sm:$0xff] }
 0x3db   :  { %6846 = vmatprep.subr.bf16.mxu0 %v11479_v26  ;;  %6887 = vmatprep.subr.bf16.mxu1 %v11481_v28  ;;  %v11421_v26 = vld [vmem:[%s16227_s2 + $0x1538] sm:$0xff]  ;;  %v11474_v28 = vcombine.low %v11408_v15, %v11412_v16  ;;  %v11483_v33 = vcombine.high %v11416_v23, %v11420_v24  ;;  %v11591_v15 = vcombine.high %v11526_v44, %v11530_v11 }
 0x3dc   :  { %v11485_v37 = vcombine.high %v11417_v25, %v11421_v26  ;;  %v11484_v46 = vcombine.low %v11417_v25, %v11421_v26  ;;  %v11546_v25 = vld [vmem:[%s16227_s2 + $0x1720] sm:$0xff]  ;;  %v11543_v26 = vld [vmem:[%s16227_s2 + $0x1708] sm:$0xff] }
 0x3de   :  { %6847 = vmatpush1.bf16.msra.mxu0 %v11478_v41  ;;  %6888 = vmatpush1.bf16.msra.mxu1 %v11480_v42  ;;  %v11428_v41 = vld [vmem:[%s16227_s2 + $0x1570] sm:$0xff]  ;;  %v11425_v42 = vld [vmem:[%s16227_s2 + $0x1558] sm:$0xff] }
 0x3df   :  { %6848 = vmatprep.subr.bf16.mxu0 %v11487_v43  ;;  %6889 = vmatprep.subr.bf16.mxu1 %v11489_v45  ;;  %v11429_v43 = vld [vmem:[%s16227_s2 + $0x1578] sm:$0xff]  ;;  %v11482_v45 = vcombine.low %v11416_v23, %v11420_v24  ;;  %v11491_v30 = vcombine.high %v11424_v40, %v11428_v41  ;;  %v11542_v24 = vld [vmem:[%s16227_s2 + $0x1700] sm:$0xff] }
 0x3e0   :  { %v11493_v31 = vcombine.high %v11425_v42, %v11429_v43  ;;  %v11492_v48 = vcombine.low %v11425_v42, %v11429_v43  ;;  %v11554_v42 = vld [vmem:[%s16227_s2 + $0x1760] sm:$0xff]  ;;  %v11551_v43 = vld [vmem:[%s16227_s2 + $0x1748] sm:$0xff] }
 0x3e2   :  { %6849 = vmatpush1.bf16.msra.mxu0 %v11486_v35  ;;  %6890 = vmatpush1.bf16.msra.mxu1 %v11488_v36  ;;  %v11436_v35 = vld [vmem:[%s16227_s2 + $0x15b0] sm:$0xff]  ;;  %v11433_v36 = vld [vmem:[%s16227_s2 + $0x1598] sm:$0xff] }
 0x3e3   :  { %6850 = vmatprep.subr.bf16.mxu0 %v11495_v39  ;;  %6891 = vmatprep.subr.bf16.mxu1 %v11497_v47  ;;  %v11437_v39 = vld [vmem:[%s16227_s2 + $0x15b8] sm:$0xff]  ;;  %v11490_v47 = vcombine.low %v11424_v40, %v11428_v41  ;;  %v11499_v49 = vcombine.high %v11432_v34, %v11436_v35  ;;  %v11550_v41 = vld [vmem:[%s16227_s2 + $0x1740] sm:$0xff] }
 0x3e4   :  { %v11501_v50 = vcombine.high %v11433_v36, %v11437_v39  ;;  %v11500_v56 = vcombine.low %v11433_v36, %v11437_v39  ;;  %v11562_v36 = vld [vmem:[%s16227_s2 + $0x17a0] sm:$0xff]  ;;  %v11559_v39 = vld [vmem:[%s16227_s2 + $0x1788] sm:$0xff] }
 0x3e6   :  { %6851 = vmatpush1.bf16.msra.mxu0 %v11494_v52  ;;  %6892 = vmatpush1.bf16.msra.mxu1 %v11496_v53  ;;  %v11444_v52 = vld [vmem:[%s16227_s2 + $0x15f0] sm:$0xff]  ;;  %v11441_v53 = vld [vmem:[%s16227_s2 + $0x15d8] sm:$0xff] }
 0x3e7   :  { %6852 = vmatprep.subr.bf16.mxu0 %v11503_v54  ;;  %6893 = vmatprep.subr.bf16.mxu1 %v11505_v55  ;;  %v11445_v54 = vld [vmem:[%s16227_s2 + $0x15f8] sm:$0xff]  ;;  %v11498_v55 = vcombine.low %v11432_v34, %v11436_v35  ;;  %v11507_v57 = vcombine.high %v11440_v51, %v11444_v52  ;;  %v11558_v35 = vld [vmem:[%s16227_s2 + $0x1780] sm:$0xff] }
 0x3e8   :  { %v11509_v58 = vcombine.high %v11441_v53, %v11445_v54 }
 0x3ea   :  { %6853 = vmatpush1.bf16.msra.mxu0 %v11502_v60  ;;  %6894 = vmatpush1.bf16.msra.mxu1 %v11504_v61  ;;  %v11514_v60 = vld [vmem:[%s16227_s2 + $0x1620] sm:$0xff]  ;;  %v11511_v61 = vld [vmem:[%s16227_s2 + $0x1608] sm:$0xff] }
 0x3eb   :  { %6920 = vmatprep.subr.bf16.mxu0 %v11451_v63  ;;  %6961 = vmatprep.subr.bf16.mxu1 %v11453_v0  ;;  %v11506_v63 = vcombine.low %v11440_v51, %v11444_v52  ;;  %v11508_v0 = vcombine.low %v11441_v53, %v11445_v54  ;;  %v11575_v1 = vcombine.high %v11510_v59, %v11514_v60  ;;  %v11566_v52 = vld [vmem:[%s16227_s2 + $0x17c0] sm:$0xff]  ;;  %v11567_v54 = vld [vmem:[%s16227_s2 + $0x17c8] sm:$0xff] }
 0x3ec   :  { %v11577_v2 = vcombine.high %v11511_v61, %v11515_v62  ;;  %v11570_v53 = vld [vmem:[%s16227_s2 + $0x17e0] sm:$0xff] }
 0x3ed   :  { %6871 = vmatmul.mubr.bf16.vlgmr.msra.gmra.mrb[16].mxu0 %v15026_v38  ;;  %6912 = vmatmul.mubr.bf16.vlgmr.msra.gmra.mrb[16].mxu1 %v15026_v38 }
 0x3ee   :  { %6921 = vmatpush1.bf16.msra.mxu0 %v11450_v5  ;;  %6962 = vmatpush1.bf16.msra.mxu1 %v11452_v6  ;;  %v11519_v5 = vld [vmem:[%s16227_s2 + $0x1648] sm:$0xff] }
 0x3ef   :  { %6922 = vmatprep.subr.bf16.mxu0 %v11459_v7  ;;  %6963 = vmatprep.subr.bf16.mxu1 %v11461_v8  ;;  %v11523_v6 = vld [vmem:[%s16227_s2 + $0x1668] sm:$0xff]  ;;  %v11574_v7 = vcombine.low %v11510_v59, %v11514_v60  ;;  %v11576_v8 = vcombine.low %v11511_v61, %v11515_v62  ;;  %v11512_v60 = vld [vmem:[%s16227_s2 + $0x1610] sm:$0xff]  ;;  %v11513_v62 = vld [vmem:[%s16227_s2 + $0x1618] sm:$0xff] }
 0x3f0   :  { %6952 = vmatprep.mubr.bf16.mxu0 %v12591_v29  ;;  %6993 = vmatprep.mubr.bf16.mxu1 %v12591_v29  ;;  %v11585_v10 = vcombine.high %v11519_v5, %v11523_v6  ;;  %v11516_v61 = vld [vmem:[%s16227_s2 + $0x1630] sm:$0xff] }
 0x3f2   :  { %6923 = vmatpush1.bf16.msra.mxu0 %v11458_v12  ;;  %6964 = vmatpush1.bf16.msra.mxu1 %v11460_v13  ;;  %v11527_v12 = vld [vmem:[%s16227_s2 + $0x1688] sm:$0xff] }
 0x3f3   :  { %6924 = vmatprep.subr.bf16.mxu0 %v11467_v14  ;;  %6965 = vmatprep.subr.bf16.mxu1 %v11469_v27  ;;  %v11531_v13 = vld [vmem:[%s16227_s2 + $0x16a8] sm:$0xff]  ;;  %v11582_v14 = vcombine.low %v11518_v3, %v11522_v4  ;;  %v11584_v27 = vcombine.low %v11519_v5, %v11523_v6  ;;  %v11579_v3 = vcombine.high %v11512_v60, %v11516_v61  ;;  %v11520_v5 = vld [vmem:[%s16227_s2 + $0x1650] sm:$0xff] }
 0x3f4   :  { %v11593_v16 = vcombine.high %v11527_v12, %v11531_v13  ;;  %v11524_v6 = vld [vmem:[%s16227_s2 + $0x1670] sm:$0xff] }
 0x3f6   :  { %6925 = vmatpush1.bf16.msra.mxu0 %v11466_v19  ;;  %6966 = vmatpush1.bf16.msra.mxu1 %v11468_v20  ;;  %v11539_v19 = vld [vmem:[%s16227_s2 + $0x16e8] sm:$0xff]  ;;  %v11590_v20 = vcombine.low %v11526_v44, %v11530_v11  ;;  %v11587_v11 = vcombine.high %v11520_v5, %v11524_v6 }
 0x3f7   :  { %6926 = vmatprep.subr.bf16.mxu0 %v11475_v21  ;;  %6967 = vmatprep.subr.bf16.mxu1 %v11477_v22  ;;  %v11592_v21 = vcombine.low %v11527_v12, %v11531_v13  ;;  %v11599_v22 = vcombine.high %v11534_v17, %v11538_v18  ;;  %v11528_v13 = vld [vmem:[%s16227_s2 + $0x1690] sm:$0xff] }
 0x3fa   :  { %6927 = vmatpush1.bf16.msra.mxu0 %v11474_v28  ;;  %6968 = vmatpush1.bf16.msra.mxu1 %v11476_v32  ;;  %v11547_v28 = vld [vmem:[%s16227_s2 + $0x1728] sm:$0xff]  ;;  %v11598_v32 = vcombine.low %v11534_v17, %v11538_v18 }
 0x3fb   :  { %6928 = vmatprep.subr.bf16.mxu0 %v11483_v33  ;;  %6969 = vmatprep.subr.bf16.mxu1 %v11485_v37  ;;  %v11607_v37 = vcombine.high %v11542_v24, %v11546_v25  ;;  %v11609_v40 = vcombine.high %v11543_v26, %v11547_v28 }
 0x3fe   :  { %6929 = vmatpush1.bf16.msra.mxu0 %v11482_v45  ;;  %6970 = vmatpush1.bf16.msra.mxu1 %v11484_v46  ;;  %v11555_v45 = vld [vmem:[%s16227_s2 + $0x1768] sm:$0xff]  ;;  %v11606_v46 = vcombine.low %v11542_v24, %v11546_v25 }
 0x3ff   :  { %6930 = vmatprep.subr.bf16.mxu0 %v11491_v30  ;;  %6971 = vmatprep.subr.bf16.mxu1 %v11493_v31  ;;  %v11608_v30 = vcombine.low %v11543_v26, %v11547_v28  ;;  %v11615_v31 = vcombine.high %v11550_v41, %v11554_v42  ;;  %v11617_v34 = vcombine.high %v11551_v43, %v11555_v45  ;;  %v11544_v28 = vld [vmem:[%s16227_s2 + $0x1710] sm:$0xff] }
 0x402   :  { %6931 = vmatpush1.bf16.msra.mxu0 %v11490_v47  ;;  %6972 = vmatpush1.bf16.msra.mxu1 %v11492_v48  ;;  %v11563_v47 = vld [vmem:[%s16227_s2 + $0x17a8] sm:$0xff]  ;;  %v11614_v48 = vcombine.low %v11550_v41, %v11554_v42 }
 0x403   :  { %6932 = vmatprep.subr.bf16.mxu0 %v11499_v49  ;;  %6973 = vmatprep.subr.bf16.mxu1 %v11501_v50  ;;  %v11616_v49 = vcombine.low %v11551_v43, %v11555_v45  ;;  %v11623_v50 = vcombine.high %v11558_v35, %v11562_v36  ;;  %v11625_v51 = vcombine.high %v11559_v39, %v11563_v47  ;;  %v11552_v45 = vld [vmem:[%s16227_s2 + $0x1750] sm:$0xff] }
 0x406   :  { %6933 = vmatpush1.bf16.msra.mxu0 %v11498_v55  ;;  %6974 = vmatpush1.bf16.msra.mxu1 %v11500_v56  ;;  %v11571_v55 = vld [vmem:[%s16227_s2 + $0x17e8] sm:$0xff]  ;;  %v11622_v56 = vcombine.low %v11558_v35, %v11562_v36 }
 0x407   :  { %6934 = vmatprep.subr.bf16.mxu0 %v11507_v57  ;;  %6975 = vmatprep.subr.bf16.mxu1 %v11509_v58  ;;  %v11624_v57 = vcombine.low %v11559_v39, %v11563_v47  ;;  %v11631_v58 = vcombine.high %v11566_v52, %v11570_v53  ;;  %v11633_v59 = vcombine.high %v11567_v54, %v11571_v55  ;;  %v11560_v47 = vld [vmem:[%s16227_s2 + $0x1790] sm:$0xff] }
 0x40a   :  { %6935 = vmatpush1.bf16.msra.mxu0 %v11506_v63  ;;  %6976 = vmatpush1.bf16.msra.mxu1 %v11508_v0  ;;  %v11517_v63 = vld [vmem:[%s16227_s2 + $0x1638] sm:$0xff]  ;;  %v11630_v0 = vcombine.low %v11566_v52, %v11570_v53 }
 0x40b   :  { %7397 = vmatprep.subr.bf16.mxu0 %v11575_v1  ;;  %7438 = vmatprep.subr.bf16.mxu1 %v11577_v2  ;;  %v11632_v1 = vcombine.low %v11567_v54, %v11571_v55  ;;  %v7010_v2 = vld [vmem:[#allocation2 + $0x16] sm:$0x3]  ;;  %v11581_v4 = vcombine.high %v11513_v62, %v11517_v63 }
 0x40c   :  { %v15228_v44 = vpack.c.bf16 %v7010_v2, %v7010_v2  ;;  %v11568_v55 = vld [vmem:[%s16227_s2 + $0x17d0] sm:$0xff]  ;;  %v11643_v2 = vld [vmem:[%s16227_s2 + $0x1828] sm:$0xff] }
 0x40d   :  { %6953 = vmatmul.mubr.bf16.vlgmr.msra.gmra.mrb[20].mxu0 %v15026_v38  ;;  %6994 = vmatmul.mubr.bf16.vlgmr.msra.gmra.mrb[20].mxu1 %v15026_v38  ;;  %v11535_v38 = vld [vmem:[%s16227_s2 + $0x16c8] sm:$0xff] }
 0x40e   :  { %7398 = vmatpush1.bf16.msra.mxu0 %v11574_v7  ;;  %7439 = vmatpush1.bf16.msra.mxu1 %v11576_v8  ;;  %v11601_v23 = vcombine.high %v11535_v38, %v11539_v19  ;;  %v11600_v33 = vcombine.low %v11535_v38, %v11539_v19  ;;  %v11521_v7 = vld [vmem:[%s16227_s2 + $0x1658] sm:$0xff]  ;;  %v11536_v19 = vld [vmem:[%s16227_s2 + $0x16d0] sm:$0xff] }
 0x40f   :  { %7399 = vmatprep.subr.bf16.mxu0 %v11583_v9  ;;  %7440 = vmatprep.subr.bf16.mxu1 %v11585_v10  ;;  %v11525_v8 = vld [vmem:[%s16227_s2 + $0x1678] sm:$0xff]  ;;  %v11578_v9 = vcombine.low %v11512_v60, %v11516_v61  ;;  %v11580_v10 = vcombine.low %v11513_v62, %v11517_v63  ;;  %v11638_v63 = vld [vmem:[%s16227_s2 + $0x1800] sm:$0xff] }
 0x410   :  { %7429 = vmatprep.mubr.bf16.mxu0 %v12591_v29  ;;  %7470 = vmatprep.mubr.bf16.mxu1 %v12591_v29  ;;  %v11589_v12 = vcombine.high %v11521_v7, %v11525_v8  ;;  %v11588_v17 = vcombine.low %v11521_v7, %v11525_v8  ;;  %v11646_v7 = vld [vmem:[%s16227_s2 + $0x1840] sm:$0xff] }
 0x411   :  { %v11650_v8 = vld [vmem:[%s16227_s2 + $0x1860] sm:$0xff] }
 0x412   :  { %7400 = vmatpush1.bf16.msra.mxu0 %v11582_v14  ;;  %7441 = vmatpush1.bf16.msra.mxu1 %v11584_v27  ;;  %v11532_v14 = vld [vmem:[%s16227_s2 + $0x16b0] sm:$0xff]  ;;  %v11529_v27 = vld [vmem:[%s16227_s2 + $0x1698] sm:$0xff] }
 0x413   :  { %7401 = vmatprep.subr.bf16.mxu0 %v11591_v15  ;;  %7442 = vmatprep.subr.bf16.mxu1 %v11593_v16  ;;  %v11533_v15 = vld [vmem:[%s16227_s2 + $0x16b8] sm:$0xff]  ;;  %v11586_v16 = vcombine.low %v11520_v5, %v11524_v6  ;;  %v11595_v18 = vcombine.high %v11528_v13, %v11532_v14 }
 0x414   :  { %v11597_v38 = vcombine.high %v11529_v27, %v11533_v15  ;;  %v11596_v24 = vcombine.low %v11529_v27, %v11533_v15  ;;  %v11654_v27 = vld [vmem:[%s16227_s2 + $0x1880] sm:$0xff] }
 0x415   :  { %v11658_v15 = vld [vmem:[%s16227_s2 + $0x18a0] sm:$0xff] }
 0x416   :  { %7402 = vmatpush1.bf16.msra.mxu0 %v11590_v20  ;;  %7443 = vmatpush1.bf16.msra.mxu1 %v11592_v21  ;;  %v11540_v20 = vld [vmem:[%s16227_s2 + $0x16f0] sm:$0xff]  ;;  %v11537_v21 = vld [vmem:[%s16227_s2 + $0x16d8] sm:$0xff] }
 0x417   :  { %7403 = vmatprep.subr.bf16.mxu0 %v11599_v22  ;;  %7444 = vmatprep.subr.bf16.mxu1 %v11601_v23  ;;  %v11541_v22 = vld [vmem:[%s16227_s2 + $0x16f8] sm:$0xff]  ;;  %v11594_v23 = vcombine.low %v11528_v13, %v11532_v14  ;;  %v11603_v25 = vcombine.high %v11536_v19, %v11540_v20  ;;  %v11711_v13 = vcombine.high %v11646_v7, %v11650_v8 }
 0x418   :  { %v11605_v26 = vcombine.high %v11537_v21, %v11541_v22  ;;  %v11604_v41 = vcombine.low %v11537_v21, %v11541_v22  ;;  %v11662_v21 = vld [vmem:[%s16227_s2 + $0x18c0] sm:$0xff] }
 0x419   :  { %v11666_v22 = vld [vmem:[%s16227_s2 + $0x18e0] sm:$0xff] }
 0x41a   :  { %7404 = vmatpush1.bf16.msra.mxu0 %v11598_v32  ;;  %7445 = vmatpush1.bf16.msra.mxu1 %v11600_v33  ;;  %v11548_v32 = vld [vmem:[%s16227_s2 + $0x1730] sm:$0xff]  ;;  %v11545_v33 = vld [vmem:[%s16227_s2 + $0x1718] sm:$0xff] }
 0x41b   :  { %7405 = vmatprep.subr.bf16.mxu0 %v11607_v37  ;;  %7446 = vmatprep.subr.bf16.mxu1 %v11609_v40  ;;  %v11549_v37 = vld [vmem:[%s16227_s2 + $0x1738] sm:$0xff]  ;;  %v11602_v40 = vcombine.low %v11536_v19, %v11540_v20  ;;  %v11611_v42 = vcombine.high %v11544_v28, %v11548_v32  ;;  %v11719_v19 = vcombine.high %v11654_v27, %v11658_v15 }
 0x41c   :  { %v11613_v43 = vcombine.high %v11545_v33, %v11549_v37  ;;  %v11612_v35 = vcombine.low %v11545_v33, %v11549_v37  ;;  %v11674_v33 = vld [vmem:[%s16227_s2 + $0x1920] sm:$0xff]  ;;  %v11671_v37 = vld [vmem:[%s16227_s2 + $0x1908] sm:$0xff] }
 0x41e   :  { %7406 = vmatpush1.bf16.msra.mxu0 %v11606_v46  ;;  %7447 = vmatpush1.bf16.msra.mxu1 %v11608_v30  ;;  %v11556_v46 = vld [vmem:[%s16227_s2 + $0x1770] sm:$0xff]  ;;  %v11553_v30 = vld [vmem:[%s16227_s2 + $0x1758] sm:$0xff] }
 0x41f   :  { %7407 = vmatprep.subr.bf16.mxu0 %v11615_v31  ;;  %7448 = vmatprep.subr.bf16.mxu1 %v11617_v34  ;;  %v11557_v31 = vld [vmem:[%s16227_s2 + $0x1778] sm:$0xff]  ;;  %v11610_v34 = vcombine.low %v11544_v28, %v11548_v32  ;;  %v11619_v36 = vcombine.high %v11552_v45, %v11556_v46  ;;  %v11670_v32 = vld [vmem:[%s16227_s2 + $0x1900] sm:$0xff] }
 0x420   :  { %v11621_v39 = vcombine.high %v11553_v30, %v11557_v31  ;;  %v11620_v52 = vcombine.low %v11553_v30, %v11557_v31  ;;  %v11682_v30 = vld [vmem:[%s16227_s2 + $0x1960] sm:$0xff]  ;;  %v11679_v31 = vld [vmem:[%s16227_s2 + $0x1948] sm:$0xff] }
 0x422   :  { %7408 = vmatpush1.bf16.msra.mxu0 %v11614_v48  ;;  %7449 = vmatpush1.bf16.msra.mxu1 %v11616_v49  ;;  %v11564_v48 = vld [vmem:[%s16227_s2 + $0x17b0] sm:$0xff]  ;;  %v11561_v49 = vld [vmem:[%s16227_s2 + $0x1798] sm:$0xff] }
 0x423   :  { %7409 = vmatprep.subr.bf16.mxu0 %v11623_v50  ;;  %7450 = vmatprep.subr.bf16.mxu1 %v11625_v51  ;;  %v11565_v50 = vld [vmem:[%s16227_s2 + $0x17b8] sm:$0xff]  ;;  %v11618_v51 = vcombine.low %v11552_v45, %v11556_v46  ;;  %v11627_v53 = vcombine.high %v11560_v47, %v11564_v48  ;;  %v11678_v46 = vld [vmem:[%s16227_s2 + $0x1940] sm:$0xff] }
 0x424   :  { %v11629_v54 = vcombine.high %v11561_v49, %v11565_v50  ;;  %v11628_v60 = vcombine.low %v11561_v49, %v11565_v50  ;;  %v11690_v49 = vld [vmem:[%s16227_s2 + $0x19a0] sm:$0xff]  ;;  %v11687_v50 = vld [vmem:[%s16227_s2 + $0x1988] sm:$0xff] }
 0x426   :  { %7410 = vmatpush1.bf16.msra.mxu0 %v11622_v56  ;;  %7451 = vmatpush1.bf16.msra.mxu1 %v11624_v57  ;;  %v11572_v56 = vld [vmem:[%s16227_s2 + $0x17f0] sm:$0xff]  ;;  %v11569_v57 = vld [vmem:[%s16227_s2 + $0x17d8] sm:$0xff] }
 0x427   :  { %7411 = vmatprep.subr.bf16.mxu0 %v11631_v58  ;;  %7452 = vmatprep.subr.bf16.mxu1 %v11633_v59  ;;  %v11573_v58 = vld [vmem:[%s16227_s2 + $0x17f8] sm:$0xff]  ;;  %v11626_v59 = vcombine.low %v11560_v47, %v11564_v48  ;;  %v11635_v61 = vcombine.high %v11568_v55, %v11572_v56  ;;  %v11686_v48 = vld [vmem:[%s16227_s2 + $0x1980] sm:$0xff] }
 0x428   :  { %v11637_v62 = vcombine.high %v11569_v57, %v11573_v58 }
 0x42a   :  { %7412 = vmatpush1.bf16.msra.mxu0 %v11630_v0  ;;  %7453 = vmatpush1.bf16.msra.mxu1 %v11632_v1  ;;  %v11642_v0 = vld [vmem:[%s16227_s2 + $0x1820] sm:$0xff]  ;;  %v11639_v1 = vld [vmem:[%s16227_s2 + $0x1808] sm:$0xff] }
 0x42b   :  { %7479 = vmatprep.subr.bf16.mxu0 %v11579_v3  ;;  %7520 = vmatprep.subr.bf16.mxu1 %v11581_v4  ;;  %v11634_v3 = vcombine.low %v11568_v55, %v11572_v56  ;;  %v11636_v4 = vcombine.low %v11569_v57, %v11573_v58  ;;  %v11703_v5 = vcombine.high %v11638_v63, %v11642_v0  ;;  %v11694_v56 = vld [vmem:[%s16227_s2 + $0x19c0] sm:$0xff]  ;;  %v11695_v58 = vld [vmem:[%s16227_s2 + $0x19c8] sm:$0xff] }
 0x42c   :  { %v11705_v6 = vcombine.high %v11639_v1, %v11643_v2  ;;  %v11698_v57 = vld [vmem:[%s16227_s2 + $0x19e0] sm:$0xff] }
 0x42d   :  { %7430 = vmatmul.mubr.bf16.vlgmr.msra.gmra.mrb[16].mxu0 %v15228_v44  ;;  %7471 = vmatmul.mubr.bf16.vlgmr.msra.gmra.mrb[16].mxu1 %v15228_v44 }
 0x42e   :  { %7480 = vmatpush1.bf16.msra.mxu0 %v11578_v9  ;;  %7521 = vmatpush1.bf16.msra.mxu1 %v11580_v10  ;;  %v11647_v9 = vld [vmem:[%s16227_s2 + $0x1848] sm:$0xff] }
 0x42f   :  { %7481 = vmatprep.subr.bf16.mxu0 %v11587_v11  ;;  %7522 = vmatprep.subr.bf16.mxu1 %v11589_v12  ;;  %v11651_v10 = vld [vmem:[%s16227_s2 + $0x1868] sm:$0xff]  ;;  %v11702_v11 = vcombine.low %v11638_v63, %v11642_v0  ;;  %v11704_v12 = vcombine.low %v11639_v1, %v11643_v2  ;;  %v11640_v0 = vld [vmem:[%s16227_s2 + $0x1810] sm:$0xff]  ;;  %v11641_v2 = vld [vmem:[%s16227_s2 + $0x1818] sm:$0xff] }
 0x430   :  { %7511 = vmatprep.mubr.bf16.mxu0 %v12591_v29  ;;  %7552 = vmatprep.mubr.bf16.mxu1 %v12591_v29  ;;  %v11713_v14 = vcombine.high %v11647_v9, %v11651_v10  ;;  %v11644_v1 = vld [vmem:[%s16227_s2 + $0x1830] sm:$0xff] }
 0x432   :  { %7482 = vmatpush1.bf16.msra.mxu0 %v11586_v16  ;;  %7523 = vmatpush1.bf16.msra.mxu1 %v11588_v17  ;;  %v11655_v16 = vld [vmem:[%s16227_s2 + $0x1888] sm:$0xff] }
 0x433   :  { %7483 = vmatprep.subr.bf16.mxu0 %v11595_v18  ;;  %7524 = vmatprep.subr.bf16.mxu1 %v11597_v38  ;;  %v11659_v17 = vld [vmem:[%s16227_s2 + $0x18a8] sm:$0xff]  ;;  %v11710_v18 = vcombine.low %v11646_v7, %v11650_v8  ;;  %v11712_v38 = vcombine.low %v11647_v9, %v11651_v10  ;;  %v11707_v7 = vcombine.high %v11640_v0, %v11644_v1  ;;  %v11648_v9 = vld [vmem:[%s16227_s2 + $0x1850] sm:$0xff] }
 0x434   :  { %v11721_v20 = vcombine.high %v11655_v16, %v11659_v17  ;;  %v11652_v10 = vld [vmem:[%s16227_s2 + $0x1870] sm:$0xff] }
 0x436   :  { %7484 = vmatpush1.bf16.msra.mxu0 %v11594_v23  ;;  %7525 = vmatpush1.bf16.msra.mxu1 %v11596_v24  ;;  %v11667_v23 = vld [vmem:[%s16227_s2 + $0x18e8] sm:$0xff]  ;;  %v11718_v24 = vcombine.low %v11654_v27, %v11658_v15  ;;  %v11715_v15 = vcombine.high %v11648_v9, %v11652_v10 }
 0x437   :  { %7485 = vmatprep.subr.bf16.mxu0 %v11603_v25  ;;  %7526 = vmatprep.subr.bf16.mxu1 %v11605_v26  ;;  %v11720_v25 = vcombine.low %v11655_v16, %v11659_v17  ;;  %v11727_v26 = vcombine.high %v11662_v21, %v11666_v22  ;;  %v11656_v17 = vld [vmem:[%s16227_s2 + $0x1890] sm:$0xff] }
 0x43a   :  { %7486 = vmatpush1.bf16.msra.mxu0 %v11602_v40  ;;  %7527 = vmatpush1.bf16.msra.mxu1 %v11604_v41  ;;  %v11675_v40 = vld [vmem:[%s16227_s2 + $0x1928] sm:$0xff]  ;;  %v11726_v41 = vcombine.low %v11662_v21, %v11666_v22 }
 0x43b   :  { %7487 = vmatprep.subr.bf16.mxu0 %v11611_v42  ;;  %7528 = vmatprep.subr.bf16.mxu1 %v11613_v43  ;;  %v11735_v43 = vcombine.high %v11670_v32, %v11674_v33  ;;  %v11737_v45 = vcombine.high %v11671_v37, %v11675_v40 }
 0x43e   :  { %7488 = vmatpush1.bf16.msra.mxu0 %v11610_v34  ;;  %7529 = vmatpush1.bf16.msra.mxu1 %v11612_v35  ;;  %v11683_v34 = vld [vmem:[%s16227_s2 + $0x1968] sm:$0xff]  ;;  %v11734_v35 = vcombine.low %v11670_v32, %v11674_v33 }
 0x43f   :  { %7489 = vmatprep.subr.bf16.mxu0 %v11619_v36  ;;  %7530 = vmatprep.subr.bf16.mxu1 %v11621_v39  ;;  %v11736_v36 = vcombine.low %v11671_v37, %v11675_v40  ;;  %v11743_v39 = vcombine.high %v11678_v46, %v11682_v30  ;;  %v11745_v47 = vcombine.high %v11679_v31, %v11683_v34  ;;  %v11672_v40 = vld [vmem:[%s16227_s2 + $0x1910] sm:$0xff] }
 0x442   :  { %7490 = vmatpush1.bf16.msra.mxu0 %v11618_v51  ;;  %7531 = vmatpush1.bf16.msra.mxu1 %v11620_v52  ;;  %v11691_v51 = vld [vmem:[%s16227_s2 + $0x19a8] sm:$0xff]  ;;  %v11742_v52 = vcombine.low %v11678_v46, %v11682_v30 }
 0x443   :  { %7491 = vmatprep.subr.bf16.mxu0 %v11627_v53  ;;  %7532 = vmatprep.subr.bf16.mxu1 %v11629_v54  ;;  %v11744_v53 = vcombine.low %v11679_v31, %v11683_v34  ;;  %v11751_v54 = vcombine.high %v11686_v48, %v11690_v49  ;;  %v11753_v55 = vcombine.high %v11687_v50, %v11691_v51  ;;  %v11680_v34 = vld [vmem:[%s16227_s2 + $0x1950] sm:$0xff] }
 0x446   :  { %7492 = vmatpush1.bf16.msra.mxu0 %v11626_v59  ;;  %7533 = vmatpush1.bf16.msra.mxu1 %v11628_v60  ;;  %v11699_v59 = vld [vmem:[%s16227_s2 + $0x19e8] sm:$0xff]  ;;  %v11750_v60 = vcombine.low %v11686_v48, %v11690_v49 }
 0x447   :  { %7493 = vmatprep.subr.bf16.mxu0 %v11635_v61  ;;  %7534 = vmatprep.subr.bf16.mxu1 %v11637_v62  ;;  %v11752_v61 = vcombine.low %v11687_v50, %v11691_v51  ;;  %v11759_v62 = vcombine.high %v11694_v56, %v11698_v57  ;;  %v11761_v63 = vcombine.high %v11695_v58, %v11699_v59  ;;  %v11688_v51 = vld [vmem:[%s16227_s2 + $0x1990] sm:$0xff] }
 0x44a   :  { %7494 = vmatpush1.bf16.msra.mxu0 %v11634_v3  ;;  %7535 = vmatpush1.bf16.msra.mxu1 %v11636_v4  ;;  %v11645_v3 = vld [vmem:[%s16227_s2 + $0x1838] sm:$0xff]  ;;  %v11758_v4 = vcombine.low %v11694_v56, %v11698_v57 }
 0x44b   :  { %7956 = vmatprep.subr.bf16.mxu0 %v11703_v5  ;;  %7997 = vmatprep.subr.bf16.mxu1 %v11705_v6  ;;  %v11760_v5 = vcombine.low %v11695_v58, %v11699_v59  ;;  %v7569_v6 = vld [vmem:[#allocation2 + $0x18] sm:$0x3]  ;;  %v11709_v8 = vcombine.high %v11641_v2, %v11645_v3  ;;  %v11696_v59 = vld [vmem:[%s16227_s2 + $0x19d0] sm:$0xff] }
 0x44c   :  { %v15430_v27 = vpack.c.bf16 %v7569_v6, %v7569_v6  ;;  %v11771_v6 = vld [vmem:[%s16227_s2 + $0x1a28] sm:$0xff] }
 0x44d   :  { %7512 = vmatmul.mubr.bf16.vlgmr.msra.gmra.mrb[20].mxu0 %v15228_v44  ;;  %7553 = vmatmul.mubr.bf16.vlgmr.msra.gmra.mrb[20].mxu1 %v15228_v44  ;;  %v11663_v44 = vld [vmem:[%s16227_s2 + $0x18c8] sm:$0xff] }
 0x44e   :  { %7957 = vmatpush1.bf16.msra.mxu0 %v11702_v11  ;;  %7998 = vmatpush1.bf16.msra.mxu1 %v11704_v12  ;;  %v11729_v28 = vcombine.high %v11663_v44, %v11667_v23  ;;  %v11728_v42 = vcombine.low %v11663_v44, %v11667_v23  ;;  %v11649_v11 = vld [vmem:[%s16227_s2 + $0x1858] sm:$0xff]  ;;  %v11664_v23 = vld [vmem:[%s16227_s2 + $0x18d0] sm:$0xff] }
 0x44f   :  { %7958 = vmatprep.subr.bf16.mxu0 %v11711_v13  ;;  %7999 = vmatprep.subr.bf16.mxu1 %v11713_v14  ;;  %v11653_v12 = vld [vmem:[%s16227_s2 + $0x1878] sm:$0xff]  ;;  %v11706_v13 = vcombine.low %v11640_v0, %v11644_v1  ;;  %v11708_v14 = vcombine.low %v11641_v2, %v11645_v3  ;;  %v11766_v3 = vld [vmem:[%s16227_s2 + $0x1a00] sm:$0xff] }
 0x450   :  { %7988 = vmatprep.mubr.bf16.mxu0 %v12591_v29  ;;  %8029 = vmatprep.mubr.bf16.mxu1 %v12591_v29  ;;  %v11717_v16 = vcombine.high %v11649_v11, %v11653_v12  ;;  %v11716_v21 = vcombine.low %v11649_v11, %v11653_v12  ;;  %v11774_v11 = vld [vmem:[%s16227_s2 + $0x1a40] sm:$0xff] }
 0x451   :  { %v11778_v12 = vld [vmem:[%s16227_s2 + $0x1a60] sm:$0xff] }
 0x452   :  { %7959 = vmatpush1.bf16.msra.mxu0 %v11710_v18  ;;  %8000 = vmatpush1.bf16.msra.mxu1 %v11712_v38  ;;  %v11660_v18 = vld [vmem:[%s16227_s2 + $0x18b0] sm:$0xff]  ;;  %v11657_v38 = vld [vmem:[%s16227_s2 + $0x1898] sm:$0xff] }
 0x453   :  { %7960 = vmatprep.subr.bf16.mxu0 %v11719_v19  ;;  %8001 = vmatprep.subr.bf16.mxu1 %v11721_v20  ;;  %v11661_v19 = vld [vmem:[%s16227_s2 + $0x18b8] sm:$0xff]  ;;  %v11714_v20 = vcombine.low %v11648_v9, %v11652_v10  ;;  %v11723_v22 = vcombine.high %v11656_v17, %v11660_v18 }
 0x454   :  { %v11725_v44 = vcombine.high %v11657_v38, %v11661_v19  ;;  %v11724_v32 = vcombine.low %v11657_v38, %v11661_v19  ;;  %v11782_v38 = vld [vmem:[%s16227_s2 + $0x1a80] sm:$0xff] }
 0x455   :  { %v11786_v19 = vld [vmem:[%s16227_s2 + $0x1aa0] sm:$0xff] }
 0x456   :  { %7961 = vmatpush1.bf16.msra.mxu0 %v11718_v24  ;;  %8002 = vmatpush1.bf16.msra.mxu1 %v11720_v25  ;;  %v11668_v24 = vld [vmem:[%s16227_s2 + $0x18f0] sm:$0xff]  ;;  %v11665_v25 = vld [vmem:[%s16227_s2 + $0x18d8] sm:$0xff] }
 0x457   :  { %7962 = vmatprep.subr.bf16.mxu0 %v11727_v26  ;;  %8003 = vmatprep.subr.bf16.mxu1 %v11729_v28  ;;  %v11669_v26 = vld [vmem:[%s16227_s2 + $0x18f8] sm:$0xff]  ;;  %v11722_v28 = vcombine.low %v11656_v17, %v11660_v18  ;;  %v11731_v33 = vcombine.high %v11664_v23, %v11668_v24  ;;  %v11839_v17 = vcombine.high %v11774_v11, %v11778_v12 }
 0x458   :  { %v11733_v37 = vcombine.high %v11665_v25, %v11669_v26  ;;  %v11732_v46 = vcombine.low %v11665_v25, %v11669_v26  ;;  %v11790_v25 = vld [vmem:[%s16227_s2 + $0x1ac0] sm:$0xff] }
 0x459   :  { %v11794_v26 = vld [vmem:[%s16227_s2 + $0x1ae0] sm:$0xff] }
 0x45a   :  { %7963 = vmatpush1.bf16.msra.mxu0 %v11726_v41  ;;  %8004 = vmatpush1.bf16.msra.mxu1 %v11728_v42  ;;  %v11676_v41 = vld [vmem:[%s16227_s2 + $0x1930] sm:$0xff]  ;;  %v11673_v42 = vld [vmem:[%s16227_s2 + $0x1918] sm:$0xff] }
 0x45b   :  { %7964 = vmatprep.subr.bf16.mxu0 %v11735_v43  ;;  %8005 = vmatprep.subr.bf16.mxu1 %v11737_v45  ;;  %v11677_v43 = vld [vmem:[%s16227_s2 + $0x1938] sm:$0xff]  ;;  %v11730_v45 = vcombine.low %v11664_v23, %v11668_v24  ;;  %v11739_v30 = vcombine.high %v11672_v40, %v11676_v41  ;;  %v11847_v23 = vcombine.high %v11782_v38, %v11786_v19 }
 0x45c   :  { %v11741_v31 = vcombine.high %v11673_v42, %v11677_v43  ;;  %v11740_v48 = vcombine.low %v11673_v42, %v11677_v43  ;;  %v11802_v42 = vld [vmem:[%s16227_s2 + $0x1b20] sm:$0xff]  ;;  %v11799_v43 = vld [vmem:[%s16227_s2 + $0x1b08] sm:$0xff] }
 0x45e   :  { %7965 = vmatpush1.bf16.msra.mxu0 %v11734_v35  ;;  %8006 = vmatpush1.bf16.msra.mxu1 %v11736_v36  ;;  %v11684_v35 = vld [vmem:[%s16227_s2 + $0x1970] sm:$0xff]  ;;  %v11681_v36 = vld [vmem:[%s16227_s2 + $0x1958] sm:$0xff] }
 0x45f   :  { %7966 = vmatprep.subr.bf16.mxu0 %v11743_v39  ;;  %8007 = vmatprep.subr.bf16.mxu1 %v11745_v47  ;;  %v11685_v39 = vld [vmem:[%s16227_s2 + $0x1978] sm:$0xff]  ;;  %v11738_v47 = vcombine.low %v11672_v40, %v11676_v41  ;;  %v11747_v49 = vcombine.high %v11680_v34, %v11684_v35  ;;  %v11798_v41 = vld [vmem:[%s16227_s2 + $0x1b00] sm:$0xff] }
 0x460   :  { %v11749_v50 = vcombine.high %v11681_v36, %v11685_v39  ;;  %v11748_v56 = vcombine.low %v11681_v36, %v11685_v39  ;;  %v11810_v36 = vld [vmem:[%s16227_s2 + $0x1b60] sm:$0xff]  ;;  %v11807_v39 = vld [vmem:[%s16227_s2 + $0x1b48] sm:$0xff] }
 0x462   :  { %7967 = vmatpush1.bf16.msra.mxu0 %v11742_v52  ;;  %8008 = vmatpush1.bf16.msra.mxu1 %v11744_v53  ;;  %v11692_v52 = vld [vmem:[%s16227_s2 + $0x19b0] sm:$0xff]  ;;  %v11689_v53 = vld [vmem:[%s16227_s2 + $0x1998] sm:$0xff] }
 0x463   :  { %7968 = vmatprep.subr.bf16.mxu0 %v11751_v54  ;;  %8009 = vmatprep.subr.bf16.mxu1 %v11753_v55  ;;  %v11693_v54 = vld [vmem:[%s16227_s2 + $0x19b8] sm:$0xff]  ;;  %v11746_v55 = vcombine.low %v11680_v34, %v11684_v35  ;;  %v11755_v57 = vcombine.high %v11688_v51, %v11692_v52  ;;  %v11806_v35 = vld [vmem:[%s16227_s2 + $0x1b40] sm:$0xff] }
 0x464   :  { %v11757_v58 = vcombine.high %v11689_v53, %v11693_v54  ;;  %v11756_v0 = vcombine.low %v11689_v53, %v11693_v54  ;;  %v11818_v53 = vld [vmem:[%s16227_s2 + $0x1ba0] sm:$0xff]  ;;  %v11815_v54 = vld [vmem:[%s16227_s2 + $0x1b88] sm:$0xff] }
 0x466   :  { %7969 = vmatpush1.bf16.msra.mxu0 %v11750_v60  ;;  %8010 = vmatpush1.bf16.msra.mxu1 %v11752_v61  ;;  %v11700_v60 = vld [vmem:[%s16227_s2 + $0x19f0] sm:$0xff]  ;;  %v11697_v61 = vld [vmem:[%s16227_s2 + $0x19d8] sm:$0xff] }
 0x467   :  { %7970 = vmatprep.subr.bf16.mxu0 %v11759_v62  ;;  %8011 = vmatprep.subr.bf16.mxu1 %v11761_v63  ;;  %v11701_v62 = vld [vmem:[%s16227_s2 + $0x19f8] sm:$0xff]  ;;  %v11754_v63 = vcombine.low %v11688_v51, %v11692_v52  ;;  %v11763_v1 = vcombine.high %v11696_v59, %v11700_v60  ;;  %v11814_v52 = vld [vmem:[%s16227_s2 + $0x1b80] sm:$0xff] }
 0x468   :  { %v11765_v2 = vcombine.high %v11697_v61, %v11701_v62 }
 0x46a   :  { %7971 = vmatpush1.bf16.msra.mxu0 %v11758_v4  ;;  %8012 = vmatpush1.bf16.msra.mxu1 %v11760_v5  ;;  %v11770_v4 = vld [vmem:[%s16227_s2 + $0x1a20] sm:$0xff]  ;;  %v11767_v5 = vld [vmem:[%s16227_s2 + $0x1a08] sm:$0xff] }
 0x46b   :  { %8038 = vmatprep.subr.bf16.mxu0 %v11707_v7  ;;  %8079 = vmatprep.subr.bf16.mxu1 %v11709_v8  ;;  %v11762_v7 = vcombine.low %v11696_v59, %v11700_v60  ;;  %v11764_v8 = vcombine.low %v11697_v61, %v11701_v62  ;;  %v11831_v9 = vcombine.high %v11766_v3, %v11770_v4  ;;  %v11822_v60 = vld [vmem:[%s16227_s2 + $0x1bc0] sm:$0xff]  ;;  %v11823_v62 = vld [vmem:[%s16227_s2 + $0x1bc8] sm:$0xff] }
 0x46c   :  { %v11833_v10 = vcombine.high %v11767_v5, %v11771_v6  ;;  %v11826_v61 = vld [vmem:[%s16227_s2 + $0x1be0] sm:$0xff] }
 0x46d   :  { %7989 = vmatmul.mubr.bf16.vlgmr.msra.gmra.mrb[16].mxu0 %v15430_v27  ;;  %8030 = vmatmul.mubr.bf16.vlgmr.msra.gmra.mrb[16].mxu1 %v15430_v27 }
 0x46e   :  { %8039 = vmatpush1.bf16.msra.mxu0 %v11706_v13  ;;  %8080 = vmatpush1.bf16.msra.mxu1 %v11708_v14  ;;  %v11775_v13 = vld [vmem:[%s16227_s2 + $0x1a48] sm:$0xff] }
 0x46f   :  { %8040 = vmatprep.subr.bf16.mxu0 %v11715_v15  ;;  %8081 = vmatprep.subr.bf16.mxu1 %v11717_v16  ;;  %v11779_v14 = vld [vmem:[%s16227_s2 + $0x1a68] sm:$0xff]  ;;  %v11830_v15 = vcombine.low %v11766_v3, %v11770_v4  ;;  %v11832_v16 = vcombine.low %v11767_v5, %v11771_v6  ;;  %v11768_v4 = vld [vmem:[%s16227_s2 + $0x1a10] sm:$0xff]  ;;  %v11769_v6 = vld [vmem:[%s16227_s2 + $0x1a18] sm:$0xff] }
 0x470   :  { %8070 = vmatprep.mubr.bf16.mxu0 %v12591_v29  ;;  %8111 = vmatprep.mubr.bf16.mxu1 %v12591_v29  ;;  %v11841_v18 = vcombine.high %v11775_v13, %v11779_v14  ;;  %v11772_v5 = vld [vmem:[%s16227_s2 + $0x1a30] sm:$0xff] }
 0x472   :  { %8041 = vmatpush1.bf16.msra.mxu0 %v11714_v20  ;;  %8082 = vmatpush1.bf16.msra.mxu1 %v11716_v21  ;;  %v11783_v20 = vld [vmem:[%s16227_s2 + $0x1a88] sm:$0xff] }
 0x473   :  { %8042 = vmatprep.subr.bf16.mxu0 %v11723_v22  ;;  %8083 = vmatprep.subr.bf16.mxu1 %v11725_v44  ;;  %v11787_v21 = vld [vmem:[%s16227_s2 + $0x1aa8] sm:$0xff]  ;;  %v11838_v22 = vcombine.low %v11774_v11, %v11778_v12  ;;  %v11840_v44 = vcombine.low %v11775_v13, %v11779_v14  ;;  %v11835_v11 = vcombine.high %v11768_v4, %v11772_v5  ;;  %v11776_v13 = vld [vmem:[%s16227_s2 + $0x1a50] sm:$0xff] }
 0x474   :  { %v11849_v24 = vcombine.high %v11783_v20, %v11787_v21  ;;  %v11780_v14 = vld [vmem:[%s16227_s2 + $0x1a70] sm:$0xff] }
 0x476   :  { %8043 = vmatpush1.bf16.msra.mxu0 %v11722_v28  ;;  %8084 = vmatpush1.bf16.msra.mxu1 %v11724_v32  ;;  %v11795_v28 = vld [vmem:[%s16227_s2 + $0x1ae8] sm:$0xff]  ;;  %v11846_v32 = vcombine.low %v11782_v38, %v11786_v19  ;;  %v11843_v19 = vcombine.high %v11776_v13, %v11780_v14 }
 0x477   :  { %8044 = vmatprep.subr.bf16.mxu0 %v11731_v33  ;;  %8085 = vmatprep.subr.bf16.mxu1 %v11733_v37  ;;  %v11848_v33 = vcombine.low %v11783_v20, %v11787_v21  ;;  %v11855_v37 = vcombine.high %v11790_v25, %v11794_v26  ;;  %v11784_v21 = vld [vmem:[%s16227_s2 + $0x1a90] sm:$0xff] }
 0x47a   :  { %8045 = vmatpush1.bf16.msra.mxu0 %v11730_v45  ;;  %8086 = vmatpush1.bf16.msra.mxu1 %v11732_v46  ;;  %v11803_v45 = vld [vmem:[%s16227_s2 + $0x1b28] sm:$0xff]  ;;  %v11854_v46 = vcombine.low %v11790_v25, %v11794_v26 }
 0x47b   :  { %8046 = vmatprep.subr.bf16.mxu0 %v11739_v30  ;;  %8087 = vmatprep.subr.bf16.mxu1 %v11741_v31  ;;  %v11863_v31 = vcombine.high %v11798_v41, %v11802_v42  ;;  %v11865_v34 = vcombine.high %v11799_v43, %v11803_v45 }
 0x47e   :  { %8047 = vmatpush1.bf16.msra.mxu0 %v11738_v47  ;;  %8088 = vmatpush1.bf16.msra.mxu1 %v11740_v48  ;;  %v11811_v47 = vld [vmem:[%s16227_s2 + $0x1b68] sm:$0xff]  ;;  %v11862_v48 = vcombine.low %v11798_v41, %v11802_v42 }
 0x47f   :  { %8048 = vmatprep.subr.bf16.mxu0 %v11747_v49  ;;  %8089 = vmatprep.subr.bf16.mxu1 %v11749_v50  ;;  %v11864_v49 = vcombine.low %v11799_v43, %v11803_v45  ;;  %v11871_v50 = vcombine.high %v11806_v35, %v11810_v36  ;;  %v11873_v51 = vcombine.high %v11807_v39, %v11811_v47  ;;  %v11800_v45 = vld [vmem:[%s16227_s2 + $0x1b10] sm:$0xff] }
 0x482   :  { %8049 = vmatpush1.bf16.msra.mxu0 %v11746_v55  ;;  %8090 = vmatpush1.bf16.msra.mxu1 %v11748_v56  ;;  %v11819_v55 = vld [vmem:[%s16227_s2 + $0x1ba8] sm:$0xff]  ;;  %v11870_v56 = vcombine.low %v11806_v35, %v11810_v36 }
 0x483   :  { %8050 = vmatprep.subr.bf16.mxu0 %v11755_v57  ;;  %8091 = vmatprep.subr.bf16.mxu1 %v11757_v58  ;;  %v11872_v57 = vcombine.low %v11807_v39, %v11811_v47  ;;  %v11879_v58 = vcombine.high %v11814_v52, %v11818_v53  ;;  %v11881_v59 = vcombine.high %v11815_v54, %v11819_v55  ;;  %v11808_v47 = vld [vmem:[%s16227_s2 + $0x1b50] sm:$0xff] }
 0x486   :  { %8051 = vmatpush1.bf16.msra.mxu0 %v11754_v63  ;;  %8092 = vmatpush1.bf16.msra.mxu1 %v11756_v0  ;;  %v11827_v63 = vld [vmem:[%s16227_s2 + $0x1be8] sm:$0xff]  ;;  %v11878_v0 = vcombine.low %v11814_v52, %v11818_v53 }
 0x487   :  { %8052 = vmatprep.subr.bf16.mxu0 %v11763_v1  ;;  %8093 = vmatprep.subr.bf16.mxu1 %v11765_v2  ;;  %v11880_v1 = vcombine.low %v11815_v54, %v11819_v55  ;;  %v11887_v2 = vcombine.high %v11822_v60, %v11826_v61  ;;  %v11889_v3 = vcombine.high %v11823_v62, %v11827_v63  ;;  %v11816_v55 = vld [vmem:[%s16227_s2 + $0x1b90] sm:$0xff] }
 0x48a   :  { %8053 = vmatpush1.bf16.msra.mxu0 %v11762_v7  ;;  %8094 = vmatpush1.bf16.msra.mxu1 %v11764_v8  ;;  %v11773_v7 = vld [vmem:[%s16227_s2 + $0x1a38] sm:$0xff]  ;;  %v11886_v8 = vcombine.low %v11822_v60, %v11826_v61 }
 0x48b   :  { %8515 = vmatprep.subr.bf16.mxu0 %v11831_v9  ;;  %8556 = vmatprep.subr.bf16.mxu1 %v11833_v10  ;;  %v11888_v9 = vcombine.low %v11823_v62, %v11827_v63  ;;  %v8128_v10 = vld [vmem:[#allocation2 + $0x1a] sm:$0x3]  ;;  %v11837_v12 = vcombine.high %v11769_v6, %v11773_v7  ;;  %v11824_v63 = vld [vmem:[%s16227_s2 + $0x1bd0] sm:$0xff] }
 0x48c   :  { %v15632_v38 = vpack.c.bf16 %v8128_v10, %v8128_v10  ;;  %v11899_v10 = vld [vmem:[%s16227_s2 + $0x1c28] sm:$0xff] }
 0x48d   :  { %8071 = vmatmul.mubr.bf16.vlgmr.msra.gmra.mrb[20].mxu0 %v15430_v27  ;;  %8112 = vmatmul.mubr.bf16.vlgmr.msra.gmra.mrb[20].mxu1 %v15430_v27  ;;  %v11791_v27 = vld [vmem:[%s16227_s2 + $0x1ac8] sm:$0xff] }
 0x48e   :  { %8516 = vmatpush1.bf16.msra.mxu0 %v11830_v15  ;;  %8557 = vmatpush1.bf16.msra.mxu1 %v11832_v16  ;;  %v11857_v40 = vcombine.high %v11791_v27, %v11795_v28  ;;  %v11856_v30 = vcombine.low %v11791_v27, %v11795_v28  ;;  %v11777_v15 = vld [vmem:[%s16227_s2 + $0x1a58] sm:$0xff]  ;;  %v11792_v28 = vld [vmem:[%s16227_s2 + $0x1ad0] sm:$0xff] }
 0x48f   :  { %8517 = vmatprep.subr.bf16.mxu0 %v11839_v17  ;;  %8558 = vmatprep.subr.bf16.mxu1 %v11841_v18  ;;  %v11781_v16 = vld [vmem:[%s16227_s2 + $0x1a78] sm:$0xff]  ;;  %v11834_v17 = vcombine.low %v11768_v4, %v11772_v5  ;;  %v11836_v18 = vcombine.low %v11769_v6, %v11773_v7  ;;  %v11894_v7 = vld [vmem:[%s16227_s2 + $0x1c00] sm:$0xff] }
 0x490   :  { %8547 = vmatprep.mubr.bf16.mxu0 %v12591_v29  ;;  %8588 = vmatprep.mubr.bf16.mxu1 %v12591_v29  ;;  %v11845_v20 = vcombine.high %v11777_v15, %v11781_v16  ;;  %v11844_v25 = vcombine.low %v11777_v15, %v11781_v16  ;;  %v11902_v15 = vld [vmem:[%s16227_s2 + $0x1c40] sm:$0xff] }
 0x491   :  { %v11906_v16 = vld [vmem:[%s16227_s2 + $0x1c60] sm:$0xff] }
 0x492   :  { %8518 = vmatpush1.bf16.msra.mxu0 %v11838_v22  ;;  %8559 = vmatpush1.bf16.msra.mxu1 %v11840_v44  ;;  %v11788_v22 = vld [vmem:[%s16227_s2 + $0x1ab0] sm:$0xff]  ;;  %v11785_v44 = vld [vmem:[%s16227_s2 + $0x1a98] sm:$0xff] }
 0x493   :  { %8519 = vmatprep.subr.bf16.mxu0 %v11847_v23  ;;  %8560 = vmatprep.subr.bf16.mxu1 %v11849_v24  ;;  %v11789_v23 = vld [vmem:[%s16227_s2 + $0x1ab8] sm:$0xff]  ;;  %v11842_v24 = vcombine.low %v11776_v13, %v11780_v14  ;;  %v11851_v26 = vcombine.high %v11784_v21, %v11788_v22 }
 0x494   :  { %v11853_v27 = vcombine.high %v11785_v44, %v11789_v23  ;;  %v11852_v41 = vcombine.low %v11785_v44, %v11789_v23  ;;  %v11910_v44 = vld [vmem:[%s16227_s2 + $0x1c80] sm:$0xff] }
 0x495   :  { %v11914_v23 = vld [vmem:[%s16227_s2 + $0x1ca0] sm:$0xff] }
 0x496   :  { %8520 = vmatpush1.bf16.msra.mxu0 %v11846_v32  ;;  %8561 = vmatpush1.bf16.msra.mxu1 %v11848_v33  ;;  %v11796_v32 = vld [vmem:[%s16227_s2 + $0x1af0] sm:$0xff]  ;;  %v11793_v33 = vld [vmem:[%s16227_s2 + $0x1ad8] sm:$0xff] }
 0x497   :  { %8521 = vmatprep.subr.bf16.mxu0 %v11855_v37  ;;  %8562 = vmatprep.subr.bf16.mxu1 %v11857_v40  ;;  %v11797_v37 = vld [vmem:[%s16227_s2 + $0x1af8] sm:$0xff]  ;;  %v11850_v40 = vcombine.low %v11784_v21, %v11788_v22  ;;  %v11859_v42 = vcombine.high %v11792_v28, %v11796_v32  ;;  %v11967_v21 = vcombine.high %v11902_v15, %v11906_v16 }
 0x498   :  { %v11861_v43 = vcombine.high %v11793_v33, %v11797_v37  ;;  %v11860_v35 = vcombine.low %v11793_v33, %v11797_v37  ;;  %v11918_v33 = vld [vmem:[%s16227_s2 + $0x1cc0] sm:$0xff] }
 0x499   :  { %v11922_v37 = vld [vmem:[%s16227_s2 + $0x1ce0] sm:$0xff] }
 0x49a   :  { %8522 = vmatpush1.bf16.msra.mxu0 %v11854_v46  ;;  %8563 = vmatpush1.bf16.msra.mxu1 %v11856_v30  ;;  %v11804_v46 = vld [vmem:[%s16227_s2 + $0x1b30] sm:$0xff]  ;;  %v11801_v30 = vld [vmem:[%s16227_s2 + $0x1b18] sm:$0xff] }
 0x49b   :  { %8523 = vmatprep.subr.bf16.mxu0 %v11863_v31  ;;  %8564 = vmatprep.subr.bf16.mxu1 %v11865_v34  ;;  %v11805_v31 = vld [vmem:[%s16227_s2 + $0x1b38] sm:$0xff]  ;;  %v11858_v34 = vcombine.low %v11792_v28, %v11796_v32  ;;  %v11867_v36 = vcombine.high %v11800_v45, %v11804_v46  ;;  %v11975_v28 = vcombine.high %v11910_v44, %v11914_v23 }
 0x49c   :  { %v11869_v39 = vcombine.high %v11801_v30, %v11805_v31  ;;  %v11868_v52 = vcombine.low %v11801_v30, %v11805_v31  ;;  %v11930_v30 = vld [vmem:[%s16227_s2 + $0x1d20] sm:$0xff]  ;;  %v11927_v31 = vld [vmem:[%s16227_s2 + $0x1d08] sm:$0xff] }
 0x49e   :  { %8524 = vmatpush1.bf16.msra.mxu0 %v11862_v48  ;;  %8565 = vmatpush1.bf16.msra.mxu1 %v11864_v49  ;;  %v11812_v48 = vld [vmem:[%s16227_s2 + $0x1b70] sm:$0xff]  ;;  %v11809_v49 = vld [vmem:[%s16227_s2 + $0x1b58] sm:$0xff] }
 0x49f   :  { %8525 = vmatprep.subr.bf16.mxu0 %v11871_v50  ;;  %8566 = vmatprep.subr.bf16.mxu1 %v11873_v51  ;;  %v11813_v50 = vld [vmem:[%s16227_s2 + $0x1b78] sm:$0xff]  ;;  %v11866_v51 = vcombine.low %v11800_v45, %v11804_v46  ;;  %v11875_v53 = vcombine.high %v11808_v47, %v11812_v48  ;;  %v11926_v46 = vld [vmem:[%s16227_s2 + $0x1d00] sm:$0xff] }
 0x4a0   :  { %v11877_v54 = vcombine.high %v11809_v49, %v11813_v50  ;;  %v11876_v60 = vcombine.low %v11809_v49, %v11813_v50  ;;  %v11938_v49 = vld [vmem:[%s16227_s2 + $0x1d60] sm:$0xff]  ;;  %v11935_v50 = vld [vmem:[%s16227_s2 + $0x1d48] sm:$0xff] }
 0x4a2   :  { %8526 = vmatpush1.bf16.msra.mxu0 %v11870_v56  ;;  %8567 = vmatpush1.bf16.msra.mxu1 %v11872_v57  ;;  %v11820_v56 = vld [vmem:[%s16227_s2 + $0x1bb0] sm:$0xff]  ;;  %v11817_v57 = vld [vmem:[%s16227_s2 + $0x1b98] sm:$0xff] }
 0x4a3   :  { %8527 = vmatprep.subr.bf16.mxu0 %v11879_v58  ;;  %8568 = vmatprep.subr.bf16.mxu1 %v11881_v59  ;;  %v11821_v58 = vld [vmem:[%s16227_s2 + $0x1bb8] sm:$0xff]  ;;  %v11874_v59 = vcombine.low %v11808_v47, %v11812_v48  ;;  %v11883_v61 = vcombine.high %v11816_v55, %v11820_v56  ;;  %v11934_v48 = vld [vmem:[%s16227_s2 + $0x1d40] sm:$0xff] }
 0x4a4   :  { %v11885_v62 = vcombine.high %v11817_v57, %v11821_v58  ;;  %v11884_v4 = vcombine.low %v11817_v57, %v11821_v58  ;;  %v11946_v57 = vld [vmem:[%s16227_s2 + $0x1da0] sm:$0xff]  ;;  %v11943_v58 = vld [vmem:[%s16227_s2 + $0x1d88] sm:$0xff] }
 0x4a6   :  { %8528 = vmatpush1.bf16.msra.mxu0 %v11878_v0  ;;  %8569 = vmatpush1.bf16.msra.mxu1 %v11880_v1  ;;  %v11828_v0 = vld [vmem:[%s16227_s2 + $0x1bf0] sm:$0xff]  ;;  %v11825_v1 = vld [vmem:[%s16227_s2 + $0x1bd8] sm:$0xff] }
 0x4a7   :  { %8529 = vmatprep.subr.bf16.mxu0 %v11887_v2  ;;  %8570 = vmatprep.subr.bf16.mxu1 %v11889_v3  ;;  %v11829_v2 = vld [vmem:[%s16227_s2 + $0x1bf8] sm:$0xff]  ;;  %v11882_v3 = vcombine.low %v11816_v55, %v11820_v56  ;;  %v11891_v5 = vcombine.high %v11824_v63, %v11828_v0  ;;  %v11942_v56 = vld [vmem:[%s16227_s2 + $0x1d80] sm:$0xff] }
 0x4a8   :  { %v11893_v6 = vcombine.high %v11825_v1, %v11829_v2 }
 0x4aa   :  { %8530 = vmatpush1.bf16.msra.mxu0 %v11886_v8  ;;  %8571 = vmatpush1.bf16.msra.mxu1 %v11888_v9  ;;  %v11898_v8 = vld [vmem:[%s16227_s2 + $0x1c20] sm:$0xff]  ;;  %v11895_v9 = vld [vmem:[%s16227_s2 + $0x1c08] sm:$0xff] }
 0x4ab   :  { %8597 = vmatprep.subr.bf16.mxu0 %v11835_v11  ;;  %8638 = vmatprep.subr.bf16.mxu1 %v11837_v12  ;;  %v11890_v11 = vcombine.low %v11824_v63, %v11828_v0  ;;  %v11892_v12 = vcombine.low %v11825_v1, %v11829_v2  ;;  %v11959_v13 = vcombine.high %v11894_v7, %v11898_v8  ;;  %v11950_v0 = vld [vmem:[%s16227_s2 + $0x1dc0] sm:$0xff]  ;;  %v11951_v2 = vld [vmem:[%s16227_s2 + $0x1dc8] sm:$0xff] }
 0x4ac   :  { %v11961_v14 = vcombine.high %v11895_v9, %v11899_v10  ;;  %v11954_v1 = vld [vmem:[%s16227_s2 + $0x1de0] sm:$0xff] }
 0x4ad   :  { %8548 = vmatmul.mubr.bf16.vlgmr.msra.gmra.mrb[16].mxu0 %v15632_v38  ;;  %8589 = vmatmul.mubr.bf16.vlgmr.msra.gmra.mrb[16].mxu1 %v15632_v38 }
 0x4ae   :  { %8598 = vmatpush1.bf16.msra.mxu0 %v11834_v17  ;;  %8639 = vmatpush1.bf16.msra.mxu1 %v11836_v18  ;;  %v11903_v17 = vld [vmem:[%s16227_s2 + $0x1c48] sm:$0xff] }
 0x4af   :  { %8599 = vmatprep.subr.bf16.mxu0 %v11843_v19  ;;  %8640 = vmatprep.subr.bf16.mxu1 %v11845_v20  ;;  %v11907_v18 = vld [vmem:[%s16227_s2 + $0x1c68] sm:$0xff]  ;;  %v11958_v19 = vcombine.low %v11894_v7, %v11898_v8  ;;  %v11960_v20 = vcombine.low %v11895_v9, %v11899_v10  ;;  %v11896_v8 = vld [vmem:[%s16227_s2 + $0x1c10] sm:$0xff]  ;;  %v11897_v10 = vld [vmem:[%s16227_s2 + $0x1c18] sm:$0xff] }
 0x4b0   :  { %8629 = vmatprep.mubr.bf16.mxu0 %v12591_v29  ;;  %8670 = vmatprep.mubr.bf16.mxu1 %v12591_v29  ;;  %v11969_v22 = vcombine.high %v11903_v17, %v11907_v18  ;;  %v11900_v9 = vld [vmem:[%s16227_s2 + $0x1c30] sm:$0xff] }
 0x4b2   :  { %8600 = vmatpush1.bf16.msra.mxu0 %v11842_v24  ;;  %8641 = vmatpush1.bf16.msra.mxu1 %v11844_v25  ;;  %v11911_v24 = vld [vmem:[%s16227_s2 + $0x1c88] sm:$0xff] }
 0x4b3   :  { %8601 = vmatprep.subr.bf16.mxu0 %v11851_v26  ;;  %8642 = vmatprep.subr.bf16.mxu1 %v11853_v27  ;;  %v11915_v25 = vld [vmem:[%s16227_s2 + $0x1ca8] sm:$0xff]  ;;  %v11966_v26 = vcombine.low %v11902_v15, %v11906_v16  ;;  %v11968_v27 = vcombine.low %v11903_v17, %v11907_v18  ;;  %v11963_v15 = vcombine.high %v11896_v8, %v11900_v9  ;;  %v11904_v17 = vld [vmem:[%s16227_s2 + $0x1c50] sm:$0xff] }
 0x4b4   :  { %v11977_v32 = vcombine.high %v11911_v24, %v11915_v25  ;;  %v11908_v18 = vld [vmem:[%s16227_s2 + $0x1c70] sm:$0xff] }
 0x4b6   :  { %8602 = vmatpush1.bf16.msra.mxu0 %v11850_v40  ;;  %8643 = vmatpush1.bf16.msra.mxu1 %v11852_v41  ;;  %v11923_v40 = vld [vmem:[%s16227_s2 + $0x1ce8] sm:$0xff]  ;;  %v11974_v41 = vcombine.low %v11910_v44, %v11914_v23  ;;  %v11971_v23 = vcombine.high %v11904_v17, %v11908_v18 }
 0x4b7   :  { %8603 = vmatprep.subr.bf16.mxu0 %v11859_v42  ;;  %8644 = vmatprep.subr.bf16.mxu1 %v11861_v43  ;;  %v11976_v42 = vcombine.low %v11911_v24, %v11915_v25  ;;  %v11983_v43 = vcombine.high %v11918_v33, %v11922_v37  ;;  %v11912_v25 = vld [vmem:[%s16227_s2 + $0x1c90] sm:$0xff] }
 0x4ba   :  { %8604 = vmatpush1.bf16.msra.mxu0 %v11858_v34  ;;  %8645 = vmatpush1.bf16.msra.mxu1 %v11860_v35  ;;  %v11931_v34 = vld [vmem:[%s16227_s2 + $0x1d28] sm:$0xff]  ;;  %v11982_v35 = vcombine.low %v11918_v33, %v11922_v37 }
 0x4bb   :  { %8605 = vmatprep.subr.bf16.mxu0 %v11867_v36  ;;  %8646 = vmatprep.subr.bf16.mxu1 %v11869_v39  ;;  %v11991_v39 = vcombine.high %v11926_v46, %v11930_v30  ;;  %v11993_v47 = vcombine.high %v11927_v31, %v11931_v34 }
 0x4be   :  { %8606 = vmatpush1.bf16.msra.mxu0 %v11866_v51  ;;  %8647 = vmatpush1.bf16.msra.mxu1 %v11868_v52  ;;  %v11939_v51 = vld [vmem:[%s16227_s2 + $0x1d68] sm:$0xff]  ;;  %v11990_v52 = vcombine.low %v11926_v46, %v11930_v30 }
 0x4bf   :  { %8607 = vmatprep.subr.bf16.mxu0 %v11875_v53  ;;  %8648 = vmatprep.subr.bf16.mxu1 %v11877_v54  ;;  %v11992_v53 = vcombine.low %v11927_v31, %v11931_v34  ;;  %v11999_v54 = vcombine.high %v11934_v48, %v11938_v49  ;;  %v12001_v55 = vcombine.high %v11935_v50, %v11939_v51  ;;  %v11928_v34 = vld [vmem:[%s16227_s2 + $0x1d10] sm:$0xff] }
 0x4c2   :  { %8608 = vmatpush1.bf16.msra.mxu0 %v11874_v59  ;;  %8649 = vmatpush1.bf16.msra.mxu1 %v11876_v60  ;;  %v11947_v59 = vld [vmem:[%s16227_s2 + $0x1da8] sm:$0xff]  ;;  %v11998_v60 = vcombine.low %v11934_v48, %v11938_v49 }
 0x4c3   :  { %8609 = vmatprep.subr.bf16.mxu0 %v11883_v61  ;;  %8650 = vmatprep.subr.bf16.mxu1 %v11885_v62  ;;  %v12000_v61 = vcombine.low %v11935_v50, %v11939_v51  ;;  %v12007_v62 = vcombine.high %v11942_v56, %v11946_v57  ;;  %v12009_v63 = vcombine.high %v11943_v58, %v11947_v59  ;;  %v11936_v51 = vld [vmem:[%s16227_s2 + $0x1d50] sm:$0xff] }
 0x4c6   :  { %8610 = vmatpush1.bf16.msra.mxu0 %v11882_v3  ;;  %8651 = vmatpush1.bf16.msra.mxu1 %v11884_v4  ;;  %v11955_v3 = vld [vmem:[%s16227_s2 + $0x1de8] sm:$0xff]  ;;  %v12006_v4 = vcombine.low %v11942_v56, %v11946_v57 }
 0x4c7   :  { %8611 = vmatprep.subr.bf16.mxu0 %v11891_v5  ;;  %8652 = vmatprep.subr.bf16.mxu1 %v11893_v6  ;;  %v12008_v5 = vcombine.low %v11943_v58, %v11947_v59  ;;  %v12015_v6 = vcombine.high %v11950_v0, %v11954_v1  ;;  %v12017_v7 = vcombine.high %v11951_v2, %v11955_v3  ;;  %v11944_v59 = vld [vmem:[%s16227_s2 + $0x1d90] sm:$0xff] }
 0x4ca   :  { %8612 = vmatpush1.bf16.msra.mxu0 %v11890_v11  ;;  %8653 = vmatpush1.bf16.msra.mxu1 %v11892_v12  ;;  %v11901_v11 = vld [vmem:[%s16227_s2 + $0x1c38] sm:$0xff]  ;;  %v12014_v12 = vcombine.low %v11950_v0, %v11954_v1 }
 0x4cb   :  { %9074 = vmatprep.subr.bf16.mxu0 %v11959_v13  ;;  %9115 = vmatprep.subr.bf16.mxu1 %v11961_v14  ;;  %v12016_v13 = vcombine.low %v11951_v2, %v11955_v3  ;;  %v8687_v14 = vld [vmem:[#allocation2 + $0x1c] sm:$0x3]  ;;  %v11965_v16 = vcombine.high %v11897_v10, %v11901_v11  ;;  %v11952_v3 = vld [vmem:[%s16227_s2 + $0x1dd0] sm:$0xff] }
 0x4cc   :  { %v15834_v44 = vpack.c.bf16 %v8687_v14, %v8687_v14  ;;  %v12027_v14 = vld [vmem:[%s16227_s2 + $0x1e28] sm:$0xff] }
 0x4cd   :  { %8630 = vmatmul.mubr.bf16.vlgmr.msra.gmra.mrb[20].mxu0 %v15632_v38  ;;  %8671 = vmatmul.mubr.bf16.vlgmr.msra.gmra.mrb[20].mxu1 %v15632_v38  ;;  %v11919_v38 = vld [vmem:[%s16227_s2 + $0x1cc8] sm:$0xff] }
 0x4ce   :  { %9075 = vmatpush1.bf16.msra.mxu0 %v11958_v19  ;;  %9116 = vmatpush1.bf16.msra.mxu1 %v11960_v20  ;;  %v11985_v45 = vcombine.high %v11919_v38, %v11923_v40  ;;  %v11984_v36 = vcombine.low %v11919_v38, %v11923_v40  ;;  %v11905_v19 = vld [vmem:[%s16227_s2 + $0x1c58] sm:$0xff]  ;;  %v11920_v40 = vld [vmem:[%s16227_s2 + $0x1cd0] sm:$0xff] }
 0x4cf   :  { %9076 = vmatprep.subr.bf16.mxu0 %v11967_v21  ;;  %9117 = vmatprep.subr.bf16.mxu1 %v11969_v22  ;;  %v11909_v20 = vld [vmem:[%s16227_s2 + $0x1c78] sm:$0xff]  ;;  %v11962_v21 = vcombine.low %v11896_v8, %v11900_v9  ;;  %v11964_v22 = vcombine.low %v11897_v10, %v11901_v11  ;;  %v12022_v11 = vld [vmem:[%s16227_s2 + $0x1e00] sm:$0xff] }
 0x4d0   :  { %9106 = vmatprep.mubr.bf16.mxu0 %v12591_v29  ;;  %9147 = vmatprep.mubr.bf16.mxu1 %v12591_v29  ;;  %v11973_v24 = vcombine.high %v11905_v19, %v11909_v20  ;;  %v11972_v33 = vcombine.low %v11905_v19, %v11909_v20  ;;  %v12030_v19 = vld [vmem:[%s16227_s2 + $0x1e40] sm:$0xff] }
 0x4d1   :  { %v12034_v20 = vld [vmem:[%s16227_s2 + $0x1e60] sm:$0xff] }
 0x4d2   :  { %9077 = vmatpush1.bf16.msra.mxu0 %v11966_v26  ;;  %9118 = vmatpush1.bf16.msra.mxu1 %v11968_v27  ;;  %v11916_v26 = vld [vmem:[%s16227_s2 + $0x1cb0] sm:$0xff]  ;;  %v11913_v27 = vld [vmem:[%s16227_s2 + $0x1c98] sm:$0xff] }
 0x4d3   :  { %9078 = vmatprep.subr.bf16.mxu0 %v11975_v28  ;;  %9119 = vmatprep.subr.bf16.mxu1 %v11977_v32  ;;  %v11917_v28 = vld [vmem:[%s16227_s2 + $0x1cb8] sm:$0xff]  ;;  %v11970_v32 = vcombine.low %v11904_v17, %v11908_v18  ;;  %v11979_v37 = vcombine.high %v11912_v25, %v11916_v26 }
 0x4d4   :  { %v11981_v38 = vcombine.high %v11913_v27, %v11917_v28  ;;  %v11980_v46 = vcombine.low %v11913_v27, %v11917_v28  ;;  %v12038_v27 = vld [vmem:[%s16227_s2 + $0x1e80] sm:$0xff] }
 0x4d5   :  { %v12042_v28 = vld [vmem:[%s16227_s2 + $0x1ea0] sm:$0xff] }
 0x4d6   :  { %9079 = vmatpush1.bf16.msra.mxu0 %v11974_v41  ;;  %9120 = vmatpush1.bf16.msra.mxu1 %v11976_v42  ;;  %v11924_v41 = vld [vmem:[%s16227_s2 + $0x1cf0] sm:$0xff]  ;;  %v11921_v42 = vld [vmem:[%s16227_s2 + $0x1cd8] sm:$0xff] }
 0x4d7   :  { %9080 = vmatprep.subr.bf16.mxu0 %v11983_v43  ;;  %9121 = vmatprep.subr.bf16.mxu1 %v11985_v45  ;;  %v11925_v43 = vld [vmem:[%s16227_s2 + $0x1cf8] sm:$0xff]  ;;  %v11978_v45 = vcombine.low %v11912_v25, %v11916_v26  ;;  %v11987_v30 = vcombine.high %v11920_v40, %v11924_v41  ;;  %v12095_v25 = vcombine.high %v12030_v19, %v12034_v20 }
 0x4d8   :  { %v11989_v31 = vcombine.high %v11921_v42, %v11925_v43  ;;  %v11988_v48 = vcombine.low %v11921_v42, %v11925_v43  ;;  %v12046_v42 = vld [vmem:[%s16227_s2 + $0x1ec0] sm:$0xff] }
 0x4d9   :  { %v12050_v43 = vld [vmem:[%s16227_s2 + $0x1ee0] sm:$0xff] }
 0x4da   :  { %9081 = vmatpush1.bf16.msra.mxu0 %v11982_v35  ;;  %9122 = vmatpush1.bf16.msra.mxu1 %v11984_v36  ;;  %v11932_v35 = vld [vmem:[%s16227_s2 + $0x1d30] sm:$0xff]  ;;  %v11929_v36 = vld [vmem:[%s16227_s2 + $0x1d18] sm:$0xff] }
 0x4db   :  { %9082 = vmatprep.subr.bf16.mxu0 %v11991_v39  ;;  %9123 = vmatprep.subr.bf16.mxu1 %v11993_v47  ;;  %v11933_v39 = vld [vmem:[%s16227_s2 + $0x1d38] sm:$0xff]  ;;  %v11986_v47 = vcombine.low %v11920_v40, %v11924_v41  ;;  %v11995_v49 = vcombine.high %v11928_v34, %v11932_v35  ;;  %v12103_v40 = vcombine.high %v12038_v27, %v12042_v28 }
 0x4dc   :  { %v11997_v50 = vcombine.high %v11929_v36, %v11933_v39  ;;  %v11996_v56 = vcombine.low %v11929_v36, %v11933_v39  ;;  %v12058_v36 = vld [vmem:[%s16227_s2 + $0x1f20] sm:$0xff]  ;;  %v12055_v39 = vld [vmem:[%s16227_s2 + $0x1f08] sm:$0xff] }
 0x4de   :  { %9083 = vmatpush1.bf16.msra.mxu0 %v11990_v52  ;;  %9124 = vmatpush1.bf16.msra.mxu1 %v11992_v53  ;;  %v11940_v52 = vld [vmem:[%s16227_s2 + $0x1d70] sm:$0xff]  ;;  %v11937_v53 = vld [vmem:[%s16227_s2 + $0x1d58] sm:$0xff] }
 0x4df   :  { %9084 = vmatprep.subr.bf16.mxu0 %v11999_v54  ;;  %9125 = vmatprep.subr.bf16.mxu1 %v12001_v55  ;;  %v11941_v54 = vld [vmem:[%s16227_s2 + $0x1d78] sm:$0xff]  ;;  %v11994_v55 = vcombine.low %v11928_v34, %v11932_v35  ;;  %v12003_v57 = vcombine.high %v11936_v51, %v11940_v52  ;;  %v12054_v35 = vld [vmem:[%s16227_s2 + $0x1f00] sm:$0xff] }
 0x4e0   :  { %v12005_v58 = vcombine.high %v11937_v53, %v11941_v54  ;;  %v12004_v0 = vcombine.low %v11937_v53, %v11941_v54  ;;  %v12066_v53 = vld [vmem:[%s16227_s2 + $0x1f60] sm:$0xff]  ;;  %v12063_v54 = vld [vmem:[%s16227_s2 + $0x1f48] sm:$0xff] }
 0x4e2   :  { %9085 = vmatpush1.bf16.msra.mxu0 %v11998_v60  ;;  %9126 = vmatpush1.bf16.msra.mxu1 %v12000_v61  ;;  %v11948_v60 = vld [vmem:[%s16227_s2 + $0x1db0] sm:$0xff]  ;;  %v11945_v61 = vld [vmem:[%s16227_s2 + $0x1d98] sm:$0xff] }
 0x4e3   :  { %9086 = vmatprep.subr.bf16.mxu0 %v12007_v62  ;;  %9127 = vmatprep.subr.bf16.mxu1 %v12009_v63  ;;  %v11949_v62 = vld [vmem:[%s16227_s2 + $0x1db8] sm:$0xff]  ;;  %v12002_v63 = vcombine.low %v11936_v51, %v11940_v52  ;;  %v12011_v1 = vcombine.high %v11944_v59, %v11948_v60  ;;  %v12062_v52 = vld [vmem:[%s16227_s2 + $0x1f40] sm:$0xff] }
 0x4e4   :  { %v12013_v2 = vcombine.high %v11945_v61, %v11949_v62  ;;  %v12012_v8 = vcombine.low %v11945_v61, %v11949_v62  ;;  %v12074_v61 = vld [vmem:[%s16227_s2 + $0x1fa0] sm:$0xff]  ;;  %v12071_v62 = vld [vmem:[%s16227_s2 + $0x1f88] sm:$0xff] }
 0x4e6   :  { %9087 = vmatpush1.bf16.msra.mxu0 %v12006_v4  ;;  %9128 = vmatpush1.bf16.msra.mxu1 %v12008_v5  ;;  %v11956_v4 = vld [vmem:[%s16227_s2 + $0x1df0] sm:$0xff]  ;;  %v11953_v5 = vld [vmem:[%s16227_s2 + $0x1dd8] sm:$0xff] }
 0x4e7   :  { %9088 = vmatprep.subr.bf16.mxu0 %v12015_v6  ;;  %9129 = vmatprep.subr.bf16.mxu1 %v12017_v7  ;;  %v11957_v6 = vld [vmem:[%s16227_s2 + $0x1df8] sm:$0xff]  ;;  %v12010_v7 = vcombine.low %v11944_v59, %v11948_v60  ;;  %v12019_v9 = vcombine.high %v11952_v3, %v11956_v4  ;;  %v12070_v60 = vld [vmem:[%s16227_s2 + $0x1f80] sm:$0xff] }
 0x4e8   :  { %v12021_v10 = vcombine.high %v11953_v5, %v11957_v6 }
 0x4ea   :  { %9089 = vmatpush1.bf16.msra.mxu0 %v12014_v12  ;;  %9130 = vmatpush1.bf16.msra.mxu1 %v12016_v13  ;;  %v12026_v12 = vld [vmem:[%s16227_s2 + $0x1e20] sm:$0xff]  ;;  %v12023_v13 = vld [vmem:[%s16227_s2 + $0x1e08] sm:$0xff] }
 0x4eb   :  { %9156 = vmatprep.subr.bf16.mxu0 %v11963_v15  ;;  %9197 = vmatprep.subr.bf16.mxu1 %v11965_v16  ;;  %v12018_v15 = vcombine.low %v11952_v3, %v11956_v4  ;;  %v12020_v16 = vcombine.low %v11953_v5, %v11957_v6  ;;  %v12087_v17 = vcombine.high %v12022_v11, %v12026_v12  ;;  %v12078_v4 = vld [vmem:[%s16227_s2 + $0x1fc0] sm:$0xff]  ;;  %v12079_v6 = vld [vmem:[%s16227_s2 + $0x1fc8] sm:$0xff] }
 0x4ec   :  { %v12089_v18 = vcombine.high %v12023_v13, %v12027_v14  ;;  %v12082_v5 = vld [vmem:[%s16227_s2 + $0x1fe0] sm:$0xff] }
 0x4ed   :  { %9107 = vmatmul.mubr.bf16.vlgmr.msra.gmra.mrb[16].mxu0 %v15834_v44  ;;  %9148 = vmatmul.mubr.bf16.vlgmr.msra.gmra.mrb[16].mxu1 %v15834_v44 }
 0x4ee   :  { %9157 = vmatpush1.bf16.msra.mxu0 %v11962_v21  ;;  %9198 = vmatpush1.bf16.msra.mxu1 %v11964_v22  ;;  %v12031_v21 = vld [vmem:[%s16227_s2 + $0x1e48] sm:$0xff] }
 0x4ef   :  { %9158 = vmatprep.subr.bf16.mxu0 %v11971_v23  ;;  %9199 = vmatprep.subr.bf16.mxu1 %v11973_v24  ;;  %v12035_v22 = vld [vmem:[%s16227_s2 + $0x1e68] sm:$0xff]  ;;  %v12086_v23 = vcombine.low %v12022_v11, %v12026_v12  ;;  %v12088_v24 = vcombine.low %v12023_v13, %v12027_v14  ;;  %v12024_v12 = vld [vmem:[%s16227_s2 + $0x1e10] sm:$0xff]  ;;  %v12025_v14 = vld [vmem:[%s16227_s2 + $0x1e18] sm:$0xff] }
 0x4f0   :  { %9188 = vmatprep.mubr.bf16.mxu0 %v12591_v29  ;;  %9229 = vmatprep.mubr.bf16.mxu1 %v12591_v29  ;;  %v12097_v26 = vcombine.high %v12031_v21, %v12035_v22  ;;  %v12028_v13 = vld [vmem:[%s16227_s2 + $0x1e30] sm:$0xff] }
 0x4f2   :  { %9159 = vmatpush1.bf16.msra.mxu0 %v11970_v32  ;;  %9200 = vmatpush1.bf16.msra.mxu1 %v11972_v33  ;;  %v12039_v32 = vld [vmem:[%s16227_s2 + $0x1e88] sm:$0xff] }
 0x4f3   :  { %9160 = vmatprep.subr.bf16.mxu0 %v11979_v37  ;;  %9201 = vmatprep.subr.bf16.mxu1 %v11981_v38  ;;  %v12043_v33 = vld [vmem:[%s16227_s2 + $0x1ea8] sm:$0xff]  ;;  %v12094_v37 = vcombine.low %v12030_v19, %v12034_v20  ;;  %v12096_v38 = vcombine.low %v12031_v21, %v12035_v22  ;;  %v12091_v19 = vcombine.high %v12024_v12, %v12028_v13  ;;  %v12032_v21 = vld [vmem:[%s16227_s2 + $0x1e50] sm:$0xff] }
 0x4f4   :  { %v12105_v41 = vcombine.high %v12039_v32, %v12043_v33  ;;  %v12036_v22 = vld [vmem:[%s16227_s2 + $0x1e70] sm:$0xff] }
 0x4f6   :  { %9161 = vmatpush1.bf16.msra.mxu0 %v11978_v45  ;;  %9202 = vmatpush1.bf16.msra.mxu1 %v11980_v46  ;;  %v12051_v45 = vld [vmem:[%s16227_s2 + $0x1ee8] sm:$0xff]  ;;  %v12102_v46 = vcombine.low %v12038_v27, %v12042_v28  ;;  %v12099_v28 = vcombine.high %v12032_v21, %v12036_v22 }
 0x4f7   :  { %9162 = vmatprep.subr.bf16.mxu0 %v11987_v30  ;;  %9203 = vmatprep.subr.bf16.mxu1 %v11989_v31  ;;  %v12104_v30 = vcombine.low %v12039_v32, %v12043_v33  ;;  %v12111_v31 = vcombine.high %v12046_v42, %v12050_v43  ;;  %v12040_v33 = vld [vmem:[%s16227_s2 + $0x1e90] sm:$0xff] }
 0x4fa   :  { %9163 = vmatpush1.bf16.msra.mxu0 %v11986_v47  ;;  %9204 = vmatpush1.bf16.msra.mxu1 %v11988_v48  ;;  %v12059_v47 = vld [vmem:[%s16227_s2 + $0x1f28] sm:$0xff]  ;;  %v12110_v48 = vcombine.low %v12046_v42, %v12050_v43 }
 0x4fb   :  { %9164 = vmatprep.subr.bf16.mxu0 %v11995_v49  ;;  %9205 = vmatprep.subr.bf16.mxu1 %v11997_v50  ;;  %v12119_v50 = vcombine.high %v12054_v35, %v12058_v36  ;;  %v12121_v51 = vcombine.high %v12055_v39, %v12059_v47 }
 0x4fe   :  { %9165 = vmatpush1.bf16.msra.mxu0 %v11994_v55  ;;  %9206 = vmatpush1.bf16.msra.mxu1 %v11996_v56  ;;  %v12067_v55 = vld [vmem:[%s16227_s2 + $0x1f68] sm:$0xff]  ;;  %v12118_v56 = vcombine.low %v12054_v35, %v12058_v36 }
 0x4ff   :  { %9166 = vmatprep.subr.bf16.mxu0 %v12003_v57  ;;  %9207 = vmatprep.subr.bf16.mxu1 %v12005_v58  ;;  %v12120_v57 = vcombine.low %v12055_v39, %v12059_v47  ;;  %v12127_v58 = vcombine.high %v12062_v52, %v12066_v53  ;;  %v12129_v59 = vcombine.high %v12063_v54, %v12067_v55  ;;  %v12056_v47 = vld [vmem:[%s16227_s2 + $0x1f10] sm:$0xff] }
 0x502   :  { %9167 = vmatpush1.bf16.msra.mxu0 %v12002_v63  ;;  %9208 = vmatpush1.bf16.msra.mxu1 %v12004_v0  ;;  %v12075_v63 = vld [vmem:[%s16227_s2 + $0x1fa8] sm:$0xff]  ;;  %v12126_v0 = vcombine.low %v12062_v52, %v12066_v53 }
 0x503   :  { %9168 = vmatprep.subr.bf16.mxu0 %v12011_v1  ;;  %9209 = vmatprep.subr.bf16.mxu1 %v12013_v2  ;;  %v12128_v1 = vcombine.low %v12063_v54, %v12067_v55  ;;  %v12135_v2 = vcombine.high %v12070_v60, %v12074_v61  ;;  %v12137_v3 = vcombine.high %v12071_v62, %v12075_v63  ;;  %v12064_v54 = vld [vmem:[%s16227_s2 + $0x1f50] sm:$0xff] }
 0x504   :  { %v12068_v55 = vld [vmem:[%s16227_s2 + $0x1f70] sm:$0xff] }
 0x506   :  { %9169 = vmatpush1.bf16.msra.mxu0 %v12010_v7  ;;  %9210 = vmatpush1.bf16.msra.mxu1 %v12012_v8  ;;  %v12083_v7 = vld [vmem:[%s16227_s2 + $0x1fe8] sm:$0xff]  ;;  %v12134_v8 = vcombine.low %v12070_v60, %v12074_v61  ;;  %v12131_v60 = vcombine.high %v12064_v54, %v12068_v55 }
 0x507   :  { %9170 = vmatprep.subr.bf16.mxu0 %v12019_v9  ;;  %9211 = vmatprep.subr.bf16.mxu1 %v12021_v10  ;;  %v12136_v9 = vcombine.low %v12071_v62, %v12075_v63  ;;  %v12143_v10 = vcombine.high %v12078_v4, %v12082_v5  ;;  %v12145_v11 = vcombine.high %v12079_v6, %v12083_v7  ;;  %v12072_v62 = vld [vmem:[%s16227_s2 + $0x1f90] sm:$0xff] }
 0x508   :  { %v12076_v63 = vld [vmem:[%s16227_s2 + $0x1fb0] sm:$0xff] }
 0x50a   :  { %9171 = vmatpush1.bf16.msra.mxu0 %v12018_v15  ;;  %9212 = vmatpush1.bf16.msra.mxu1 %v12020_v16  ;;  %v12029_v15 = vld [vmem:[%s16227_s2 + $0x1e38] sm:$0xff]  ;;  %v12142_v16 = vcombine.low %v12078_v4, %v12082_v5  ;;  %v12139_v4 = vcombine.high %v12072_v62, %v12076_v63 }
 0x50b   :  { %9633 = vmatprep.subr.bf16.mxu0 %v12087_v17  ;;  %9674 = vmatprep.subr.bf16.mxu1 %v12089_v18  ;;  %v12144_v17 = vcombine.low %v12079_v6, %v12083_v7  ;;  %v9246_v18 = vld [vmem:[#allocation2 + $0x1e] sm:$0x3]  ;;  %v12093_v20 = vcombine.high %v12025_v14, %v12029_v15  ;;  %v12080_v6 = vld [vmem:[%s16227_s2 + $0x1fd0] sm:$0xff] }
 0x50c   :  { %v16036_v27 = vpack.c.bf16 %v9246_v18, %v9246_v18  ;;  %v12084_v7 = vld [vmem:[%s16227_s2 + $0x1ff0] sm:$0xff] }
 0x50d   :  { %9189 = vmatmul.mubr.bf16.vlgmr.msra.gmra.mrb[20].mxu0 %v15834_v44  ;;  %9230 = vmatmul.mubr.bf16.vlgmr.msra.gmra.mrb[20].mxu1 %v15834_v44  ;;  %v12047_v44 = vld [vmem:[%s16227_s2 + $0x1ec8] sm:$0xff] }
 0x50e   :  { %9634 = vmatpush1.bf16.msra.mxu0 %v12086_v23  ;;  %9675 = vmatpush1.bf16.msra.mxu1 %v12088_v24  ;;  %v12113_v34 = vcombine.high %v12047_v44, %v12051_v45  ;;  %v12112_v49 = vcombine.low %v12047_v44, %v12051_v45  ;;  %v12033_v23 = vld [vmem:[%s16227_s2 + $0x1e58] sm:$0xff]  ;;  %v12048_v45 = vld [vmem:[%s16227_s2 + $0x1ed0] sm:$0xff] }
 0x50f   :  { %9635 = vmatprep.subr.bf16.mxu0 %v12095_v25  ;;  %9676 = vmatprep.subr.bf16.mxu1 %v12097_v26  ;;  %v12037_v24 = vld [vmem:[%s16227_s2 + $0x1e78] sm:$0xff]  ;;  %v12090_v25 = vcombine.low %v12024_v12, %v12028_v13  ;;  %v12092_v26 = vcombine.low %v12025_v14, %v12029_v15  ;;  %v12147_v12 = vcombine.high %v12080_v6, %v12084_v7 }
 0x510   :  { %9665 = vmatprep.mubr.bf16.mxu0 %v12591_v29  ;;  %9706 = vmatprep.mubr.bf16.mxu1 %v12591_v29  ;;  %v12101_v32 = vcombine.high %v12033_v23, %v12037_v24  ;;  %v12100_v42 = vcombine.low %v12033_v23, %v12037_v24  ;;  %v12146_v14 = vcombine.low %v12080_v6, %v12084_v7 }
 0x512   :  { %9636 = vmatpush1.bf16.msra.mxu0 %v12094_v37  ;;  %9677 = vmatpush1.bf16.msra.mxu1 %v12096_v38  ;;  %v12044_v37 = vld [vmem:[%s16227_s2 + $0x1eb0] sm:$0xff]  ;;  %v12041_v38 = vld [vmem:[%s16227_s2 + $0x1e98] sm:$0xff] }
 0x513   :  { %9637 = vmatprep.subr.bf16.mxu0 %v12103_v40  ;;  %9678 = vmatprep.subr.bf16.mxu1 %v12105_v41  ;;  %v12045_v40 = vld [vmem:[%s16227_s2 + $0x1eb8] sm:$0xff]  ;;  %v12098_v41 = vcombine.low %v12032_v21, %v12036_v22  ;;  %v12107_v43 = vcombine.high %v12040_v33, %v12044_v37 }
 0x514   :  { %v12109_v44 = vcombine.high %v12041_v38, %v12045_v40  ;;  %v12108_v35 = vcombine.low %v12041_v38, %v12045_v40 }
 0x516   :  { %9638 = vmatpush1.bf16.msra.mxu0 %v12102_v46  ;;  %9679 = vmatpush1.bf16.msra.mxu1 %v12104_v30  ;;  %v12052_v46 = vld [vmem:[%s16227_s2 + $0x1ef0] sm:$0xff]  ;;  %v12049_v30 = vld [vmem:[%s16227_s2 + $0x1ed8] sm:$0xff] }
 0x517   :  { %9639 = vmatprep.subr.bf16.mxu0 %v12111_v31  ;;  %9680 = vmatprep.subr.bf16.mxu1 %v12113_v34  ;;  %v12053_v31 = vld [vmem:[%s16227_s2 + $0x1ef8] sm:$0xff]  ;;  %v12106_v34 = vcombine.low %v12040_v33, %v12044_v37  ;;  %v12115_v36 = vcombine.high %v12048_v45, %v12052_v46 }
 0x518   :  { %v12117_v39 = vcombine.high %v12049_v30, %v12053_v31 }
 0x51a   :  { %9640 = vmatpush1.bf16.msra.mxu0 %v12110_v48  ;;  %9681 = vmatpush1.bf16.msra.mxu1 %v12112_v49  ;;  %v12060_v48 = vld [vmem:[%s16227_s2 + $0x1f30] sm:$0xff]  ;;  %v12061_v49 = vld [vmem:[%s16227_s2 + $0x1f38] sm:$0xff] }
 0x51b   :  { %9641 = vmatprep.subr.bf16.mxu0 %v12119_v50  ;;  %9682 = vmatprep.subr.bf16.mxu1 %v12121_v51  ;;  %v12114_v50 = vcombine.low %v12048_v45, %v12052_v46  ;;  %v12116_v51 = vcombine.low %v12049_v30, %v12053_v31  ;;  %v12123_v52 = vcombine.high %v12056_v47, %v12060_v48 }
 0x51e   :  { %9642 = vmatpush1.bf16.msra.mxu0 %v12118_v56  ;;  %9683 = vmatpush1.bf16.msra.mxu1 %v12120_v57  ;;  %v12065_v56 = vld [vmem:[%s16227_s2 + $0x1f58] sm:$0xff] }
 0x51f   :  { %9643 = vmatprep.subr.bf16.mxu0 %v12127_v58  ;;  %9684 = vmatprep.subr.bf16.mxu1 %v12129_v59  ;;  %v12069_v57 = vld [vmem:[%s16227_s2 + $0x1f78] sm:$0xff]  ;;  %v12122_v58 = vcombine.low %v12056_v47, %v12060_v48 }
 0x520   :  { %v12133_v61 = vcombine.high %v12065_v56, %v12069_v57 }
 0x522   :  { %9644 = vmatpush1.bf16.msra.mxu0 %v12126_v0  ;;  %9685 = vmatpush1.bf16.msra.mxu1 %v12128_v1  ;;  %v12073_v0 = vld [vmem:[%s16227_s2 + $0x1f98] sm:$0xff] }
 0x523   :  { %9645 = vmatprep.subr.bf16.mxu0 %v12135_v2  ;;  %9686 = vmatprep.subr.bf16.mxu1 %v12137_v3  ;;  %v12077_v1 = vld [vmem:[%s16227_s2 + $0x1fb8] sm:$0xff]  ;;  %v12130_v2 = vcombine.low %v12064_v54, %v12068_v55  ;;  %v12132_v3 = vcombine.low %v12065_v56, %v12069_v57 }
 0x524   :  { %v12141_v5 = vcombine.high %v12073_v0, %v12077_v1 }
 0x526   :  { %9646 = vmatpush1.bf16.msra.mxu0 %v12134_v8  ;;  %9687 = vmatpush1.bf16.msra.mxu1 %v12136_v9  ;;  %v12081_v8 = vld [vmem:[%s16227_s2 + $0x1fd8] sm:$0xff] }
 0x527   :  { %9647 = vmatprep.subr.bf16.mxu0 %v12143_v10  ;;  %9688 = vmatprep.subr.bf16.mxu1 %v12145_v11  ;;  %v12085_v9 = vld [vmem:[%s16227_s2 + $0x1ff8] sm:$0xff]  ;;  %v12138_v10 = vcombine.low %v12072_v62, %v12076_v63  ;;  %v12140_v11 = vcombine.low %v12073_v0, %v12077_v1 }
 0x528   :  { %v12149_v13 = vcombine.high %v12081_v8, %v12085_v9  ;;  %v12148_v15 = vcombine.low %v12081_v8, %v12085_v9 }
 0x52a   :  { %9648 = vmatpush1.bf16.msra.mxu0 %v12142_v16  ;;  %9689 = vmatpush1.bf16.msra.mxu1 %v12144_v17  ;;  %v10_v16 = vstv %s16228_s4 }
 0x52b   :  { %9715 = vmatprep.subr.bf16.mxu0 %v12091_v19  ;;  %9756 = vmatprep.subr.bf16.mxu1 %v12093_v20  ;;  %11 = vst [vmem:[#allocation3] sm:$0x1] %v10_v16 }
 0x52d   :  { %9666 = vmatmul.mubr.bf16.vlgmr.msra.gmra.mrb[16].mxu0 %v16036_v27  ;;  %9707 = vmatmul.mubr.bf16.vlgmr.msra.gmra.mrb[16].mxu1 %v16036_v27 }
 0x52e   :  { %9716 = vmatpush1.bf16.msra.mxu0 %v12090_v25  ;;  %9757 = vmatpush1.bf16.msra.mxu1 %v12092_v26 }
 0x52f   :  { %9717 = vmatprep.subr.bf16.mxu0 %v12099_v28  ;;  %9758 = vmatprep.subr.bf16.mxu1 %v12101_v32 }
 0x530   :  { %9747 = vmatprep.mubr.bf16.mxu0 %v12591_v29  ;;  %9788 = vmatprep.mubr.bf16.mxu1 %v12591_v29  ;;  %v12057_v29 = vld [vmem:[%s16227_s2 + $0x1f18] sm:$0xff] }
 0x531   :  { %v12125_v53 = vcombine.high %v12057_v29, %v12061_v49  ;;  %v12124_v59 = vcombine.low %v12057_v29, %v12061_v49 }
 0x532   :  { %9718 = vmatpush1.bf16.msra.mxu0 %v12098_v41  ;;  %9759 = vmatpush1.bf16.msra.mxu1 %v12100_v42 }
 0x533   :  { %9719 = vmatprep.subr.bf16.mxu0 %v12107_v43  ;;  %9760 = vmatprep.subr.bf16.mxu1 %v12109_v44 }
 0x536   :  { %9720 = vmatpush1.bf16.msra.mxu0 %v12106_v34  ;;  %9761 = vmatpush1.bf16.msra.mxu1 %v12108_v35 }
 0x537   :  { %9721 = vmatprep.subr.bf16.mxu0 %v12115_v36  ;;  %9762 = vmatprep.subr.bf16.mxu1 %v12117_v39 }
 0x53a   :  { %9722 = vmatpush1.bf16.msra.mxu0 %v12114_v50  ;;  %9763 = vmatpush1.bf16.msra.mxu1 %v12116_v51 }
 0x53b   :  { %9723 = vmatprep.subr.bf16.mxu0 %v12123_v52  ;;  %9764 = vmatprep.subr.bf16.mxu1 %v12125_v53 }
 0x53e   :  { %9724 = vmatpush1.bf16.msra.mxu0 %v12122_v58  ;;  %9765 = vmatpush1.bf16.msra.mxu1 %v12124_v59 }
 0x53f   :  { %9725 = vmatprep.subr.bf16.mxu0 %v12131_v60  ;;  %9766 = vmatprep.subr.bf16.mxu1 %v12133_v61 }
 0x542   :  { %9726 = vmatpush1.bf16.msra.mxu0 %v12130_v2  ;;  %9767 = vmatpush1.bf16.msra.mxu1 %v12132_v3 }
 0x543   :  { %9727 = vmatprep.subr.bf16.mxu0 %v12139_v4  ;;  %9768 = vmatprep.subr.bf16.mxu1 %v12141_v5 }
 0x546   :  { %9728 = vmatpush1.bf16.msra.mxu0 %v12138_v10  ;;  %9769 = vmatpush1.bf16.msra.mxu1 %v12140_v11 }
 0x547   :  { %9729 = vmatprep.subr.bf16.mxu0 %v12147_v12  ;;  %9770 = vmatprep.subr.bf16.mxu1 %v12149_v13 }
 0x54a   :  { %9730 = vmatpush1.bf16.msra.mxu0 %v12146_v14  ;;  %9771 = vmatpush1.bf16.msra.mxu1 %v12148_v15 }
 0x54d   :  { %9748 = vmatmul.mubr.bf16.vlgmr.msra.gmra.mrb[20].mxu0 %v16036_v27  ;;  %9789 = vmatmul.mubr.bf16.vlgmr.msra.gmra.mrb[20].mxu1 %v16036_v27 }
 0x600   :  { %v9667_v17 = vpop.f32.mrb[16].mxu0  ;;  %v9708_v18 = vpop.f32.mrb[16].mxu1 }
 0x601   :  { %v9806_v19 = vsel %vm9805_vm4, %v9667_v17, 0.0  ;;  %v9820_v20 = vsel %vm9805_vm4, %v9708_v18, 0.0  ;;  %v9669_v21 = vpop.f32.mrb[17].mxu0  ;;  %v9710_v22 = vpop.f32.mrb[17].mxu1 }
 0x602   :  { %v9807_v23 = vrot.slane %v9806_v19, 4  ;;  %v9821_v24 = vrot.slane %v9820_v20, 4  ;;  %v9813_v25 = vsel %vm9805_vm4, %v9669_v21, 0.0  ;;  %v9827_v26 = vsel %vm9805_vm4, %v9710_v22, 0.0  ;;  %v9671_v27 = vpop.f32.mrb[18].mxu0  ;;  %v9712_v28 = vpop.f32.mrb[18].mxu1 }
 0x603   :  { %v9814_v32 = vrot.slane %v9813_v25, 4  ;;  %v9828_v33 = vrot.slane %v9827_v26, 4  ;;  %v9672_v37 = vpop.f32.mrb[19].mxu0  ;;  %v9713_v38 = vpop.f32.mrb[19].mxu1  ;;  %v10001_v27 = vlaneseq }
 0x604   :  { %v9808_v40 = vadd.f32 %v9807_v23, %v9806_v19  ;;  %v9822_v41 = vadd.f32 %v9821_v24, %v9820_v20 }
 0x605   :  { %v9815_v42 = vadd.f32 %v9814_v32, %v9813_v25  ;;  %v9829_v43 = vadd.f32 %v9828_v33, %v9827_v26 }
 0x606   :  { %v9809_v44 = vrot.slane %v9808_v40, 2  ;;  %v9823_v45 = vrot.slane %v9822_v41, 2 }
 0x607   :  { %v9816_v46 = vrot.slane %v9815_v42, 2  ;;  %v9830_v30 = vrot.slane %v9829_v43, 2 }
 0x608   :  { %v9810_v31 = vadd.f32 %v9809_v44, %v9808_v40  ;;  %v9824_v34 = vadd.f32 %v9823_v45, %v9822_v41 }
 0x609   :  { %v9817_v35 = vadd.f32 %v9816_v46, %v9815_v42  ;;  %v9831_v36 = vadd.f32 %v9830_v30, %v9829_v43 }
 0x60a   :  { %v9811_v39 = vrot.slane %v9810_v31, 1  ;;  %v9825_v47 = vrot.slane %v9824_v34, 1 }
 0x60b   :  { %v9818_v48 = vrot.slane %v9817_v35, 1  ;;  %v9832_v29 = vrot.slane %v9831_v36, 1 }
 0x60c   :  { %v9812_v49 = vadd.f32 %v9811_v39, %v9810_v31  ;;  %v9826_v50 = vadd.f32 %v9825_v47, %v9824_v34 }
 0x60d   :  { %v9819_v51 = vadd.f32 %v9818_v48, %v9817_v35  ;;  %v9833_v52 = vadd.f32 %v9832_v29, %v9831_v36 }
 0x60e   :  { %v9863_v53 = vmul.f32 0.5, %v9812_v49  ;;  %v9865_v54 = vmul.f32 0.5, %v9826_v50 }
 0x60f   :  { %v9864_v55 = vmul.f32 0.5, %v9819_v51  ;;  %v9866_v56 = vmul.f32 0.5, %v9833_v52 }
 0x610   :  { %v16123_v57 = vsub.f32 %v9667_v17, %v9863_v53  ;;  %v16125_v58 = vsub.f32 %v9708_v18, %v9865_v54 }
 0x611   :  { %v16127_v59 = vsub.f32 %v9669_v21, %v9864_v55  ;;  %v16129_v60 = vsub.f32 %v9710_v22, %v9866_v56 }
 0x612   :  { %v9879_v61 = vmul.f32 %v16123_v57, %v16123_v57  ;;  %v9881_v62 = vmul.f32 %v16125_v58, %v16125_v58 }
 0x613   :  { %v9880_v63 = vmul.f32 %v16127_v59, %v16127_v59  ;;  %v9882_v0 = vmul.f32 %v16129_v60, %v16129_v60 }
 0x614   :  { %v9887_v1 = vsel %vm9805_vm4, %v9879_v61, 0.0  ;;  %v9901_v2 = vsel %vm9805_vm4, %v9881_v62, 0.0  ;;  %v16159_v62 = vshrl.u32 %v10001_v27, 7 }
 0x615   :  { %v9888_v3 = vrot.slane %v9887_v1, 4  ;;  %v9902_v4 = vrot.slane %v9901_v2, 4  ;;  %v9894_v5 = vsel %vm9805_vm4, %v9880_v63, 0.0  ;;  %v9908_v6 = vsel %vm9805_vm4, %v9882_v0, 0.0 }
 0x616   :  { %v9895_v7 = vrot.slane %v9894_v5, 4  ;;  %v9909_v8 = vrot.slane %v9908_v6, 4 }
 0x617   :  { %v9889_v9 = vadd.f32 %v9888_v3, %v9887_v1  ;;  %v9903_v10 = vadd.f32 %v9902_v4, %v9901_v2 }
 0x618   :  { %v9896_v11 = vadd.f32 %v9895_v7, %v9894_v5  ;;  %v9910_v12 = vadd.f32 %v9909_v8, %v9908_v6  ;;  %v10003_v7 = vsub.s32 0, %v16159_v62  ;;  %v10011_v8 = vsub.s32 2, %v16159_v62 }
 0x619   :  { %v9890_v13 = vrot.slane %v9889_v9, 2  ;;  %v9904_v14 = vrot.slane %v9903_v10, 2 }
 0x61a   :  { %v9897_v15 = vrot.slane %v9896_v11, 2  ;;  %v9911_v16 = vrot.slane %v9910_v12, 2 }
 0x61b   :  { %v9891_v17 = vadd.f32 %v9890_v13, %v9889_v9  ;;  %v9905_v18 = vadd.f32 %v9904_v14, %v9903_v10 }
 0x61c   :  { %v9898_v19 = vadd.f32 %v9897_v15, %v9896_v11  ;;  %v9912_v20 = vadd.f32 %v9911_v16, %v9910_v12  ;;  %v16166_v11 = vld [vmem:[%s16229_s3] sm:$0xff]  ;;  %v10007_v12 = vsub.s32 1, %v16159_v62  ;;  %v10015_v15 = vsub.s32 3, %v16159_v62 }
 0x61d   :  { %v9892_v21 = vrot.slane %v9891_v17, 1  ;;  %v9906_v22 = vrot.slane %v9905_v18, 1 }
 0x61e   :  { %v9899_v23 = vrot.slane %v9898_v19, 1  ;;  %v9913_v24 = vrot.slane %v9912_v20, 1  ;;  %v10008_v27 = vrot.slane %v16166_v11, %v10007_v12 }
 0x61f   :  { %v9893_v25 = vadd.f32 %v9892_v21, %v9891_v17  ;;  %v9907_v26 = vadd.f32 %v9906_v22, %v9905_v18  ;;  %v10004_v21 = vrot.slane %v16166_v11, %v10003_v7  ;;  %v10012_v22 = vrot.slane %v16166_v11, %v10011_v8 }
 0x620   :  { %v9900_v28 = vadd.f32 %v9899_v23, %v9898_v19  ;;  %v9914_v32 = vadd.f32 %v9913_v24, %v9912_v20  ;;  %v16143_v33 = vpop.f32.mrb[20].mxu0  ;;  %v16145_v37 = vpop.f32.mrb[20].mxu1 }
 0x621   :  { %v9943_v38 = vmul.f32 0.5, %v9893_v25  ;;  %v9945_v40 = vmul.f32 0.5, %v9907_v26  ;;  %v9834_v41 = vsel %vm9805_vm4, %v16143_v33, 0.0  ;;  %v9848_v42 = vsel %vm9805_vm4, %v16145_v37, 0.0  ;;  %v16151_v43 = vpop.f32.mrb[21].mxu0  ;;  %v16153_v44 = vpop.f32.mrb[21].mxu1 }
 0x622   :  { %v9944_v45 = vmul.f32 0.5, %v9900_v28  ;;  %v9946_v46 = vmul.f32 0.5, %v9914_v32  ;;  %v9835_v30 = vrot.slane %v9834_v41, 4  ;;  %v9849_v31 = vrot.slane %v9848_v42, 4  ;;  %v9753_v34 = vpop.f32.mrb[22].mxu0  ;;  %v9794_v35 = vpop.f32.mrb[22].mxu1 }
 0x623   :  { %v9951_v36 = vadd.f32 1e-05, %v9943_v38  ;;  %v9953_v39 = vadd.f32 1e-05, %v9945_v40  ;;  %v9841_v47 = vsel %vm9805_vm4, %v16151_v43, 0.0  ;;  %v9855_v48 = vsel %vm9805_vm4, %v16153_v44, 0.0 }
 0x624   :  { %v9952_v29 = vadd.f32 1e-05, %v9944_v45  ;;  %v9954_v49 = vadd.f32 1e-05, %v9946_v46  ;;  %v9836_v50 = vadd.f32 %v9835_v30, %v9834_v41  ;;  %v9850_v51 = vadd.f32 %v9849_v31, %v9848_v42  ;;  %v9754_v52 = vpop.f32.mrb[23].mxu0  ;;  %v9795_v53 = vpop.f32.mrb[23].mxu1 }
 0x625   :  { %12571 = vrsqrt.f32 %v9951_v36  ;;  %v9842_v54 = vrot.slane %v9841_v47, 4  ;;  %v9856_v55 = vrot.slane %v9855_v48, 4  ;;  %v10016_v41 = vrot.slane %v16166_v11, %v10015_v15 }
 0x626   :  { %12573 = vrsqrt.f32 %v9953_v39  ;;  %v9837_v56 = vrot.slane %v9836_v50, 2  ;;  %v9851_v61 = vrot.slane %v9850_v51, 2 }
 0x627   :  { %12575 = vrsqrt.f32 %v9952_v29  ;;  %v9843_v63 = vadd.f32 %v9842_v54, %v9841_v47  ;;  %v9857_v0 = vadd.f32 %v9856_v55, %v9855_v48 }
 0x628   :  { %12577 = vrsqrt.f32 %v9954_v49  ;;  %v9838_v1 = vadd.f32 %v9837_v56, %v9836_v50  ;;  %v9852_v2 = vadd.f32 %v9851_v61, %v9850_v51 }
 0x629   :  { %v9844_v3 = vrot.slane %v9843_v63, 2  ;;  %v9858_v4 = vrot.slane %v9857_v0, 2 }
 0x62a   :  { %v9839_v5 = vrot.slane %v9838_v1, 1  ;;  %v9853_v6 = vrot.slane %v9852_v2, 1 }
 0x62b   :  { %v9845_v9 = vadd.f32 %v9844_v3, %v9843_v63  ;;  %v9859_v10 = vadd.f32 %v9858_v4, %v9857_v0 }
 0x62c   :  { %v9840_v13 = vadd.f32 %v9839_v5, %v9838_v1  ;;  %v9854_v14 = vadd.f32 %v9853_v6, %v9852_v2 }
 0x62d   :  { %v9846_v16 = vrot.slane %v9845_v9, 1  ;;  %v9860_v17 = vrot.slane %v9859_v10, 1 }
 0x62e   :  { %v9867_v18 = vmul.f32 0.5, %v9840_v13  ;;  %v9869_v19 = vmul.f32 0.5, %v9854_v14 }
 0x62f   :  { %v12572_v20 = vpop.eup %12571  ;;  %v9847_v23 = vadd.f32 %v9846_v16, %v9845_v9  ;;  %v9861_v24 = vadd.f32 %v9860_v17, %v9859_v10 }
 0x630   :  { %v12574_v25 = vpop.eup %12573  ;;  %v9967_v26 = vmul.f32 %v12572_v20, %v16123_v57  ;;  %v16175_v28 = vsub.f32 %v16143_v33, %v9867_v18  ;;  %v16178_v32 = vsub.f32 %v16145_v37, %v9869_v19 }
 0x631   :  { %v12576_v38 = vpop.eup %12575  ;;  %v9969_v40 = vmul.f32 %v12574_v25, %v16125_v58  ;;  %v9868_v42 = vmul.f32 0.5, %v9847_v23  ;;  %v9870_v45 = vmul.f32 0.5, %v9861_v24 }
 0x632   :  { %v12578_v46 = vpop.eup %12577  ;;  %vm9975_vm5 = vcmp.gt.f32.partialorder %v9967_v26, 0.0  ;;  %v9983_v30 = vmul.f32 0.2, %v9967_v26  ;;  %v9968_v57 = vmul.f32 %v12576_v38, %v16127_v59  ;;  %v9883_v31 = vmul.f32 %v16175_v28, %v16175_v28 }
 0x633   :  { %vm9977_vm6 = vcmp.gt.f32.partialorder %v9969_v40, 0.0  ;;  %v9985_v33 = vmul.f32 0.2, %v9969_v40  ;;  %v9970_v37 = vmul.f32 %v12578_v46, %v16129_v60  ;;  %v9885_v34 = vmul.f32 %v16178_v32, %v16178_v32 }
 0x634   :  { %v9991_v58 = vsel %vm9975_vm5, %v9967_v26, %v9983_v30  ;;  %vm9976_vm7 = vcmp.gt.f32.partialorder %v9968_v57, 0.0  ;;  %v9984_v35 = vmul.f32 0.2, %v9968_v57  ;;  %v9915_v36 = vsel %vm9805_vm4, %v9883_v31, 0.0 }
 0x635   :  { %v10041_v39 = vmul.f32 %v10004_v21, %v9991_v58  ;;  %v9993_v47 = vsel %vm9977_vm6, %v9969_v40, %v9985_v33  ;;  %vm9978_vm8 = vcmp.gt.f32.partialorder %v9970_v37, 0.0  ;;  %v9986_v48 = vmul.f32 0.2, %v9970_v37 }
 0x636   :  { %v10043_v59 = vmul.f32 %v10012_v22, %v9993_v47  ;;  %v9992_v29 = vsel %vm9976_vm7, %v9968_v57, %v9984_v35  ;;  %v9916_v49 = vrot.slane %v9915_v36, 4  ;;  %v9929_v50 = vsel %vm9805_vm4, %v9885_v34, 0.0 }
 0x637   :  { %v10049_v51 = vsel %vm9805_vm4, %v10041_v39, 0.0  ;;  %v10042_v60 = vmul.f32 %v10008_v27, %v9992_v29  ;;  %v9994_v52 = vsel %vm9978_vm8, %v9970_v37, %v9986_v48  ;;  %v9930_v53 = vrot.slane %v9929_v50, 4 }
 0x638   :  { %v9917_v54 = vadd.f32 %v9916_v49, %v9915_v36  ;;  %v16192_v55 = vsub.f32 %v16151_v43, %v9868_v42  ;;  %v16195_v56 = vsub.f32 %v16153_v44, %v9870_v45  ;;  %v10044_v63 = vmul.f32 %v10016_v41, %v9994_v52 }
 0x639   :  { %v10050_v61 = vsel %vm9805_vm4, %v10042_v60, 0.0  ;;  %v9931_v0 = vadd.f32 %v9930_v53, %v9929_v50  ;;  %v10052_v6 = vsel %vm9805_vm4, %v10043_v59, 0.0  ;;  %v10019_v33 = vsub.s32 4, %v16159_v62 }
 0x63a   :  { %v9918_v1 = vrot.slane %v9917_v54, 2  ;;  %v9884_v2 = vmul.f32 %v16192_v55, %v16192_v55  ;;  %v9886_v3 = vmul.f32 %v16195_v56, %v16195_v56  ;;  %v10051_v4 = vadd.f32 %v10050_v61, %v10049_v51 }
 0x63b   :  { %v9932_v5 = vrot.slane %v9931_v0, 2  ;;  %v10054_v13 = vsel %vm9805_vm4, %v10044_v63, 0.0  ;;  %v10020_v36 = vrot.slane %v16166_v11, %v10019_v33  ;;  %v10023_v48 = vsub.s32 5, %v16159_v62 }
 0x63c   :  { %v9919_v43 = vadd.f32 %v9918_v1, %v9917_v54  ;;  %v9922_v7 = vsel %vm9805_vm4, %v9884_v2, 0.0  ;;  %v9936_v44 = vsel %vm9805_vm4, %v9886_v3, 0.0  ;;  %v10053_v8 = vadd.f32 %v10052_v6, %v10051_v4 }
 0x63d   :  { %v9933_v9 = vadd.f32 %v9932_v5, %v9931_v0  ;;  %v9923_v10 = vrot.slane %v9922_v7, 4  ;;  %v9937_v12 = vrot.slane %v9936_v44, 4  ;;  %v10027_v59 = vsub.s32 6, %v16159_v62 }
 0x63e   :  { %v9920_v14 = vrot.slane %v9919_v43, 1  ;;  %v10055_v15 = vadd.f32 %v10054_v13, %v10053_v8  ;;  %v10031_v51 = vsub.s32 7, %v16159_v62  ;;  %v10024_v53 = vrot.slane %v16166_v11, %v10023_v48 }
 0x63f   :  { %v9934_v16 = vrot.slane %v9933_v9, 1  ;;  %v9924_v17 = vadd.f32 %v9923_v10, %v9922_v7  ;;  %v9938_v18 = vadd.f32 %v9937_v12, %v9936_v44  ;;  %v10028_v54 = vrot.slane %v16166_v11, %v10027_v59 }
 0x640   :  { %v9921_v19 = vadd.f32 %v9920_v14, %v9919_v43  ;;  %v10032_v2 = vrot.slane %v16166_v11, %v10031_v51 }
 0x641   :  { %v9935_v20 = vadd.f32 %v9934_v16, %v9933_v9  ;;  %v9925_v21 = vrot.slane %v9924_v17, 2  ;;  %v9939_v22 = vrot.slane %v9938_v18, 2  ;;  %v12150_v9 = vld [vmem:[#allocation3] ss:$0 sm:$0xff] }
 0x642   :  { %v9947_v23 = vmul.f32 0.5, %v9921_v19 }
 0x643   :  { %v9949_v24 = vmul.f32 0.5, %v9935_v20  ;;  %v9926_v25 = vadd.f32 %v9925_v21, %v9924_v17  ;;  %v9940_v26 = vadd.f32 %v9939_v22, %v9938_v18 }
 0x644   :  { %v9955_v27 = vadd.f32 1e-05, %v9947_v23 }
 0x645   :  { %v9957_v38 = vadd.f32 1e-05, %v9949_v24  ;;  %v9927_v40 = vrot.slane %v9926_v25, 1  ;;  %v9941_v41 = vrot.slane %v9940_v26, 1 }
 0x646   :  { %12579 = vrsqrt.f32 %v9955_v27 }
 0x647   :  { %12581 = vrsqrt.f32 %v9957_v38  ;;  %v9928_v42 = vadd.f32 %v9927_v40, %v9926_v25  ;;  %v9942_v45 = vadd.f32 %v9941_v41, %v9940_v26 }
 0x649   :  { %v9948_v46 = vmul.f32 0.5, %v9928_v42  ;;  %v9950_v30 = vmul.f32 0.5, %v9942_v45 }
 0x64b   :  { %v9956_v57 = vadd.f32 1e-05, %v9948_v46  ;;  %v9958_v31 = vadd.f32 1e-05, %v9950_v30 }
 0x64d   :  { %12583 = vrsqrt.f32 %v9956_v57 }
 0x64e   :  { %12585 = vrsqrt.f32 %v9958_v31 }
 0x650   :  { %v12580_v37 = vpop.eup %12579 }
 0x651   :  { %v12582_v34 = vpop.eup %12581  ;;  %v9971_v58 = vmul.f32 %v12580_v37, %v16175_v28 }
 0x652   :  { %v9973_v35 = vmul.f32 %v12582_v34, %v16178_v32 }
 0x653   :  { %vm9979_vm9 = vcmp.gt.f32.partialorder %v9971_v58, 0.0  ;;  %v9987_v39 = vmul.f32 0.2, %v9971_v58 }
 0x654   :  { %v9989_v29 = vmul.f32 0.2, %v9973_v35  ;;  %vm9981_vm10 = vcmp.gt.f32.partialorder %v9973_v35, 0.0 }
 0x655   :  { %v9995_v47 = vsel %vm9979_vm9, %v9971_v58, %v9987_v39 }
 0x656   :  { %v10045_v49 = vmul.f32 %v10020_v36, %v9995_v47  ;;  %v9997_v0 = vsel %vm9981_vm10, %v9973_v35, %v9989_v29 }
 0x657   :  { %v12584_v50 = vpop.eup %12583 }
 0x658   :  { %v12586_v60 = vpop.eup %12585  ;;  %v9972_v28 = vmul.f32 %v12584_v50, %v16192_v55  ;;  %v10056_v32 = vsel %vm9805_vm4, %v10045_v49, 0.0  ;;  %v10047_v55 = vmul.f32 %v10028_v54, %v9997_v0 }
 0x659   :  { %v9974_v52 = vmul.f32 %v12586_v60, %v16195_v56  ;;  %v10057_v61 = vadd.f32 %v10056_v32, %v10055_v15 }
 0x65a   :  { %vm9980_vm11 = vcmp.gt.f32.partialorder %v9972_v28, 0.0  ;;  %v9988_v63 = vmul.f32 0.2, %v9972_v28  ;;  %v10060_v43 = vsel %vm9805_vm4, %v10047_v55, 0.0 }
 0x65b   :  { %v9990_v1 = vmul.f32 0.2, %v9974_v52  ;;  %vm9982_vm12 = vcmp.gt.f32.partialorder %v9974_v52, 0.0 }
 0x65c   :  { %v9996_v62 = vsel %vm9980_vm11, %v9972_v28, %v9988_v63 }
 0x65d   :  { %v9998_v3 = vsel %vm9982_vm12, %v9974_v52, %v9990_v1  ;;  %v10046_v4 = vmul.f32 %v10024_v53, %v9996_v62 }
 0x65e   :  { %v10048_v5 = vmul.f32 %v10032_v2, %v9998_v3 }
 0x65f   :  { %v10058_v6 = vsel %vm9805_vm4, %v10046_v4, 0.0 }
 0x660   :  { %v10059_v56 = vadd.f32 %v10058_v6, %v10057_v61  ;;  %v10062_v44 = vsel %vm9805_vm4, %v10048_v5, 0.0 }
 0x662   :  { %v10061_v7 = vadd.f32 %v10060_v43, %v10059_v56 }
 0x664   :  { %v10063_v8 = vadd.f32 %v10062_v44, %v10061_v7 }
 0x666   :  { %10064 = vadd.xlane.f32.xlu0 %v10063_v8 }
 0x6f3   :  { %v10065_v10 = vpop.xlane.xlu0 %10064 }
 0x6f4   :  { %v10073_v12 = vadd.f32 %v12150_v9, %v10065_v10 }
 0x6f6   :  { %v12151_v13 = vmul.f32 -1.442695, %v10073_v12 }
 0x6f8   :  { %12587 = vpow2.f32 %v12151_v13 }
 0x702   :  { %v12588_v11 = vpop.eup %12587 }
 0x703   :  { %v10077_v14 = vadd.f32 1.0, %v12588_v11 }
 0x705   :  { %12589 = vrcp.f32 %v10077_v14 }
 0x70f   :  { %v12590_v15 = vpop.eup %12589 }
 0x710   :  { %10081 = vst.msk [vmem:[%s16230_s5] sm:$0x3] %vm10080_vm13, %v12590_v15 }

</bundles_post_ra>
